<compile_context>
chip_gen: v7x
topology: tpu7x:2x2x1
jax: 0.10.0
libtpu: 0.0.40
codegen_flags: <defaults>
</compile_context>

<pallas_src>
import functools
import math

import jax
import jax.numpy as jnp
from jax import lax
from jax.experimental import pallas as pl
from jax.experimental.pallas import tpu as pltpu


_VMEM_LIMIT = 64 * 1024 * 1024      # raise scoped VMEM (default 16/32 MiB)
_APPROX_SOFTMAX = True              # EUP approximate reciprocal in softmax


def _to_bf16(v):
    return v if v.dtype == jnp.bfloat16 else v.astype(jnp.bfloat16)


# ------------------------- generic tiled matmul kernel -----------------------

def _mm_kernel(*refs, activation, has_bias):
    """One (tm, tn) output tile; K reduced over grid axis 2 ("arbitrary")."""
    if has_bias:
        x_ref, w_ref, b_ref, o_ref, acc_ref = refs
    else:
        x_ref, w_ref, o_ref, acc_ref = refs
        b_ref = None

    @pl.when(pl.program_id(2) == 0)
    def _():
        acc_ref[...] = jnp.zeros_like(acc_ref)

    acc_ref[...] += jnp.dot(_to_bf16(x_ref[...]), _to_bf16(w_ref[...]),
                            preferred_element_type=jnp.float32)

    @pl.when(pl.program_id(2) == pl.num_programs(2) - 1)
    def _():
        r = acc_ref[...]
        if has_bias:
            r = r + b_ref[...]
        if activation == "gelu":
            r = jax.nn.gelu(r, approximate=True)
        o_ref[...] = r.astype(o_ref.dtype)


def _pick_tile(d, target):
    if d <= target:
        return d
    for c in (target, 512, 256, 128):
        if d % c == 0:
            return c
    return d                     # full extent always divides


def linear(x2d, w, b=None, activation=None, *, out_dtype=jnp.float32,
           tm_target=512, tn_target=512, tk_target=512):
    """(M, K) @ (K, N) [+ b] [+ fused GELU], tiled over (M, N, K).

    Weights are expected bf16 (stored bf16 at the JAX level) and stay
    VMEM-resident along the M axis; accumulation is f32.  The bias stream is
    skipped entirely for bias-free calls.
    """
    M, K = x2d.shape
    N = w.shape[1]
    has_bias = b is not None
    tm = M if M <= tm_target else tm_target
    tn = _pick_tile(N, tn_target)
    tk = _pick_tile(K, tk_target)
    assert N % tn == 0 and K % tk == 0, "N/K tiles must divide exactly"
    grid = (pl.cdiv(M, tm), N // tn, K // tk)

    in_specs = [pl.BlockSpec((tm, tk), lambda i, j, k: (i, k)),
                pl.BlockSpec((tk, tn), lambda i, j, k: (k, j))]
    args = [x2d, w]
    if has_bias:
        in_specs.append(pl.BlockSpec((1, tn), lambda i, j, k: (0, j)))
        args.append(b.reshape(1, N).astype(jnp.float32))

    return pl.pallas_call(
        functools.partial(_mm_kernel, activation=activation, has_bias=has_bias),
        grid=grid,
        in_specs=in_specs,
        out_specs=pl.BlockSpec((tm, tn), lambda i, j, k: (i, j)),
        out_shape=jax.ShapeDtypeStruct((M, N), out_dtype),
        scratch_shapes=[pltpu.VMEM((tm, tn), jnp.float32)],
        compiler_params=pltpu.CompilerParams(
            dimension_semantics=("parallel", "parallel", "arbitrary"),
            vmem_limit_bytes=_VMEM_LIMIT),
    )(*args)


# --------------------- LayerNorm helpers / fused LN + 2x matmul --------------

def _ln_rows(x, g, b, eps):
    mean = jnp.mean(x, axis=-1, keepdims=True)
    xc = x - mean
    var = jnp.mean(xc * xc, axis=-1, keepdims=True)
    return xc * lax.rsqrt(var + eps) * g + b


def _ln_mm2_kernel(x_ref, g_ref, bb_ref, w1_ref, w2_ref, b2_ref, o_ref, *, eps):
    h = _ln_rows(x_ref[...], g_ref[...], bb_ref[...], eps)
    # intermediate kept in f32, only rounded to bf16 at the MXU boundary
    t = jnp.dot(_to_bf16(h), w1_ref[...], preferred_element_type=jnp.float32)
    o_ref[...] = (jnp.dot(_to_bf16(t), w2_ref[...],
                          preferred_element_type=jnp.float32)
                  + b2_ref[...]).astype(o_ref.dtype)


def ln_linear2(x2d, gamma, beta, w1, w2, b2, *, eps=1e-5, tm_target=512,
               out_dtype=jnp.float32):
    """LayerNorm -> matmul (no bias) -> matmul (+bias), fused in one kernel.

    Used for a Block's final (ln, proj) fused with the following
    quant_proj / proj_out projection, removing two HBM round trips.
    """
    M, D = x2d.shape
    Dm = w1.shape[1]
    N = w2.shape[1]
    tm = M if M <= tm_target else tm_target
    grid = (pl.cdiv(M, tm),)
    # TODO(synk): for small N (<128) at large M, reshape the output to a
    # 128-lane slab before writeback to avoid masked partial stores.
    return pl.pallas_call(
        functools.partial(_ln_mm2_kernel, eps=eps),
        grid=grid,
        in_specs=[pl.BlockSpec((tm, D), lambda i: (i, 0)),
                  pl.BlockSpec((1, D), lambda i: (0, 0)),
                  pl.BlockSpec((1, D), lambda i: (0, 0)),
                  pl.BlockSpec((D, Dm), lambda i: (0, 0)),
                  pl.BlockSpec((Dm, N), lambda i: (0, 0)),
                  pl.BlockSpec((1, N), lambda i: (0, 0))],
        out_specs=pl.BlockSpec((tm, N), lambda i: (i, 0)),
        out_shape=jax.ShapeDtypeStruct((M, N), out_dtype),
        compiler_params=pltpu.CompilerParams(
            dimension_semantics=("parallel",),
            vmem_limit_bytes=_VMEM_LIMIT),
    )(x2d, gamma.reshape(1, D).astype(jnp.float32),
      beta.reshape(1, D).astype(jnp.float32), w1, w2,
      b2.reshape(1, N).astype(jnp.float32))


# ------------------------- fused pre-LN transformer layer --------------------

def _transformer_layer_kernel(*refs, n_heads, use_pe, eps):
    if use_pe:
        (x_ref, pe_ref, ln1_g, ln1_b, wqkv, bqkv, wo, bo,
         ln2_g, ln2_b, w1, b1, w2, b2, o_ref) = refs
    else:
        (x_ref, ln1_g, ln1_b, wqkv, bqkv, wo, bo,
         ln2_g, ln2_b, w1, b1, w2, b2, o_ref) = refs

    x = x_ref[0]                                          # (T, D) float32
    if use_pe:
        x = x + pe_ref[...]
    T, D = x.shape
    dh = D // n_heads
    scale = 1.0 / math.sqrt(dh)

    # --- attention sub-block (pre-LN), bidirectional (mask=None path) --------
    h = _ln_rows(x, ln1_g[...], ln1_b[...], eps)
    qkv = jnp.dot(_to_bf16(h), wqkv[...],
                  preferred_element_type=jnp.float32) + bqkv[...]   # (T, 3D)
    qkv_b = qkv.astype(jnp.bfloat16)

    def heads_of(col0):
        # column band of qkv -> (n_heads, T, dh) with the head axis leading,
        # so QK^T and PV are single batched (MXU-pipelined) matmuls.
        return jnp.concatenate(
            [qkv_b[:, col0 + hh * dh: col0 + (hh + 1) * dh].reshape(1, T, dh)
             for hh in range(n_heads)], axis=0)

    q3 = heads_of(0)
    k3 = heads_of(D)
    v3 = heads_of(2 * D)

    s = jnp.einsum('htd,hsd->hts', q3, k3,
                   preferred_element_type=jnp.float32) * scale       # (H, T, T)
    s = s - jnp.max(s, axis=-1, keepdims=True)
    p = jnp.exp(s)
    denom = jnp.sum(p, axis=-1, keepdims=True)
    if _APPROX_SOFTMAX:
        p = p * pl.reciprocal(denom, approx=True)
    else:
        p = p / denom
    o3 = jnp.einsum('hts,hsd->htd', p.astype(jnp.bfloat16), v3,
                    preferred_element_type=jnp.float32)               # (H, T, dh)
    a = jnp.concatenate([o3[hh] for hh in range(n_heads)], axis=-1)   # (T, D)
    a = jnp.dot(_to_bf16(a), wo[...],
                preferred_element_type=jnp.float32) + bo[...]
    x = x + a

    # --- MLP sub-block --------------------------------------------------------
    h = _ln_rows(x, ln2_g[...], ln2_b[...], eps)
    h = jax.nn.gelu(jnp.dot(_to_bf16(h), w1[...],
                            preferred_element_type=jnp.float32) + b1[...],
                    approximate=True)
    h = jnp.dot(_to_bf16(h), w2[...], preferred_element_type=jnp.float32) + b2[...]
    o_ref[0] = x + h


def transformer_layer(x, p, n_heads, pe=None, eps=1e-5):
    """One fused pre-LN transformer layer; grid over batch, bf16 weights resident."""
    B, T, D = x.shape
    Hm = p['w1'].shape[1]
    use_pe = pe is not None

    def const(shape):
        return pl.BlockSpec(shape, lambda b: (0, 0))

    in_specs = [pl.BlockSpec((1, T, D), lambda b: (b, 0, 0))]
    args = [x]
    if use_pe:
        in_specs.append(const((T, D)))
        args.append(pe)
    weights = [
        (p['ln1_g'].reshape(1, D), (1, D)),
        (p['ln1_b'].reshape(1, D), (1, D)),
        (p['wqkv'], (D, 3 * D)),
        (p['bqkv'].reshape(1, 3 * D), (1, 3 * D)),
        (p['wo'], (D, D)),
        (p['bo'].reshape(1, D), (1, D)),
        (p['ln2_g'].reshape(1, D), (1, D)),
        (p['ln2_b'].reshape(1, D), (1, D)),
        (p['w1'], (D, Hm)),
        (p['b1'].reshape(1, Hm), (1, Hm)),
        (p['w2'], (Hm, D)),
        (p['b2'].reshape(1, D), (1, D)),
    ]
    for arr, shp in weights:
        in_specs.append(const(shp))
        args.append(arr)

    # TODO(synk): for D >= 768 or long T on v7x (64 MiB VMEM), split attention
    # and MLP into two kernels or tile the query axis flash-style, and single-
    # buffer the constant-index weight specs (pl.Buffered(1)); at these sizes
    # the single fused kernel fits comfortably with bf16-resident weights.
    return pl.pallas_call(
        functools.partial(_transformer_layer_kernel, n_heads=n_heads,
                          use_pe=use_pe, eps=eps),
        grid=(B,),
        in_specs=in_specs,
        out_specs=pl.BlockSpec((1, T, D), lambda b: (b, 0, 0)),
        out_shape=jax.ShapeDtypeStruct((B, T, D), jnp.float32),
        compiler_params=pltpu.CompilerParams(
            dimension_semantics=("parallel",),
            vmem_limit_bytes=_VMEM_LIMIT),
    )(*args)


# ------------------------------ vector quantizer -----------------------------

def _vq_kernel(z_ref, cb_ref, zq_ref, idx_ref, *, n_books, n_codes, dsub):
    z = z_ref[...]                                 # (tn, e_dim) float32
    zq_parts, idx_parts = [], []
    for bk in range(n_books):                      # n_books is small & static
        zb = z[:, bk * dsub:(bk + 1) * dsub]       # (tn, dsub)
        cb = cb_ref[bk]                            # (n_codes, dsub) float32
        # VPU distance: broadcast-subtract-square-sum (no tiny-K MXU pass).
        diff = zb[:, None, :] - cb[None, :, :]     # (tn, n_codes, dsub)
        d = jnp.sum(diff * diff, axis=-1)          # (tn, n_codes)
        dmin = jnp.min(d, axis=-1, keepdims=True)
        iota = lax.broadcasted_iota(jnp.int32, d.shape, 1)
        masked = jnp.where(d <= dmin, iota, jnp.int32(n_codes))
        idx = jnp.min(masked, axis=-1, keepdims=True)          # (tn, 1) int32
        one_hot = (iota == idx).astype(jnp.float32)            # (tn, n_codes)
        zq_parts.append(jnp.dot(one_hot, cb,
                                preferred_element_type=jnp.float32))
        idx_parts.append(idx)
    zq_ref[...] = jnp.concatenate(zq_parts, axis=-1)
    idx_ref[...] = jnp.concatenate(idx_parts, axis=-1)


def vector_quantize(z, codebooks, *, rows_per_block=1024):
    """z: (B, T, e_dim); codebooks: (n_books, n_codes, dsub) float32.
    Returns z_q (B, T, e_dim) and indices (B, T, n_books) int32."""
    B, T, e_dim = z.shape
    n_books, n_codes, dsub = codebooks.shape
    N = B * T
    z2 = z.reshape(N, e_dim)
    tn = N if N <= rows_per_block else rows_per_block
    grid = (pl.cdiv(N, tn),)
    zq2, idx2 = pl.pallas_call(
        functools.partial(_vq_kernel, n_books=n_books, n_codes=n_codes,
                          dsub=dsub),
        grid=grid,
        in_specs=[pl.BlockSpec((tn, e_dim), lambda i: (i, 0)),
                  pl.BlockSpec((n_books, n_codes, dsub),
                               lambda i: (0, 0, 0))],
        out_specs=(pl.BlockSpec((tn, e_dim), lambda i: (i, 0)),
                   pl.BlockSpec((tn, n_books), lambda i: (i, 0))),
        out_shape=(jax.ShapeDtypeStruct((N, e_dim), jnp.float32),
                   jax.ShapeDtypeStruct((N, n_books), jnp.int32)),
        compiler_params=pltpu.CompilerParams(
            dimension_semantics=("parallel",),
            vmem_limit_bytes=_VMEM_LIMIT),
    )(z2, codebooks)
    return zq2.reshape(B, T, e_dim), idx2.reshape(B, T, n_books)


# ------------------------------ conv kernels ---------------------------------

def _down_conv_kernel(x_ref, w_ref, b_ref, o_ref, *, c):
    # x_ref block: (1, To+1, 2C) f32 with lanes [0:C]=x_pad[2m], [C:2C]=x_pad[2m+1]
    v = x_ref[0]
    to = o_ref.shape[1]
    x0 = v[0:to, 0:c]                  # x_pad[2t]
    x1 = v[0:to, c:2 * c]              # x_pad[2t+1]
    x2 = v[1:to + 1, 0:c]              # x_pad[2t+2]
    patch = jnp.concatenate([x0, x1, x2], axis=-1)       # (To, 3C) in VMEM
    o_ref[0] = (jnp.dot(_to_bf16(patch), w_ref[...],
                        preferred_element_type=jnp.float32) + b_ref[...])


def masked_conv_down(x, w, b):
    """Conv1d(C, C, kernel_size=3, stride=2, padding=1) in NWC layout (mask=None).
    w: (3C, C) bf16 laid out as [W_k0; W_k1; W_k2]."""
    B, T, C = x.shape
    assert T % 2 == 0
    To = T // 2
    # pad + free reshape so even/odd taps land in separate lane bands
    xp = jnp.pad(x, ((0, 0), (1, 1), (0, 0))).reshape(B, To + 1, 2 * C)
    return pl.pallas_call(
        functools.partial(_down_conv_kernel, c=C),
        grid=(B,),
        in_specs=[pl.BlockSpec((1, To + 1, 2 * C), lambda bb: (bb, 0, 0)),
                  pl.BlockSpec((3 * C, C), lambda bb: (0, 0)),
                  pl.BlockSpec((1, C), lambda bb: (0, 0))],
        out_specs=pl.BlockSpec((1, To, C), lambda bb: (bb, 0, 0)),
        out_shape=jax.ShapeDtypeStruct((B, To, C), jnp.float32),
        compiler_params=pltpu.CompilerParams(
            dimension_semantics=("parallel",),
            vmem_limit_bytes=_VMEM_LIMIT),
    )(xp, w, b.reshape(1, C).astype(jnp.float32))


def fuse_up_conv_weights(w_t, b):
    """ConvTranspose1d(k=4, s=2, p=1) weights (C_in, C_out, 4) (PyTorch layout)
    -> single block-structured (3C, 2C) matrix applied to [x[s-1] | x[s] | x[s+1]]:
       even output y[2s]   = x[s-1] @ W3 + x[s] @ W1
       odd  output y[2s+1] = x[s]   @ W2 + x[s+1] @ W0
    """
    w0, w1, w2, w3 = (w_t[:, :, k] for k in range(4))
    z = jnp.zeros_like(w0)
    w_f = jnp.concatenate([
        jnp.concatenate([w3, z], axis=1),
        jnp.concatenate([w1, w2], axis=1),
        jnp.concatenate([z, w0], axis=1)], axis=0)           # (3C, 2C)
    return w_f, jnp.concatenate([b, b], axis=0)              # (2C,)


def _up_conv_kernel(x_ref, w_ref, b_ref, o_ref):
    v = x_ref[0]                                  # (T+2, C), zero padded ends
    t = o_ref.shape[1]
    xm1 = v[0:t, :]
    xc = v[1:t + 1, :]
    xp1 = v[2:t + 2, :]
    patch = jnp.concatenate([xm1, xc, xp1], axis=-1)         # (T, 3C)
    o_ref[0] = (jnp.dot(_to_bf16(patch), w_ref[...],
                        preferred_element_type=jnp.float32) + b_ref[...])


def masked_up_conv(x, w_fused, b_fused):
    """ConvTranspose1d(C, C, kernel_size=4, stride=2, padding=1): T -> 2T.
    Kernel writes even|odd packed along lanes (lane-dense 2C-wide store); the
    interleave back to (B, 2T, C) is a free row-major reshape."""
    B, T, C = x.shape
    xp = jnp.pad(x, ((0, 0), (1, 1), (0, 0)))
    y = pl.pallas_call(
        _up_conv_kernel,
        grid=(B,),
        in_specs=[pl.BlockSpec((1, T + 2, C), lambda bb: (bb, 0, 0)),
                  pl.BlockSpec((3 * C, 2 * C), lambda bb: (0, 0)),
                  pl.BlockSpec((1, 2 * C), lambda bb: (0, 0))],
        out_specs=pl.BlockSpec((1, T, 2 * C), lambda bb: (bb, 0, 0)),
        out_shape=jax.ShapeDtypeStruct((B, T, 2 * C), jnp.float32),
        compiler_params=pltpu.CompilerParams(
            dimension_semantics=("parallel",),
            vmem_limit_bytes=_VMEM_LIMIT),
    )(xp, w_fused, b_fused.reshape(1, 2 * C).astype(jnp.float32))
    return y.reshape(B, T, 2, C).reshape(B, 2 * T, C)


# ------------------------------ model pieces ---------------------------------

def sine_pos_encoding(dim, max_len):
    rest = dim % 2
    d = dim + rest
    position = jnp.arange(max_len, dtype=jnp.float32)[:, None]
    div_term = jnp.exp(jnp.arange(0, d, 2, dtype=jnp.float32)
                       * (-math.log(10000.0) / d))
    pe = jnp.zeros((max_len, d), jnp.float32)
    pe = pe.at[:, 0::2].set(jnp.sin(position * div_term))
    pe = pe.at[:, 1::2].set(jnp.cos(position * div_term))
    return pe[:, :dim]


def block_forward(x, bp, cfg, down=False, up=False):
    n_layers, n_heads, pos_all = cfg['n_layers'], cfg['n_heads'], cfg['pos_all']
    if down:
        x = masked_conv_down(x, bp['down_w'], bp['down_b'])
    # dropout: eval-mode identity
    for i in range(n_layers):
        use_pe = (i == 0) or bool(pos_all)
        pe = bp['pe'][:x.shape[1]] if use_pe else None
        x = transformer_layer(x, bp['layers'][i], n_heads, pe=pe)
    if up:
        x = masked_up_conv(x, bp['up_w'], bp['up_b'])
    # NOTE: the Block's final (LayerNorm, bias-free proj) is fused with the
    # following projection at the call site via ln_linear2.
    return x


def transformer_vqvae_forward(x, params, cfg):
    """Full VQVAE forward: returns (total_loss, y, indices)."""
    B, T, in_dim = x.shape
    D = cfg['n_embd']
    # proj_in
    h = linear(x.reshape(B * T, in_dim),
               params['proj_in_w'], params['proj_in_b']).reshape(B, T, D)
    # encoder Block (down_conv); final LN + proj fused with quant_proj
    enc = block_forward(h, params['encoder'], cfg, down=True)
    Be, Te, _ = enc.shape
    l_x = ln_linear2(enc.reshape(Be * Te, D),
                     params['encoder']['ln_g'], params['encoder']['ln_b'],
                     params['encoder']['proj_w'],
                     params['quant_proj_w'], params['quant_proj_b']
                     ).reshape(Be, Te, cfg['e_dim'])
    # quantize (mask=None path)
    z_q, indices = vector_quantize(l_x, params['codebooks'])
    # commitment + codebook losses; forward value = (1 + beta) * ||z_q - z||^2.
    q_loss = (1.0 + cfg['beta']) * jnp.mean((z_q - l_x) ** 2)
    # decoder: post_quant_proj -> decoder Block (up_conv) -> fused LN+proj+proj_out
    d = linear(z_q.reshape(Be * Te, cfg['e_dim']),
               params['post_quant_proj_w'], params['post_quant_proj_b']
               ).reshape(Be, Te, D)
    dec = block_forward(d, params['decoder'], cfg, up=True)
    Bd, Td, _ = dec.shape
    y = ln_linear2(dec.reshape(Bd * Td, D),
                   params['decoder']['ln_g'], params['decoder']['ln_b'],
                   params['decoder']['proj_w'],
                   params['proj_out_w'], params['proj_out_b']
                   ).reshape(Bd, Td, cfg['out_dim'])
    loss_recon = jnp.mean((y - x) ** 2)
    total_loss = q_loss + loss_recon
    return total_loss, y, indices


# ------------------------------ init ------------------------------------------

class KeyGen:
    def __init__(self, key):
        self.key = key

    def __call__(self):
        self.key, sub = jax.random.split(self.key)
        return sub


def init_params(key, cfg):
    kg = KeyGen(key)
    D = cfg['n_embd']

    def nrm(shape, std=0.02, dtype=jnp.bfloat16):
        # matmul weights are stored bf16 (halves DMA bytes + resident VMEM)
        return (std * jax.random.normal(kg(), shape, dtype=jnp.float32)
                ).astype(dtype)

    def init_layer():
        Hm = 4 * D
        return dict(
            ln1_g=jnp.ones((D,), jnp.float32), ln1_b=jnp.zeros((D,), jnp.float32),
            wqkv=nrm((D, 3 * D)), bqkv=jnp.zeros((3 * D,), jnp.float32),
            wo=nrm((D, D)), bo=jnp.zeros((D,), jnp.float32),
            ln2_g=jnp.ones((D,), jnp.float32), ln2_b=jnp.zeros((D,), jnp.float32),
            w1=nrm((D, Hm)), b1=jnp.zeros((Hm,), jnp.float32),
            w2=nrm((Hm, D)), b2=jnp.zeros((D,), jnp.float32),
        )

    def init_block(down=False, up=False):
        bp = dict(
            pe=sine_pos_encoding(D, cfg['block_size']),
            layers=[init_layer() for _ in range(cfg['n_layers'])],
            ln_g=jnp.ones((D,), jnp.float32), ln_b=jnp.zeros((D,), jnp.float32),
            proj_w=nrm((D, D)),
        )
        if down:
            bp['down_w'] = nrm((3 * D, D))      # [W_k0; W_k1; W_k2] layout
            bp['down_b'] = jnp.zeros((D,), jnp.float32)
        if up:
            w_t = nrm((D, D, 4), dtype=jnp.float32)   # ConvTranspose1d layout
            w_f, b_f = fuse_up_conv_weights(w_t, jnp.zeros((D,), jnp.float32))
            bp['up_w'] = w_f.astype(jnp.bfloat16)
            bp['up_b'] = b_f
        return bp

    n_books = cfg['n_books']
    n_codes = cfg['n_e'] // n_books
    dsub = cfg['e_dim'] // n_books
    return dict(
        proj_in_w=nrm((cfg['in_dim'], D)),
        proj_in_b=jnp.zeros((D,), jnp.float32),
        encoder=init_block(down=True),
        quant_proj_w=nrm((D, cfg['e_dim'])),
        quant_proj_b=jnp.zeros((cfg['e_dim'],), jnp.float32),
        codebooks=jax.random.uniform(kg(), (n_books, n_codes, dsub),
                                     minval=-1.0 / n_codes, maxval=1.0 / n_codes,
                                     dtype=jnp.float32),
        post_quant_proj_w=nrm((cfg['e_dim'], D)),
        post_quant_proj_b=jnp.zeros((D,), jnp.float32),
        decoder=init_block(up=True),
        proj_out_w=nrm((D, cfg['out_dim'])),
        proj_out_b=jnp.zeros((cfg['out_dim'],), jnp.float32),
    )


# ------------------------------ main -------------------------------------------

if __name__ == "__main__":
    cfg = dict(in_dim=16, out_dim=16, n_layers=2, n_embd=32, n_heads=4,
               block_size=64, e_dim=16, n_books=4, n_e=64, beta=0.25, pos_all=0)

    key = jax.random.PRNGKey(0)
    k_x, k_p = jax.random.split(key)
    params = init_params(k_p, cfg)
    x = jax.random.normal(k_x, (2, 8, cfg['in_dim']), dtype=jnp.float32)

    fwd = jax.jit(functools.partial(transformer_vqvae_forward, cfg=cfg))
    total_loss, y, indices = fwd(x, params)
    jax.block_until_ready((total_loss, y, indices))

    assert y.shape == x.shape
    assert indices.shape == (2, 4, cfg['n_books'])
    assert bool(jnp.isfinite(total_loss))
    print("KERNEL_OK")
</pallas_src>

<mosaic_0001>
module attributes {stable_mosaic.version = 11 : i64} {
  func.func @_mm_kernel(%arg0: i32, %arg1: i32, %arg2: i32, %arg3: memref<16x16xf32, #tpu.memory_space<vmem>>, %arg4: memref<16x32xbf16, #tpu.memory_space<vmem>>, %arg5: memref<1x32xf32, #tpu.memory_space<vmem>>, %arg6: memref<16x32xf32, #tpu.memory_space<vmem>>, %arg7: memref<16x32xf32, #tpu.memory_space<vmem>>) attributes {dimension_semantics = [#tpu.dimension_semantics<parallel>, #tpu.dimension_semantics<parallel>, #tpu.dimension_semantics<arbitrary>], iteration_bounds = array<i64: 1, 1, 1>, scalar_prefetch = 0 : i64, scratch_operands = 1 : i64, tpu.core_type = #tpu.core_type<tc>, window_params = [{transform_indices = @transform_0, window_bounds = array<i64: 16, 16>}, {transform_indices = @transform_1, window_bounds = array<i64: 16, 32>}, {transform_indices = @transform_2, window_bounds = array<i64: 1, 32>}, {transform_indices = @transform_3, window_bounds = array<i64: 16, 32>}]} {
    %c0_i32 = arith.constant 0 : i32
    %0 = arith.cmpi eq, %arg2, %c0_i32 : i32
    %1 = arith.extui %0 : i1 to i32
    %c0_i32_0 = arith.constant 0 : i32
    %2 = arith.cmpi ne, %1, %c0_i32_0 : i32
    scf.if %2 {
      %cst_10 = arith.constant 0.000000e+00 : f32
      %13 = vector.broadcast %cst_10 : f32 to vector<16x32xf32>
      %c0_11 = arith.constant 0 : index
      %c0_12 = arith.constant 0 : index
      %14 = vector.load %arg7[%c0_11, %c0_12] : memref<16x32xf32, #tpu.memory_space<vmem>>, vector<16x32xf32>
      tpu.vector_store %arg7[%c0_11, %c0_12], %13 {strides = array<i32>} : memref<16x32xf32, #tpu.memory_space<vmem>>, vector<16x32xf32>,
    } else {
    }
    %c0 = arith.constant 0 : index
    %c0_1 = arith.constant 0 : index
    %3 = vector.load %arg7[%c0, %c0_1] : memref<16x32xf32, #tpu.memory_space<vmem>>, vector<16x32xf32>
    %c0_2 = arith.constant 0 : index
    %c0_3 = arith.constant 0 : index
    %4 = vector.load %arg3[%c0_2, %c0_3] : memref<16x16xf32, #tpu.memory_space<vmem>>, vector<16x16xf32>
    %5 = arith.truncf %4 : vector<16x16xf32> to vector<16x16xbf16>
    %c0_4 = arith.constant 0 : index
    %c0_5 = arith.constant 0 : index
    %6 = vector.load %arg4[%c0_4, %c0_5] : memref<16x32xbf16, #tpu.memory_space<vmem>>, vector<16x32xbf16>
    %cst = arith.constant dense<0.000000e+00> : vector<16x32xf32>
    %7 = tpu.matmul %5, %6, %cst {dimension_numbers = #tpu.dot_dimension_numbers<[1], [0], [0], [1], [0, 0, 1, 1], [], []>} : vector<16x16xbf16>, vector<16x32xbf16>, vector<16x32xf32> -> vector<16x32xf32>
    %8 = arith.addf %3, %7 : vector<16x32xf32>
    %c0_6 = arith.constant 0 : index
    %c0_7 = arith.constant 0 : index
    %9 = vector.load %arg7[%c0_6, %c0_7] : memref<16x32xf32, #tpu.memory_space<vmem>>, vector<16x32xf32>
    tpu.vector_store %arg7[%c0_6, %c0_7], %8 {strides = array<i32>} : memref<16x32xf32, #tpu.memory_space<vmem>>, vector<16x32xf32>,
    %c0_i32_8 = arith.constant 0 : i32
    %10 = arith.cmpi eq, %arg2, %c0_i32_8 : i32
    %11 = arith.extui %10 : i1 to i32
    %c0_i32_9 = arith.constant 0 : i32
    %12 = arith.cmpi ne, %11, %c0_i32_9 : i32
    scf.if %12 {
      %c0_10 = arith.constant 0 : index
      %c0_11 = arith.constant 0 : index
      %13 = vector.load %arg7[%c0_10, %c0_11] : memref<16x32xf32, #tpu.memory_space<vmem>>, vector<16x32xf32>
      %c0_12 = arith.constant 0 : index
      %c0_13 = arith.constant 0 : index
      %14 = vector.load %arg5[%c0_12, %c0_13] : memref<1x32xf32, #tpu.memory_space<vmem>>, vector<1x32xf32>
      %15 = vector.broadcast %14 : vector<1x32xf32> to vector<16x32xf32>
      %16 = arith.addf %13, %15 : vector<16x32xf32>
      %c0_14 = arith.constant 0 : index
      %c0_15 = arith.constant 0 : index
      %17 = vector.load %arg6[%c0_14, %c0_15] : memref<16x32xf32, #tpu.memory_space<vmem>>, vector<16x32xf32>
      tpu.vector_store %arg6[%c0_14, %c0_15], %16 {strides = array<i32>} : memref<16x32xf32, #tpu.memory_space<vmem>>, vector<16x32xf32>,
    } else {
    }
    return
  }
  func.func @transform_0(%arg0: i32, %arg1: i32, %arg2: i32) -> (i32, i32) {
    %c0_i32 = arith.constant 0 : i32
    return %arg0, %arg2 : i32, i32
  }
  func.func @transform_1(%arg0: i32, %arg1: i32, %arg2: i32) -> (i32, i32) {
    %c0_i32 = arith.constant 0 : i32
    return %arg2, %arg1 : i32, i32
  }
  func.func @transform_2(%arg0: i32, %arg1: i32, %arg2: i32) -> (i32, i32) {
    %c0_i32 = arith.constant 0 : i32
    %c0_i32_0 = arith.constant 0 : i32
    return %c0_i32, %arg1 : i32, i32
  }
  func.func @transform_3(%arg0: i32, %arg1: i32, %arg2: i32) -> (i32, i32) {
    %c0_i32 = arith.constant 0 : i32
    return %arg0, %arg1 : i32, i32
  }
}

module attributes {stable_mosaic.version = 11 : i64} {
  func.func @_down_conv_kernel(%arg0: i32, %arg1: memref<1x5x64xf32, #tpu.memory_space<vmem>>, %arg2: memref<96x32xbf16, #tpu.memory_space<vmem>>, %arg3: memref<1x32xf32, #tpu.memory_space<vmem>>, %arg4: memref<1x4x32xf32, #tpu.memory_space<vmem>>) attributes {dimension_semantics = [#tpu.dimension_semantics<parallel>], iteration_bounds = array<i64: 2>, scalar_prefetch = 0 : i64, scratch_operands = 0 : i64, tpu.core_type = #tpu.core_type<tc>, window_params = [{transform_indices = @transform_0, window_bounds = array<i64: 1, 5, 64>}, {pipeline_mode = #tpu.pipeline_mode<synchronous>, transform_indices = @transform_1, window_bounds = array<i64: 96, 32>}, {pipeline_mode = #tpu.pipeline_mode<synchronous>, transform_indices = @transform_2, window_bounds = array<i64: 1, 32>}, {transform_indices = @transform_3, window_bounds = array<i64: 1, 4, 32>}]} {
    %c0 = arith.constant 0 : index
    %c0_0 = arith.constant 0 : index
    %c0_1 = arith.constant 0 : index
    %0 = vector.load %arg1[%c0, %c0_0, %c0_1] : memref<1x5x64xf32, #tpu.memory_space<vmem>>, vector<1x5x64xf32>
    %1 = vector.shape_cast %0 : vector<1x5x64xf32> to vector<5x64xf32>
    %2 = vector.extract_strided_slice %1 {offsets = [0, 0], sizes = [4, 32], strides = [1, 1]} : vector<5x64xf32> to vector<4x32xf32>
    %3 = vector.extract_strided_slice %1 {offsets = [0, 32], sizes = [4, 32], strides = [1, 1]} : vector<5x64xf32> to vector<4x32xf32>
    %4 = vector.extract_strided_slice %1 {offsets = [1, 0], sizes = [4, 32], strides = [1, 1]} : vector<5x64xf32> to vector<4x32xf32>
    %5 = tpu.concatenate %2, %3, %4 in 1 : vector<4x32xf32>, vector<4x32xf32>, vector<4x32xf32> -> vector<4x96xf32>
    %6 = arith.truncf %5 : vector<4x96xf32> to vector<4x96xbf16>
    %c0_2 = arith.constant 0 : index
    %c0_3 = arith.constant 0 : index
    %7 = vector.load %arg2[%c0_2, %c0_3] : memref<96x32xbf16, #tpu.memory_space<vmem>>, vector<96x32xbf16>
    %cst = arith.constant dense<0.000000e+00> : vector<4x32xf32>
    %8 = tpu.matmul %6, %7, %cst {dimension_numbers = #tpu.dot_dimension_numbers<[1], [0], [0], [1], [0, 0, 1, 1], [], []>} : vector<4x96xbf16>, vector<96x32xbf16>, vector<4x32xf32> -> vector<4x32xf32>
    %c0_4 = arith.constant 0 : index
    %c0_5 = arith.constant 0 : index
    %9 = vector.load %arg3[%c0_4, %c0_5] : memref<1x32xf32, #tpu.memory_space<vmem>>, vector<1x32xf32>
    %10 = vector.broadcast %9 : vector<1x32xf32> to vector<4x32xf32>
    %11 = arith.addf %8, %10 : vector<4x32xf32>
    %c0_6 = arith.constant 0 : index
    %c0_7 = arith.constant 0 : index
    %c0_8 = arith.constant 0 : index
    %12 = vector.load %arg4[%c0_6, %c0_7, %c0_8] : memref<1x4x32xf32, #tpu.memory_space<vmem>>, vector<1x4x32xf32>
    %13 = vector.shape_cast %12 : vector<1x4x32xf32> to vector<4x32xf32>
    %14 = vector.shape_cast %11 : vector<4x32xf32> to vector<1x4x32xf32>
    tpu.vector_store %arg4[%c0_6, %c0_7, %c0_8], %14 {strides = array<i32>} : memref<1x4x32xf32, #tpu.memory_space<vmem>>, vector<1x4x32xf32>,
    return
  }
  func.func @transform_0(%arg0: i32) -> (i32, i32, i32) {
    %c0_i32 = arith.constant 0 : i32
    %c0_i32_0 = arith.constant 0 : i32
    %c0_i32_1 = arith.constant 0 : i32
    return %arg0, %c0_i32, %c0_i32_0 : i32, i32, i32
  }
  func.func @transform_1(%arg0: i32) -> (i32, i32) {
    %c0_i32 = arith.constant 0 : i32
    %c0_i32_0 = arith.constant 0 : i32
    %c0_i32_1 = arith.constant 0 : i32
    return %c0_i32, %c0_i32_0 : i32, i32
  }
  func.func @transform_2(%arg0: i32) -> (i32, i32) {
    %c0_i32 = arith.constant 0 : i32
    %c0_i32_0 = arith.constant 0 : i32
    %c0_i32_1 = arith.constant 0 : i32
    return %c0_i32, %c0_i32_0 : i32, i32
  }
  func.func @transform_3(%arg0: i32) -> (i32, i32, i32) {
    %c0_i32 = arith.constant 0 : i32
    %c0_i32_0 = arith.constant 0 : i32
    %c0_i32_1 = arith.constant 0 : i32
    return %arg0, %c0_i32, %c0_i32_0 : i32, i32, i32
  }
}

module attributes {stable_mosaic.version = 11 : i64} {
  func.func @_transformer_layer_kernel(%arg0: i32, %arg1: memref<1x4x32xf32, #tpu.memory_space<vmem>>, %arg2: memref<1x32xf32, #tpu.memory_space<vmem>>, %arg3: memref<1x32xf32, #tpu.memory_space<vmem>>, %arg4: memref<32x96xbf16, #tpu.memory_space<vmem>>, %arg5: memref<1x96xf32, #tpu.memory_space<vmem>>, %arg6: memref<32x32xbf16, #tpu.memory_space<vmem>>, %arg7: memref<1x32xf32, #tpu.memory_space<vmem>>, %arg8: memref<1x32xf32, #tpu.memory_space<vmem>>, %arg9: memref<1x32xf32, #tpu.memory_space<vmem>>, %arg10: memref<32x128xbf16, #tpu.memory_space<vmem>>, %arg11: memref<1x128xf32, #tpu.memory_space<vmem>>, %arg12: memref<128x32xbf16, #tpu.memory_space<vmem>>, %arg13: memref<1x32xf32, #tpu.memory_space<vmem>>, %arg14: memref<1x4x32xf32, #tpu.memory_space<vmem>>) attributes {dimension_semantics = [#tpu.dimension_semantics<parallel>], iteration_bounds = array<i64: 2>, scalar_prefetch = 0 : i64, scratch_operands = 0 : i64, tpu.core_type = #tpu.core_type<tc>, window_params = [{transform_indices = @transform_0, window_bounds = array<i64: 1, 4, 32>}, {pipeline_mode = #tpu.pipeline_mode<synchronous>, transform_indices = @transform_1, window_bounds = array<i64: 1, 32>}, {pipeline_mode = #tpu.pipeline_mode<synchronous>, transform_indices = @transform_2, window_bounds = array<i64: 1, 32>}, {pipeline_mode = #tpu.pipeline_mode<synchronous>, transform_indices = @transform_3, window_bounds = array<i64: 32, 96>}, {pipeline_mode = #tpu.pipeline_mode<synchronous>, transform_indices = @transform_4, window_bounds = array<i64: 1, 96>}, {pipeline_mode = #tpu.pipeline_mode<synchronous>, transform_indices = @transform_5, window_bounds = array<i64: 32, 32>}, {pipeline_mode = #tpu.pipeline_mode<synchronous>, transform_indices = @transform_6, window_bounds = array<i64: 1, 32>}, {pipeline_mode = #tpu.pipeline_mode<synchronous>, transform_indices = @transform_7, window_bounds = array<i64: 1, 32>}, {pipeline_mode = #tpu.pipeline_mode<synchronous>, transform_indices = @transform_8, window_bounds = array<i64: 1, 32>}, {pipeline_mode = #tpu.pipeline_mode<synchronous>, transform_indices = @transform_9, window_bounds = array<i64: 32, 128>}, {pipeline_mode = #tpu.pipeline_mode<synchronous>, transform_indices = @transform_10, window_bounds = array<i64: 1, 128>}, {pipeline_mode = #tpu.pipeline_mode<synchronous>, transform_indices = @transform_11, window_bounds = array<i64: 128, 32>}, {pipeline_mode = #tpu.pipeline_mode<synchronous>, transform_indices = @transform_12, window_bounds = array<i64: 1, 32>}, {transform_indices = @transform_13, window_bounds = array<i64: 1, 4, 32>}]} {
    %c0 = arith.constant 0 : index
    %c0_0 = arith.constant 0 : index
    %c0_1 = arith.constant 0 : index
    %0 = vector.load %arg1[%c0, %c0_0, %c0_1] : memref<1x4x32xf32, #tpu.memory_space<vmem>>, vector<1x4x32xf32>
    %1 = vector.shape_cast %0 : vector<1x4x32xf32> to vector<4x32xf32>
    %c0_2 = arith.constant 0 : index
    %c0_3 = arith.constant 0 : index
    %2 = vector.load %arg2[%c0_2, %c0_3] : memref<1x32xf32, #tpu.memory_space<vmem>>, vector<1x32xf32>
    %c0_4 = arith.constant 0 : index
    %c0_5 = arith.constant 0 : index
    %3 = vector.load %arg3[%c0_4, %c0_5] : memref<1x32xf32, #tpu.memory_space<vmem>>, vector<1x32xf32>
    %cst = arith.constant dense<0.000000e+00> : vector<4xf32>
    %4 = vector.multi_reduction <add>, %1, %cst [1] : vector<4x32xf32> to vector<4xf32>
    %5 = vector.shape_cast %4 : vector<4xf32> to vector<4x1xf32>
    %cst_6 = arith.constant 3.200000e+01 : f32
    %6 = vector.broadcast %cst_6 : f32 to vector<4x1xf32>
    %7 = arith.divf %5, %6 : vector<4x1xf32>
    %8 = vector.broadcast %7 : vector<4x1xf32> to vector<4x32xf32>
    %9 = arith.subf %1, %8 : vector<4x32xf32>
    %10 = arith.mulf %9, %9 : vector<4x32xf32>
    %cst_7 = arith.constant dense<0.000000e+00> : vector<4xf32>
    %11 = vector.multi_reduction <add>, %10, %cst_7 [1] : vector<4x32xf32> to vector<4xf32>
    %12 = vector.shape_cast %11 : vector<4xf32> to vector<4x1xf32>
    %cst_8 = arith.constant 3.200000e+01 : f32
    %13 = vector.broadcast %cst_8 : f32 to vector<4x1xf32>
    %14 = arith.divf %12, %13 : vector<4x1xf32>
    %cst_9 = arith.constant 9.99999974E-6 : f32
    %15 = vector.broadcast %cst_9 : f32 to vector<4x1xf32>
    %16 = arith.addf %14, %15 : vector<4x1xf32>
    %17 = math.rsqrt %16 : vector<4x1xf32>
    %18 = vector.broadcast %17 : vector<4x1xf32> to vector<4x32xf32>
    %19 = arith.mulf %9, %18 : vector<4x32xf32>
    %20 = vector.broadcast %2 : vector<1x32xf32> to vector<4x32xf32>
    %21 = arith.mulf %19, %20 : vector<4x32xf32>
    %22 = vector.broadcast %3 : vector<1x32xf32> to vector<4x32xf32>
    %23 = arith.addf %21, %22 : vector<4x32xf32>
    %24 = arith.truncf %23 : vector<4x32xf32> to vector<4x32xbf16>
    %c0_10 = arith.constant 0 : index
    %c0_11 = arith.constant 0 : index
    %25 = vector.load %arg4[%c0_10, %c0_11] : memref<32x96xbf16, #tpu.memory_space<vmem>>, vector<32x96xbf16>
    %cst_12 = arith.constant dense<0.000000e+00> : vector<4x96xf32>
    %26 = tpu.matmul %24, %25, %cst_12 {dimension_numbers = #tpu.dot_dimension_numbers<[1], [0], [0], [1], [0, 0, 1, 1], [], []>} : vector<4x32xbf16>, vector<32x96xbf16>, vector<4x96xf32> -> vector<4x96xf32>
    %c0_13 = arith.constant 0 : index
    %c0_14 = arith.constant 0 : index
    %27 = vector.load %arg5[%c0_13, %c0_14] : memref<1x96xf32, #tpu.memory_space<vmem>>, vector<1x96xf32>
    %28 = vector.broadcast %27 : vector<1x96xf32> to vector<4x96xf32>
    %29 = arith.addf %26, %28 : vector<4x96xf32>
    %30 = arith.truncf %29 : vector<4x96xf32> to vector<4x96xbf16>
    %31 = vector.extract_strided_slice %30 {offsets = [0, 0], sizes = [4, 8], strides = [1, 1]} : vector<4x96xbf16> to vector<4x8xbf16>
    %32 = vector.shape_cast %31 : vector<4x8xbf16> to vector<1x4x8xbf16>
    %33 = vector.extract_strided_slice %30 {offsets = [0, 8], sizes = [4, 8], strides = [1, 1]} : vector<4x96xbf16> to vector<4x8xbf16>
    %34 = vector.shape_cast %33 : vector<4x8xbf16> to vector<1x4x8xbf16>
    %35 = vector.extract_strided_slice %30 {offsets = [0, 16], sizes = [4, 8], strides = [1, 1]} : vector<4x96xbf16> to vector<4x8xbf16>
    %36 = vector.shape_cast %35 : vector<4x8xbf16> to vector<1x4x8xbf16>
    %37 = vector.extract_strided_slice %30 {offsets = [0, 24], sizes = [4, 8], strides = [1, 1]} : vector<4x96xbf16> to vector<4x8xbf16>
    %38 = vector.shape_cast %37 : vector<4x8xbf16> to vector<1x4x8xbf16>
    %39 = tpu.concatenate %32, %34, %36, %38 in 0 : vector<1x4x8xbf16>, vector<1x4x8xbf16>, vector<1x4x8xbf16>, vector<1x4x8xbf16> -> vector<4x4x8xbf16>
    %40 = vector.extract_strided_slice %30 {offsets = [0, 32], sizes = [4, 8], strides = [1, 1]} : vector<4x96xbf16> to vector<4x8xbf16>
    %41 = vector.shape_cast %40 : vector<4x8xbf16> to vector<1x4x8xbf16>
    %42 = vector.extract_strided_slice %30 {offsets = [0, 40], sizes = [4, 8], strides = [1, 1]} : vector<4x96xbf16> to vector<4x8xbf16>
    %43 = vector.shape_cast %42 : vector<4x8xbf16> to vector<1x4x8xbf16>
    %44 = vector.extract_strided_slice %30 {offsets = [0, 48], sizes = [4, 8], strides = [1, 1]} : vector<4x96xbf16> to vector<4x8xbf16>
    %45 = vector.shape_cast %44 : vector<4x8xbf16> to vector<1x4x8xbf16>
    %46 = vector.extract_strided_slice %30 {offsets = [0, 56], sizes = [4, 8], strides = [1, 1]} : vector<4x96xbf16> to vector<4x8xbf16>
    %47 = vector.shape_cast %46 : vector<4x8xbf16> to vector<1x4x8xbf16>
    %48 = tpu.concatenate %41, %43, %45, %47 in 0 : vector<1x4x8xbf16>, vector<1x4x8xbf16>, vector<1x4x8xbf16>, vector<1x4x8xbf16> -> vector<4x4x8xbf16>
    %49 = vector.extract_strided_slice %30 {offsets = [0, 64], sizes = [4, 8], strides = [1, 1]} : vector<4x96xbf16> to vector<4x8xbf16>
    %50 = vector.shape_cast %49 : vector<4x8xbf16> to vector<1x4x8xbf16>
    %51 = vector.extract_strided_slice %30 {offsets = [0, 72], sizes = [4, 8], strides = [1, 1]} : vector<4x96xbf16> to vector<4x8xbf16>
    %52 = vector.shape_cast %51 : vector<4x8xbf16> to vector<1x4x8xbf16>
    %53 = vector.extract_strided_slice %30 {offsets = [0, 80], sizes = [4, 8], strides = [1, 1]} : vector<4x96xbf16> to vector<4x8xbf16>
    %54 = vector.shape_cast %53 : vector<4x8xbf16> to vector<1x4x8xbf16>
    %55 = vector.extract_strided_slice %30 {offsets = [0, 88], sizes = [4, 8], strides = [1, 1]} : vector<4x96xbf16> to vector<4x8xbf16>
    %56 = vector.shape_cast %55 : vector<4x8xbf16> to vector<1x4x8xbf16>
    %57 = tpu.concatenate %50, %52, %54, %56 in 0 : vector<1x4x8xbf16>, vector<1x4x8xbf16>, vector<1x4x8xbf16>, vector<1x4x8xbf16> -> vector<4x4x8xbf16>
    "tpu.trace_start"() <{level = 10 : i32, message = "htd,hsd->hts"}> : () -> ()
    %cst_15 = arith.constant dense<0.000000e+00> : vector<4x4x4xf32>
    %58 = tpu.matmul %39, %48, %cst_15 {dimension_numbers = #tpu.dot_dimension_numbers<[2], [2], [1], [1], [0, 0, 0, 1, 1, 1], [0], [0]>} : vector<4x4x8xbf16>, vector<4x4x8xbf16>, vector<4x4x4xf32> -> vector<4x4x4xf32>
    "tpu.trace_stop"() : () -> ()
    %cst_16 = arith.constant 0.353553385 : f32
    %59 = vector.broadcast %cst_16 : f32 to vector<4x4x4xf32>
    %60 = arith.mulf %58, %59 : vector<4x4x4xf32>
    %cst_17 = arith.constant dense<0xFF800000> : vector<4x4xf32>
    %61 = vector.multi_reduction <maximumf>, %60, %cst_17 [2] : vector<4x4x4xf32> to vector<4x4xf32>
    %62 = vector.shape_cast %61 : vector<4x4xf32> to vector<4x4x1xf32>
    %63 = vector.broadcast %62 : vector<4x4x1xf32> to vector<4x4x4xf32>
    %64 = arith.subf %60, %63 : vector<4x4x4xf32>
    %65 = math.exp %64 : vector<4x4x4xf32>
    %cst_18 = arith.constant dense<0.000000e+00> : vector<4x4xf32>
    %66 = vector.multi_reduction <add>, %65, %cst_18 [2] : vector<4x4x4xf32> to vector<4x4xf32>
    %67 = vector.shape_cast %66 : vector<4x4xf32> to vector<4x4x1xf32>
    %68 = tpu.reciprocal %67 {approx = true} : vector<4x4x1xf32> -> vector<4x4x1xf32>
    %69 = vector.broadcast %68 : vector<4x4x1xf32> to vector<4x4x4xf32>
    %70 = arith.mulf %65, %69 : vector<4x4x4xf32>
    %71 = arith.truncf %70 : vector<4x4x4xf32> to vector<4x4x4xbf16>
    "tpu.trace_start"() <{level = 10 : i32, message = "hts,hsd->htd"}> : () -> ()
    %cst_19 = arith.constant dense<0.000000e+00> : vector<4x4x8xf32>
    %72 = tpu.matmul %71, %57, %cst_19 {dimension_numbers = #tpu.dot_dimension_numbers<[2], [1], [1], [2], [0, 0, 0, 1, 1, 2], [0], [0]>} : vector<4x4x4xbf16>, vector<4x4x8xbf16>, vector<4x4x8xf32> -> vector<4x4x8xf32>
    "tpu.trace_stop"() : () -> ()
    %73 = vector.extract_strided_slice %72 {offsets = [0, 0, 0], sizes = [1, 4, 8], strides = [1, 1, 1]} : vector<4x4x8xf32> to vector<1x4x8xf32>
    %74 = vector.shape_cast %73 : vector<1x4x8xf32> to vector<4x8xf32>
    %75 = vector.extract_strided_slice %72 {offsets = [1, 0, 0], sizes = [1, 4, 8], strides = [1, 1, 1]} : vector<4x4x8xf32> to vector<1x4x8xf32>
    %76 = vector.shape_cast %75 : vector<1x4x8xf32> to vector<4x8xf32>
    %77 = vector.extract_strided_slice %72 {offsets = [2, 0, 0], sizes = [1, 4, 8], strides = [1, 1, 1]} : vector<4x4x8xf32> to vector<1x4x8xf32>
    %78 = vector.shape_cast %77 : vector<1x4x8xf32> to vector<4x8xf32>
    %79 = vector.extract_strided_slice %72 {offsets = [3, 0, 0], sizes = [1, 4, 8], strides = [1, 1, 1]} : vector<4x4x8xf32> to vector<1x4x8xf32>
    %80 = vector.shape_cast %79 : vector<1x4x8xf32> to vector<4x8xf32>
    %81 = tpu.concatenate %74, %76, %78, %80 in 1 : vector<4x8xf32>, vector<4x8xf32>, vector<4x8xf32>, vector<4x8xf32> -> vector<4x32xf32>
    %82 = arith.truncf %81 : vector<4x32xf32> to vector<4x32xbf16>
    %c0_20 = arith.constant 0 : index
    %c0_21 = arith.constant 0 : index
    %83 = vector.load %arg6[%c0_20, %c0_21] : memref<32x32xbf16, #tpu.memory_space<vmem>>, vector<32x32xbf16>
    %cst_22 = arith.constant dense<0.000000e+00> : vector<4x32xf32>
    %84 = tpu.matmul %82, %83, %cst_22 {dimension_numbers = #tpu.dot_dimension_numbers<[1], [0], [0], [1], [0, 0, 1, 1], [], []>} : vector<4x32xbf16>, vector<32x32xbf16>, vector<4x32xf32> -> vector<4x32xf32>
    %c0_23 = arith.constant 0 : index
    %c0_24 = arith.constant 0 : index
    %85 = vector.load %arg7[%c0_23, %c0_24] : memref<1x32xf32, #tpu.memory_space<vmem>>, vector<1x32xf32>
    %86 = vector.broadcast %85 : vector<1x32xf32> to vector<4x32xf32>
    %87 = arith.addf %84, %86 : vector<4x32xf32>
    %88 = arith.addf %1, %87 : vector<4x32xf32>
    %c0_25 = arith.constant 0 : index
    %c0_26 = arith.constant 0 : index
    %89 = vector.load %arg8[%c0_25, %c0_26] : memref<1x32xf32, #tpu.memory_space<vmem>>, vector<1x32xf32>
    %c0_27 = arith.constant 0 : index
    %c0_28 = arith.constant 0 : index
    %90 = vector.load %arg9[%c0_27, %c0_28] : memref<1x32xf32, #tpu.memory_space<vmem>>, vector<1x32xf32>
    %cst_29 = arith.constant dense<0.000000e+00> : vector<4xf32>
    %91 = vector.multi_reduction <add>, %88, %cst_29 [1] : vector<4x32xf32> to vector<4xf32>
    %92 = vector.shape_cast %91 : vector<4xf32> to vector<4x1xf32>
    %cst_30 = arith.constant 3.200000e+01 : f32
    %93 = vector.broadcast %cst_30 : f32 to vector<4x1xf32>
    %94 = arith.divf %92, %93 : vector<4x1xf32>
    %95 = vector.broadcast %94 : vector<4x1xf32> to vector<4x32xf32>
    %96 = arith.subf %88, %95 : vector<4x32xf32>
    %97 = arith.mulf %96, %96 : vector<4x32xf32>
    %cst_31 = arith.constant dense<0.000000e+00> : vector<4xf32>
    %98 = vector.multi_reduction <add>, %97, %cst_31 [1] : vector<4x32xf32> to vector<4xf32>
    %99 = vector.shape_cast %98 : vector<4xf32> to vector<4x1xf32>
    %cst_32 = arith.constant 3.200000e+01 : f32
    %100 = vector.broadcast %cst_32 : f32 to vector<4x1xf32>
    %101 = arith.divf %99, %100 : vector<4x1xf32>
    %cst_33 = arith.constant 9.99999974E-6 : f32
    %102 = vector.broadcast %cst_33 : f32 to vector<4x1xf32>
    %103 = arith.addf %101, %102 : vector<4x1xf32>
    %104 = math.rsqrt %103 : vector<4x1xf32>
    %105 = vector.broadcast %104 : vector<4x1xf32> to vector<4x32xf32>
    %106 = arith.mulf %96, %105 : vector<4x32xf32>
    %107 = vector.broadcast %89 : vector<1x32xf32> to vector<4x32xf32>
    %108 = arith.mulf %106, %107 : vector<4x32xf32>
    %109 = vector.broadcast %90 : vector<1x32xf32> to vector<4x32xf32>
    %110 = arith.addf %108, %109 : vector<4x32xf32>
    %111 = arith.truncf %110 : vector<4x32xf32> to vector<4x32xbf16>
    %c0_34 = arith.constant 0 : index
    %c0_35 = arith.constant 0 : index
    %112 = vector.load %arg10[%c0_34, %c0_35] : memref<32x128xbf16, #tpu.memory_space<vmem>>, vector<32x128xbf16>
    %cst_36 = arith.constant dense<0.000000e+00> : vector<4x128xf32>
    %113 = tpu.matmul %111, %112, %cst_36 {dimension_numbers = #tpu.dot_dimension_numbers<[1], [0], [0], [1], [0, 0, 1, 1], [], []>} : vector<4x32xbf16>, vector<32x128xbf16>, vector<4x128xf32> -> vector<4x128xf32>
    %c0_37 = arith.constant 0 : index
    %c0_38 = arith.constant 0 : index
    %114 = vector.load %arg11[%c0_37, %c0_38] : memref<1x128xf32, #tpu.memory_space<vmem>>, vector<1x128xf32>
    %115 = vector.broadcast %114 : vector<1x128xf32> to vector<4x128xf32>
    %116 = arith.addf %113, %115 : vector<4x128xf32>
    %117 = arith.mulf %116, %116 : vector<4x128xf32>
    %118 = arith.mulf %116, %117 : vector<4x128xf32>
    %cst_39 = arith.constant 4.471500e-02 : f32
    %119 = vector.broadcast %cst_39 : f32 to vector<4x128xf32>
    %120 = arith.mulf %119, %118 : vector<4x128xf32>
    %121 = arith.addf %116, %120 : vector<4x128xf32>
    %cst_40 = arith.constant 0.797884583 : f32
    %122 = vector.broadcast %cst_40 : f32 to vector<4x128xf32>
    %123 = arith.mulf %122, %121 : vector<4x128xf32>
    %124 = math.tanh %123 : vector<4x128xf32>
    %cst_41 = arith.constant 1.000000e+00 : f32
    %125 = vector.broadcast %cst_41 : f32 to vector<4x128xf32>
    %126 = arith.addf %125, %124 : vector<4x128xf32>
    %cst_42 = arith.constant 5.000000e-01 : f32
    %127 = vector.broadcast %cst_42 : f32 to vector<4x128xf32>
    %128 = arith.mulf %127, %126 : vector<4x128xf32>
    %129 = arith.mulf %116, %128 : vector<4x128xf32>
    %130 = arith.truncf %129 : vector<4x128xf32> to vector<4x128xbf16>
    %c0_43 = arith.constant 0 : index
    %c0_44 = arith.constant 0 : index
    %131 = vector.load %arg12[%c0_43, %c0_44] : memref<128x32xbf16, #tpu.memory_space<vmem>>, vector<128x32xbf16>
    %cst_45 = arith.constant dense<0.000000e+00> : vector<4x32xf32>
    %132 = tpu.matmul %130, %131, %cst_45 {dimension_numbers = #tpu.dot_dimension_numbers<[1], [0], [0], [1], [0, 0, 1, 1], [], []>} : vector<4x128xbf16>, vector<128x32xbf16>, vector<4x32xf32> -> vector<4x32xf32>
    %c0_46 = arith.constant 0 : index
    %c0_47 = arith.constant 0 : index
    %133 = vector.load %arg13[%c0_46, %c0_47] : memref<1x32xf32, #tpu.memory_space<vmem>>, vector<1x32xf32>
    %134 = vector.broadcast %133 : vector<1x32xf32> to vector<4x32xf32>
    %135 = arith.addf %132, %134 : vector<4x32xf32>
    %136 = arith.addf %88, %135 : vector<4x32xf32>
    %c0_48 = arith.constant 0 : index
    %c0_49 = arith.constant 0 : index
    %c0_50 = arith.constant 0 : index
    %137 = vector.load %arg14[%c0_48, %c0_49, %c0_50] : memref<1x4x32xf32, #tpu.memory_space<vmem>>, vector<1x4x32xf32>
    %138 = vector.shape_cast %137 : vector<1x4x32xf32> to vector<4x32xf32>
    %139 = vector.shape_cast %136 : vector<4x32xf32> to vector<1x4x32xf32>
    tpu.vector_store %arg14[%c0_48, %c0_49, %c0_50], %139 {strides = array<i32>} : memref<1x4x32xf32, #tpu.memory_space<vmem>>, vector<1x4x32xf32>,
    return
  }
  func.func @transform_0(%arg0: i32) -> (i32, i32, i32) {
    %c0_i32 = arith.constant 0 : i32
    %c0_i32_0 = arith.constant 0 : i32
    %c0_i32_1 = arith.constant 0 : i32
    return %arg0, %c0_i32, %c0_i32_0 : i32, i32, i32
  }
  func.func @transform_1(%arg0: i32) -> (i32, i32) {
    %c0_i32 = arith.constant 0 : i32
    %c0_i32_0 = arith.constant 0 : i32
    %c0_i32_1 = arith.constant 0 : i32
    return %c0_i32, %c0_i32_0 : i32, i32
  }
  func.func @transform_2(%arg0: i32) -> (i32, i32) {
    %c0_i32 = arith.constant 0 : i32
    %c0_i32_0 = arith.constant 0 : i32
    %c0_i32_1 = arith.constant 0 : i32
    return %c0_i32, %c0_i32_0 : i32, i32
  }
  func.func @transform_3(%arg0: i32) -> (i32, i32) {
    %c0_i32 = arith.constant 0 : i32
    %c0_i32_0 = arith.constant 0 : i32
    %c0_i32_1 = arith.constant 0 : i32
    return %c0_i32, %c0_i32_0 : i32, i32
  }
  func.func @transform_4(%arg0: i32) -> (i32, i32) {
    %c0_i32 = arith.constant 0 : i32
    %c0_i32_0 = arith.constant 0 : i32
    %c0_i32_1 = arith.constant 0 : i32
    return %c0_i32, %c0_i32_0 : i32, i32
  }
  func.func @transform_5(%arg0: i32) -> (i32, i32) {
    %c0_i32 = arith.constant 0 : i32
    %c0_i32_0 = arith.constant 0 : i32
    %c0_i32_1 = arith.constant 0 : i32
    return %c0_i32, %c0_i32_0 : i32, i32
  }
  func.func @transform_6(%arg0: i32) -> (i32, i32) {
    %c0_i32 = arith.constant 0 : i32
    %c0_i32_0 = arith.constant 0 : i32
    %c0_i32_1 = arith.constant 0 : i32
    return %c0_i32, %c0_i32_0 : i32, i32
  }
  func.func @transform_7(%arg0: i32) -> (i32, i32) {
    %c0_i32 = arith.constant 0 : i32
    %c0_i32_0 = arith.constant 0 : i32
    %c0_i32_1 = arith.constant 0 : i32
    return %c0_i32, %c0_i32_0 : i32, i32
  }
  func.func @transform_8(%arg0: i32) -> (i32, i32) {
    %c0_i32 = arith.constant 0 : i32
    %c0_i32_0 = arith.constant 0 : i32
    %c0_i32_1 = arith.constant 0 : i32
    return %c0_i32, %c0_i32_0 : i32, i32
  }
  func.func @transform_9(%arg0: i32) -> (i32, i32) {
    %c0_i32 = arith.constant 0 : i32
    %c0_i32_0 = arith.constant 0 : i32
    %c0_i32_1 = arith.constant 0 : i32
    return %c0_i32, %c0_i32_0 : i32, i32
  }
  func.func @transform_10(%arg0: i32) -> (i32, i32) {
    %c0_i32 = arith.constant 0 : i32
    %c0_i32_0 = arith.constant 0 : i32
    %c0_i32_1 = arith.constant 0 : i32
    return %c0_i32, %c0_i32_0 : i32, i32
  }
  func.func @transform_11(%arg0: i32) -> (i32, i32) {
    %c0_i32 = arith.constant 0 : i32
    %c0_i32_0 = arith.constant 0 : i32
    %c0_i32_1 = arith.constant 0 : i32
    return %c0_i32, %c0_i32_0 : i32, i32
  }
  func.func @transform_12(%arg0: i32) -> (i32, i32) {
    %c0_i32 = arith.constant 0 : i32
    %c0_i32_0 = arith.constant 0 : i32
    %c0_i32_1 = arith.constant 0 : i32
    return %c0_i32, %c0_i32_0 : i32, i32
  }
  func.func @transform_13(%arg0: i32) -> (i32, i32, i32) {
    %c0_i32 = arith.constant 0 : i32
    %c0_i32_0 = arith.constant 0 : i32
    %c0_i32_1 = arith.constant 0 : i32
    return %arg0, %c0_i32, %c0_i32_0 : i32, i32, i32
  }
}

module attributes {stable_mosaic.version = 11 : i64} {
  func.func @_transformer_layer_kernel(%arg0: i32, %arg1: memref<1x4x32xf32, #tpu.memory_space<vmem>>, %arg2: memref<4x32xf32, #tpu.memory_space<vmem>>, %arg3: memref<1x32xf32, #tpu.memory_space<vmem>>, %arg4: memref<1x32xf32, #tpu.memory_space<vmem>>, %arg5: memref<32x96xbf16, #tpu.memory_space<vmem>>, %arg6: memref<1x96xf32, #tpu.memory_space<vmem>>, %arg7: memref<32x32xbf16, #tpu.memory_space<vmem>>, %arg8: memref<1x32xf32, #tpu.memory_space<vmem>>, %arg9: memref<1x32xf32, #tpu.memory_space<vmem>>, %arg10: memref<1x32xf32, #tpu.memory_space<vmem>>, %arg11: memref<32x128xbf16, #tpu.memory_space<vmem>>, %arg12: memref<1x128xf32, #tpu.memory_space<vmem>>, %arg13: memref<128x32xbf16, #tpu.memory_space<vmem>>, %arg14: memref<1x32xf32, #tpu.memory_space<vmem>>, %arg15: memref<1x4x32xf32, #tpu.memory_space<vmem>>) attributes {dimension_semantics = [#tpu.dimension_semantics<parallel>], iteration_bounds = array<i64: 2>, scalar_prefetch = 0 : i64, scratch_operands = 0 : i64, tpu.core_type = #tpu.core_type<tc>, window_params = [{transform_indices = @transform_0, window_bounds = array<i64: 1, 4, 32>}, {pipeline_mode = #tpu.pipeline_mode<synchronous>, transform_indices = @transform_1, window_bounds = array<i64: 4, 32>}, {pipeline_mode = #tpu.pipeline_mode<synchronous>, transform_indices = @transform_2, window_bounds = array<i64: 1, 32>}, {pipeline_mode = #tpu.pipeline_mode<synchronous>, transform_indices = @transform_3, window_bounds = array<i64: 1, 32>}, {pipeline_mode = #tpu.pipeline_mode<synchronous>, transform_indices = @transform_4, window_bounds = array<i64: 32, 96>}, {pipeline_mode = #tpu.pipeline_mode<synchronous>, transform_indices = @transform_5, window_bounds = array<i64: 1, 96>}, {pipeline_mode = #tpu.pipeline_mode<synchronous>, transform_indices = @transform_6, window_bounds = array<i64: 32, 32>}, {pipeline_mode = #tpu.pipeline_mode<synchronous>, transform_indices = @transform_7, window_bounds = array<i64: 1, 32>}, {pipeline_mode = #tpu.pipeline_mode<synchronous>, transform_indices = @transform_8, window_bounds = array<i64: 1, 32>}, {pipeline_mode = #tpu.pipeline_mode<synchronous>, transform_indices = @transform_9, window_bounds = array<i64: 1, 32>}, {pipeline_mode = #tpu.pipeline_mode<synchronous>, transform_indices = @transform_10, window_bounds = array<i64: 32, 128>}, {pipeline_mode = #tpu.pipeline_mode<synchronous>, transform_indices = @transform_11, window_bounds = array<i64: 1, 128>}, {pipeline_mode = #tpu.pipeline_mode<synchronous>, transform_indices = @transform_12, window_bounds = array<i64: 128, 32>}, {pipeline_mode = #tpu.pipeline_mode<synchronous>, transform_indices = @transform_13, window_bounds = array<i64: 1, 32>}, {transform_indices = @transform_14, window_bounds = array<i64: 1, 4, 32>}]} {
    %c0 = arith.constant 0 : index
    %c0_0 = arith.constant 0 : index
    %c0_1 = arith.constant 0 : index
    %0 = vector.load %arg1[%c0, %c0_0, %c0_1] : memref<1x4x32xf32, #tpu.memory_space<vmem>>, vector<1x4x32xf32>
    %1 = vector.shape_cast %0 : vector<1x4x32xf32> to vector<4x32xf32>
    %c0_2 = arith.constant 0 : index
    %c0_3 = arith.constant 0 : index
    %2 = vector.load %arg2[%c0_2, %c0_3] : memref<4x32xf32, #tpu.memory_space<vmem>>, vector<4x32xf32>
    %3 = arith.addf %1, %2 : vector<4x32xf32>
    %c0_4 = arith.constant 0 : index
    %c0_5 = arith.constant 0 : index
    %4 = vector.load %arg3[%c0_4, %c0_5] : memref<1x32xf32, #tpu.memory_space<vmem>>, vector<1x32xf32>
    %c0_6 = arith.constant 0 : index
    %c0_7 = arith.constant 0 : index
    %5 = vector.load %arg4[%c0_6, %c0_7] : memref<1x32xf32, #tpu.memory_space<vmem>>, vector<1x32xf32>
    %cst = arith.constant dense<0.000000e+00> : vector<4xf32>
    %6 = vector.multi_reduction <add>, %3, %cst [1] : vector<4x32xf32> to vector<4xf32>
    %7 = vector.shape_cast %6 : vector<4xf32> to vector<4x1xf32>
    %cst_8 = arith.constant 3.200000e+01 : f32
    %8 = vector.broadcast %cst_8 : f32 to vector<4x1xf32>
    %9 = arith.divf %7, %8 : vector<4x1xf32>
    %10 = vector.broadcast %9 : vector<4x1xf32> to vector<4x32xf32>
    %11 = arith.subf %3, %10 : vector<4x32xf32>
    %12 = arith.mulf %11, %11 : vector<4x32xf32>
    %cst_9 = arith.constant dense<0.000000e+00> : vector<4xf32>
    %13 = vector.multi_reduction <add>, %12, %cst_9 [1] : vector<4x32xf32> to vector<4xf32>
    %14 = vector.shape_cast %13 : vector<4xf32> to vector<4x1xf32>
    %cst_10 = arith.constant 3.200000e+01 : f32
    %15 = vector.broadcast %cst_10 : f32 to vector<4x1xf32>
    %16 = arith.divf %14, %15 : vector<4x1xf32>
    %cst_11 = arith.constant 9.99999974E-6 : f32
    %17 = vector.broadcast %cst_11 : f32 to vector<4x1xf32>
    %18 = arith.addf %16, %17 : vector<4x1xf32>
    %19 = math.rsqrt %18 : vector<4x1xf32>
    %20 = vector.broadcast %19 : vector<4x1xf32> to vector<4x32xf32>
    %21 = arith.mulf %11, %20 : vector<4x32xf32>
    %22 = vector.broadcast %4 : vector<1x32xf32> to vector<4x32xf32>
    %23 = arith.mulf %21, %22 : vector<4x32xf32>
    %24 = vector.broadcast %5 : vector<1x32xf32> to vector<4x32xf32>
    %25 = arith.addf %23, %24 : vector<4x32xf32>
    %26 = arith.truncf %25 : vector<4x32xf32> to vector<4x32xbf16>
    %c0_12 = arith.constant 0 : index
    %c0_13 = arith.constant 0 : index
    %27 = vector.load %arg5[%c0_12, %c0_13] : memref<32x96xbf16, #tpu.memory_space<vmem>>, vector<32x96xbf16>
    %cst_14 = arith.constant dense<0.000000e+00> : vector<4x96xf32>
    %28 = tpu.matmul %26, %27, %cst_14 {dimension_numbers = #tpu.dot_dimension_numbers<[1], [0], [0], [1], [0, 0, 1, 1], [], []>} : vector<4x32xbf16>, vector<32x96xbf16>, vector<4x96xf32> -> vector<4x96xf32>
    %c0_15 = arith.constant 0 : index
    %c0_16 = arith.constant 0 : index
    %29 = vector.load %arg6[%c0_15, %c0_16] : memref<1x96xf32, #tpu.memory_space<vmem>>, vector<1x96xf32>
    %30 = vector.broadcast %29 : vector<1x96xf32> to vector<4x96xf32>
    %31 = arith.addf %28, %30 : vector<4x96xf32>
    %32 = arith.truncf %31 : vector<4x96xf32> to vector<4x96xbf16>
    %33 = vector.extract_strided_slice %32 {offsets = [0, 0], sizes = [4, 8], strides = [1, 1]} : vector<4x96xbf16> to vector<4x8xbf16>
    %34 = vector.shape_cast %33 : vector<4x8xbf16> to vector<1x4x8xbf16>
    %35 = vector.extract_strided_slice %32 {offsets = [0, 8], sizes = [4, 8], strides = [1, 1]} : vector<4x96xbf16> to vector<4x8xbf16>
    %36 = vector.shape_cast %35 : vector<4x8xbf16> to vector<1x4x8xbf16>
    %37 = vector.extract_strided_slice %32 {offsets = [0, 16], sizes = [4, 8], strides = [1, 1]} : vector<4x96xbf16> to vector<4x8xbf16>
    %38 = vector.shape_cast %37 : vector<4x8xbf16> to vector<1x4x8xbf16>
    %39 = vector.extract_strided_slice %32 {offsets = [0, 24], sizes = [4, 8], strides = [1, 1]} : vector<4x96xbf16> to vector<4x8xbf16>
    %40 = vector.shape_cast %39 : vector<4x8xbf16> to vector<1x4x8xbf16>
    %41 = tpu.concatenate %34, %36, %38, %40 in 0 : vector<1x4x8xbf16>, vector<1x4x8xbf16>, vector<1x4x8xbf16>, vector<1x4x8xbf16> -> vector<4x4x8xbf16>
    %42 = vector.extract_strided_slice %32 {offsets = [0, 32], sizes = [4, 8], strides = [1, 1]} : vector<4x96xbf16> to vector<4x8xbf16>
    %43 = vector.shape_cast %42 : vector<4x8xbf16> to vector<1x4x8xbf16>
    %44 = vector.extract_strided_slice %32 {offsets = [0, 40], sizes = [4, 8], strides = [1, 1]} : vector<4x96xbf16> to vector<4x8xbf16>
    %45 = vector.shape_cast %44 : vector<4x8xbf16> to vector<1x4x8xbf16>
    %46 = vector.extract_strided_slice %32 {offsets = [0, 48], sizes = [4, 8], strides = [1, 1]} : vector<4x96xbf16> to vector<4x8xbf16>
    %47 = vector.shape_cast %46 : vector<4x8xbf16> to vector<1x4x8xbf16>
    %48 = vector.extract_strided_slice %32 {offsets = [0, 56], sizes = [4, 8], strides = [1, 1]} : vector<4x96xbf16> to vector<4x8xbf16>
    %49 = vector.shape_cast %48 : vector<4x8xbf16> to vector<1x4x8xbf16>
    %50 = tpu.concatenate %43, %45, %47, %49 in 0 : vector<1x4x8xbf16>, vector<1x4x8xbf16>, vector<1x4x8xbf16>, vector<1x4x8xbf16> -> vector<4x4x8xbf16>
    %51 = vector.extract_strided_slice %32 {offsets = [0, 64], sizes = [4, 8], strides = [1, 1]} : vector<4x96xbf16> to vector<4x8xbf16>
    %52 = vector.shape_cast %51 : vector<4x8xbf16> to vector<1x4x8xbf16>
    %53 = vector.extract_strided_slice %32 {offsets = [0, 72], sizes = [4, 8], strides = [1, 1]} : vector<4x96xbf16> to vector<4x8xbf16>
    %54 = vector.shape_cast %53 : vector<4x8xbf16> to vector<1x4x8xbf16>
    %55 = vector.extract_strided_slice %32 {offsets = [0, 80], sizes = [4, 8], strides = [1, 1]} : vector<4x96xbf16> to vector<4x8xbf16>
    %56 = vector.shape_cast %55 : vector<4x8xbf16> to vector<1x4x8xbf16>
    %57 = vector.extract_strided_slice %32 {offsets = [0, 88], sizes = [4, 8], strides = [1, 1]} : vector<4x96xbf16> to vector<4x8xbf16>
    %58 = vector.shape_cast %57 : vector<4x8xbf16> to vector<1x4x8xbf16>
    %59 = tpu.concatenate %52, %54, %56, %58 in 0 : vector<1x4x8xbf16>, vector<1x4x8xbf16>, vector<1x4x8xbf16>, vector<1x4x8xbf16> -> vector<4x4x8xbf16>
    "tpu.trace_start"() <{level = 10 : i32, message = "htd,hsd->hts"}> : () -> ()
    %cst_17 = arith.constant dense<0.000000e+00> : vector<4x4x4xf32>
    %60 = tpu.matmul %41, %50, %cst_17 {dimension_numbers = #tpu.dot_dimension_numbers<[2], [2], [1], [1], [0, 0, 0, 1, 1, 1], [0], [0]>} : vector<4x4x8xbf16>, vector<4x4x8xbf16>, vector<4x4x4xf32> -> vector<4x4x4xf32>
    "tpu.trace_stop"() : () -> ()
    %cst_18 = arith.constant 0.353553385 : f32
    %61 = vector.broadcast %cst_18 : f32 to vector<4x4x4xf32>
    %62 = arith.mulf %60, %61 : vector<4x4x4xf32>
    %cst_19 = arith.constant dense<0xFF800000> : vector<4x4xf32>
    %63 = vector.multi_reduction <maximumf>, %62, %cst_19 [2] : vector<4x4x4xf32> to vector<4x4xf32>
    %64 = vector.shape_cast %63 : vector<4x4xf32> to vector<4x4x1xf32>
    %65 = vector.broadcast %64 : vector<4x4x1xf32> to vector<4x4x4xf32>
    %66 = arith.subf %62, %65 : vector<4x4x4xf32>
    %67 = math.exp %66 : vector<4x4x4xf32>
    %cst_20 = arith.constant dense<0.000000e+00> : vector<4x4xf32>
    %68 = vector.multi_reduction <add>, %67, %cst_20 [2] : vector<4x4x4xf32> to vector<4x4xf32>
    %69 = vector.shape_cast %68 : vector<4x4xf32> to vector<4x4x1xf32>
    %70 = tpu.reciprocal %69 {approx = true} : vector<4x4x1xf32> -> vector<4x4x1xf32>
    %71 = vector.broadcast %70 : vector<4x4x1xf32> to vector<4x4x4xf32>
    %72 = arith.mulf %67, %71 : vector<4x4x4xf32>
    %73 = arith.truncf %72 : vector<4x4x4xf32> to vector<4x4x4xbf16>
    "tpu.trace_start"() <{level = 10 : i32, message = "hts,hsd->htd"}> : () -> ()
    %cst_21 = arith.constant dense<0.000000e+00> : vector<4x4x8xf32>
    %74 = tpu.matmul %73, %59, %cst_21 {dimension_numbers = #tpu.dot_dimension_numbers<[2], [1], [1], [2], [0, 0, 0, 1, 1, 2], [0], [0]>} : vector<4x4x4xbf16>, vector<4x4x8xbf16>, vector<4x4x8xf32> -> vector<4x4x8xf32>
    "tpu.trace_stop"() : () -> ()
    %75 = vector.extract_strided_slice %74 {offsets = [0, 0, 0], sizes = [1, 4, 8], strides = [1, 1, 1]} : vector<4x4x8xf32> to vector<1x4x8xf32>
    %76 = vector.shape_cast %75 : vector<1x4x8xf32> to vector<4x8xf32>
    %77 = vector.extract_strided_slice %74 {offsets = [1, 0, 0], sizes = [1, 4, 8], strides = [1, 1, 1]} : vector<4x4x8xf32> to vector<1x4x8xf32>
    %78 = vector.shape_cast %77 : vector<1x4x8xf32> to vector<4x8xf32>
    %79 = vector.extract_strided_slice %74 {offsets = [2, 0, 0], sizes = [1, 4, 8], strides = [1, 1, 1]} : vector<4x4x8xf32> to vector<1x4x8xf32>
    %80 = vector.shape_cast %79 : vector<1x4x8xf32> to vector<4x8xf32>
    %81 = vector.extract_strided_slice %74 {offsets = [3, 0, 0], sizes = [1, 4, 8], strides = [1, 1, 1]} : vector<4x4x8xf32> to vector<1x4x8xf32>
    %82 = vector.shape_cast %81 : vector<1x4x8xf32> to vector<4x8xf32>
    %83 = tpu.concatenate %76, %78, %80, %82 in 1 : vector<4x8xf32>, vector<4x8xf32>, vector<4x8xf32>, vector<4x8xf32> -> vector<4x32xf32>
    %84 = arith.truncf %83 : vector<4x32xf32> to vector<4x32xbf16>
    %c0_22 = arith.constant 0 : index
    %c0_23 = arith.constant 0 : index
    %85 = vector.load %arg7[%c0_22, %c0_23] : memref<32x32xbf16, #tpu.memory_space<vmem>>, vector<32x32xbf16>
    %cst_24 = arith.constant dense<0.000000e+00> : vector<4x32xf32>
    %86 = tpu.matmul %84, %85, %cst_24 {dimension_numbers = #tpu.dot_dimension_numbers<[1], [0], [0], [1], [0, 0, 1, 1], [], []>} : vector<4x32xbf16>, vector<32x32xbf16>, vector<4x32xf32> -> vector<4x32xf32>
    %c0_25 = arith.constant 0 : index
    %c0_26 = arith.constant 0 : index
    %87 = vector.load %arg8[%c0_25, %c0_26] : memref<1x32xf32, #tpu.memory_space<vmem>>, vector<1x32xf32>
    %88 = vector.broadcast %87 : vector<1x32xf32> to vector<4x32xf32>
    %89 = arith.addf %86, %88 : vector<4x32xf32>
    %90 = arith.addf %3, %89 : vector<4x32xf32>
    %c0_27 = arith.constant 0 : index
    %c0_28 = arith.constant 0 : index
    %91 = vector.load %arg9[%c0_27, %c0_28] : memref<1x32xf32, #tpu.memory_space<vmem>>, vector<1x32xf32>
    %c0_29 = arith.constant 0 : index
    %c0_30 = arith.constant 0 : index
    %92 = vector.load %arg10[%c0_29, %c0_30] : memref<1x32xf32, #tpu.memory_space<vmem>>, vector<1x32xf32>
    %cst_31 = arith.constant dense<0.000000e+00> : vector<4xf32>
    %93 = vector.multi_reduction <add>, %90, %cst_31 [1] : vector<4x32xf32> to vector<4xf32>
    %94 = vector.shape_cast %93 : vector<4xf32> to vector<4x1xf32>
    %cst_32 = arith.constant 3.200000e+01 : f32
    %95 = vector.broadcast %cst_32 : f32 to vector<4x1xf32>
    %96 = arith.divf %94, %95 : vector<4x1xf32>
    %97 = vector.broadcast %96 : vector<4x1xf32> to vector<4x32xf32>
    %98 = arith.subf %90, %97 : vector<4x32xf32>
    %99 = arith.mulf %98, %98 : vector<4x32xf32>
    %cst_33 = arith.constant dense<0.000000e+00> : vector<4xf32>
    %100 = vector.multi_reduction <add>, %99, %cst_33 [1] : vector<4x32xf32> to vector<4xf32>
    %101 = vector.shape_cast %100 : vector<4xf32> to vector<4x1xf32>
    %cst_34 = arith.constant 3.200000e+01 : f32
    %102 = vector.broadcast %cst_34 : f32 to vector<4x1xf32>
    %103 = arith.divf %101, %102 : vector<4x1xf32>
    %cst_35 = arith.constant 9.99999974E-6 : f32
    %104 = vector.broadcast %cst_35 : f32 to vector<4x1xf32>
    %105 = arith.addf %103, %104 : vector<4x1xf32>
    %106 = math.rsqrt %105 : vector<4x1xf32>
    %107 = vector.broadcast %106 : vector<4x1xf32> to vector<4x32xf32>
    %108 = arith.mulf %98, %107 : vector<4x32xf32>
    %109 = vector.broadcast %91 : vector<1x32xf32> to vector<4x32xf32>
    %110 = arith.mulf %108, %109 : vector<4x32xf32>
    %111 = vector.broadcast %92 : vector<1x32xf32> to vector<4x32xf32>
    %112 = arith.addf %110, %111 : vector<4x32xf32>
    %113 = arith.truncf %112 : vector<4x32xf32> to vector<4x32xbf16>
    %c0_36 = arith.constant 0 : index
    %c0_37 = arith.constant 0 : index
    %114 = vector.load %arg11[%c0_36, %c0_37] : memref<32x128xbf16, #tpu.memory_space<vmem>>, vector<32x128xbf16>
    %cst_38 = arith.constant dense<0.000000e+00> : vector<4x128xf32>
    %115 = tpu.matmul %113, %114, %cst_38 {dimension_numbers = #tpu.dot_dimension_numbers<[1], [0], [0], [1], [0, 0, 1, 1], [], []>} : vector<4x32xbf16>, vector<32x128xbf16>, vector<4x128xf32> -> vector<4x128xf32>
    %c0_39 = arith.constant 0 : index
    %c0_40 = arith.constant 0 : index
    %116 = vector.load %arg12[%c0_39, %c0_40] : memref<1x128xf32, #tpu.memory_space<vmem>>, vector<1x128xf32>
    %117 = vector.broadcast %116 : vector<1x128xf32> to vector<4x128xf32>
    %118 = arith.addf %115, %117 : vector<4x128xf32>
    %119 = arith.mulf %118, %118 : vector<4x128xf32>
    %120 = arith.mulf %118, %119 : vector<4x128xf32>
    %cst_41 = arith.constant 4.471500e-02 : f32
    %121 = vector.broadcast %cst_41 : f32 to vector<4x128xf32>
    %122 = arith.mulf %121, %120 : vector<4x128xf32>
    %123 = arith.addf %118, %122 : vector<4x128xf32>
    %cst_42 = arith.constant 0.797884583 : f32
    %124 = vector.broadcast %cst_42 : f32 to vector<4x128xf32>
    %125 = arith.mulf %124, %123 : vector<4x128xf32>
    %126 = math.tanh %125 : vector<4x128xf32>
    %cst_43 = arith.constant 1.000000e+00 : f32
    %127 = vector.broadcast %cst_43 : f32 to vector<4x128xf32>
    %128 = arith.addf %127, %126 : vector<4x128xf32>
    %cst_44 = arith.constant 5.000000e-01 : f32
    %129 = vector.broadcast %cst_44 : f32 to vector<4x128xf32>
    %130 = arith.mulf %129, %128 : vector<4x128xf32>
    %131 = arith.mulf %118, %130 : vector<4x128xf32>
    %132 = arith.truncf %131 : vector<4x128xf32> to vector<4x128xbf16>
    %c0_45 = arith.constant 0 : index
    %c0_46 = arith.constant 0 : index
    %133 = vector.load %arg13[%c0_45, %c0_46] : memref<128x32xbf16, #tpu.memory_space<vmem>>, vector<128x32xbf16>
    %cst_47 = arith.constant dense<0.000000e+00> : vector<4x32xf32>
    %134 = tpu.matmul %132, %133, %cst_47 {dimension_numbers = #tpu.dot_dimension_numbers<[1], [0], [0], [1], [0, 0, 1, 1], [], []>} : vector<4x128xbf16>, vector<128x32xbf16>, vector<4x32xf32> -> vector<4x32xf32>
    %c0_48 = arith.constant 0 : index
    %c0_49 = arith.constant 0 : index
    %135 = vector.load %arg14[%c0_48, %c0_49] : memref<1x32xf32, #tpu.memory_space<vmem>>, vector<1x32xf32>
    %136 = vector.broadcast %135 : vector<1x32xf32> to vector<4x32xf32>
    %137 = arith.addf %134, %136 : vector<4x32xf32>
    %138 = arith.addf %90, %137 : vector<4x32xf32>
    %c0_50 = arith.constant 0 : index
    %c0_51 = arith.constant 0 : index
    %c0_52 = arith.constant 0 : index
    %139 = vector.load %arg15[%c0_50, %c0_51, %c0_52] : memref<1x4x32xf32, #tpu.memory_space<vmem>>, vector<1x4x32xf32>
    %140 = vector.shape_cast %139 : vector<1x4x32xf32> to vector<4x32xf32>
    %141 = vector.shape_cast %138 : vector<4x32xf32> to vector<1x4x32xf32>
    tpu.vector_store %arg15[%c0_50, %c0_51, %c0_52], %141 {strides = array<i32>} : memref<1x4x32xf32, #tpu.memory_space<vmem>>, vector<1x4x32xf32>,
    return
  }
  func.func @transform_0(%arg0: i32) -> (i32, i32, i32) {
    %c0_i32 = arith.constant 0 : i32
    %c0_i32_0 = arith.constant 0 : i32
    %c0_i32_1 = arith.constant 0 : i32
    return %arg0, %c0_i32, %c0_i32_0 : i32, i32, i32
  }
  func.func @transform_1(%arg0: i32) -> (i32, i32) {
    %c0_i32 = arith.constant 0 : i32
    %c0_i32_0 = arith.constant 0 : i32
    %c0_i32_1 = arith.constant 0 : i32
    return %c0_i32, %c0_i32_0 : i32, i32
  }
  func.func @transform_2(%arg0: i32) -> (i32, i32) {
    %c0_i32 = arith.constant 0 : i32
    %c0_i32_0 = arith.constant 0 : i32
    %c0_i32_1 = arith.constant 0 : i32
    return %c0_i32, %c0_i32_0 : i32, i32
  }
  func.func @transform_3(%arg0: i32) -> (i32, i32) {
    %c0_i32 = arith.constant 0 : i32
    %c0_i32_0 = arith.constant 0 : i32
    %c0_i32_1 = arith.constant 0 : i32
    return %c0_i32, %c0_i32_0 : i32, i32
  }
  func.func @transform_4(%arg0: i32) -> (i32, i32) {
    %c0_i32 = arith.constant 0 : i32
    %c0_i32_0 = arith.constant 0 : i32
    %c0_i32_1 = arith.constant 0 : i32
    return %c0_i32, %c0_i32_0 : i32, i32
  }
  func.func @transform_5(%arg0: i32) -> (i32, i32) {
    %c0_i32 = arith.constant 0 : i32
    %c0_i32_0 = arith.constant 0 : i32
    %c0_i32_1 = arith.constant 0 : i32
    return %c0_i32, %c0_i32_0 : i32, i32
  }
  func.func @transform_6(%arg0: i32) -> (i32, i32) {
    %c0_i32 = arith.constant 0 : i32
    %c0_i32_0 = arith.constant 0 : i32
    %c0_i32_1 = arith.constant 0 : i32
    return %c0_i32, %c0_i32_0 : i32, i32
  }
  func.func @transform_7(%arg0: i32) -> (i32, i32) {
    %c0_i32 = arith.constant 0 : i32
    %c0_i32_0 = arith.constant 0 : i32
    %c0_i32_1 = arith.constant 0 : i32
    return %c0_i32, %c0_i32_0 : i32, i32
  }
  func.func @transform_8(%arg0: i32) -> (i32, i32) {
    %c0_i32 = arith.constant 0 : i32
    %c0_i32_0 = arith.constant 0 : i32
    %c0_i32_1 = arith.constant 0 : i32
    return %c0_i32, %c0_i32_0 : i32, i32
  }
  func.func @transform_9(%arg0: i32) -> (i32, i32) {
    %c0_i32 = arith.constant 0 : i32
    %c0_i32_0 = arith.constant 0 : i32
    %c0_i32_1 = arith.constant 0 : i32
    return %c0_i32, %c0_i32_0 : i32, i32
  }
  func.func @transform_10(%arg0: i32) -> (i32, i32) {
    %c0_i32 = arith.constant 0 : i32
    %c0_i32_0 = arith.constant 0 : i32
    %c0_i32_1 = arith.constant 0 : i32
    return %c0_i32, %c0_i32_0 : i32, i32
  }
  func.func @transform_11(%arg0: i32) -> (i32, i32) {
    %c0_i32 = arith.constant 0 : i32
    %c0_i32_0 = arith.constant 0 : i32
    %c0_i32_1 = arith.constant 0 : i32
    return %c0_i32, %c0_i32_0 : i32, i32
  }
  func.func @transform_12(%arg0: i32) -> (i32, i32) {
    %c0_i32 = arith.constant 0 : i32
    %c0_i32_0 = arith.constant 0 : i32
    %c0_i32_1 = arith.constant 0 : i32
    return %c0_i32, %c0_i32_0 : i32, i32
  }
  func.func @transform_13(%arg0: i32) -> (i32, i32) {
    %c0_i32 = arith.constant 0 : i32
    %c0_i32_0 = arith.constant 0 : i32
    %c0_i32_1 = arith.constant 0 : i32
    return %c0_i32, %c0_i32_0 : i32, i32
  }
  func.func @transform_14(%arg0: i32) -> (i32, i32, i32) {
    %c0_i32 = arith.constant 0 : i32
    %c0_i32_0 = arith.constant 0 : i32
    %c0_i32_1 = arith.constant 0 : i32
    return %arg0, %c0_i32, %c0_i32_0 : i32, i32, i32
  }
}

module attributes {stable_mosaic.version = 11 : i64} {
  func.func @_ln_mm2_kernel(%arg0: i32, %arg1: memref<8x32xf32, #tpu.memory_space<vmem>>, %arg2: memref<1x32xf32, #tpu.memory_space<vmem>>, %arg3: memref<1x32xf32, #tpu.memory_space<vmem>>, %arg4: memref<32x32xbf16, #tpu.memory_space<vmem>>, %arg5: memref<32x16xbf16, #tpu.memory_space<vmem>>, %arg6: memref<1x16xf32, #tpu.memory_space<vmem>>, %arg7: memref<8x16xf32, #tpu.memory_space<vmem>>) attributes {dimension_semantics = [#tpu.dimension_semantics<parallel>], iteration_bounds = array<i64: 1>, scalar_prefetch = 0 : i64, scratch_operands = 0 : i64, tpu.core_type = #tpu.core_type<tc>, window_params = [{transform_indices = @transform_0, window_bounds = array<i64: 8, 32>}, {pipeline_mode = #tpu.pipeline_mode<synchronous>, transform_indices = @transform_1, window_bounds = array<i64: 1, 32>}, {pipeline_mode = #tpu.pipeline_mode<synchronous>, transform_indices = @transform_2, window_bounds = array<i64: 1, 32>}, {pipeline_mode = #tpu.pipeline_mode<synchronous>, transform_indices = @transform_3, window_bounds = array<i64: 32, 32>}, {pipeline_mode = #tpu.pipeline_mode<synchronous>, transform_indices = @transform_4, window_bounds = array<i64: 32, 16>}, {pipeline_mode = #tpu.pipeline_mode<synchronous>, transform_indices = @transform_5, window_bounds = array<i64: 1, 16>}, {transform_indices = @transform_6, window_bounds = array<i64: 8, 16>}]} {
    %c0 = arith.constant 0 : index
    %c0_0 = arith.constant 0 : index
    %0 = vector.load %arg1[%c0, %c0_0] : memref<8x32xf32, #tpu.memory_space<vmem>>, vector<8x32xf32>
    %c0_1 = arith.constant 0 : index
    %c0_2 = arith.constant 0 : index
    %1 = vector.load %arg2[%c0_1, %c0_2] : memref<1x32xf32, #tpu.memory_space<vmem>>, vector<1x32xf32>
    %c0_3 = arith.constant 0 : index
    %c0_4 = arith.constant 0 : index
    %2 = vector.load %arg3[%c0_3, %c0_4] : memref<1x32xf32, #tpu.memory_space<vmem>>, vector<1x32xf32>
    %cst = arith.constant dense<0.000000e+00> : vector<8xf32>
    %3 = vector.multi_reduction <add>, %0, %cst [1] : vector<8x32xf32> to vector<8xf32>
    %4 = vector.shape_cast %3 : vector<8xf32> to vector<8x1xf32>
    %cst_5 = arith.constant 3.200000e+01 : f32
    %5 = vector.broadcast %cst_5 : f32 to vector<8x1xf32>
    %6 = arith.divf %4, %5 : vector<8x1xf32>
    %7 = vector.broadcast %6 : vector<8x1xf32> to vector<8x32xf32>
    %8 = arith.subf %0, %7 : vector<8x32xf32>
    %9 = arith.mulf %8, %8 : vector<8x32xf32>
    %cst_6 = arith.constant dense<0.000000e+00> : vector<8xf32>
    %10 = vector.multi_reduction <add>, %9, %cst_6 [1] : vector<8x32xf32> to vector<8xf32>
    %11 = vector.shape_cast %10 : vector<8xf32> to vector<8x1xf32>
    %cst_7 = arith.constant 3.200000e+01 : f32
    %12 = vector.broadcast %cst_7 : f32 to vector<8x1xf32>
    %13 = arith.divf %11, %12 : vector<8x1xf32>
    %cst_8 = arith.constant 9.99999974E-6 : f32
    %14 = vector.broadcast %cst_8 : f32 to vector<8x1xf32>
    %15 = arith.addf %13, %14 : vector<8x1xf32>
    %16 = math.rsqrt %15 : vector<8x1xf32>
    %17 = vector.broadcast %16 : vector<8x1xf32> to vector<8x32xf32>
    %18 = arith.mulf %8, %17 : vector<8x32xf32>
    %19 = vector.broadcast %1 : vector<1x32xf32> to vector<8x32xf32>
    %20 = arith.mulf %18, %19 : vector<8x32xf32>
    %21 = vector.broadcast %2 : vector<1x32xf32> to vector<8x32xf32>
    %22 = arith.addf %20, %21 : vector<8x32xf32>
    %23 = arith.truncf %22 : vector<8x32xf32> to vector<8x32xbf16>
    %c0_9 = arith.constant 0 : index
    %c0_10 = arith.constant 0 : index
    %24 = vector.load %arg4[%c0_9, %c0_10] : memref<32x32xbf16, #tpu.memory_space<vmem>>, vector<32x32xbf16>
    %cst_11 = arith.constant dense<0.000000e+00> : vector<8x32xf32>
    %25 = tpu.matmul %23, %24, %cst_11 {dimension_numbers = #tpu.dot_dimension_numbers<[1], [0], [0], [1], [0, 0, 1, 1], [], []>} : vector<8x32xbf16>, vector<32x32xbf16>, vector<8x32xf32> -> vector<8x32xf32>
    %26 = arith.truncf %25 : vector<8x32xf32> to vector<8x32xbf16>
    %c0_12 = arith.constant 0 : index
    %c0_13 = arith.constant 0 : index
    %27 = vector.load %arg5[%c0_12, %c0_13] : memref<32x16xbf16, #tpu.memory_space<vmem>>, vector<32x16xbf16>
    %cst_14 = arith.constant dense<0.000000e+00> : vector<8x16xf32>
    %28 = tpu.matmul %26, %27, %cst_14 {dimension_numbers = #tpu.dot_dimension_numbers<[1], [0], [0], [1], [0, 0, 1, 1], [], []>} : vector<8x32xbf16>, vector<32x16xbf16>, vector<8x16xf32> -> vector<8x16xf32>
    %c0_15 = arith.constant 0 : index
    %c0_16 = arith.constant 0 : index
    %29 = vector.load %arg6[%c0_15, %c0_16] : memref<1x16xf32, #tpu.memory_space<vmem>>, vector<1x16xf32>
    %30 = vector.broadcast %29 : vector<1x16xf32> to vector<8x16xf32>
    %31 = arith.addf %28, %30 : vector<8x16xf32>
    %c0_17 = arith.constant 0 : index
    %c0_18 = arith.constant 0 : index
    %32 = vector.load %arg7[%c0_17, %c0_18] : memref<8x16xf32, #tpu.memory_space<vmem>>, vector<8x16xf32>
    tpu.vector_store %arg7[%c0_17, %c0_18], %31 {strides = array<i32>} : memref<8x16xf32, #tpu.memory_space<vmem>>, vector<8x16xf32>,
    return
  }
  func.func @transform_0(%arg0: i32) -> (i32, i32) {
    %c0_i32 = arith.constant 0 : i32
    %c0_i32_0 = arith.constant 0 : i32
    return %arg0, %c0_i32 : i32, i32
  }
  func.func @transform_1(%arg0: i32) -> (i32, i32) {
    %c0_i32 = arith.constant 0 : i32
    %c0_i32_0 = arith.constant 0 : i32
    %c0_i32_1 = arith.constant 0 : i32
    return %c0_i32, %c0_i32_0 : i32, i32
  }
  func.func @transform_2(%arg0: i32) -> (i32, i32) {
    %c0_i32 = arith.constant 0 : i32
    %c0_i32_0 = arith.constant 0 : i32
    %c0_i32_1 = arith.constant 0 : i32
    return %c0_i32, %c0_i32_0 : i32, i32
  }
  func.func @transform_3(%arg0: i32) -> (i32, i32) {
    %c0_i32 = arith.constant 0 : i32
    %c0_i32_0 = arith.constant 0 : i32
    %c0_i32_1 = arith.constant 0 : i32
    return %c0_i32, %c0_i32_0 : i32, i32
  }
  func.func @transform_4(%arg0: i32) -> (i32, i32) {
    %c0_i32 = arith.constant 0 : i32
    %c0_i32_0 = arith.constant 0 : i32
    %c0_i32_1 = arith.constant 0 : i32
    return %c0_i32, %c0_i32_0 : i32, i32
  }
  func.func @transform_5(%arg0: i32) -> (i32, i32) {
    %c0_i32 = arith.constant 0 : i32
    %c0_i32_0 = arith.constant 0 : i32
    %c0_i32_1 = arith.constant 0 : i32
    return %c0_i32, %c0_i32_0 : i32, i32
  }
  func.func @transform_6(%arg0: i32) -> (i32, i32) {
    %c0_i32 = arith.constant 0 : i32
    %c0_i32_0 = arith.constant 0 : i32
    return %arg0, %c0_i32 : i32, i32
  }
}

module attributes {stable_mosaic.version = 11 : i64} {
  func.func @_vq_kernel(%arg0: i32, %arg1: memref<8x16xf32, #tpu.memory_space<vmem>>, %arg2: memref<4x16x4xf32, #tpu.memory_space<vmem>>, %arg3: memref<8x16xf32, #tpu.memory_space<vmem>>, %arg4: memref<8x4xi32, #tpu.memory_space<vmem>>) attributes {dimension_semantics = [#tpu.dimension_semantics<parallel>], iteration_bounds = array<i64: 1>, scalar_prefetch = 0 : i64, scratch_operands = 0 : i64, tpu.core_type = #tpu.core_type<tc>, window_params = [{transform_indices = @transform_0, window_bounds = array<i64: 8, 16>}, {pipeline_mode = #tpu.pipeline_mode<synchronous>, transform_indices = @transform_1, window_bounds = array<i64: 4, 16, 4>}, {transform_indices = @transform_2, window_bounds = array<i64: 8, 16>}, {transform_indices = @transform_3, window_bounds = array<i64: 8, 4>}]} {
    %c0 = arith.constant 0 : index
    %c0_0 = arith.constant 0 : index
    %0 = vector.load %arg1[%c0, %c0_0] : memref<8x16xf32, #tpu.memory_space<vmem>>, vector<8x16xf32>
    %1 = vector.extract_strided_slice %0 {offsets = [0, 0], sizes = [8, 4], strides = [1, 1]} : vector<8x16xf32> to vector<8x4xf32>
    %c0_1 = arith.constant 0 : index
    %c0_2 = arith.constant 0 : index
    %c0_3 = arith.constant 0 : index
    %2 = vector.load %arg2[%c0_1, %c0_2, %c0_3] : memref<4x16x4xf32, #tpu.memory_space<vmem>>, vector<1x16x4xf32>
    %3 = vector.shape_cast %2 : vector<1x16x4xf32> to vector<16x4xf32>
    %4 = vector.shape_cast %1 : vector<8x4xf32> to vector<8x1x4xf32>
    %5 = vector.shape_cast %3 : vector<16x4xf32> to vector<1x16x4xf32>
    %6 = vector.broadcast %4 : vector<8x1x4xf32> to vector<8x16x4xf32>
    %7 = vector.broadcast %5 : vector<1x16x4xf32> to vector<8x16x4xf32>
    %8 = arith.subf %6, %7 : vector<8x16x4xf32>
    %9 = arith.mulf %8, %8 : vector<8x16x4xf32>
    %cst = arith.constant dense<0.000000e+00> : vector<8x16xf32>
    %10 = vector.multi_reduction <add>, %9, %cst [2] : vector<8x16x4xf32> to vector<8x16xf32>
    %cst_4 = arith.constant dense<0x7F800000> : vector<8xf32>
    %11 = vector.multi_reduction <minimumf>, %10, %cst_4 [1] : vector<8x16xf32> to vector<8xf32>
    %12 = vector.shape_cast %11 : vector<8xf32> to vector<8x1xf32>
    %13 = tpu.iota {dimensions = array<i32: 1>} : vector<8x16xi32>
    %14 = vector.broadcast %12 : vector<8x1xf32> to vector<8x16xf32>
    %15 = arith.cmpf ole, %10, %14 : vector<8x16xf32>
    %c16_i32 = arith.constant 16 : i32
    %16 = vector.broadcast %c16_i32 : i32 to vector<8x16xi32>
    %17 = arith.select %15, %13, %16 : vector<8x16xi1>, vector<8x16xi32>
    %cst_5 = arith.constant dense<2147483647> : vector<8xi32>
    %18 = vector.multi_reduction <minsi>, %17, %cst_5 [1] : vector<8x16xi32> to vector<8xi32>
    %19 = vector.shape_cast %18 : vector<8xi32> to vector<8x1xi32>
    %20 = vector.broadcast %19 : vector<8x1xi32> to vector<8x16xi32>
    %21 = arith.cmpi eq, %13, %20 : vector<8x16xi32>
    %22 = arith.extui %21 : vector<8x16xi1> to vector<8x16xi32>
    %23 = arith.sitofp %22 : vector<8x16xi32> to vector<8x16xf32>
    %cst_6 = arith.constant dense<0.000000e+00> : vector<8x4xf32>
    %24 = tpu.matmul %23, %3, %cst_6 {dimension_numbers = #tpu.dot_dimension_numbers<[1], [0], [0], [1], [0, 0, 1, 1], [], []>} : vector<8x16xf32>, vector<16x4xf32>, vector<8x4xf32> -> vector<8x4xf32>
    %25 = vector.extract_strided_slice %0 {offsets = [0, 4], sizes = [8, 4], strides = [1, 1]} : vector<8x16xf32> to vector<8x4xf32>
    %c1 = arith.constant 1 : index
    %c0_7 = arith.constant 0 : index
    %c0_8 = arith.constant 0 : index
    %26 = vector.load %arg2[%c1, %c0_7, %c0_8] : memref<4x16x4xf32, #tpu.memory_space<vmem>>, vector<1x16x4xf32>
    %27 = vector.shape_cast %26 : vector<1x16x4xf32> to vector<16x4xf32>
    %28 = vector.shape_cast %25 : vector<8x4xf32> to vector<8x1x4xf32>
    %29 = vector.shape_cast %27 : vector<16x4xf32> to vector<1x16x4xf32>
    %30 = vector.broadcast %28 : vector<8x1x4xf32> to vector<8x16x4xf32>
    %31 = vector.broadcast %29 : vector<1x16x4xf32> to vector<8x16x4xf32>
    %32 = arith.subf %30, %31 : vector<8x16x4xf32>
    %33 = arith.mulf %32, %32 : vector<8x16x4xf32>
    %cst_9 = arith.constant dense<0.000000e+00> : vector<8x16xf32>
    %34 = vector.multi_reduction <add>, %33, %cst_9 [2] : vector<8x16x4xf32> to vector<8x16xf32>
    %cst_10 = arith.constant dense<0x7F800000> : vector<8xf32>
    %35 = vector.multi_reduction <minimumf>, %34, %cst_10 [1] : vector<8x16xf32> to vector<8xf32>
    %36 = vector.shape_cast %35 : vector<8xf32> to vector<8x1xf32>
    %37 = tpu.iota {dimensions = array<i32: 1>} : vector<8x16xi32>
    %38 = vector.broadcast %36 : vector<8x1xf32> to vector<8x16xf32>
    %39 = arith.cmpf ole, %34, %38 : vector<8x16xf32>
    %c16_i32_11 = arith.constant 16 : i32
    %40 = vector.broadcast %c16_i32_11 : i32 to vector<8x16xi32>
    %41 = arith.select %39, %37, %40 : vector<8x16xi1>, vector<8x16xi32>
    %cst_12 = arith.constant dense<2147483647> : vector<8xi32>
    %42 = vector.multi_reduction <minsi>, %41, %cst_12 [1] : vector<8x16xi32> to vector<8xi32>
    %43 = vector.shape_cast %42 : vector<8xi32> to vector<8x1xi32>
    %44 = vector.broadcast %43 : vector<8x1xi32> to vector<8x16xi32>
    %45 = arith.cmpi eq, %37, %44 : vector<8x16xi32>
    %46 = arith.extui %45 : vector<8x16xi1> to vector<8x16xi32>
    %47 = arith.sitofp %46 : vector<8x16xi32> to vector<8x16xf32>
    %cst_13 = arith.constant dense<0.000000e+00> : vector<8x4xf32>
    %48 = tpu.matmul %47, %27, %cst_13 {dimension_numbers = #tpu.dot_dimension_numbers<[1], [0], [0], [1], [0, 0, 1, 1], [], []>} : vector<8x16xf32>, vector<16x4xf32>, vector<8x4xf32> -> vector<8x4xf32>
    %49 = vector.extract_strided_slice %0 {offsets = [0, 8], sizes = [8, 4], strides = [1, 1]} : vector<8x16xf32> to vector<8x4xf32>
    %c2 = arith.constant 2 : index
    %c0_14 = arith.constant 0 : index
    %c0_15 = arith.constant 0 : index
    %50 = vector.load %arg2[%c2, %c0_14, %c0_15] : memref<4x16x4xf32, #tpu.memory_space<vmem>>, vector<1x16x4xf32>
    %51 = vector.shape_cast %50 : vector<1x16x4xf32> to vector<16x4xf32>
    %52 = vector.shape_cast %49 : vector<8x4xf32> to vector<8x1x4xf32>
    %53 = vector.shape_cast %51 : vector<16x4xf32> to vector<1x16x4xf32>
    %54 = vector.broadcast %52 : vector<8x1x4xf32> to vector<8x16x4xf32>
    %55 = vector.broadcast %53 : vector<1x16x4xf32> to vector<8x16x4xf32>
    %56 = arith.subf %54, %55 : vector<8x16x4xf32>
    %57 = arith.mulf %56, %56 : vector<8x16x4xf32>
    %cst_16 = arith.constant dense<0.000000e+00> : vector<8x16xf32>
    %58 = vector.multi_reduction <add>, %57, %cst_16 [2] : vector<8x16x4xf32> to vector<8x16xf32>
    %cst_17 = arith.constant dense<0x7F800000> : vector<8xf32>
    %59 = vector.multi_reduction <minimumf>, %58, %cst_17 [1] : vector<8x16xf32> to vector<8xf32>
    %60 = vector.shape_cast %59 : vector<8xf32> to vector<8x1xf32>
    %61 = tpu.iota {dimensions = array<i32: 1>} : vector<8x16xi32>
    %62 = vector.broadcast %60 : vector<8x1xf32> to vector<8x16xf32>
    %63 = arith.cmpf ole, %58, %62 : vector<8x16xf32>
    %c16_i32_18 = arith.constant 16 : i32
    %64 = vector.broadcast %c16_i32_18 : i32 to vector<8x16xi32>
    %65 = arith.select %63, %61, %64 : vector<8x16xi1>, vector<8x16xi32>
    %cst_19 = arith.constant dense<2147483647> : vector<8xi32>
    %66 = vector.multi_reduction <minsi>, %65, %cst_19 [1] : vector<8x16xi32> to vector<8xi32>
    %67 = vector.shape_cast %66 : vector<8xi32> to vector<8x1xi32>
    %68 = vector.broadcast %67 : vector<8x1xi32> to vector<8x16xi32>
    %69 = arith.cmpi eq, %61, %68 : vector<8x16xi32>
    %70 = arith.extui %69 : vector<8x16xi1> to vector<8x16xi32>
    %71 = arith.sitofp %70 : vector<8x16xi32> to vector<8x16xf32>
    %cst_20 = arith.constant dense<0.000000e+00> : vector<8x4xf32>
    %72 = tpu.matmul %71, %51, %cst_20 {dimension_numbers = #tpu.dot_dimension_numbers<[1], [0], [0], [1], [0, 0, 1, 1], [], []>} : vector<8x16xf32>, vector<16x4xf32>, vector<8x4xf32> -> vector<8x4xf32>
    %73 = vector.extract_strided_slice %0 {offsets = [0, 12], sizes = [8, 4], strides = [1, 1]} : vector<8x16xf32> to vector<8x4xf32>
    %c3 = arith.constant 3 : index
    %c0_21 = arith.constant 0 : index
    %c0_22 = arith.constant 0 : index
    %74 = vector.load %arg2[%c3, %c0_21, %c0_22] : memref<4x16x4xf32, #tpu.memory_space<vmem>>, vector<1x16x4xf32>
    %75 = vector.shape_cast %74 : vector<1x16x4xf32> to vector<16x4xf32>
    %76 = vector.shape_cast %73 : vector<8x4xf32> to vector<8x1x4xf32>
    %77 = vector.shape_cast %75 : vector<16x4xf32> to vector<1x16x4xf32>
    %78 = vector.broadcast %76 : vector<8x1x4xf32> to vector<8x16x4xf32>
    %79 = vector.broadcast %77 : vector<1x16x4xf32> to vector<8x16x4xf32>
    %80 = arith.subf %78, %79 : vector<8x16x4xf32>
    %81 = arith.mulf %80, %80 : vector<8x16x4xf32>
    %cst_23 = arith.constant dense<0.000000e+00> : vector<8x16xf32>
    %82 = vector.multi_reduction <add>, %81, %cst_23 [2] : vector<8x16x4xf32> to vector<8x16xf32>
    %cst_24 = arith.constant dense<0x7F800000> : vector<8xf32>
    %83 = vector.multi_reduction <minimumf>, %82, %cst_24 [1] : vector<8x16xf32> to vector<8xf32>
    %84 = vector.shape_cast %83 : vector<8xf32> to vector<8x1xf32>
    %85 = tpu.iota {dimensions = array<i32: 1>} : vector<8x16xi32>
    %86 = vector.broadcast %84 : vector<8x1xf32> to vector<8x16xf32>
    %87 = arith.cmpf ole, %82, %86 : vector<8x16xf32>
    %c16_i32_25 = arith.constant 16 : i32
    %88 = vector.broadcast %c16_i32_25 : i32 to vector<8x16xi32>
    %89 = arith.select %87, %85, %88 : vector<8x16xi1>, vector<8x16xi32>
    %cst_26 = arith.constant dense<2147483647> : vector<8xi32>
    %90 = vector.multi_reduction <minsi>, %89, %cst_26 [1] : vector<8x16xi32> to vector<8xi32>
    %91 = vector.shape_cast %90 : vector<8xi32> to vector<8x1xi32>
    %92 = vector.broadcast %91 : vector<8x1xi32> to vector<8x16xi32>
    %93 = arith.cmpi eq, %85, %92 : vector<8x16xi32>
    %94 = arith.extui %93 : vector<8x16xi1> to vector<8x16xi32>
    %95 = arith.sitofp %94 : vector<8x16xi32> to vector<8x16xf32>
    %cst_27 = arith.constant dense<0.000000e+00> : vector<8x4xf32>
    %96 = tpu.matmul %95, %75, %cst_27 {dimension_numbers = #tpu.dot_dimension_numbers<[1], [0], [0], [1], [0, 0, 1, 1], [], []>} : vector<8x16xf32>, vector<16x4xf32>, vector<8x4xf32> -> vector<8x4xf32>
    %97 = tpu.concatenate %24, %48, %72, %96 in 1 : vector<8x4xf32>, vector<8x4xf32>, vector<8x4xf32>, vector<8x4xf32> -> vector<8x16xf32>
    %c0_28 = arith.constant 0 : index
    %c0_29 = arith.constant 0 : index
    %98 = vector.load %arg3[%c0_28, %c0_29] : memref<8x16xf32, #tpu.memory_space<vmem>>, vector<8x16xf32>
    tpu.vector_store %arg3[%c0_28, %c0_29], %97 {strides = array<i32>} : memref<8x16xf32, #tpu.memory_space<vmem>>, vector<8x16xf32>,
    %99 = tpu.concatenate %19, %43, %67, %91 in 1 : vector<8x1xi32>, vector<8x1xi32>, vector<8x1xi32>, vector<8x1xi32> -> vector<8x4xi32>
    %c0_30 = arith.constant 0 : index
    %c0_31 = arith.constant 0 : index
    %100 = vector.load %arg4[%c0_30, %c0_31] : memref<8x4xi32, #tpu.memory_space<vmem>>, vector<8x4xi32>
    tpu.vector_store %arg4[%c0_30, %c0_31], %99 {strides = array<i32>} : memref<8x4xi32, #tpu.memory_space<vmem>>, vector<8x4xi32>,
    return
  }
  func.func @transform_0(%arg0: i32) -> (i32, i32) {
    %c0_i32 = arith.constant 0 : i32
    %c0_i32_0 = arith.constant 0 : i32
    return %arg0, %c0_i32 : i32, i32
  }
  func.func @transform_1(%arg0: i32) -> (i32, i32, i32) {
    %c0_i32 = arith.constant 0 : i32
    %c0_i32_0 = arith.constant 0 : i32
    %c0_i32_1 = arith.constant 0 : i32
    %c0_i32_2 = arith.constant 0 : i32
    return %c0_i32, %c0_i32_0, %c0_i32_1 : i32, i32, i32
  }
  func.func @transform_2(%arg0: i32) -> (i32, i32) {
    %c0_i32 = arith.constant 0 : i32
    %c0_i32_0 = arith.constant 0 : i32
    return %arg0, %c0_i32 : i32, i32
  }
  func.func @transform_3(%arg0: i32) -> (i32, i32) {
    %c0_i32 = arith.constant 0 : i32
    %c0_i32_0 = arith.constant 0 : i32
    return %arg0, %c0_i32 : i32, i32
  }
}

module attributes {stable_mosaic.version = 11 : i64} {
  func.func @_mm_kernel(%arg0: i32, %arg1: i32, %arg2: i32, %arg3: memref<8x16xf32, #tpu.memory_space<vmem>>, %arg4: memref<16x32xbf16, #tpu.memory_space<vmem>>, %arg5: memref<1x32xf32, #tpu.memory_space<vmem>>, %arg6: memref<8x32xf32, #tpu.memory_space<vmem>>, %arg7: memref<8x32xf32, #tpu.memory_space<vmem>>) attributes {dimension_semantics = [#tpu.dimension_semantics<parallel>, #tpu.dimension_semantics<parallel>, #tpu.dimension_semantics<arbitrary>], iteration_bounds = array<i64: 1, 1, 1>, scalar_prefetch = 0 : i64, scratch_operands = 1 : i64, tpu.core_type = #tpu.core_type<tc>, window_params = [{transform_indices = @transform_0, window_bounds = array<i64: 8, 16>}, {transform_indices = @transform_1, window_bounds = array<i64: 16, 32>}, {transform_indices = @transform_2, window_bounds = array<i64: 1, 32>}, {transform_indices = @transform_3, window_bounds = array<i64: 8, 32>}]} {
    %c0_i32 = arith.constant 0 : i32
    %0 = arith.cmpi eq, %arg2, %c0_i32 : i32
    %1 = arith.extui %0 : i1 to i32
    %c0_i32_0 = arith.constant 0 : i32
    %2 = arith.cmpi ne, %1, %c0_i32_0 : i32
    scf.if %2 {
      %cst_10 = arith.constant 0.000000e+00 : f32
      %13 = vector.broadcast %cst_10 : f32 to vector<8x32xf32>
      %c0_11 = arith.constant 0 : index
      %c0_12 = arith.constant 0 : index
      %14 = vector.load %arg7[%c0_11, %c0_12] : memref<8x32xf32, #tpu.memory_space<vmem>>, vector<8x32xf32>
      tpu.vector_store %arg7[%c0_11, %c0_12], %13 {strides = array<i32>} : memref<8x32xf32, #tpu.memory_space<vmem>>, vector<8x32xf32>,
    } else {
    }
    %c0 = arith.constant 0 : index
    %c0_1 = arith.constant 0 : index
    %3 = vector.load %arg7[%c0, %c0_1] : memref<8x32xf32, #tpu.memory_space<vmem>>, vector<8x32xf32>
    %c0_2 = arith.constant 0 : index
    %c0_3 = arith.constant 0 : index
    %4 = vector.load %arg3[%c0_2, %c0_3] : memref<8x16xf32, #tpu.memory_space<vmem>>, vector<8x16xf32>
    %5 = arith.truncf %4 : vector<8x16xf32> to vector<8x16xbf16>
    %c0_4 = arith.constant 0 : index
    %c0_5 = arith.constant 0 : index
    %6 = vector.load %arg4[%c0_4, %c0_5] : memref<16x32xbf16, #tpu.memory_space<vmem>>, vector<16x32xbf16>
    %cst = arith.constant dense<0.000000e+00> : vector<8x32xf32>
    %7 = tpu.matmul %5, %6, %cst {dimension_numbers = #tpu.dot_dimension_numbers<[1], [0], [0], [1], [0, 0, 1, 1], [], []>} : vector<8x16xbf16>, vector<16x32xbf16>, vector<8x32xf32> -> vector<8x32xf32>
    %8 = arith.addf %3, %7 : vector<8x32xf32>
    %c0_6 = arith.constant 0 : index
    %c0_7 = arith.constant 0 : index
    %9 = vector.load %arg7[%c0_6, %c0_7] : memref<8x32xf32, #tpu.memory_space<vmem>>, vector<8x32xf32>
    tpu.vector_store %arg7[%c0_6, %c0_7], %8 {strides = array<i32>} : memref<8x32xf32, #tpu.memory_space<vmem>>, vector<8x32xf32>,
    %c0_i32_8 = arith.constant 0 : i32
    %10 = arith.cmpi eq, %arg2, %c0_i32_8 : i32
    %11 = arith.extui %10 : i1 to i32
    %c0_i32_9 = arith.constant 0 : i32
    %12 = arith.cmpi ne, %11, %c0_i32_9 : i32
    scf.if %12 {
      %c0_10 = arith.constant 0 : index
      %c0_11 = arith.constant 0 : index
      %13 = vector.load %arg7[%c0_10, %c0_11] : memref<8x32xf32, #tpu.memory_space<vmem>>, vector<8x32xf32>
      %c0_12 = arith.constant 0 : index
      %c0_13 = arith.constant 0 : index
      %14 = vector.load %arg5[%c0_12, %c0_13] : memref<1x32xf32, #tpu.memory_space<vmem>>, vector<1x32xf32>
      %15 = vector.broadcast %14 : vector<1x32xf32> to vector<8x32xf32>
      %16 = arith.addf %13, %15 : vector<8x32xf32>
      %c0_14 = arith.constant 0 : index
      %c0_15 = arith.constant 0 : index
      %17 = vector.load %arg6[%c0_14, %c0_15] : memref<8x32xf32, #tpu.memory_space<vmem>>, vector<8x32xf32>
      tpu.vector_store %arg6[%c0_14, %c0_15], %16 {strides = array<i32>} : memref<8x32xf32, #tpu.memory_space<vmem>>, vector<8x32xf32>,
    } else {
    }
    return
  }
  func.func @transform_0(%arg0: i32, %arg1: i32, %arg2: i32) -> (i32, i32) {
    %c0_i32 = arith.constant 0 : i32
    return %arg0, %arg2 : i32, i32
  }
  func.func @transform_1(%arg0: i32, %arg1: i32, %arg2: i32) -> (i32, i32) {
    %c0_i32 = arith.constant 0 : i32
    return %arg2, %arg1 : i32, i32
  }
  func.func @transform_2(%arg0: i32, %arg1: i32, %arg2: i32) -> (i32, i32) {
    %c0_i32 = arith.constant 0 : i32
    %c0_i32_0 = arith.constant 0 : i32
    return %c0_i32, %arg1 : i32, i32
  }
  func.func @transform_3(%arg0: i32, %arg1: i32, %arg2: i32) -> (i32, i32) {
    %c0_i32 = arith.constant 0 : i32
    return %arg0, %arg1 : i32, i32
  }
}

module attributes {stable_mosaic.version = 11 : i64} {
  func.func @_up_conv_kernel(%arg0: i32, %arg1: memref<1x6x32xf32, #tpu.memory_space<vmem>>, %arg2: memref<96x64xbf16, #tpu.memory_space<vmem>>, %arg3: memref<1x64xf32, #tpu.memory_space<vmem>>, %arg4: memref<1x4x64xf32, #tpu.memory_space<vmem>>) attributes {dimension_semantics = [#tpu.dimension_semantics<parallel>], iteration_bounds = array<i64: 2>, scalar_prefetch = 0 : i64, scratch_operands = 0 : i64, tpu.core_type = #tpu.core_type<tc>, window_params = [{transform_indices = @transform_0, window_bounds = array<i64: 1, 6, 32>}, {pipeline_mode = #tpu.pipeline_mode<synchronous>, transform_indices = @transform_1, window_bounds = array<i64: 96, 64>}, {pipeline_mode = #tpu.pipeline_mode<synchronous>, transform_indices = @transform_2, window_bounds = array<i64: 1, 64>}, {transform_indices = @transform_3, window_bounds = array<i64: 1, 4, 64>}]} {
    %c0 = arith.constant 0 : index
    %c0_0 = arith.constant 0 : index
    %c0_1 = arith.constant 0 : index
    %0 = vector.load %arg1[%c0, %c0_0, %c0_1] : memref<1x6x32xf32, #tpu.memory_space<vmem>>, vector<1x6x32xf32>
    %1 = vector.shape_cast %0 : vector<1x6x32xf32> to vector<6x32xf32>
    %2 = vector.extract_strided_slice %1 {offsets = [0, 0], sizes = [4, 32], strides = [1, 1]} : vector<6x32xf32> to vector<4x32xf32>
    %3 = vector.extract_strided_slice %1 {offsets = [1, 0], sizes = [4, 32], strides = [1, 1]} : vector<6x32xf32> to vector<4x32xf32>
    %4 = vector.extract_strided_slice %1 {offsets = [2, 0], sizes = [4, 32], strides = [1, 1]} : vector<6x32xf32> to vector<4x32xf32>
    %5 = tpu.concatenate %2, %3, %4 in 1 : vector<4x32xf32>, vector<4x32xf32>, vector<4x32xf32> -> vector<4x96xf32>
    %6 = arith.truncf %5 : vector<4x96xf32> to vector<4x96xbf16>
    %c0_2 = arith.constant 0 : index
    %c0_3 = arith.constant 0 : index
    %7 = vector.load %arg2[%c0_2, %c0_3] : memref<96x64xbf16, #tpu.memory_space<vmem>>, vector<96x64xbf16>
    %cst = arith.constant dense<0.000000e+00> : vector<4x64xf32>
    %8 = tpu.matmul %6, %7, %cst {dimension_numbers = #tpu.dot_dimension_numbers<[1], [0], [0], [1], [0, 0, 1, 1], [], []>} : vector<4x96xbf16>, vector<96x64xbf16>, vector<4x64xf32> -> vector<4x64xf32>
    %c0_4 = arith.constant 0 : index
    %c0_5 = arith.constant 0 : index
    %9 = vector.load %arg3[%c0_4, %c0_5] : memref<1x64xf32, #tpu.memory_space<vmem>>, vector<1x64xf32>
    %10 = vector.broadcast %9 : vector<1x64xf32> to vector<4x64xf32>
    %11 = arith.addf %8, %10 : vector<4x64xf32>
    %c0_6 = arith.constant 0 : index
    %c0_7 = arith.constant 0 : index
    %c0_8 = arith.constant 0 : index
    %12 = vector.load %arg4[%c0_6, %c0_7, %c0_8] : memref<1x4x64xf32, #tpu.memory_space<vmem>>, vector<1x4x64xf32>
    %13 = vector.shape_cast %12 : vector<1x4x64xf32> to vector<4x64xf32>
    %14 = vector.shape_cast %11 : vector<4x64xf32> to vector<1x4x64xf32>
    tpu.vector_store %arg4[%c0_6, %c0_7, %c0_8], %14 {strides = array<i32>} : memref<1x4x64xf32, #tpu.memory_space<vmem>>, vector<1x4x64xf32>,
    return
  }
  func.func @transform_0(%arg0: i32) -> (i32, i32, i32) {
    %c0_i32 = arith.constant 0 : i32
    %c0_i32_0 = arith.constant 0 : i32
    %c0_i32_1 = arith.constant 0 : i32
    return %arg0, %c0_i32, %c0_i32_0 : i32, i32, i32
  }
  func.func @transform_1(%arg0: i32) -> (i32, i32) {
    %c0_i32 = arith.constant 0 : i32
    %c0_i32_0 = arith.constant 0 : i32
    %c0_i32_1 = arith.constant 0 : i32
    return %c0_i32, %c0_i32_0 : i32, i32
  }
  func.func @transform_2(%arg0: i32) -> (i32, i32) {
    %c0_i32 = arith.constant 0 : i32
    %c0_i32_0 = arith.constant 0 : i32
    %c0_i32_1 = arith.constant 0 : i32
    return %c0_i32, %c0_i32_0 : i32, i32
  }
  func.func @transform_3(%arg0: i32) -> (i32, i32, i32) {
    %c0_i32 = arith.constant 0 : i32
    %c0_i32_0 = arith.constant 0 : i32
    %c0_i32_1 = arith.constant 0 : i32
    return %arg0, %c0_i32, %c0_i32_0 : i32, i32, i32
  }
}

module attributes {stable_mosaic.version = 11 : i64} {
  func.func @_ln_mm2_kernel(%arg0: i32, %arg1: memref<16x32xf32, #tpu.memory_space<vmem>>, %arg2: memref<1x32xf32, #tpu.memory_space<vmem>>, %arg3: memref<1x32xf32, #tpu.memory_space<vmem>>, %arg4: memref<32x32xbf16, #tpu.memory_space<vmem>>, %arg5: memref<32x16xbf16, #tpu.memory_space<vmem>>, %arg6: memref<1x16xf32, #tpu.memory_space<vmem>>, %arg7: memref<16x16xf32, #tpu.memory_space<vmem>>) attributes {dimension_semantics = [#tpu.dimension_semantics<parallel>], iteration_bounds = array<i64: 1>, scalar_prefetch = 0 : i64, scratch_operands = 0 : i64, tpu.core_type = #tpu.core_type<tc>, window_params = [{transform_indices = @transform_0, window_bounds = array<i64: 16, 32>}, {pipeline_mode = #tpu.pipeline_mode<synchronous>, transform_indices = @transform_1, window_bounds = array<i64: 1, 32>}, {pipeline_mode = #tpu.pipeline_mode<synchronous>, transform_indices = @transform_2, window_bounds = array<i64: 1, 32>}, {pipeline_mode = #tpu.pipeline_mode<synchronous>, transform_indices = @transform_3, window_bounds = array<i64: 32, 32>}, {pipeline_mode = #tpu.pipeline_mode<synchronous>, transform_indices = @transform_4, window_bounds = array<i64: 32, 16>}, {pipeline_mode = #tpu.pipeline_mode<synchronous>, transform_indices = @transform_5, window_bounds = array<i64: 1, 16>}, {transform_indices = @transform_6, window_bounds = array<i64: 16, 16>}]} {
    %c0 = arith.constant 0 : index
    %c0_0 = arith.constant 0 : index
    %0 = vector.load %arg1[%c0, %c0_0] : memref<16x32xf32, #tpu.memory_space<vmem>>, vector<16x32xf32>
    %c0_1 = arith.constant 0 : index
    %c0_2 = arith.constant 0 : index
    %1 = vector.load %arg2[%c0_1, %c0_2] : memref<1x32xf32, #tpu.memory_space<vmem>>, vector<1x32xf32>
    %c0_3 = arith.constant 0 : index
    %c0_4 = arith.constant 0 : index
    %2 = vector.load %arg3[%c0_3, %c0_4] : memref<1x32xf32, #tpu.memory_space<vmem>>, vector<1x32xf32>
    %cst = arith.constant dense<0.000000e+00> : vector<16xf32>
    %3 = vector.multi_reduction <add>, %0, %cst [1] : vector<16x32xf32> to vector<16xf32>
    %4 = vector.shape_cast %3 : vector<16xf32> to vector<16x1xf32>
    %cst_5 = arith.constant 3.200000e+01 : f32
    %5 = vector.broadcast %cst_5 : f32 to vector<16x1xf32>
    %6 = arith.divf %4, %5 : vector<16x1xf32>
    %7 = vector.broadcast %6 : vector<16x1xf32> to vector<16x32xf32>
    %8 = arith.subf %0, %7 : vector<16x32xf32>
    %9 = arith.mulf %8, %8 : vector<16x32xf32>
    %cst_6 = arith.constant dense<0.000000e+00> : vector<16xf32>
    %10 = vector.multi_reduction <add>, %9, %cst_6 [1] : vector<16x32xf32> to vector<16xf32>
    %11 = vector.shape_cast %10 : vector<16xf32> to vector<16x1xf32>
    %cst_7 = arith.constant 3.200000e+01 : f32
    %12 = vector.broadcast %cst_7 : f32 to vector<16x1xf32>
    %13 = arith.divf %11, %12 : vector<16x1xf32>
    %cst_8 = arith.constant 9.99999974E-6 : f32
    %14 = vector.broadcast %cst_8 : f32 to vector<16x1xf32>
    %15 = arith.addf %13, %14 : vector<16x1xf32>
    %16 = math.rsqrt %15 : vector<16x1xf32>
    %17 = vector.broadcast %16 : vector<16x1xf32> to vector<16x32xf32>
    %18 = arith.mulf %8, %17 : vector<16x32xf32>
    %19 = vector.broadcast %1 : vector<1x32xf32> to vector<16x32xf32>
    %20 = arith.mulf %18, %19 : vector<16x32xf32>
    %21 = vector.broadcast %2 : vector<1x32xf32> to vector<16x32xf32>
    %22 = arith.addf %20, %21 : vector<16x32xf32>
    %23 = arith.truncf %22 : vector<16x32xf32> to vector<16x32xbf16>
    %c0_9 = arith.constant 0 : index
    %c0_10 = arith.constant 0 : index
    %24 = vector.load %arg4[%c0_9, %c0_10] : memref<32x32xbf16, #tpu.memory_space<vmem>>, vector<32x32xbf16>
    %cst_11 = arith.constant dense<0.000000e+00> : vector<16x32xf32>
    %25 = tpu.matmul %23, %24, %cst_11 {dimension_numbers = #tpu.dot_dimension_numbers<[1], [0], [0], [1], [0, 0, 1, 1], [], []>} : vector<16x32xbf16>, vector<32x32xbf16>, vector<16x32xf32> -> vector<16x32xf32>
    %26 = arith.truncf %25 : vector<16x32xf32> to vector<16x32xbf16>
    %c0_12 = arith.constant 0 : index
    %c0_13 = arith.constant 0 : index
    %27 = vector.load %arg5[%c0_12, %c0_13] : memref<32x16xbf16, #tpu.memory_space<vmem>>, vector<32x16xbf16>
    %cst_14 = arith.constant dense<0.000000e+00> : vector<16x16xf32>
    %28 = tpu.matmul %26, %27, %cst_14 {dimension_numbers = #tpu.dot_dimension_numbers<[1], [0], [0], [1], [0, 0, 1, 1], [], []>} : vector<16x32xbf16>, vector<32x16xbf16>, vector<16x16xf32> -> vector<16x16xf32>
    %c0_15 = arith.constant 0 : index
    %c0_16 = arith.constant 0 : index
    %29 = vector.load %arg6[%c0_15, %c0_16] : memref<1x16xf32, #tpu.memory_space<vmem>>, vector<1x16xf32>
    %30 = vector.broadcast %29 : vector<1x16xf32> to vector<16x16xf32>
    %31 = arith.addf %28, %30 : vector<16x16xf32>
    %c0_17 = arith.constant 0 : index
    %c0_18 = arith.constant 0 : index
    %32 = vector.load %arg7[%c0_17, %c0_18] : memref<16x16xf32, #tpu.memory_space<vmem>>, vector<16x16xf32>
    tpu.vector_store %arg7[%c0_17, %c0_18], %31 {strides = array<i32>} : memref<16x16xf32, #tpu.memory_space<vmem>>, vector<16x16xf32>,
    return
  }
  func.func @transform_0(%arg0: i32) -> (i32, i32) {
    %c0_i32 = arith.constant 0 : i32
    %c0_i32_0 = arith.constant 0 : i32
    return %arg0, %c0_i32 : i32, i32
  }
  func.func @transform_1(%arg0: i32) -> (i32, i32) {
    %c0_i32 = arith.constant 0 : i32
    %c0_i32_0 = arith.constant 0 : i32
    %c0_i32_1 = arith.constant 0 : i32
    return %c0_i32, %c0_i32_0 : i32, i32
  }
  func.func @transform_2(%arg0: i32) -> (i32, i32) {
    %c0_i32 = arith.constant 0 : i32
    %c0_i32_0 = arith.constant 0 : i32
    %c0_i32_1 = arith.constant 0 : i32
    return %c0_i32, %c0_i32_0 : i32, i32
  }
  func.func @transform_3(%arg0: i32) -> (i32, i32) {
    %c0_i32 = arith.constant 0 : i32
    %c0_i32_0 = arith.constant 0 : i32
    %c0_i32_1 = arith.constant 0 : i32
    return %c0_i32, %c0_i32_0 : i32, i32
  }
  func.func @transform_4(%arg0: i32) -> (i32, i32) {
    %c0_i32 = arith.constant 0 : i32
    %c0_i32_0 = arith.constant 0 : i32
    %c0_i32_1 = arith.constant 0 : i32
    return %c0_i32, %c0_i32_0 : i32, i32
  }
  func.func @transform_5(%arg0: i32) -> (i32, i32) {
    %c0_i32 = arith.constant 0 : i32
    %c0_i32_0 = arith.constant 0 : i32
    %c0_i32_1 = arith.constant 0 : i32
    return %c0_i32, %c0_i32_0 : i32, i32
  }
  func.func @transform_6(%arg0: i32) -> (i32, i32) {
    %c0_i32 = arith.constant 0 : i32
    %c0_i32_0 = arith.constant 0 : i32
    return %arg0, %c0_i32 : i32, i32
  }
}

</mosaic_0001>

<bundles_post_ra>
// kernel: transformer_vqvae_forward.12
= control target key start
LH: loop header
LB: loop body
LE: loop exit
PB: predicated region body
PF: predicated region fallthrough
CT: control target
= control target key end

     0   :  { %8 = vsyncpa [#allocation3], 0  ;;  %s970_s0 = inlined_call_operand.hbm [shape: f32[2,5,64], index: 0, kind: input, shape index: {}]   ;;  %s971_s1 = inlined_call_operand.hbm [shape: bf16[96,32], index: 1, kind: input, shape index: {}]   ;;  %s972_s2 = inlined_call_operand.hbm [shape: f32[1,32], index: 2, kind: input, shape index: {}]   ;;  %s973_s3 = inlined_call_operand.hbm [shape: f32[2,4,32], index: 3, kind: output, shape index: {}]  }
   0x1   :  { %10 = vsyncpa [#allocation3 + $0x1], 0 }
   0x2   :  { %11 = vsyncpa [#allocation6], 0 }
   0x3   :  { %12 = vsyncpa [#allocation4], 0 }
   0x4   :  { %14 = vsyncpa [#allocation4 + $0x1], 0  ;;  %s739_s12 = smov 0   ;;  %s741_s13 = smov 0  }
   0x5   :  { %s743_s14 = smov 0   ;;  %s745_s15 = smov 0  }
   0x6 LB: > { %s760_s16 = sadd.s32 4294967295, %s708_s15   ;;  %s427_s17 = sadd.s32 4294967294, %s708_s15   ;;  %s708_s15 = sphi %s745_s15, %s993_s15   ;;  %s704_s14 = sphi %s743_s14, %s992_s14   ;;  %s700_s13 = sphi %s741_s13, %s991_s13   ;;  %s696_s12 = sphi %s739_s12, %s990_s12  }
   0x7   : > { %p40_p0 = scmp.ne.s32.totalorder %s700_s13, %s696_s12  ;;  %p974_p1 = scmp.eq.s32.totalorder %s760_s16, 0 }
   0x8   : > { %p112_p3 = scmp.eq.s32.totalorder %s427_s17, 1  ;;  %p428_p5 = scmp.ge.s32.totalorder %s708_s15, 1 }
   0x9   : > { %p769_p4 = por %p974_p1, %p40_p0  ;;  %p119_p7 = scmp.lt.s32.totalorder %s708_s15, 3 }
   0xa   : > { %p774_p6 = por %p112_p3, %p40_p0  ;;  %s710_s21 = smov [#allocation5]  }
   0xb   : > { %s977_s18 = scalar_select %p769_p4, 1, 0 }
   0xc   : > { %s978_s19 = scalar_select %p774_p6, 1, 0 }
   0xd   : > { %p779_p8 = pnand %p428_p5, %p119_p7  ;;  %s131_s22 = sshll.u32 %s710_s21, 4  ;;  %s783_s22 = int_to_ptr.vmem [resolvable:$true] %s131_s22 }
   0xe   : > { %s711_s24 = smov [#allocation7]   ;;  %s552_s28 = scalar_lea.hbm %s971_s1, 768 }
   0xf   : > { %p486_p9 = pneg %p779_p8  ;;  %s145_s25 = sshll.u32 %s711_s24, 4  ;;  %s794_s25 = int_to_ptr.vmem [resolvable:$true] %s145_s25 }
  0x10   : > { %p553_p12 = scmp.ne.s32.totalorder %s971_s1, %s552_s28  ;;  %p559_p5 = scmp.lt.u32.totalorder %s552_s28, %s971_s1 }
  0x11   : > { %p790_p11 = pnand %p486_p9, %p974_p1 }
  0x13   : > { %p554_p13 = pneg %p790_p11 }
  0x15   : > { %p555_p0 = pnand %p554_p13, %p553_p12 }
  0x17   : > { %p556_p3 = pneg %p555_p0 }
  0x19   : > { %p561_p7 = pnand %p559_p5, %p556_p3 }
  0x1b   : > { %564 = shalt.err (!%p561_p7)
}
  0x1c   : > { %s565_s6 = scalar_lea.vmem %s783_s22, 768  ;;  %p573_p2 = scmp.lt.s32.totalorder %s783_s22, %s783_s22 }
  0x1d   : > { %p566_p9 = scmp.ne.s32.totalorder %s783_s22, %s565_s6  ;;  %p574_p12 = scmp.lt.s32.totalorder %s565_s6, %s565_s6 }
  0x1f   : > { %p568_p10 = pnand %p566_p9, %p554_p13  ;;  %p575_p0 = por %p574_p12, %p573_p2 }
  0x21   : > { %p569_p1 = pneg %p568_p10 }
  0x23   : > { %p576_p6 = pnand %p575_p0, %p569_p1 }
  0x25   : > { %579 = shalt.err (!%p576_p6)
}
  0x26   : > { %s712_s7 = smov 64   ;;  %s713_s8 = smov 4  }
  0x27   : > { %489 = dma.hbm_to_vmem [thread:$0]  (!%p790_p11), %s971_s1, 768, %s783_s22, [#allocation6], %s712_s7, %s712_s7, %s713_s8  }
  0x28   : > { %s580_s21 = scalar_lea.hbm %s972_s2, 16 }
  0x29   : > { %p581_p2 = scmp.ne.s32.totalorder %s972_s2, %s580_s21  ;;  %p587_p10 = scmp.lt.u32.totalorder %s580_s21, %s972_s2 }
  0x2b   : > { %p583_p1 = pnand %p581_p2, %p554_p13 }
  0x2d   : > { %p584_p6 = pneg %p583_p1 }
  0x2f   : > { %p589_p3 = pnand %p587_p10, %p584_p6 }
  0x31   : > { %592 = shalt.err (!%p589_p3)
}
  0x32   : > { %s593_s22 = scalar_lea.vmem %s794_s25, 16  ;;  %s600_s29 = scalar_lea.vmem %s794_s25, 32 }
  0x33   : > { %p594_p5 = scmp.ne.s32.totalorder %s794_s25, %s593_s22  ;;  %p601_p12 = scmp.lt.s32.totalorder %s794_s25, %s794_s25 }
  0x34   : > { %p602_p0 = scmp.lt.s32.totalorder %s600_s29, %s593_s22 }
  0x35   : > { %p596_p7 = pnand %p594_p5, %p554_p13 }
  0x36   : > { %p603_p2 = por %p602_p0, %p601_p12 }
  0x37   : > { %p597_p9 = pneg %p596_p7 }
  0x39   : > { %p604_p1 = pnand %p603_p2, %p597_p9 }
  0x3b   : > { %607 = shalt.err (!%p604_p1)
}
  0x3c   : > { %492 = dma.hbm_to_vmem [thread:$0]  (!%p790_p11), %s972_s2, 16, %s794_s25, [#allocation6]  }
  0x3d   : > { %s850_s5 = sadd.s32 1, %s708_s15   ;;  %s27_s23 = sadd.s32 1, %s704_s14 }
  0x3e   : > { %s24_s6 = ssub.s32 %s708_s15, %s850_s5  ;;  %p34_p13 = scmp.ne.s32.totalorder %s704_s14, %s700_s13 }
  0x3f   : > { %p25_p6 = scmp.eq.s32.totalorder %s24_s6, 0  ;;  %p35_p10 = scmp.eq.s32.totalorder %s708_s15, 0 }
  0x40   : > { %p981_p3 = scmp.eq.s32.totalorder %s760_s16, 1  ;;  %p503_p7 = scmp.lt.s32.totalorder %s708_s15, 2 }
  0x41   : > { %s866_s8 = scalar_select %p25_p6, %s704_s14, %s27_s23  }
  0x42   : > { %p860_p5 = por %p981_p3, %p34_p13  ;;  %p36_p9 = por %p35_p10, %p34_p13 }
  0x43   : > { %s156_s9 = sand.u32 1, %s704_s14   ;;  %s433_s25 = sshll.u32 %s708_s15, 7 }
  0x44   : > { %s982_s7 = scalar_select %p860_p5, 1, 0 }
  0x45   : > { %s432_s10 = sshll.u32 %s156_s9, 3  ;;  %s873_s21 = scalar_lea.hbm %s970_s0, %s433_s25 }
  0x46   : > { %s160_s24 = scalar_lea.vmem [#allocation2], %s432_s10  ;;  %p877_p11 = pnand %p503_p7, %p36_p9 }
  0x47   : > { %s167_s26 = sshll.u32 %s160_s24, 4  ;;  %s157_s28 = scalar_lea.sflag [#allocation3], %s156_s9  ;;  %s875_s26 = int_to_ptr.vmem [resolvable:$true] %s167_s26 }
  0x48   : > { %s608_s22 = scalar_lea.hbm %s873_s21, 128  ;;  %p610_p0 = pneg %p877_p11 }
  0x49   : > { %p609_p12 = scmp.ne.s32.totalorder %s873_s21, %s608_s22  ;;  %s613_s4 = scalar_lea.hbm %s970_s0, 256 }
  0x4a   : > { %p614_p13 = scmp.lt.u32.totalorder %s873_s21, %s970_s0  ;;  %p615_p6 = scmp.lt.u32.totalorder %s613_s4, %s608_s22 }
  0x4b   : > { %p611_p2 = pnand %p610_p0, %p609_p12  ;;  %p617_p3 = scmp.lt.u32.totalorder %s608_s22, %s873_s21 }
  0x4c   : > { %p616_p10 = por %p615_p6, %p614_p13 }
  0x4d   : > { %p612_p1 = pneg %p611_p2 }
  0x4e   : > { %p618_p7 = por %p617_p3, %p616_p10 }
  0x50   : > { %p619_p9 = pnand %p618_p7, %p612_p1 }
  0x52   : > { %622 = shalt.err (!%p619_p9)
}
  0x53   : > { %s623_s9 = scalar_lea.vmem %s875_s26, 128  ;;  %s714_s10 = smov [#allocation2]  }
  0x54   : > { %p624_p12 = scmp.ne.s32.totalorder %s875_s26, %s623_s9  ;;  %s628_s25 = sshll.u32 %s714_s10, 4  ;;  %s629_s25 = int_to_ptr.vmem [resolvable:$false] %s628_s25 }
  0x55   : > { %s630_s11 = scalar_lea.vmem %s629_s25, 256  ;;  %p631_p4 = scmp.lt.s32.totalorder %s875_s26, %s629_s25 }
  0x56   : > { %p626_p2 = pnand %p624_p12, %p610_p0  ;;  %p632_p13 = scmp.lt.s32.totalorder %s630_s11, %s623_s9 }
  0x58   : > { %p627_p5 = pneg %p626_p2  ;;  %p633_p6 = por %p632_p13, %p631_p4 }
  0x5a   : > { %p634_p10 = pnand %p633_p6, %p627_p5 }
  0x5c   : > { %637 = shalt.err (!%p634_p10)
}
  0x5d   : > { %496 = dma.hbm_to_vmem [thread:$0]  (!%p877_p11), %s873_s21, 128, %s875_s26, %s157_s28  }
  0x5e   : > { %176 = sbr.rel (%p779_p8) target bundleno = 454 (0x1c6), region = 32  ;;  %s909_s17 = sand.u32 (!%p779_p8), 1, %s700_s13  }
  0x5f   : > { %s435_s24 = sshll.u32 (!%p779_p8), %s909_s17, 3  ;;  %s179_s22 = scalar_lea.sflag (!%p779_p8), [#allocation3], %s909_s17 }
  0x60   : > { %s182_s29 = scalar_lea.vmem (!%p779_p8), [#allocation2], %s435_s24  ;;  %p984_p4 = scmp.ne.s32.totalorder (!%p779_p8), %s977_s18, 0 }
  0x65   : > { %683 = dma.done.wait (%p984_p4), %s179_s22, 128  }
  0x66   : > { %685 = vsyncadd (%p984_p4), %s179_s22, 4294967168  ;;  %p985_p5 = scmp.eq.s32.totalorder %s760_s16, 0 }
  0x68   : > { %687 = dma.done.wait (%p985_p5), [#allocation6], 784   ;;  %p986_p11 = pmov %p985_p5 }
  0x69   : > { %v715_v0 = vmov 0.0   ;;  %vm716_vm0 = vmmov 0   ;;  %v214_v1 = vld [vmem:[%s182_s29] sm:$0x1f]  ;;  %v546_v3 = vld [vmem:[#allocation5] sm:$0xff]   ;;  %s717_s20 = smov 64  }
  0x6a   : > { %689 = vsyncadd (%p986_p11), [#allocation6], 4294966512  ;;  %458 = vmatprep.subr.bf16.mxu0 %v715_v0  ;;  %470 = vmatprep.mubr.msk.bf16.mxu0 %vm716_vm0, %v715_v0  ;;  %v216_v2 = vrot.slane %v214_v1, 1  ;;  %v547_v4 = vld [vmem:[#allocation5 + $0x8] sm:$0xff]   ;;  %v548_v5 = vld [vmem:[#allocation5 + $0x10] sm:$0xff]   ;;  %vm220_vm1 = vcmask 523264  }
  0x6b   : > { %459 = vmatpush3.bf16.msra.mxu0 %v546_v3  ;;  %v549_v6 = vld [vmem:[#allocation5 + $0x18] sm:$0xff]   ;;  %v550_v7 = vld [vmem:[#allocation5 + $0x20] sm:$0xff]   ;;  %v551_v8 = vld [vmem:[#allocation5 + $0x28] sm:$0xff]   ;;  %vm278_vm2 = vcmask 785408   ;;  %s438_s18 = sshll.u32 %s909_s17, 2  ;;  %s448_s21 = sshll.u32 %s760_s16, 6 }
  0x6c   : > { %217 = vrot.lane.b32.xlu0 %v216_v2, %s717_s20  ;;  %460 = vmatprep.subr.bf16.mxu0 %v715_v0  ;;  %v439_v12 = vld [vmem:[#allocation7] ss:$0 sm:$0xff]  ;;  %s212_s26 = scalar_lea.vmem [#allocation8], %s438_s18  ;;  %vm322_vm3 = vcmask 257024   ;;  %s926_s4 = scalar_lea.hbm %s973_s3, %s448_s21 }
  0x6d   : > { %s338_s27 = sshll.u32 %s212_s26, 4  ;;  %s325_s16 = scalar_lea.sflag [#allocation4], %s909_s17  ;;  %s928_s27 = int_to_ptr.vmem [resolvable:$true] %s338_s27 }
  0x6e   : > { %s638_s23 = scalar_lea.vmem %s928_s27, 64  ;;  %p987_p0 = scmp.ne.s32.totalorder %s982_s7, 0 }
  0x6f   : > { %461 = vmatpush3.bf16.msra.mxu0 %v547_v4  ;;  %p639_p8 = scmp.ne.s32.totalorder %s928_s27, %s638_s23  ;;  %s718_s6 = smov [#allocation8]  }
  0x70   : > { %462 = vmatprep.subr.bf16.mxu0 %v715_v0  ;;  %s642_s9 = sshll.u32 %s718_s6, 4  ;;  %s643_s9 = int_to_ptr.vmem [resolvable:$false] %s642_s9 }
  0x71   : > { %p640_p1 = pnand %p639_p8, %p987_p0  ;;  %s644_s10 = scalar_lea.vmem %s643_s9, 128 }
  0x72   : > { %p645_p7 = scmp.lt.s32.totalorder %s928_s27, %s643_s9  ;;  %p646_p9 = scmp.lt.s32.totalorder %s644_s10, %s638_s23 }
  0x73   : > { %463 = vmatpush3.bf16.msra.mxu0 %v548_v5  ;;  %p641_p3 = pneg %p640_p1 }
  0x74   : > { %464 = vmatprep.subr.bf16.mxu0 %v715_v0  ;;  %p647_p12 = por %p646_p9, %p645_p7 }
  0x76   : > { %p648_p2 = pnand %p647_p12, %p641_p3 }
  0x77   : > { %465 = vmatpush3.bf16.msra.mxu0 %v549_v6 }
  0x78   : > { %466 = vmatprep.subr.bf16.mxu0 %v715_v0 }
  0x7b   : > { %467 = vmatpush3.bf16.msra.mxu0 %v550_v7 }
  0x7c   : > { %468 = vmatprep.subr.bf16.mxu0 %v715_v0 }
  0x7f   : > { %469 = vmatpush3.bf16.msra.mxu0 %v551_v8 }
  0xde   : > { %v218_v9 = vpop.permute.xlu0 %217 }
  0xdf   : > { %v221_v10 = vsel %vm220_vm1, %v214_v1, %v218_v9 }
  0xe0   : > { %v222_v11 = vpack.c.bf16 %v221_v10, %v221_v10 }
  0xe2   : > { %471 = vmatmul.mubr.msk.bf16.vlgmr.msra.gmra.mrb[0].mxu0 %vm278_vm2, %v222_v11 }
 0x1b5   : > { %v316_v13 = vpop.f32.mrb[0].mxu0 }
 0x1b6   : > { %v317_v14 = vadd.f32 %v439_v12, %v316_v13  ;;  %v472_v15 = vpop.f32.mrb[1].mxu0 }
 0x1b7   : > { %v319_v16 = vpop.f32.mrb[2].mxu0 }
 0x1b8   : > { %v473_v17 = vpop.f32.mrb[3].mxu0  ;;  %323 = vst.msk [vmem:[%s212_s26] sm:$0xf] %vm322_vm3, %v317_v14 }
 0x1b9   : > { %651 = shalt.err (!%p648_p2)
}
 0x1ba   : > { %s652_s25 = scalar_lea.hbm %s926_s4, 64  ;;  %s656_s24 = scalar_lea.hbm %s973_s3, 128 }
 0x1bb   : > { %p653_p13 = scmp.ne.s32.totalorder %s926_s4, %s652_s25  ;;  %p657_p4 = scmp.lt.u32.totalorder %s926_s4, %s973_s3 }
 0x1bc   : > { %p658_p5 = scmp.lt.u32.totalorder %s656_s24, %s652_s25  ;;  %p660_p8 = scmp.lt.u32.totalorder %s652_s25, %s926_s4 }
 0x1bd   : > { %p654_p6 = pnand %p653_p13, %p987_p0 }
 0x1be   : > { %p659_p11 = por %p658_p5, %p657_p4 }
 0x1bf   : > { %p655_p10 = pneg %p654_p6 }
 0x1c0   : > { %p661_p1 = por %p660_p8, %p659_p11 }
 0x1c2   : > { %p662_p3 = pnand %p661_p1, %p655_p10 }
 0x1c4   : > { %665 = shalt.err (!%p662_p3)
}
 0x1c5   : > { %484 = dma.vmem_to_hbm [thread:$0]  (%p987_p0), %s928_s27, 64, %s926_s4, %s325_s16  }
 0x1c6 PF: > { %s350_s20 = sand.u32 1, %s696_s12   ;;  %p988_p7 = scmp.ne.s32.totalorder %s978_s19, 0 }
 0x1c7   : > { %p989_p9 = scmp.ge.s32.totalorder %s708_s15, 2  ;;  %s351_s18 = scalar_lea.sflag [#allocation4], %s350_s20 }
 0x1c9   : > { %p498_p12 = pnand %p989_p9, %p988_p7 }
 0x1cb   : > { %691 = dma.done.wait (!%p498_p12), %s351_s18, 64  }
 0x1cc   : > { %693 = vsyncadd (!%p498_p12), %s351_s18, 4294967232  ;;  %p17_p2 = scmp.ge.s32.totalorder %s850_s5, 4   ;;  %s990_s12 = smov %s700_s13 }
 0x1cd   : > { %s991_s13 = smov %s704_s14  ;;  %s992_s14 = smov %s866_s8 }
 0x1ce   : > { %s993_s15 = smov %s850_s5  ;;  %19 = sbr.rel (!%p17_p2) target bundleno = 6 (0x6), region = 85 }
 0x1d5   :  { %356 = vsyncpa [#allocation3], 1 }
 0x1d6   :  { %358 = vsyncpa [#allocation3 + $0x1], 1 }
 0x1d7   :  { %359 = vsyncpa [#allocation6], 1 }
 0x1d8   :  { %360 = vsyncpa [#allocation4], 1 }
 0x1d9   :  { %362 = vsyncpa [#allocation4 + $0x1], 1 }

// kernel: transformer_vqvae_forward.11
= control target key start
LH: loop header
LB: loop body
LE: loop exit
PB: predicated region body
PF: predicated region fallthrough
CT: control target
= control target key end

     0   :  { %8 = vsyncpa [#allocation4], 0  ;;  %s365_s0 = inlined_call_operand.hbm [shape: f32[16,16], index: 0, kind: input, shape index: {}]   ;;  %s366_s1 = inlined_call_operand.hbm [shape: bf16[16,32], index: 1, kind: input, shape index: {}]   ;;  %s367_s2 = inlined_call_operand.hbm [shape: f32[1,32], index: 2, kind: input, shape index: {}]   ;;  %s368_s3 = inlined_call_operand.hbm [shape: f32[16,32], index: 3, kind: output, shape index: {}]  }
   0x1   :  { %9 = vsyncpa [#allocation7], 0 }
   0x2   :  { %10 = vsyncpa [#allocation5], 0  ;;  %s275_s12 = smov [#allocation6]   ;;  %s181_s16 = scalar_lea.hbm %s366_s1, 128 }
   0x3   :  { %s28_s13 = sshll.u32 %s275_s12, 4  ;;  %p182_p0 = scmp.ne.s32.totalorder %s366_s1, %s181_s16  ;;  %s29_s13 = int_to_ptr.vmem [resolvable:$true] %s28_s13 }
   0x4   :  { %p185_p1 = scmp.lt.u32.totalorder %s181_s16, %s366_s1 }
   0x6   :  { %p187_p2 = pnand %p185_p1, %p182_p0 }
   0x8   :  { %190 = shalt.err (!%p187_p2)
}
   0x9   :  { %s191_s21 = scalar_lea.vmem %s29_s13, 128  ;;  %p196_p4 = scmp.lt.s32.totalorder %s29_s13, %s29_s13 }
   0xa   :  { %p192_p3 = scmp.ne.s32.totalorder %s29_s13, %s191_s21  ;;  %p197_p5 = scmp.lt.s32.totalorder %s191_s21, %s191_s21 }
   0xc   :  { %p198_p6 = por %p197_p5, %p196_p4 }
   0xe   :  { %p199_p7 = pnand %p198_p6, %p192_p3 }
  0x10   :  { %202 = shalt.err (!%p199_p7)
}
  0x11   :  { %s276_s22 = smov 64   ;;  %s277_s23 = smov 4  }
  0x12   :  { %34 = dma.hbm_to_vmem [thread:$0]  %s366_s1, 128, %s29_s13, [#allocation7], %s276_s22, %s276_s22, %s277_s23  }
  0x13   :  { %s278_s26 = smov [#allocation3]   ;;  %s203_s30 = scalar_lea.hbm %s365_s0, 256 }
  0x14   :  { %s16_s27 = sshll.u32 %s278_s26, 4  ;;  %p204_p8 = scmp.ne.s32.totalorder %s365_s0, %s203_s30  ;;  %s17_s27 = int_to_ptr.vmem [resolvable:$true] %s16_s27 }
  0x15   :  { %p207_p9 = scmp.lt.u32.totalorder %s203_s30, %s365_s0 }
  0x17   :  { %p209_p10 = pnand %p207_p9, %p204_p8 }
  0x19   :  { %212 = shalt.err (!%p209_p10)
}
  0x1a   :  { %s213_s8 = scalar_lea.vmem %s17_s27, 256  ;;  %p218_p12 = scmp.lt.s32.totalorder %s17_s27, %s17_s27 }
  0x1b   :  { %p214_p11 = scmp.ne.s32.totalorder %s17_s27, %s213_s8  ;;  %p219_p13 = scmp.lt.s32.totalorder %s213_s8, %s213_s8 }
  0x1d   :  { %p220_p0 = por %p219_p13, %p218_p12 }
  0x1f   :  { %p221_p1 = pnand %p220_p0, %p214_p11 }
  0x21   :  { %224 = shalt.err (!%p221_p1)
}
  0x22   :  { %s279_s1 = smov 128   ;;  %s280_s9 = smov 8  }
  0x23   :  { %22 = dma.hbm_to_vmem [thread:$0]  %s365_s0, 256, %s17_s27, [#allocation4], %s279_s1, %s279_s1, %s280_s9  }
  0x24   :  { %s281_s12 = smov [#allocation8]   ;;  %s225_s16 = scalar_lea.hbm %s367_s2, 16 }
  0x25   :  { %s41_s13 = sshll.u32 %s281_s12, 4  ;;  %p226_p2 = scmp.ne.s32.totalorder %s367_s2, %s225_s16  ;;  %s42_s13 = int_to_ptr.vmem [resolvable:$true] %s41_s13 }
  0x26   :  { %p229_p3 = scmp.lt.u32.totalorder %s225_s16, %s367_s2 }
  0x28   :  { %p231_p4 = pnand %p229_p3, %p226_p2 }
  0x2a   :  { %234 = shalt.err (!%p231_p4)
}
  0x2b   :  { %s235_s21 = scalar_lea.vmem %s42_s13, 16  ;;  %s239_s0 = scalar_lea.vmem %s42_s13, 32 }
  0x2c   :  { %p236_p5 = scmp.ne.s32.totalorder %s42_s13, %s235_s21  ;;  %p240_p6 = scmp.lt.s32.totalorder %s42_s13, %s42_s13 }
  0x2d   :  { %p241_p7 = scmp.lt.s32.totalorder %s239_s0, %s235_s21 }
  0x2f   :  { %p242_p8 = por %p241_p7, %p240_p6 }
  0x31   :  { %p243_p9 = pnand %p242_p8, %p236_p5 }
  0x33   :  { %246 = shalt.err (!%p243_p9)
}
  0x34   :  { %44 = dma.hbm_to_vmem [thread:$0]  %s367_s2, 16, %s42_s13, [#allocation7]  }
  0x35   :  { %269 = dma.done.wait [#allocation4], 256  }
  0x36   :  { %270 = vsyncadd [#allocation4], 4294967040 }
  0x37   :  { %271 = dma.done.wait [#allocation7], 144  }
  0x38   :  { %272 = vsyncadd [#allocation7], 4294967152  ;;  %vm59_vm0 = vcmask 261120   ;;  %v282_v0 = vmov 0.0   ;;  %vm283_vm1 = vmmov 0   ;;  %v180_v1 = vld [vmem:[#allocation6] sm:$0xff]  }
  0x39   :  { %60 = vst.msk [vmem:[#allocation2] sm:$0xff] %vm59_vm0, %v282_v0  ;;  %61 = vst.msk [vmem:[#allocation2 + $0x8] sm:$0xff] %vm59_vm0, %v282_v0  ;;  %164 = vmatprep.subr.bf16.mxu0 %v282_v0  ;;  %166 = vmatprep.mubr.msk.bf16.mxu0 %vm283_vm1, %v282_v0  ;;  %v64_v2 = vld [vmem:[#allocation3] sm:$0xff]  ;;  %v65_v3 = vld [vmem:[#allocation3 + $0x8] sm:$0xff]  ;;  %vm75_vm2 = vcmask 130048   ;;  %s284_s2 = smov [#allocation9]  }
  0x3a   :  { %165 = vmatpush3.bf16.msra.mxu0 %v180_v1  ;;  %v66_v4 = vpack.c.bf16 %v65_v3, %v64_v2  ;;  %v161_v13 = vld [vmem:[#allocation8] ss:$0 sm:$0xff]  ;;  %s146_s24 = sshll.u32 %s284_s2, 4  ;;  %s147_s24 = int_to_ptr.vmem [resolvable:$true] %s146_s24 }
  0x3b   :  { %s247_s25 = scalar_lea.vmem %s147_s24, 256  ;;  %p252_p11 = scmp.lt.s32.totalorder %s147_s24, %s147_s24 }
  0x3c   :  { %p248_p10 = scmp.ne.s32.totalorder %s147_s24, %s247_s25  ;;  %p253_p12 = scmp.lt.s32.totalorder %s247_s25, %s247_s25 }
  0x3d   :  { %167 = vmatmul.mubr.msk.bf16.vlgmr.msra.gmra.mrb[0].mxu0 %vm75_vm2, %v66_v4 }
  0x3e   :  { %p254_p13 = por %p253_p12, %p252_p11 }
  0x40   :  { %v62_v5 = vld [vmem:[#allocation2] sm:$0xff]  ;;  %v63_v7 = vld [vmem:[#allocation2 + $0x8] sm:$0xff]  ;;  %p255_p0 = pnand %p254_p13, %p248_p10 }
 0x110   :  { %v113_v6 = vpop.f32.mrb[0].mxu0 }
 0x111   :  { %v120_v8 = vadd.f32 %v113_v6, %v62_v5  ;;  %v168_v9 = vpop.f32.mrb[1].mxu0 }
 0x112   :  { %v116_v10 = vpop.f32.mrb[2].mxu0 }
 0x113   :  { %123 = vst.msk [vmem:[#allocation2] sm:$0xff] %vm59_vm0, %v120_v8  ;;  %v121_v11 = vadd.f32 %v116_v10, %v63_v7  ;;  %v169_v12 = vpop.f32.mrb[3].mxu0 }
 0x115   :  { %124 = vst.msk [vmem:[#allocation2 + $0x8] sm:$0xff] %vm59_vm0, %v121_v11 }
 0x11a   :  { %v128_v14 = vld [vmem:[#allocation2] sm:$0xff] }
 0x11b   :  { %v137_v15 = vadd.f32 %v161_v13, %v128_v14 }
 0x11c   :  { %v129_v16 = vld [vmem:[#allocation2 + $0x8] sm:$0xff] }
 0x11d   :  { %v138_v17 = vadd.f32 %v161_v13, %v129_v16  ;;  %139 = vst.msk [vmem:[#allocation9] sm:$0xff] %vm59_vm0, %v137_v15 }
 0x11f   :  { %140 = vst.msk [vmem:[#allocation9 + $0x8] sm:$0xff] %vm59_vm0, %v138_v17 }
 0x120   :  { %258 = shalt.err (!%p255_p0)
}
 0x121   :  { %s259_s28 = scalar_lea.hbm %s368_s3, 256 }
 0x122   :  { %p260_p1 = scmp.ne.s32.totalorder %s368_s3, %s259_s28  ;;  %p263_p2 = scmp.lt.u32.totalorder %s259_s28, %s368_s3 }
 0x124   :  { %p265_p3 = pnand %p263_p2, %p260_p1 }
 0x126   :  { %268 = shalt.err (!%p265_p3)
}
 0x127   :  { %152 = dma.vmem_to_hbm [thread:$0]  %s147_s24, 256, %s368_s3, [#allocation5], %s279_s1, %s279_s1, %s280_s9  }
 0x128   :  { %273 = dma.done.wait [#allocation5], 256  }
 0x129   :  { %274 = vsyncadd [#allocation5], 4294967040 }
 0x12a   :  { %156 = vsyncpa [#allocation4], 1 }
 0x12b   :  { %157 = vsyncpa [#allocation7], 1 }
 0x12c   :  { %158 = vsyncpa [#allocation5], 1 }

// kernel: transformer_vqvae_forward.14
= control target key start
LH: loop header
LB: loop body
LE: loop exit
PB: predicated region body
PF: predicated region fallthrough
CT: control target
= control target key end

     0   :  { %s3202_s0 = inlined_call_operand.hbm [shape: f32[2,4,32], index: 0, kind: input, shape index: {}]   ;;  %s3203_s1 = inlined_call_operand.hbm [shape: f32[1,32], index: 1, kind: input, shape index: {}]   ;;  %s3204_s2 = inlined_call_operand.hbm [shape: f32[1,32], index: 2, kind: input, shape index: {}]   ;;  %s3205_s3 = inlined_call_operand.hbm [shape: bf16[32,96], index: 3, kind: input, shape index: {}]   ;;  %s3206_s4 = inlined_call_operand.hbm [shape: f32[1,96], index: 4, kind: input, shape index: {}]   ;;  %s3207_s5 = inlined_call_operand.hbm [shape: bf16[32,32], index: 5, kind: input, shape index: {}]   ;;  %s3208_s6 = inlined_call_operand.hbm [shape: f32[1,32], index: 6, kind: input, shape index: {}]   ;;  %s3209_s7 = inlined_call_operand.hbm [shape: f32[1,32], index: 7, kind: input, shape index: {}]   ;;  %s3210_s8 = inlined_call_operand.hbm [shape: f32[1,32], index: 8, kind: input, shape index: {}]   ;;  %s3211_s9 = inlined_call_operand.hbm [shape: bf16[32,128], index: 9, kind: input, shape index: {}]   ;;  %s3212_s10 = inlined_call_operand.hbm [shape: f32[1,128], index: 10, kind: input, shape index: {}]   ;;  %s3213_s11 = inlined_call_operand.hbm [shape: bf16[128,32], index: 11, kind: input, shape index: {}]   ;;  %s3214_s12 = inlined_call_operand.hbm [shape: f32[1,32], index: 12, kind: input, shape index: {}]   ;;  %s3215_s13 = inlined_call_operand.hbm [shape: f32[2,4,32], index: 13, kind: output, shape index: {}]  }
   0x1   :  { %3225 = sst [smem:[#allocation34_spill]] %s3202_s0 }
   0x2   :  { %3226 = sst [smem:[#allocation35_spill]] %s3203_s1 }
   0x3   :  { %3227 = sst [smem:[#allocation36_spill]] %s3204_s2 }
   0x4   :  { %3228 = sst [smem:[#allocation37_spill]] %s3205_s3 }
   0x5   :  { %3229 = sst [smem:[#allocation38_spill]] %s3215_s13 }
   0x6   :  { %18 = vsyncpa [#allocation3], 0 }
   0x7   :  { %20 = vsyncpa [#allocation3 + $0x1], 0 }
   0x8   :  { %21 = vsyncpa [#allocation6], 0 }
   0x9   :  { %22 = vsyncpa [#allocation9], 0 }
   0xa   :  { %23 = vsyncpa [#allocation12], 0 }
   0xb   :  { %24 = vsyncpa [#allocation15], 0 }
   0xc   :  { %25 = vsyncpa [#allocation18], 0 }
   0xd   :  { %26 = vsyncpa [#allocation21], 0 }
   0xe   :  { %27 = vsyncpa [#allocation4], 0 }
   0xf   :  { %29 = vsyncpa [#allocation4 + $0x1], 0  ;;  %s2629_s25 = smov 0   ;;  %s2631_s26 = smov 0  }
  0x10   :  { %s2633_s27 = smov 0   ;;  %s2635_s28 = smov 0  }
  0x11 LB: > { %s2533_s29 = smov [#allocation5]   ;;  %s2650_s14 = sadd.s32 4294967295, %s2531_s28   ;;  %s2531_s28 = sphi %s2635_s28, %s3268_s28   ;;  %s2527_s27 = sphi %s2633_s27, %s3267_s27   ;;  %s2523_s26 = sphi %s2631_s26, %s3266_s26   ;;  %s2519_s25 = sphi %s2629_s25, %s3265_s25  }
  0x12   : > { %s357_s30 = sshll.u32 %s2533_s29, 4  ;;  %3230 = sst [smem:[#allocation32_spill]] %s2650_s14  ;;  %s2655_s30 = int_to_ptr.vmem [resolvable:$true] %s357_s30 }
  0x13   : > { %p1666_p0 = scmp.ge.s32.totalorder %s2531_s28, 1  ;;  %p3222_p1 = scmp.eq.s32.totalorder %s2650_s14, 0 }
  0x14   : > { %p344_p2 = scmp.lt.s32.totalorder %s2531_s28, 3  ;;  %s2534_s16 = smov [#allocation8]  }
  0x15   : > { %s378_s17 = sshll.u32 %s2534_s16, 4  ;;  %s2535_s19 = smov [#allocation11]   ;;  %s2664_s17 = int_to_ptr.vmem [resolvable:$true] %s378_s17 }
  0x16   : > { %p2657_p3 = pnand %p1666_p0, %p344_p2  ;;  %s402_s20 = sshll.u32 %s2535_s19, 4  ;;  %s2672_s20 = int_to_ptr.vmem [resolvable:$true] %s402_s20 }
  0x17   : > { %s3234_s1 = sld [smem:[#allocation35_spill]] }
  0x18   : > { %s3231_s15 = scalar_select %p2657_p3, 1, 0 }
  0x19   : > { %p1912_p5 = pneg %p2657_p3 }
  0x1a   : > { %3232 = sst [smem:[#allocation33_spill]] %s3231_s15 }
  0x1b   : > { %p2668_p6 = pnand %p1912_p5, %p3222_p1 }
  0x1d   : > { %s2075_s23 = scalar_lea.hbm %s3234_s1, 16  ;;  %p2682_p8 = pneg %p2668_p6 }
  0x1e   : > { %p2076_p7 = scmp.ne.s32.totalorder %s3234_s1, %s2075_s23  ;;  %p2082_p11 = scmp.lt.u32.totalorder %s2075_s23, %s3234_s1 }
  0x20   : > { %p2078_p9 = pnand %p2682_p8, %p2076_p7 }
  0x22   : > { %p2079_p10 = pneg %p2078_p9 }
  0x24   : > { %p2084_p12 = pnand %p2082_p11, %p2079_p10 }
  0x26   : > { %2087 = shalt.err (!%p2084_p12)
}
  0x27   : > { %s2088_s21 = scalar_lea.vmem %s2655_s30, 16  ;;  %s2095_s22 = scalar_lea.vmem %s2655_s30, 32 }
  0x28   : > { %p2089_p13 = scmp.ne.s32.totalorder %s2655_s30, %s2088_s21  ;;  %p2096_p5 = scmp.lt.s32.totalorder %s2655_s30, %s2655_s30 }
  0x29   : > { %p2097_p7 = scmp.lt.s32.totalorder %s2095_s22, %s2088_s21 }
  0x2a   : > { %p2091_p0 = pnand %p2089_p13, %p2682_p8 }
  0x2b   : > { %p2098_p9 = por %p2097_p7, %p2096_p5 }
  0x2c   : > { %p2092_p2 = pneg %p2091_p0 }
  0x2e   : > { %p2099_p4 = pnand %p2098_p9, %p2092_p2 }
  0x30   : > { %2102 = shalt.err (!%p2099_p4)
}
  0x31   : > { %1915 = dma.hbm_to_vmem [thread:$0]  (!%p2668_p6), %s3234_s1, 16, %s2655_s30, [#allocation6]  }
  0x32   : > { %s3236_s3 = sld [smem:[#allocation37_spill]] }
  0x38   : > { %s2103_s19 = scalar_lea.hbm %s3236_s3, 256 }
  0x39   : > { %p2104_p10 = scmp.ne.s32.totalorder %s3236_s3, %s2103_s19  ;;  %p2110_p4 = scmp.lt.u32.totalorder %s2103_s19, %s3236_s3 }
  0x3b   : > { %p2106_p11 = pnand %p2104_p10, %p2682_p8 }
  0x3d   : > { %p2107_p12 = pneg %p2106_p11 }
  0x3f   : > { %p2112_p13 = pnand %p2110_p4, %p2107_p12 }
  0x41   : > { %2115 = shalt.err (!%p2112_p13)
}
  0x42   : > { %s2116_s30 = scalar_lea.vmem %s2664_s17, 256  ;;  %p2124_p7 = scmp.lt.s32.totalorder %s2664_s17, %s2664_s17 }
  0x43   : > { %p2117_p0 = scmp.ne.s32.totalorder %s2664_s17, %s2116_s30  ;;  %p2125_p9 = scmp.lt.s32.totalorder %s2116_s30, %s2116_s30 }
  0x45   : > { %p2119_p2 = pnand %p2117_p0, %p2682_p8  ;;  %p2126_p10 = por %p2125_p9, %p2124_p7 }
  0x47   : > { %p2120_p5 = pneg %p2119_p2 }
  0x49   : > { %p2127_p11 = pnand %p2126_p10, %p2120_p5 }
  0x4b   : > { %2130 = shalt.err (!%p2127_p11)
}
  0x4c   : > { %s2536_s0 = smov 64   ;;  %s2537_s15 = smov 4  }
  0x4d   : > { %1921 = dma.hbm_to_vmem [thread:$0]  (!%p2668_p6), %s3236_s3, 256, %s2664_s17, [#allocation9], %s2536_s0, %s2536_s0, %s2537_s15  }
  0x4e   : > { %s2131_s19 = scalar_lea.hbm %s3207_s5, 256 }
  0x4f   : > { %p2132_p12 = scmp.ne.s32.totalorder %s3207_s5, %s2131_s19  ;;  %p2138_p0 = scmp.lt.u32.totalorder %s2131_s19, %s3207_s5 }
  0x51   : > { %p2134_p4 = pnand %p2132_p12, %p2682_p8 }
  0x53   : > { %p2135_p13 = pneg %p2134_p4 }
  0x55   : > { %p2140_p2 = pnand %p2138_p0, %p2135_p13 }
  0x57   : > { %2143 = shalt.err (!%p2140_p2)
}
  0x58   : > { %s2144_s17 = scalar_lea.vmem %s2672_s20, 256  ;;  %p2152_p10 = scmp.lt.s32.totalorder %s2672_s20, %s2672_s20 }
  0x59   : > { %p2145_p5 = scmp.ne.s32.totalorder %s2672_s20, %s2144_s17  ;;  %p2153_p11 = scmp.lt.s32.totalorder %s2144_s17, %s2144_s17 }
  0x5b   : > { %p2147_p7 = pnand %p2145_p5, %p2682_p8  ;;  %p2154_p12 = por %p2153_p11, %p2152_p10 }
  0x5d   : > { %p2148_p9 = pneg %p2147_p7 }
  0x5f   : > { %p2155_p4 = pnand %p2154_p12, %p2148_p9 }
  0x61   : > { %2158 = shalt.err (!%p2155_p4)
}
  0x62   : > { %1927 = dma.hbm_to_vmem [thread:$0]  (!%p2668_p6), %s3207_s5, 256, %s2672_s20, [#allocation12], %s2536_s0, %s2536_s0, %s2537_s15  }
  0x63   : > { %s2538_s23 = smov [#allocation14]   ;;  %s2539_s29 = smov [#allocation17]  }
  0x64   : > { %s427_s24 = sshll.u32 %s2538_s23, 4  ;;  %s448_s19 = sshll.u32 %s2539_s29, 4  ;;  %s428_s24 = int_to_ptr.vmem [resolvable:$true] %s427_s24  ;;  %s449_s19 = int_to_ptr.vmem [resolvable:$true] %s448_s19 }
  0x65   : > { %s2159_s30 = scalar_lea.hbm %s3209_s7, 16 }
  0x66   : > { %p2160_p13 = scmp.ne.s32.totalorder %s3209_s7, %s2159_s30  ;;  %p2166_p5 = scmp.lt.u32.totalorder %s2159_s30, %s3209_s7 }
  0x68   : > { %p2162_p0 = pnand %p2160_p13, %p2682_p8 }
  0x6a   : > { %p2163_p2 = pneg %p2162_p0 }
  0x6c   : > { %p2168_p7 = pnand %p2166_p5, %p2163_p2 }
  0x6e   : > { %2171 = shalt.err (!%p2168_p7)
}
  0x6f   : > { %s2172_s20 = scalar_lea.vmem %s428_s24, 16  ;;  %s2179_s13 = scalar_lea.vmem %s428_s24, 32 }
  0x70   : > { %p2173_p9 = scmp.ne.s32.totalorder %s428_s24, %s2172_s20  ;;  %p2180_p12 = scmp.lt.s32.totalorder %s428_s24, %s428_s24 }
  0x71   : > { %p2181_p4 = scmp.lt.s32.totalorder %s2179_s13, %s2172_s20 }
  0x72   : > { %p2175_p10 = pnand %p2173_p9, %p2682_p8 }
  0x73   : > { %p2182_p1 = por %p2181_p4, %p2180_p12 }
  0x74   : > { %p2176_p11 = pneg %p2175_p10 }
  0x76   : > { %p2183_p3 = pnand %p2182_p1, %p2176_p11 }
  0x78   : > { %2186 = shalt.err (!%p2183_p3)
}
  0x79   : > { %1933 = dma.hbm_to_vmem [thread:$0]  (!%p2668_p6), %s3209_s7, 16, %s428_s24, [#allocation15]  }
  0x7a   : > { %s2187_s21 = scalar_lea.hbm %s3211_s9, 256 }
  0x7b   : > { %p2188_p13 = scmp.ne.s32.totalorder %s3211_s9, %s2187_s21  ;;  %p2194_p3 = scmp.lt.u32.totalorder %s2187_s21, %s3211_s9 }
  0x7d   : > { %p2190_p0 = pnand %p2188_p13, %p2682_p8 }
  0x7f   : > { %p2191_p1 = pneg %p2190_p0 }
  0x81   : > { %p2196_p2 = pnand %p2194_p3, %p2191_p1 }
  0x83   : > { %2199 = shalt.err (!%p2196_p2)
}
  0x84   : > { %s2200_s20 = scalar_lea.vmem %s449_s19, 256  ;;  %p2208_p10 = scmp.lt.s32.totalorder %s449_s19, %s449_s19 }
  0x85   : > { %p2201_p5 = scmp.ne.s32.totalorder %s449_s19, %s2200_s20  ;;  %p2209_p11 = scmp.lt.s32.totalorder %s2200_s20, %s2200_s20 }
  0x87   : > { %p2203_p7 = pnand %p2201_p5, %p2682_p8  ;;  %p2210_p12 = por %p2209_p11, %p2208_p10 }
  0x89   : > { %p2204_p9 = pneg %p2203_p7 }
  0x8b   : > { %p2211_p4 = pnand %p2210_p12, %p2204_p9 }
  0x8d   : > { %2214 = shalt.err (!%p2211_p4)
}
  0x8e   : > { %1939 = dma.hbm_to_vmem [thread:$0]  (!%p2668_p6), %s3211_s9, 256, %s449_s19, [#allocation18], %s2536_s0, %s2536_s0, %s2537_s15  }
  0x8f   : > { %s2540_s3 = smov [#allocation20]   ;;  %s2541_s14 = smov [#allocation7]  }
  0x90   : > { %s472_s23 = sshll.u32 %s2540_s3, 4  ;;  %s368_s29 = sshll.u32 %s2541_s14, 4  ;;  %s473_s23 = int_to_ptr.vmem [resolvable:$true] %s472_s23  ;;  %s369_s29 = int_to_ptr.vmem [resolvable:$true] %s368_s29 }
  0x91   : > { %s2215_s30 = scalar_lea.hbm %s3213_s11, 1024 }
  0x92   : > { %p2216_p13 = scmp.ne.s32.totalorder %s3213_s11, %s2215_s30  ;;  %p2222_p3 = scmp.lt.u32.totalorder %s2215_s30, %s3213_s11 }
  0x94   : > { %p2218_p0 = pnand %p2216_p13, %p2682_p8 }
  0x96   : > { %p2219_p1 = pneg %p2218_p0 }
  0x98   : > { %p2224_p2 = pnand %p2222_p3, %p2219_p1 }
  0x9a   : > { %2227 = shalt.err (!%p2224_p2)
}
  0x9b   : > { %s2228_s19 = scalar_lea.vmem %s473_s23, 1024  ;;  %p2236_p10 = scmp.lt.s32.totalorder %s473_s23, %s473_s23 }
  0x9c   : > { %p2229_p5 = scmp.ne.s32.totalorder %s473_s23, %s2228_s19  ;;  %p2237_p11 = scmp.lt.s32.totalorder %s2228_s19, %s2228_s19 }
  0x9e   : > { %p2231_p7 = pnand %p2229_p5, %p2682_p8  ;;  %p2238_p12 = por %p2237_p11, %p2236_p10 }
  0xa0   : > { %p2232_p9 = pneg %p2231_p7 }
  0xa2   : > { %p2239_p4 = pnand %p2238_p12, %p2232_p9 }
  0xa4   : > { %2242 = shalt.err (!%p2239_p4)
}
  0xa5   : > { %1945 = dma.hbm_to_vmem [thread:$0]  (!%p2668_p6), %s3213_s11, 1024, %s473_s23, [#allocation21], %s2536_s0, %s2536_s0, %s2537_s15  }
  0xa6   : > { %s3237_s2 = sld [smem:[#allocation36_spill]] }
  0xac   : > { %s2243_s22 = scalar_lea.hbm %s3237_s2, 16 }
  0xad   : > { %p2244_p13 = scmp.ne.s32.totalorder %s3237_s2, %s2243_s22  ;;  %p2250_p3 = scmp.lt.u32.totalorder %s2243_s22, %s3237_s2 }
  0xaf   : > { %p2246_p0 = pnand %p2244_p13, %p2682_p8 }
  0xb1   : > { %p2247_p1 = pneg %p2246_p0 }
  0xb3   : > { %p2252_p2 = pnand %p2250_p3, %p2247_p1 }
  0xb5   : > { %2255 = shalt.err (!%p2252_p2)
}
  0xb6   : > { %s2256_s24 = scalar_lea.vmem %s369_s29, 16  ;;  %s2263_s0 = scalar_lea.vmem %s369_s29, 32 }
  0xb7   : > { %p2257_p5 = scmp.ne.s32.totalorder %s369_s29, %s2256_s24  ;;  %p2264_p10 = scmp.lt.s32.totalorder %s369_s29, %s369_s29 }
  0xb8   : > { %p2265_p11 = scmp.lt.s32.totalorder %s2263_s0, %s2256_s24 }
  0xb9   : > { %p2259_p7 = pnand %p2257_p5, %p2682_p8 }
  0xba   : > { %p2266_p12 = por %p2265_p11, %p2264_p10 }
  0xbb   : > { %p2260_p9 = pneg %p2259_p7 }
  0xbd   : > { %p2267_p4 = pnand %p2266_p12, %p2260_p9 }
  0xbf   : > { %2270 = shalt.err (!%p2267_p4)
}
  0xc0   : > { %1918 = dma.hbm_to_vmem [thread:$0]  (!%p2668_p6), %s3237_s2, 16, %s369_s29, [#allocation6]  }
  0xc1   : > { %s2542_s19 = smov [#allocation10]   ;;  %s2543_s3 = smov [#allocation13]  }
  0xc2   : > { %s392_s13 = sshll.u32 %s2542_s19, 4  ;;  %s416_s14 = sshll.u32 %s2543_s3, 4  ;;  %s393_s13 = int_to_ptr.vmem [resolvable:$true] %s392_s13  ;;  %s417_s14 = int_to_ptr.vmem [resolvable:$true] %s416_s14 }
  0xc3   : > { %s2271_s30 = scalar_lea.hbm %s3206_s4, 16 }
  0xc4   : > { %p2272_p13 = scmp.ne.s32.totalorder %s3206_s4, %s2271_s30  ;;  %p2278_p3 = scmp.lt.u32.totalorder %s2271_s30, %s3206_s4 }
  0xc6   : > { %p2274_p0 = pnand %p2272_p13, %p2682_p8 }
  0xc8   : > { %p2275_p1 = pneg %p2274_p0 }
  0xca   : > { %p2280_p2 = pnand %p2278_p3, %p2275_p1 }
  0xcc   : > { %2283 = shalt.err (!%p2280_p2)
}
  0xcd   : > { %s2284_s29 = scalar_lea.vmem %s393_s13, 16  ;;  %s2291_s0 = scalar_lea.vmem %s393_s13, 32 }
  0xce   : > { %p2285_p5 = scmp.ne.s32.totalorder %s393_s13, %s2284_s29  ;;  %p2292_p10 = scmp.lt.s32.totalorder %s393_s13, %s393_s13 }
  0xcf   : > { %p2293_p11 = scmp.lt.s32.totalorder %s2291_s0, %s2284_s29 }
  0xd0   : > { %p2287_p7 = pnand %p2285_p5, %p2682_p8 }
  0xd1   : > { %p2294_p12 = por %p2293_p11, %p2292_p10 }
  0xd2   : > { %p2288_p9 = pneg %p2287_p7 }
  0xd4   : > { %p2295_p4 = pnand %p2294_p12, %p2288_p9 }
  0xd6   : > { %2298 = shalt.err (!%p2295_p4)
}
  0xd7   : > { %1924 = dma.hbm_to_vmem [thread:$0]  (!%p2668_p6), %s3206_s4, 16, %s393_s13, [#allocation9]  }
  0xd8   : > { %s2299_s21 = scalar_lea.hbm %s3208_s6, 16 }
  0xd9   : > { %p2300_p13 = scmp.ne.s32.totalorder %s3208_s6, %s2299_s21  ;;  %p2306_p3 = scmp.lt.u32.totalorder %s2299_s21, %s3208_s6 }
  0xdb   : > { %p2302_p0 = pnand %p2300_p13, %p2682_p8 }
  0xdd   : > { %p2303_p1 = pneg %p2302_p0 }
  0xdf   : > { %p2308_p2 = pnand %p2306_p3, %p2303_p1 }
  0xe1   : > { %2311 = shalt.err (!%p2308_p2)
}
  0xe2   : > { %s2312_s20 = scalar_lea.vmem %s417_s14, 16  ;;  %s2319_s13 = scalar_lea.vmem %s417_s14, 32 }
  0xe3   : > { %p2313_p5 = scmp.ne.s32.totalorder %s417_s14, %s2312_s20  ;;  %p2320_p10 = scmp.lt.s32.totalorder %s417_s14, %s417_s14 }
  0xe4   : > { %p2321_p11 = scmp.lt.s32.totalorder %s2319_s13, %s2312_s20 }
  0xe5   : > { %p2315_p7 = pnand %p2313_p5, %p2682_p8 }
  0xe6   : > { %p2322_p12 = por %p2321_p11, %p2320_p10 }
  0xe7   : > { %p2316_p9 = pneg %p2315_p7 }
  0xe9   : > { %p2323_p4 = pnand %p2322_p12, %p2316_p9 }
  0xeb   : > { %2326 = shalt.err (!%p2323_p4)
}
  0xec   : > { %1930 = dma.hbm_to_vmem [thread:$0]  (!%p2668_p6), %s3208_s6, 16, %s417_s14, [#allocation12]  }
  0xed   : > { %s2544_s0 = smov [#allocation16]   ;;  %s2545_s23 = smov [#allocation19]  }
  0xee   : > { %s438_s15 = sshll.u32 %s2544_s0, 4  ;;  %s462_s19 = sshll.u32 %s2545_s23, 4  ;;  %s439_s15 = int_to_ptr.vmem [resolvable:$true] %s438_s15  ;;  %s463_s19 = int_to_ptr.vmem [resolvable:$true] %s462_s19 }
  0xef   : > { %s2327_s22 = scalar_lea.hbm %s3210_s8, 16 }
  0xf0   : > { %p2328_p13 = scmp.ne.s32.totalorder %s3210_s8, %s2327_s22  ;;  %p2334_p3 = scmp.lt.u32.totalorder %s2327_s22, %s3210_s8 }
  0xf2   : > { %p2330_p0 = pnand %p2328_p13, %p2682_p8 }
  0xf4   : > { %p2331_p1 = pneg %p2330_p0 }
  0xf6   : > { %p2336_p2 = pnand %p2334_p3, %p2331_p1 }
  0xf8   : > { %2339 = shalt.err (!%p2336_p2)
}
  0xf9   : > { %s2340_s14 = scalar_lea.vmem %s439_s15, 16  ;;  %s2347_s13 = scalar_lea.vmem %s439_s15, 32 }
  0xfa   : > { %p2341_p5 = scmp.ne.s32.totalorder %s439_s15, %s2340_s14  ;;  %p2348_p10 = scmp.lt.s32.totalorder %s439_s15, %s439_s15 }
  0xfb   : > { %p2349_p11 = scmp.lt.s32.totalorder %s2347_s13, %s2340_s14 }
  0xfc   : > { %p2343_p7 = pnand %p2341_p5, %p2682_p8 }
  0xfd   : > { %p2350_p12 = por %p2349_p11, %p2348_p10 }
  0xfe   : > { %p2344_p9 = pneg %p2343_p7 }
 0x100   : > { %p2351_p4 = pnand %p2350_p12, %p2344_p9 }
 0x102   : > { %2354 = shalt.err (!%p2351_p4)
}
 0x103   : > { %1936 = dma.hbm_to_vmem [thread:$0]  (!%p2668_p6), %s3210_s8, 16, %s439_s15, [#allocation15]  }
 0x104   : > { %s2355_s3 = scalar_lea.hbm %s3212_s10, 16 }
 0x105   : > { %p2356_p13 = scmp.ne.s32.totalorder %s3212_s10, %s2355_s3  ;;  %p2362_p3 = scmp.lt.u32.totalorder %s2355_s3, %s3212_s10 }
 0x107   : > { %p2358_p0 = pnand %p2356_p13, %p2682_p8 }
 0x109   : > { %p2359_p1 = pneg %p2358_p0 }
 0x10b   : > { %p2364_p2 = pnand %p2362_p3, %p2359_p1 }
 0x10d   : > { %2367 = shalt.err (!%p2364_p2)
}
 0x10e   : > { %s2368_s1 = scalar_lea.vmem %s463_s19, 16  ;;  %s2375_s15 = scalar_lea.vmem %s463_s19, 32 }
 0x10f   : > { %p2369_p5 = scmp.ne.s32.totalorder %s463_s19, %s2368_s1  ;;  %p2376_p10 = scmp.lt.s32.totalorder %s463_s19, %s463_s19 }
 0x110   : > { %p2377_p11 = scmp.lt.s32.totalorder %s2375_s15, %s2368_s1 }
 0x111   : > { %p2371_p7 = pnand %p2369_p5, %p2682_p8 }
 0x112   : > { %p2378_p12 = por %p2377_p11, %p2376_p10 }
 0x113   : > { %p2372_p9 = pneg %p2371_p7 }
 0x115   : > { %p2379_p4 = pnand %p2378_p12, %p2372_p9 }
 0x117   : > { %2382 = shalt.err (!%p2379_p4)
}
 0x118   : > { %1942 = dma.hbm_to_vmem [thread:$0]  (!%p2668_p6), %s3212_s10, 16, %s463_s19, [#allocation18]  }
 0x119   : > { %s2546_s13 = smov [#allocation22]   ;;  %s2383_s23 = scalar_lea.hbm %s3214_s12, 16 }
 0x11a   : > { %s486_s24 = sshll.u32 %s2546_s13, 4  ;;  %p2384_p13 = scmp.ne.s32.totalorder %s3214_s12, %s2383_s23  ;;  %s487_s24 = int_to_ptr.vmem [resolvable:$true] %s486_s24 }
 0x11b   : > { %p2390_p3 = scmp.lt.u32.totalorder %s2383_s23, %s3214_s12 }
 0x11c   : > { %p2386_p0 = pnand %p2384_p13, %p2682_p8 }
 0x11e   : > { %p2387_p1 = pneg %p2386_p0 }
 0x120   : > { %p2392_p2 = pnand %p2390_p3, %p2387_p1 }
 0x122   : > { %2395 = shalt.err (!%p2392_p2)
}
 0x123   : > { %s2396_s19 = scalar_lea.vmem %s487_s24, 16  ;;  %s2403_s17 = scalar_lea.vmem %s487_s24, 32 }
 0x124   : > { %p2397_p5 = scmp.ne.s32.totalorder %s487_s24, %s2396_s19  ;;  %p2404_p10 = scmp.lt.s32.totalorder %s487_s24, %s487_s24 }
 0x125   : > { %p2405_p11 = scmp.lt.s32.totalorder %s2403_s17, %s2396_s19 }
 0x126   : > { %p2399_p7 = pnand %p2397_p5, %p2682_p8 }
 0x127   : > { %p2406_p12 = por %p2405_p11, %p2404_p10 }
 0x128   : > { %p2400_p9 = pneg %p2399_p7 }
 0x12a   : > { %p2407_p4 = pnand %p2406_p12, %p2400_p9 }
 0x12c   : > { %2410 = shalt.err (!%p2407_p4)
}
 0x12d   : > { %s3238_s16 = sld [smem:[#allocation32_spill]]  ;;  %s1665_s20 = sadd.s32 4294967294, %s2531_s28  }
 0x12e   : > { %1948 = dma.hbm_to_vmem [thread:$0]  (!%p2668_p6), %s3214_s12, 16, %s487_s24, [#allocation21]  }
 0x12f   : > { %s2926_s18 = sadd.s32 1, %s2531_s28   ;;  %s42_s13 = sadd.s32 1, %s2527_s27 }
 0x130   : > { %s39_s14 = ssub.s32 %s2531_s28, %s2926_s18  ;;  %p49_p13 = scmp.ne.s32.totalorder %s2527_s27, %s2523_s26 }
 0x131   : > { %p40_p8 = scmp.eq.s32.totalorder %s39_s14, 0  ;;  %p50_p0 = scmp.eq.s32.totalorder %s2531_s28, 0 }
 0x132   : > { %p55_p1 = scmp.ne.s32.totalorder %s2523_s26, %s2519_s25  ;;  %p337_p7 = scmp.eq.s32.totalorder %s1665_s20, 1 }
 0x133   : > { %s2937_s29 = scalar_select %p40_p8, %s2527_s27, %s42_s13  }
 0x134   : > { %p2939_p3 = por %p50_p0, %p49_p13  ;;  %p3240_p2 = scmp.eq.s32.totalorder %s3238_s16, 0 }
 0x135   : > { %p331_p5 = scmp.eq.s32.totalorder %s3238_s16, 1  ;;  %p1969_p9 = scmp.lt.s32.totalorder %s2531_s28, 2 }
 0x136   : > { %p2945_p6 = por %p3240_p2, %p55_p1  ;;  %s497_s23 = sand.u32 1, %s2527_s27  }
 0x137   : > { %p2952_p10 = por %p331_p5, %p49_p13  ;;  %p2956_p11 = por %p337_p7, %p55_p1 }
 0x138   : > { %s1680_s22 = sshll.u32 %s497_s23, 2  ;;  %s1681_s30 = sshll.u32 %s2531_s28, 6 }
 0x139   : > { %s3242_s3 = scalar_select %p2952_p10, 1, 0 }
 0x13a   : > { %s3243_s21 = scalar_select %p2956_p11, 1, 0 }
 0x13b   : > { %s3244_s1 = sld [smem:[#allocation34_spill]]  ;;  %s501_s16 = scalar_lea.vmem [#allocation2], %s1680_s22 }
 0x13c   : > { %s508_s20 = sshll.u32 %s501_s16, 4  ;;  %p2970_p12 = pnand %p1969_p9, %p2939_p3  ;;  %s2966_s20 = int_to_ptr.vmem [resolvable:$true] %s508_s20 }
 0x13d   : > { %s498_s13 = scalar_lea.sflag [#allocation3], %s497_s23 }
 0x13e   : > { %p2413_p8 = pneg %p2970_p12 }
 0x141   : > { %s2964_s15 = scalar_lea.hbm %s3244_s1, %s1681_s30  ;;  %s2416_s19 = scalar_lea.hbm %s3244_s1, 128 }
 0x142   : > { %s2411_s2 = scalar_lea.hbm %s2964_s15, 64  ;;  %p2417_p1 = scmp.lt.u32.totalorder %s2964_s15, %s3244_s1 }
 0x143   : > { %p2412_p4 = scmp.ne.s32.totalorder %s2964_s15, %s2411_s2  ;;  %p2418_p3 = scmp.lt.u32.totalorder %s2416_s19, %s2411_s2 }
 0x144   : > { %p2420_p5 = scmp.lt.u32.totalorder %s2411_s2, %s2964_s15 }
 0x145   : > { %p2414_p13 = pnand %p2413_p8, %p2412_p4  ;;  %p2419_p2 = por %p2418_p3, %p2417_p1 }
 0x147   : > { %p2415_p0 = pneg %p2414_p13  ;;  %p2421_p7 = por %p2420_p5, %p2419_p2 }
 0x149   : > { %p2422_p9 = pnand %p2421_p7, %p2415_p0 }
 0x14b   : > { %2425 = shalt.err (!%p2422_p9)
}
 0x14c   : > { %s2426_s23 = scalar_lea.vmem %s2966_s20, 64  ;;  %s2547_s16 = smov [#allocation2]  }
 0x14d   : > { %p2427_p4 = scmp.ne.s32.totalorder %s2966_s20, %s2426_s23  ;;  %s2431_s22 = sshll.u32 %s2547_s16, 4  ;;  %s2432_s22 = int_to_ptr.vmem [resolvable:$false] %s2431_s22 }
 0x14e   : > { %s2433_s30 = scalar_lea.vmem %s2432_s22, 128  ;;  %p2434_p10 = scmp.lt.s32.totalorder %s2966_s20, %s2432_s22 }
 0x14f   : > { %p2429_p13 = pnand %p2427_p4, %p2413_p8  ;;  %p2435_p1 = scmp.lt.s32.totalorder %s2433_s30, %s2426_s23 }
 0x151   : > { %p2430_p11 = pneg %p2429_p13  ;;  %p2436_p3 = por %p2435_p1, %p2434_p10 }
 0x153   : > { %p2437_p2 = pnand %p2436_p3, %p2430_p11 }
 0x155   : > { %2440 = shalt.err (!%p2437_p2)
}
 0x156   : > { %1952 = dma.hbm_to_vmem [thread:$0]  (!%p2970_p12), %s2964_s15, 64, %s2966_s20, %s498_s13  }
 0x157   : > { %s3246_s2 = sld [smem:[#allocation33_spill]] }
 0x15d   : > { %p3247_p0 = scmp.ne.s32.totalorder %s3246_s2, 0 }
 0x15e   : > { %s3002_s19 = sand.u32 (!%p3247_p0), 1, %s2523_s26  }
 0x15f   : > { %517 = sbr.rel (%p3247_p0) target bundleno = 3027 (0xbd3), region = 72  ;;  %s1683_s0 = sshll.u32 (!%p3247_p0), %s3002_s19, 2 }
 0x160   : > { %s520_s17 = scalar_lea.sflag (!%p3247_p0), [#allocation3], %s3002_s19  ;;  %s523_s23 = scalar_lea.vmem (!%p3247_p0), [#allocation2], %s1683_s0 }
 0x166   : > { %2486 = dma.done.wait (%p2945_p6), %s520_s17, 64  }
 0x167   : > { %2488 = vsyncadd (%p2945_p6), %s520_s17, 4294967232  ;;  %s3248_s15 = sld [smem:[#allocation32_spill]] }
 0x16d   : > { %p3249_p10 = scmp.eq.s32.totalorder %s3248_s15, 0 }
 0x16f   : > { %2490 = dma.done.wait (%p3249_p10), [#allocation6], 32   ;;  %p3250_p11 = pmov %p3249_p10 }
 0x170   : > { %p3251_p12 = pmov %p3249_p10 }
 0x171   : > { %2492 = vsyncadd (%p3250_p11), [#allocation6], 4294967264 }
 0x172   : > { %2494 = dma.done.wait (%p3251_p12), [#allocation9], 272   ;;  %p3252_p8 = pmov %p3249_p10 }
 0x174   : > { %2496 = vsyncadd (%p3252_p8), [#allocation9], 4294967024  ;;  %p3253_p5 = pmov %p3252_p8 }
 0x176   : > { %2498 = dma.done.wait (%p3253_p5), [#allocation12], 272   ;;  %p3254_p7 = pmov %p3253_p5 }
 0x177   : > { %p3255_p6 = pmov %p3253_p5 }
 0x178   : > { %2500 = vsyncadd (%p3254_p7), [#allocation12], 4294967024 }
 0x179   : > { %2502 = dma.done.wait (%p3255_p6), [#allocation15], 32   ;;  %p3256_p9 = pmov %p3253_p5 }
 0x17a   : > { %p3257_p4 = pmov %p3253_p5 }
 0x17b   : > { %2504 = vsyncadd (%p3256_p9), [#allocation15], 4294967264 }
 0x17c   : > { %2506 = dma.done.wait (%p3257_p4), [#allocation18], 272   ;;  %p3258_p13 = pmov %p3257_p4 }
 0x17d   : > { %p3259_p1 = pmov %p3257_p4 }
 0x17e   : > { %2508 = vsyncadd (%p3258_p13), [#allocation18], 4294967024 }
 0x17f   : > { %2510 = dma.done.wait (%p3259_p1), [#allocation21], 1040   ;;  %p3260_p3 = pmov %p3259_p1 }
 0x180   : > { %vm618_vm0 = vcmask 257024   ;;  %v3036_v0 = vld [vmem:[%s523_s23] sm:$0xf]  ;;  %v2039_v7 = vld [vmem:[#allocation8] sm:$0xff]   ;;  %v2548_v8 = vmov 0.0   ;;  %vm2549_vm1 = vmmov 0  }
 0x181   : > { %2512 = vsyncadd (%p3260_p3), [#allocation21], 4294966256  ;;  %v619_v1 = vsel %vm618_vm0, %v3036_v0, 0.0  ;;  %1768 = vmatprep.subr.bf16.mxu0 %v2548_v8  ;;  %1772 = vmatprep.mubr.msk.bf16.mxu0 %vm2549_vm1, %v2548_v8  ;;  %v2040_v9 = vld [vmem:[#allocation8 + $0x8] sm:$0xff]   ;;  %v1697_v14 = vld [vmem:[#allocation5] ss:$0 sm:$0xff] }
 0x182   : > { %620 = vadd.xlane.f32.xlu0 %v619_v1  ;;  %1769 = vmatpush3.bf16.msra.mxu0 %v2039_v7  ;;  %v1698_v16 = vld [vmem:[#allocation7] ss:$0 sm:$0xff]  ;;  %vm671_vm2 = vcmask 261120   ;;  %v1699_v20 = vld [vmem:[#allocation10] ss:$0 sm:$0xff]  ;;  %s2550_s24 = smov 104  }
 0x183   : > { %1788 = vmatprep.subr.bf16.mxu1 %v2548_v8  ;;  %1770 = vmatprep.subr.bf16.mxu0 %v2548_v8  ;;  %s2551_s20 = smov 120   ;;  %s2552_s14 = smov 112   ;;  %vm725_vm3 = vcmask 64512   ;;  %vm920_vm4 = vcmask 27648   ;;  %vm975_vm5 = vcmask 1041408   ;;  %vm971_vm6 = vcmask 31744  }
 0x184   : > { %1790 = vmatprep.mubr.msk.bf16.mxu1 %vm2549_vm1, %v2548_v8  ;;  %s2553_s13 = smov 96   ;;  %s2554_s16 = smov 64   ;;  %vm1176_vm7 = vcmask 130048   ;;  %vm1178_vm8 = vcmask 195584  }
 0x185   : > { %s2555_s22 = smov 8   ;;  %s2556_s30 = smov 16  }
 0x186   : > { %1771 = vmatpush3.bf16.msra.mxu0 %v2040_v9  ;;  %s2557_s2 = smov 24   ;;  %s1731_s17 = sshll.u32 %s3248_s15, 6 }
 0x187   : > { %1776 = vmatprep.subr.bf16.mxu0 %v2548_v8  ;;  %s613_s23 = scalar_lea.vmem [#allocation23], %s1683_s0  ;;  %s1468_s0 = scalar_lea.sflag [#allocation4], %s3002_s19 }
 0x188   : > { %p3262_p0 = scmp.ne.s32.totalorder %s3242_s3, 0 }
 0x20f   : > { %v621_v2 = vpop.xlane.xlu0 %620 }
 0x210   : > { %v623_v3 = vmul.f32 0.03125, %v621_v2 }
 0x212   : > { %v624_v4 = vsub.f32 %v3036_v0, %v623_v3 }
 0x214   : > { %v625_v5 = vmul.f32 %v624_v4, %v624_v4 }
 0x216   : > { %v626_v6 = vsel %vm618_vm0, %v625_v5, 0.0 }
 0x217   : > { %627 = vadd.xlane.f32.xlu0 %v626_v6 }
 0x2a4   : > { %v628_v10 = vpop.xlane.xlu0 %627 }
 0x2a5   : > { %v629_v11 = vmul.f32 0.03125, %v628_v10 }
 0x2a7   : > { %v630_v12 = vadd.f32 1e-05, %v629_v11 }
 0x2a9   : > { %2053 = vrsqrt.f32 %v630_v12 }
 0x2b3   : > { %v2054_v13 = vpop.eup %2053 }
 0x2b4   : > { %v632_v15 = vmul.f32 %v2054_v13, %v624_v4 }
 0x2b6   : > { %v639_v17 = vmul.f32 %v1697_v14, %v632_v15 }
 0x2b8   : > { %v646_v18 = vadd.f32 %v1698_v16, %v639_v17 }
 0x2ba   : > { %v647_v19 = vpack.c.bf16 %v646_v18, %v646_v18 }
 0x2bc   : > { %1773 = vmatmul.mubr.msk.bf16.vlgmr.msra.gmra.mrb[0].mxu0 %vm671_vm2, %v647_v19 }
 0x2bd   : > { %1778 = vmatprep.mubr.msk.bf16.mxu0 %vm2549_vm1, %v2548_v8 }
 0x38f   : > { %v709_v21 = vpop.f32.mrb[0].mxu0 }
 0x390   : > { %v710_v22 = vadd.f32 %v1699_v20, %v709_v21  ;;  %v1774_v23 = vpop.f32.mrb[1].mxu0 }
 0x391   : > { %v712_v24 = vpop.f32.mrb[2].mxu0 }
 0x392   : > { %v3053_v25 = vpack.c.bf16 %v710_v22, %v710_v22  ;;  %v1775_v26 = vpop.f32.mrb[3].mxu0 }
 0x394   : > { %721 = vrot.lane.b32.xlu0 %v3053_v25, %s2550_s24  ;;  %717 = vrot.lane.b32.xlu1 %v3053_v25, %s2551_s20  ;;  %s1481_s24 = sshll.u32 %s613_s23, 4  ;;  %s3159_s24 = int_to_ptr.vmem [resolvable:$true] %s1481_s24 }
 0x395   : > { %s2441_s15 = scalar_lea.vmem %s3159_s24, 64 }
 0x396   : > { %p2442_p2 = scmp.ne.s32.totalorder %s3159_s24, %s2441_s15 }
 0x398   : > { %719 = vrot.lane.b32.xlu1 %v3053_v25, %s2552_s14  ;;  %p2443_p10 = pnand %p2442_p2, %p3262_p0 }
 0x39a   : > { %p2444_p11 = pneg %p2443_p10 }
 0x39c   : > { %723 = vrot.lane.b32.xlu1 %v3053_v25, %s2553_s13 }
 0x406   : > { %v3059_v27 = vpop.permute.xlu1 %717  ;;  %v3065_v29 = vpop.permute.xlu0 %721 }
 0x407   : > { %772 = vrot.lane.b32.xlu1 %v3059_v27, %s2553_s13 }
 0x40a   : > { %v3062_v28 = vpop.permute.xlu1 %719 }
 0x40b   : > { %820 = vrot.lane.b32.xlu1 %v3062_v28, %s2553_s13 }
 0x40e   : > { %v724_v30 = vpop.permute.xlu1 %723 }
 0x40f   : > { %v730_v31 = vsel %vm725_vm3, %v724_v30, 0  ;;  %868 = vrot.lane.b32.xlu1 %v3065_v29, %s2553_s13  ;;  %s3261_s13 = sld [smem:[#allocation38_spill]] }
 0x410   : > { %1777 = vmatpush3.bf16.xpose.msra.mxu0 %v730_v31 }
 0x411   : > { %1782 = vmatprep.subr.bf16.mxu0 %v2548_v8 }
 0x417   : > { %1779 = vmatmul.mubr.msk.bf16.vlgmr.msra.gmra.mrb[4].mxu0 %vm725_vm3, %v3053_v25 }
 0x418   : > { %1784 = vmatprep.mubr.msk.bf16.mxu0 %vm2549_vm1, %v2548_v8 }
 0x479   : > { %v773_v32 = vpop.permute.xlu1 %772 }
 0x47a   : > { %v778_v33 = vsel %vm725_vm3, %v773_v32, 0 }
 0x47b   : > { %1783 = vmatpush3.bf16.xpose.msra.mxu0 %v778_v33 }
 0x47c   : > { %1794 = vmatprep.subr.bf16.mxu0 %v2548_v8 }
 0x47d   : > { %v821_v34 = vpop.permute.xlu1 %820 }
 0x47e   : > { %v826_v35 = vsel %vm725_vm3, %v821_v34, 0 }
 0x47f   : > { %1789 = vmatpush3.bf16.xpose.msra.mxu1 %v826_v35 }
 0x480   : > { %1800 = vmatprep.subr.bf16.mxu1 %v2548_v8 }
 0x481   : > { %v869_v36 = vpop.permute.xlu1 %868 }
 0x482   : > { %v874_v37 = vsel %vm725_vm3, %v869_v36, 0  ;;  %1785 = vmatmul.mubr.msk.bf16.vlgmr.msra.gmra.mrb[8].mxu0 %vm725_vm3, %v3059_v27 }
 0x483   : > { %1795 = vmatpush3.bf16.xpose.msra.mxu0 %v874_v37  ;;  %1796 = vmatprep.mubr.msk.bf16.mxu0 %vm2549_vm1, %v2548_v8 }
 0x484   : > { %1806 = vmatprep.subr.bf16.mxu0 %v2548_v8 }
 0x486   : > { %1791 = vmatmul.mubr.msk.bf16.vlgmr.msra.gmra.mrb[0].mxu1 %vm725_vm3, %v3062_v28 }
 0x487   : > { %1802 = vmatprep.mubr.msk.bf16.mxu1 %vm2549_vm1, %v2548_v8 }
 0x48a   : > { %1797 = vmatmul.mubr.msk.bf16.vlgmr.msra.gmra.mrb[12].mxu0 %vm725_vm3, %v3065_v29 }
 0x48b   : > { %1808 = vmatprep.mubr.msk.bf16.mxu0 %vm2549_vm1, %v2548_v8 }
 0x4ea   : > { %v766_v38 = vpop.f32.mrb[4].mxu0 }
 0x4eb   : > { %v916_v39 = vmul.f32 0.35355338, %v766_v38  ;;  %v1780_v40 = vpop.f32.mrb[5].mxu0 }
 0x4ec   : > { %v769_v41 = vpop.f32.mrb[6].mxu0 }
 0x4ed   : > { %v1781_v42 = vpop.f32.mrb[7].mxu0  ;;  %v921_v43 = vsel %vm920_vm4, %v916_v39, -inf }
 0x4ee   : > { %922 = vmax.xlane.f32.xlu1 %v921_v43 }
 0x555   : > { %v814_v44 = vpop.f32.mrb[8].mxu0 }
 0x556   : > { %v917_v45 = vmul.f32 0.35355338, %v814_v44  ;;  %v1786_v46 = vpop.f32.mrb[9].mxu0 }
 0x557   : > { %v817_v47 = vpop.f32.mrb[10].mxu0 }
 0x558   : > { %v1787_v48 = vpop.f32.mrb[11].mxu0  ;;  %v924_v49 = vsel %vm920_vm4, %v917_v45, -inf }
 0x559   : > { %v862_v50 = vpop.f32.mrb[0].mxu1  ;;  %925 = vmax.xlane.f32.xlu0 %v924_v49  ;;  %v2041_v48 = vld [vmem:[#allocation11] sm:$0xff]   ;;  %v2042_v49 = vld [vmem:[#allocation11 + $0x8] sm:$0xff]  }
 0x55a   : > { %v918_v51 = vmul.f32 0.35355338, %v862_v50  ;;  %v1792_v52 = vpop.f32.mrb[1].mxu1 }
 0x55b   : > { %v865_v53 = vpop.f32.mrb[2].mxu1 }
 0x55c   : > { %v1793_v54 = vpop.f32.mrb[3].mxu1  ;;  %v927_v55 = vsel %vm920_vm4, %v918_v51, -inf }
 0x55d   : > { %928 = vmax.xlane.f32.xlu1 %v927_v55  ;;  %v910_v56 = vpop.f32.mrb[12].mxu0 }
 0x55e   : > { %v919_v57 = vmul.f32 0.35355338, %v910_v56  ;;  %v1798_v58 = vpop.f32.mrb[13].mxu0 }
 0x55f   : > { %v913_v59 = vpop.f32.mrb[14].mxu0 }
 0x560   : > { %v1799_v60 = vpop.f32.mrb[15].mxu0  ;;  %v930_v61 = vsel %vm920_vm4, %v919_v57, -inf }
 0x561   : > { %931 = vmax.xlane.f32.xlu0 %v930_v61 }
 0x56e   : > { %969 = vrot.lane.b32.xlu1 %v3053_v25, %s2554_s16 }
 0x57b   : > { %v923_v62 = vpop.xlane.xlu1 %922 }
 0x57c   : > { %v933_v63 = vsub.f32 %v916_v39, %v923_v62 }
 0x57e   : > { %v937_v1 = vmul.f32 1.442695, %v933_v63 }
 0x580   : > { %2055 = vpow2.f32 %v937_v1 }
 0x58a   : > { %v2056_v2 = vpop.eup %2055 }
 0x58b   : > { %v945_v3 = vsel %vm920_vm4, %v2056_v2, 0.0 }
 0x592   : > { %946 = vadd.xlane.f32.xlu1 %v945_v3 }
 0x5e6   : > { %v926_v4 = vpop.xlane.xlu0 %925 }
 0x5e7   : > { %v934_v5 = vsub.f32 %v917_v45, %v926_v4 }
 0x5e9   : > { %v939_v6 = vmul.f32 1.442695, %v934_v5 }
 0x5ea   : > { %v929_v7 = vpop.xlane.xlu1 %928 }
 0x5eb   : > { %2057 = vpow2.f32 %v939_v6  ;;  %v935_v9 = vsub.f32 %v918_v51, %v929_v7  ;;  %v1711_v6 = vld [vmem:[#allocation13] ss:$0 sm:$0xff] }
 0x5ed   : > { %v941_v10 = vmul.f32 1.442695, %v935_v9 }
 0x5ee   : > { %v970_v11 = vpop.permute.xlu1 %969  ;;  %v932_v12 = vpop.xlane.xlu0 %931 }
 0x5ef   : > { %2059 = vpow2.f32 %v941_v10  ;;  %v977_v13 = vsel %vm975_vm5, %v970_v11, 0  ;;  %v936_v14 = vsub.f32 %v919_v57, %v932_v12 }
 0x5f0   : > { %1801 = vmatpush3.bf16.msra.mxu1 %v977_v13 }
 0x5f1   : > { %v943_v15 = vmul.f32 1.442695, %v936_v14  ;;  %1812 = vmatprep.subr.bf16.mxu1 %v2548_v8 }
 0x5f3   : > { %2061 = vpow2.f32 %v943_v15 }
 0x5f5   : > { %v2058_v16 = vpop.eup %2057 }
 0x5f6   : > { %v948_v17 = vsel %vm920_vm4, %v2058_v16, 0.0 }
 0x5f7   : > { %949 = vadd.xlane.f32.xlu0 %v948_v17 }
 0x5f9   : > { %v2060_v18 = vpop.eup %2059 }
 0x5fa   : > { %v951_v19 = vsel %vm920_vm4, %v2060_v18, 0.0 }
 0x5fb   : > { %952 = vadd.xlane.f32.xlu1 %v951_v19 }
 0x5fd   : > { %v2062_v20 = vpop.eup %2061 }
 0x5fe   : > { %v954_v21 = vsel %vm920_vm4, %v2062_v20, 0.0 }
 0x5ff   : > { %955 = vadd.xlane.f32.xlu0 %v954_v21  ;;  %v2044_v21 = vld [vmem:[#allocation17 + $0x8] sm:$0xff]  }
 0x60c   : > { %1067 = vrot.lane.b32.xlu1 %v3062_v28, %s2554_s16 }
 0x610   : > { %1115 = vrot.lane.b32.xlu1 %v3065_v29, %s2554_s16 }
 0x615   : > { %1019 = vrot.lane.b32.xlu0 %v3059_v27, %s2554_s16  ;;  %s3157_s16 = scalar_lea.hbm %s3261_s13, %s1731_s17 }
 0x61f   : > { %v947_v22 = vpop.xlane.xlu1 %946 }
 0x620   : > { %2063 = vrcp.f32 %v947_v22 }
 0x62a   : > { %v2064_v23 = vpop.eup %2063 }
 0x62b   : > { %v961_v24 = vmul.f32 %v2064_v23, %v2056_v2 }
 0x62d   : > { %v965_v25 = vpack.c.bf16 %v961_v24, %v961_v24 }
 0x62f   : > { %1803 = vmatmul.mubr.msk.bf16.vlgmr.msra.gmra.mrb[4].mxu1 %vm971_vm6, %v965_v25  ;;  %v1715_v25 = vld [vmem:[#allocation14] ss:$0 sm:$0xff] }
 0x630   : > { %1814 = vmatprep.mubr.msk.bf16.mxu1 %vm2549_vm1, %v2548_v8 }
 0x684   : > { %v950_v26 = vpop.xlane.xlu0 %949 }
 0x685   : > { %2065 = vrcp.f32 %v950_v26 }
 0x688   : > { %v953_v28 = vpop.xlane.xlu1 %952 }
 0x689   : > { %2067 = vrcp.f32 %v953_v28  ;;  %v1716_v28 = vld [vmem:[#allocation16] ss:$0 sm:$0xff] }
 0x68c   : > { %v1068_v30 = vpop.permute.xlu1 %1067  ;;  %v956_v29 = vpop.xlane.xlu0 %955 }
 0x68d   : > { %v1073_v31 = vsel %vm975_vm5, %v1068_v30, 0  ;;  %2069 = vrcp.f32 %v956_v29 }
 0x68e   : > { %1813 = vmatpush3.bf16.msra.mxu1 %v1073_v31 }
 0x68f   : > { %v2066_v27 = vpop.eup %2065  ;;  %1824 = vmatprep.subr.bf16.mxu1 %v2548_v8 }
 0x690   : > { %v962_v32 = vmul.f32 %v2066_v27, %v2058_v16  ;;  %v1020_v33 = vpop.permute.xlu0 %1019  ;;  %v1116_v35 = vpop.permute.xlu1 %1115  ;;  %v2045_v27 = vld [vmem:[#allocation20] sm:$0xff]  }
 0x691   : > { %v1025_v34 = vsel %vm975_vm5, %v1020_v33, 0  ;;  %v1121_v39 = vsel %vm975_vm5, %v1116_v35, 0  ;;  %v2047_v33 = vld [vmem:[#allocation20 + $0x10] sm:$0xff]   ;;  %v2049_v35 = vld [vmem:[#allocation20 + $0x20] sm:$0xff]  }
 0x692   : > { %1807 = vmatpush3.bf16.msra.mxu0 %v1025_v34  ;;  %v966_v36 = vpack.c.bf16 %v962_v32, %v962_v32  ;;  %v2046_v32 = vld [vmem:[#allocation20 + $0x8] sm:$0xff]   ;;  %v2048_v34 = vld [vmem:[#allocation20 + $0x18] sm:$0xff]  }
 0x693   : > { %v2068_v37 = vpop.eup %2067  ;;  %1818 = vmatprep.subr.bf16.mxu0 %v2548_v8 }
 0x694   : > { %v963_v38 = vmul.f32 %v2068_v37, %v2060_v18  ;;  %v2051_v37 = vld [vmem:[#allocation20 + $0x30] sm:$0xff]  }
 0x695   : > { %1809 = vmatmul.mubr.msk.bf16.vlgmr.msra.gmra.mrb[16].mxu0 %vm971_vm6, %v966_v36  ;;  %v2050_v36 = vld [vmem:[#allocation20 + $0x28] sm:$0xff]  }
 0x696   : > { %1819 = vmatpush3.bf16.msra.mxu0 %v1121_v39  ;;  %v967_v40 = vpack.c.bf16 %v963_v38, %v963_v38  ;;  %1820 = vmatprep.mubr.msk.bf16.mxu0 %vm2549_vm1, %v2548_v8  ;;  %v2052_v38 = vld [vmem:[#allocation20 + $0x38] sm:$0xff]  }
 0x697   : > { %v2070_v41 = vpop.eup %2069  ;;  %1832 = vmatprep.subr.bf16.mxu0 %v2548_v8  ;;  %v1717_v39 = vld [vmem:[#allocation19] ss:$0 sm:$0xff] }
 0x698   : > { %v964_v42 = vmul.f32 %v2070_v41, %v2062_v20  ;;  %1815 = vmatmul.mubr.msk.bf16.vlgmr.msra.gmra.mrb[8].mxu1 %vm971_vm6, %v967_v40  ;;  %v2043_v20 = vld [vmem:[#allocation17] sm:$0xff]  }
 0x699   : > { %1828 = vmatprep.mubr.msk.bf16.mxu1 %vm2549_vm1, %v2548_v8  ;;  %1825 = vmatpush3.bf16.msra.mxu1 %v2041_v48 }
 0x69a   : > { %v968_v43 = vpack.c.bf16 %v964_v42, %v964_v42  ;;  %1826 = vmatprep.subr.bf16.mxu1 %v2548_v8 }
 0x69d   : > { %1821 = vmatmul.mubr.msk.bf16.vlgmr.msra.gmra.mrb[20].mxu0 %vm971_vm6, %v968_v43  ;;  %1827 = vmatpush3.bf16.msra.mxu1 %v2042_v49 }
 0x69e   : > { %1836 = vmatprep.mubr.msk.bf16.mxu0 %vm2549_vm1, %v2548_v8  ;;  %1840 = vmatprep.subr.bf16.mxu1 %v2548_v8 }
 0x69f   : > { %1833 = vmatpush3.bf16.msra.mxu0 %v2043_v20 }
 0x6a0   : > { %1834 = vmatprep.subr.bf16.mxu0 %v2548_v8 }
 0x6a3   : > { %1835 = vmatpush3.bf16.msra.mxu0 %v2044_v21 }
 0x702   : > { %v1013_v44 = vpop.f32.mrb[4].mxu1 }
 0x703   : > { %v1804_v45 = vpop.f32.mrb[5].mxu1 }
 0x704   : > { %v1016_v46 = vpop.f32.mrb[6].mxu1 }
 0x705   : > { %v1805_v47 = vpop.f32.mrb[7].mxu1 }
 0x768   : > { %v1061_v50 = vpop.f32.mrb[16].mxu0 }
 0x769   : > { %1164 = vrot.lane.b32.xlu0 %v1061_v50, %s2555_s22  ;;  %v1810_v51 = vpop.f32.mrb[17].mxu0  ;;  %s2558_s22 = smov [#allocation23]  }
 0x76a   : > { %v1064_v52 = vpop.f32.mrb[18].mxu0 }
 0x76b   : > { %v1811_v53 = vpop.f32.mrb[19].mxu0  ;;  %v1109_v54 = vpop.f32.mrb[8].mxu1 }
 0x76c   : > { %1168 = vrot.lane.b32.xlu1 %v1109_v54, %s2556_s30  ;;  %v1816_v55 = vpop.f32.mrb[9].mxu1  ;;  %v1721_v54 = vld [vmem:[#allocation22] ss:$0 sm:$0xff]  ;;  %s2445_s30 = sshll.u32 %s2558_s22, 4  ;;  %s2446_s30 = int_to_ptr.vmem [resolvable:$false] %s2445_s30 }
 0x76d   : > { %v1112_v56 = vpop.f32.mrb[10].mxu1  ;;  %p2448_p12 = scmp.lt.s32.totalorder %s3159_s24, %s2446_s30 }
 0x76e   : > { %v1817_v57 = vpop.f32.mrb[11].mxu1 }
 0x770   : > { %v1157_v58 = vpop.f32.mrb[20].mxu0 }
 0x771   : > { %1172 = vrot.lane.b32.xlu0 %v1157_v58, %s2557_s2  ;;  %v1822_v59 = vpop.f32.mrb[21].mxu0  ;;  %s2447_s2 = scalar_lea.vmem %s2446_s30, 128 }
 0x772   : > { %v1160_v60 = vpop.f32.mrb[22].mxu0  ;;  %p2449_p8 = scmp.lt.s32.totalorder %s2447_s2, %s2441_s15 }
 0x773   : > { %v1823_v61 = vpop.f32.mrb[23].mxu0 }
 0x774   : > { %p2450_p5 = por %p2449_p8, %p2448_p12 }
 0x776   : > { %p2451_p7 = pnand %p2450_p5, %p2444_p11 }
 0x7db   : > { %v1165_v62 = vpop.permute.xlu0 %1164 }
 0x7dc   : > { %v1175_v1 = vsel %vm725_vm3, %v1013_v44, %v1165_v62 }
 0x7de   : > { %v1169_v63 = vpop.permute.xlu1 %1168 }
 0x7df   : > { %v1177_v2 = vsel %vm1176_vm7, %v1175_v1, %v1169_v63 }
 0x7e3   : > { %v1173_v3 = vpop.permute.xlu0 %1172 }
 0x7e4   : > { %v1179_v4 = vsel %vm1178_vm8, %v1177_v2, %v1173_v3 }
 0x7e5   : > { %v1180_v5 = vpack.c.bf16 %v1179_v4, %v1179_v4 }
 0x7e7   : > { %1829 = vmatmul.mubr.msk.bf16.vlgmr.msra.gmra.mrb[12].mxu1 %vm671_vm2, %v1180_v5 }
 0x7e8   : > { %1856 = vmatprep.mubr.msk.bf16.mxu1 %vm2549_vm1, %v2548_v8  ;;  %1841 = vmatpush3.bf16.msra.mxu1 %v2045_v27 }
 0x7e9   : > { %1842 = vmatprep.subr.bf16.mxu1 %v2548_v8 }
 0x7ec   : > { %1843 = vmatpush3.bf16.msra.mxu1 %v2046_v32 }
 0x7ed   : > { %1844 = vmatprep.subr.bf16.mxu1 %v2548_v8 }
 0x7f0   : > { %1845 = vmatpush3.bf16.msra.mxu1 %v2047_v33 }
 0x7f1   : > { %1846 = vmatprep.subr.bf16.mxu1 %v2548_v8 }
 0x7f4   : > { %1847 = vmatpush3.bf16.msra.mxu1 %v2048_v34 }
 0x7f5   : > { %1848 = vmatprep.subr.bf16.mxu1 %v2548_v8 }
 0x7f8   : > { %1849 = vmatpush3.bf16.msra.mxu1 %v2049_v35 }
 0x7f9   : > { %1850 = vmatprep.subr.bf16.mxu1 %v2548_v8 }
 0x7fc   : > { %1851 = vmatpush3.bf16.msra.mxu1 %v2050_v36 }
 0x7fd   : > { %1852 = vmatprep.subr.bf16.mxu1 %v2548_v8 }
 0x800   : > { %1853 = vmatpush3.bf16.msra.mxu1 %v2051_v37 }
 0x801   : > { %1854 = vmatprep.subr.bf16.mxu1 %v2548_v8 }
 0x804   : > { %1855 = vmatpush3.bf16.msra.mxu1 %v2052_v38 }
 0x8ba   : > { %v1241_v7 = vpop.f32.mrb[12].mxu1 }
 0x8bb   : > { %v1242_v9 = vadd.f32 %v1711_v6, %v1241_v7  ;;  %v1830_v10 = vpop.f32.mrb[13].mxu1 }
 0x8bc   : > { %v1244_v11 = vpop.f32.mrb[14].mxu1 }
 0x8bd   : > { %v3135_v12 = vadd.f32 %v1242_v9, %v3036_v0  ;;  %v1831_v13 = vpop.f32.mrb[15].mxu1 }
 0x8bf   : > { %v1250_v14 = vsel %vm618_vm0, %v3135_v12, 0.0 }
 0x8c0   : > { %1251 = vadd.xlane.f32.xlu1 %v1250_v14 }
 0x94d   : > { %v1252_v15 = vpop.xlane.xlu1 %1251 }
 0x94e   : > { %v1253_v16 = vmul.f32 0.03125, %v1252_v15 }
 0x950   : > { %v1254_v17 = vsub.f32 %v3135_v12, %v1253_v16 }
 0x952   : > { %v1255_v18 = vmul.f32 %v1254_v17, %v1254_v17 }
 0x954   : > { %v1256_v19 = vsel %vm618_vm0, %v1255_v18, 0.0 }
 0x955   : > { %1257 = vadd.xlane.f32.xlu0 %v1256_v19 }
 0x9e2   : > { %v1258_v0 = vpop.xlane.xlu0 %1257 }
 0x9e3   : > { %v1259_v22 = vmul.f32 0.03125, %v1258_v0 }
 0x9e5   : > { %v1260_v23 = vadd.f32 1e-05, %v1259_v22 }
 0x9e7   : > { %2071 = vrsqrt.f32 %v1260_v23 }
 0x9f1   : > { %v2072_v24 = vpop.eup %2071 }
 0x9f2   : > { %v1262_v26 = vmul.f32 %v2072_v24, %v1254_v17 }
 0x9f4   : > { %v1269_v30 = vmul.f32 %v1715_v25, %v1262_v26 }
 0x9f6   : > { %v1276_v29 = vadd.f32 %v1716_v28, %v1269_v30 }
 0x9f8   : > { %v1277_v31 = vpack.c.bf16 %v1276_v29, %v1276_v29 }
 0x9fa   : > { %1837 = vmatmul.mubr.msk.bf16.vlgmr.msra.gmra.mrb[24].mxu0 %vm671_vm2, %v1277_v31 }
 0xacd   : > { %v1338_v40 = vpop.f32.mrb[24].mxu0 }
 0xace   : > { %v1339_v41 = vadd.f32 %v1717_v39, %v1338_v40  ;;  %v1838_v42 = vpop.f32.mrb[25].mxu0 }
 0xacf   : > { %v1341_v43 = vpop.f32.mrb[26].mxu0 }
 0xad0   : > { %v1344_v44 = vmul.f32 %v1339_v41, %v1339_v41  ;;  %v1839_v45 = vpop.f32.mrb[27].mxu0 }
 0xad2   : > { %v1345_v46 = vmul.f32 %v1344_v44, %v1339_v41 }
 0xad4   : > { %v1346_v47 = vmul.f32 0.044715, %v1345_v46 }
 0xad6   : > { %v1347_v48 = vadd.f32 %v1346_v47, %v1339_v41 }
 0xad8   : > { %v1348_v49 = vmul.f32 0.7978846, %v1347_v48 }
 0xada   : > { %2073 = vtanh.f32 %v1348_v49 }
 0xae4   : > { %v2074_v50 = vpop.eup %2073 }
 0xae5   : > { %v1350_v51 = vadd.f32 1.0, %v2074_v50 }
 0xae7   : > { %v1351_v52 = vmul.f32 0.5, %v1350_v51 }
 0xae9   : > { %v1352_v53 = vmul.f32 %v1351_v52, %v1339_v41 }
 0xaeb   : > { %v1353_v8 = vpack.c.bf16 %v1352_v53, %v1352_v53 }
 0xaed   : > { %1857 = vmatmul.mubr.bf16.vlgmr.msra.gmra.mrb[16].mxu1 %v1353_v8 }
 0xbc0   : > { %v1459_v55 = vpop.f32.mrb[16].mxu1 }
 0xbc1   : > { %v1460_v56 = vadd.f32 %v1721_v54, %v1459_v55  ;;  %v1858_v57 = vpop.f32.mrb[17].mxu1 }
 0xbc2   : > { %v1462_v58 = vpop.f32.mrb[18].mxu1 }
 0xbc3   : > { %v1465_v59 = vadd.f32 %v1460_v56, %v3135_v12  ;;  %v1859_v60 = vpop.f32.mrb[19].mxu1 }
 0xbc5   : > { %1466 = vst.msk [vmem:[%s613_s23] sm:$0xf] %vm618_vm0, %v1465_v59 }
 0xbc6   : > { %2454 = shalt.err (!%p2451_p7)
}
 0xbc7   : > { %s2455_s19 = scalar_lea.hbm %s3157_s16, 64  ;;  %s2459_s20 = scalar_lea.hbm %s3261_s13, 128 }
 0xbc8   : > { %p2456_p6 = scmp.ne.s32.totalorder %s3157_s16, %s2455_s19  ;;  %p2460_p13 = scmp.lt.u32.totalorder %s3157_s16, %s3261_s13 }
 0xbc9   : > { %p2461_p1 = scmp.lt.u32.totalorder %s2459_s20, %s2455_s19  ;;  %p2463_p2 = scmp.lt.u32.totalorder %s2455_s19, %s3157_s16 }
 0xbca   : > { %p2457_p9 = pnand %p2456_p6, %p3262_p0 }
 0xbcb   : > { %p2462_p3 = por %p2461_p1, %p2460_p13 }
 0xbcc   : > { %p2458_p4 = pneg %p2457_p9 }
 0xbcd   : > { %p2464_p10 = por %p2463_p2, %p2462_p3 }
 0xbcf   : > { %p2465_p11 = pnand %p2464_p10, %p2458_p4 }
 0xbd1   : > { %2468 = shalt.err (!%p2465_p11)
}
 0xbd2   : > { %1910 = dma.vmem_to_hbm [thread:$0]  (%p3262_p0), %s3159_s24, 64, %s3157_s16, %s1468_s0  }
 0xbd3 PF: > { %s1493_s15 = sand.u32 1, %s2519_s25   ;;  %p3263_p12 = scmp.ne.s32.totalorder %s3243_s21, 0 }
 0xbd4   : > { %p3264_p8 = scmp.ge.s32.totalorder %s2531_s28, 2  ;;  %s1494_s30 = scalar_lea.sflag [#allocation4], %s1493_s15 }
 0xbd6   : > { %p1954_p5 = pnand %p3264_p8, %p3263_p12 }
 0xbd8   : > { %2514 = dma.done.wait (!%p1954_p5), %s1494_s30, 64  }
 0xbd9   : > { %2516 = vsyncadd (!%p1954_p5), %s1494_s30, 4294967232  ;;  %p32_p7 = scmp.ge.s32.totalorder %s2926_s18, 4   ;;  %s3265_s25 = smov %s2523_s26 }
 0xbda   : > { %s3266_s26 = smov %s2527_s27  ;;  %s3267_s27 = smov %s2937_s29 }
 0xbdb   : > { %s3268_s28 = smov %s2926_s18  ;;  %34 = sbr.rel (!%p32_p7) target bundleno = 17 (0x11), region = 165 }
 0xbe2   :  { %1499 = vsyncpa [#allocation3], 1 }
 0xbe3   :  { %1501 = vsyncpa [#allocation3 + $0x1], 1 }
 0xbe4   :  { %1502 = vsyncpa [#allocation6], 1 }
 0xbe5   :  { %1503 = vsyncpa [#allocation9], 1 }
 0xbe6   :  { %1504 = vsyncpa [#allocation12], 1 }
 0xbe7   :  { %1505 = vsyncpa [#allocation15], 1 }
 0xbe8   :  { %1506 = vsyncpa [#allocation18], 1 }
 0xbe9   :  { %1507 = vsyncpa [#allocation21], 1 }
 0xbea   :  { %1508 = vsyncpa [#allocation4], 1 }
 0xbeb   :  { %1510 = vsyncpa [#allocation4 + $0x1], 1 }

// kernel: transformer_vqvae_forward.13
= control target key start
LH: loop header
LB: loop body
LE: loop exit
PB: predicated region body
PF: predicated region fallthrough
CT: control target
= control target key end

     0   :  { %s3339_s0 = inlined_call_operand.hbm [shape: f32[2,4,32], index: 0, kind: input, shape index: {}]   ;;  %s3340_s1 = inlined_call_operand.hbm [shape: f32[4,32], index: 1, kind: input, shape index: {}]   ;;  %s3341_s2 = inlined_call_operand.hbm [shape: f32[1,32], index: 2, kind: input, shape index: {}]   ;;  %s3342_s3 = inlined_call_operand.hbm [shape: f32[1,32], index: 3, kind: input, shape index: {}]   ;;  %s3343_s4 = inlined_call_operand.hbm [shape: bf16[32,96], index: 4, kind: input, shape index: {}]   ;;  %s3344_s5 = inlined_call_operand.hbm [shape: f32[1,96], index: 5, kind: input, shape index: {}]   ;;  %s3345_s6 = inlined_call_operand.hbm [shape: bf16[32,32], index: 6, kind: input, shape index: {}]   ;;  %s3346_s7 = inlined_call_operand.hbm [shape: f32[1,32], index: 7, kind: input, shape index: {}]   ;;  %s3347_s8 = inlined_call_operand.hbm [shape: f32[1,32], index: 8, kind: input, shape index: {}]   ;;  %s3348_s9 = inlined_call_operand.hbm [shape: f32[1,32], index: 9, kind: input, shape index: {}]   ;;  %s3349_s10 = inlined_call_operand.hbm [shape: bf16[32,128], index: 10, kind: input, shape index: {}]   ;;  %s3350_s11 = inlined_call_operand.hbm [shape: f32[1,128], index: 11, kind: input, shape index: {}]   ;;  %s3351_s12 = inlined_call_operand.hbm [shape: bf16[128,32], index: 12, kind: input, shape index: {}]   ;;  %s3352_s13 = inlined_call_operand.hbm [shape: f32[1,32], index: 13, kind: input, shape index: {}]   ;;  %s3353_s14 = inlined_call_operand.hbm [shape: f32[2,4,32], index: 14, kind: output, shape index: {}]  }
   0x1   :  { %3363 = sst [smem:[#allocation38_spill]] %s3339_s0 }
   0x2   :  { %3364 = sst [smem:[#allocation39_spill]] %s3340_s1 }
   0x3   :  { %3365 = sst [smem:[#allocation40_spill]] %s3341_s2 }
   0x4   :  { %3366 = sst [smem:[#allocation41_spill]] %s3342_s3 }
   0x5   :  { %3367 = sst [smem:[#allocation42_spill]] %s3353_s14 }
   0x6   :  { %19 = vsyncpa [#allocation3], 0 }
   0x7   :  { %21 = vsyncpa [#allocation3 + $0x1], 0 }
   0x8   :  { %22 = vsyncpa [#allocation6], 0 }
   0x9   :  { %23 = vsyncpa [#allocation9], 0 }
   0xa   :  { %24 = vsyncpa [#allocation12], 0 }
   0xb   :  { %25 = vsyncpa [#allocation15], 0 }
   0xc   :  { %26 = vsyncpa [#allocation18], 0 }
   0xd   :  { %27 = vsyncpa [#allocation21], 0 }
   0xe   :  { %28 = vsyncpa [#allocation24], 0 }
   0xf   :  { %29 = vsyncpa [#allocation4], 0 }
  0x10   :  { %31 = vsyncpa [#allocation4 + $0x1], 0  ;;  %s2731_s29 = smov 0   ;;  %s2733_s30 = smov 0  }
  0x11   :  { %s2735_s15 = smov 0   ;;  %s2737_s16 = smov 0  }
  0x12 LB: > { %3368 = sst [smem:[#allocation35_spill]] %s2615_s29  ;;  %s2629_s17 = smov [#allocation5]   ;;  %s2627_s16 = sphi %s2737_s16, %s3410_s16   ;;  %s2623_s15 = sphi %s2735_s15, %s3409_s15   ;;  %s2619_s30 = sphi %s2733_s30, %s3408_s30   ;;  %s2615_s29 = sphi %s2731_s29, %s3407_s29  }
  0x13   : > { %s380_s18 = sshll.u32 %s2629_s17, 4  ;;  %s2752_s19 = sadd.s32 4294967295, %s2627_s16   ;;  %s2757_s18 = int_to_ptr.vmem [resolvable:$true] %s380_s18 }
  0x14   : > { %3369 = sst [smem:[#allocation36_spill]] %s2752_s19  ;;  %p1718_p0 = scmp.ge.s32.totalorder %s2627_s16, 1 }
  0x15   : > { %p3360_p1 = scmp.eq.s32.totalorder %s2752_s19, 0  ;;  %p367_p2 = scmp.lt.s32.totalorder %s2627_s16, 3 }
  0x16   : > { %s2630_s21 = smov [#allocation8]   ;;  %s2631_s23 = smov [#allocation11]  }
  0x17   : > { %p2759_p3 = pnand %p1718_p0, %p367_p2  ;;  %s402_s22 = sshll.u32 %s2630_s21, 4  ;;  %s2766_s22 = int_to_ptr.vmem [resolvable:$true] %s402_s22 }
  0x18   : > { %s426_s24 = sshll.u32 %s2631_s23, 4  ;;  %s2632_s26 = smov [#allocation14]   ;;  %s2774_s24 = int_to_ptr.vmem [resolvable:$true] %s426_s24 }
  0x19   : > { %s3370_s20 = scalar_select %p2759_p3, 1, 0 }
  0x1a   : > { %p1970_p5 = pneg %p2759_p3  ;;  %s2776_s27 = sshll.u32 %s2632_s26, 4  ;;  %s451_s27 = int_to_ptr.vmem [resolvable:$true] %s2776_s27 }
  0x1b   : > { %3371 = sst [smem:[#allocation37_spill]] %s3370_s20  ;;  %s3373_s1 = sld [smem:[#allocation39_spill]] }
  0x1c   : > { %p2770_p6 = pnand %p1970_p5, %p3360_p1 }
  0x1e   : > { %p2786_p8 = pneg %p2770_p6 }
  0x21   : > { %s2139_s14 = scalar_lea.hbm %s3373_s1, 64 }
  0x22   : > { %p2140_p7 = scmp.ne.s32.totalorder %s3373_s1, %s2139_s14  ;;  %p2146_p11 = scmp.lt.u32.totalorder %s2139_s14, %s3373_s1 }
  0x24   : > { %p2142_p9 = pnand %p2786_p8, %p2140_p7 }
  0x26   : > { %p2143_p10 = pneg %p2142_p9 }
  0x28   : > { %p2148_p12 = pnand %p2146_p11, %p2143_p10 }
  0x2a   : > { %2151 = shalt.err (!%p2148_p12)
}
  0x2b   : > { %s2152_s20 = scalar_lea.vmem %s2757_s18, 64  ;;  %p2160_p5 = scmp.lt.s32.totalorder %s2757_s18, %s2757_s18 }
  0x2c   : > { %p2153_p13 = scmp.ne.s32.totalorder %s2757_s18, %s2152_s20  ;;  %p2161_p4 = scmp.lt.s32.totalorder %s2152_s20, %s2152_s20 }
  0x2e   : > { %p2155_p0 = pnand %p2153_p13, %p2786_p8  ;;  %p2162_p7 = por %p2161_p4, %p2160_p5 }
  0x30   : > { %p2156_p2 = pneg %p2155_p0 }
  0x32   : > { %p2163_p9 = pnand %p2162_p7, %p2156_p2 }
  0x34   : > { %2166 = shalt.err (!%p2163_p9)
}
  0x35   : > { %1973 = dma.hbm_to_vmem [thread:$0]  (!%p2770_p6), %s3373_s1, 64, %s2757_s18, [#allocation6]  }
  0x36   : > { %s3375_s3 = sld [smem:[#allocation41_spill]] }
  0x3c   : > { %s2167_s21 = scalar_lea.hbm %s3375_s3, 16 }
  0x3d   : > { %p2168_p10 = scmp.ne.s32.totalorder %s3375_s3, %s2167_s21  ;;  %p2174_p12 = scmp.lt.u32.totalorder %s2167_s21, %s3375_s3 }
  0x3f   : > { %p2170_p4 = pnand %p2168_p10, %p2786_p8 }
  0x41   : > { %p2171_p11 = pneg %p2170_p4 }
  0x43   : > { %p2176_p13 = pnand %p2174_p12, %p2171_p11 }
  0x45   : > { %2179 = shalt.err (!%p2176_p13)
}
  0x46   : > { %s2180_s18 = scalar_lea.vmem %s2766_s22, 16  ;;  %s2187_s19 = scalar_lea.vmem %s2766_s22, 32 }
  0x47   : > { %p2181_p0 = scmp.ne.s32.totalorder %s2766_s22, %s2180_s18  ;;  %p2188_p7 = scmp.lt.s32.totalorder %s2766_s22, %s2766_s22 }
  0x48   : > { %p2189_p9 = scmp.lt.s32.totalorder %s2187_s19, %s2180_s18 }
  0x49   : > { %p2183_p2 = pnand %p2181_p0, %p2786_p8 }
  0x4a   : > { %p2190_p10 = por %p2189_p9, %p2188_p7 }
  0x4b   : > { %p2184_p5 = pneg %p2183_p2 }
  0x4d   : > { %p2191_p4 = pnand %p2190_p10, %p2184_p5 }
  0x4f   : > { %2194 = shalt.err (!%p2191_p4)
}
  0x50   : > { %1979 = dma.hbm_to_vmem [thread:$0]  (!%p2770_p6), %s3375_s3, 16, %s2766_s22, [#allocation9]  }
  0x51   : > { %s2195_s17 = scalar_lea.hbm %s3344_s5, 16 }
  0x52   : > { %p2196_p11 = scmp.ne.s32.totalorder %s3344_s5, %s2195_s17  ;;  %p2202_p0 = scmp.lt.u32.totalorder %s2195_s17, %s3344_s5 }
  0x54   : > { %p2198_p12 = pnand %p2196_p11, %p2786_p8 }
  0x56   : > { %p2199_p13 = pneg %p2198_p12 }
  0x58   : > { %p2204_p2 = pnand %p2202_p0, %p2199_p13 }
  0x5a   : > { %2207 = shalt.err (!%p2204_p2)
}
  0x5b   : > { %s2208_s22 = scalar_lea.vmem %s2774_s24, 16  ;;  %s2215_s19 = scalar_lea.vmem %s2774_s24, 32 }
  0x5c   : > { %p2209_p5 = scmp.ne.s32.totalorder %s2774_s24, %s2208_s22  ;;  %p2216_p10 = scmp.lt.s32.totalorder %s2774_s24, %s2774_s24 }
  0x5d   : > { %p2217_p4 = scmp.lt.s32.totalorder %s2215_s19, %s2208_s22 }
  0x5e   : > { %p2211_p7 = pnand %p2209_p5, %p2786_p8 }
  0x5f   : > { %p2218_p11 = por %p2217_p4, %p2216_p10 }
  0x60   : > { %p2212_p9 = pneg %p2211_p7 }
  0x62   : > { %p2219_p12 = pnand %p2218_p11, %p2212_p9 }
  0x64   : > { %2222 = shalt.err (!%p2219_p12)
}
  0x65   : > { %1985 = dma.hbm_to_vmem [thread:$0]  (!%p2770_p6), %s3344_s5, 16, %s2774_s24, [#allocation12]  }
  0x66   : > { %s2633_s14 = smov [#allocation17]   ;;  %s2223_s26 = scalar_lea.hbm %s3346_s7, 16 }
  0x67   : > { %s472_s28 = sshll.u32 %s2633_s14, 4  ;;  %p2224_p13 = scmp.ne.s32.totalorder %s3346_s7, %s2223_s26  ;;  %s473_s28 = int_to_ptr.vmem [resolvable:$true] %s472_s28 }
  0x68   : > { %p2230_p5 = scmp.lt.u32.totalorder %s2223_s26, %s3346_s7 }
  0x69   : > { %p2226_p0 = pnand %p2224_p13, %p2786_p8 }
  0x6b   : > { %p2227_p2 = pneg %p2226_p0 }
  0x6d   : > { %p2232_p7 = pnand %p2230_p5, %p2227_p2 }
  0x6f   : > { %2235 = shalt.err (!%p2232_p7)
}
  0x70   : > { %s2236_s24 = scalar_lea.vmem %s451_s27, 16  ;;  %s2243_s29 = scalar_lea.vmem %s451_s27, 32 }
  0x71   : > { %p2237_p9 = scmp.ne.s32.totalorder %s451_s27, %s2236_s24  ;;  %p2244_p11 = scmp.lt.s32.totalorder %s451_s27, %s451_s27 }
  0x72   : > { %p2245_p12 = scmp.lt.s32.totalorder %s2243_s29, %s2236_s24 }
  0x73   : > { %p2239_p10 = pnand %p2237_p9, %p2786_p8 }
  0x74   : > { %p2246_p1 = por %p2245_p12, %p2244_p11 }
  0x75   : > { %p2240_p4 = pneg %p2239_p10 }
  0x77   : > { %p2247_p3 = pnand %p2246_p1, %p2240_p4 }
  0x79   : > { %2250 = shalt.err (!%p2247_p3)
}
  0x7a   : > { %1991 = dma.hbm_to_vmem [thread:$0]  (!%p2770_p6), %s3346_s7, 16, %s451_s27, [#allocation15]  }
  0x7b   : > { %s2251_s26 = scalar_lea.hbm %s3348_s9, 16 }
  0x7c   : > { %p2252_p13 = scmp.ne.s32.totalorder %s3348_s9, %s2251_s26  ;;  %p2258_p3 = scmp.lt.u32.totalorder %s2251_s26, %s3348_s9 }
  0x7e   : > { %p2254_p0 = pnand %p2252_p13, %p2786_p8 }
  0x80   : > { %p2255_p1 = pneg %p2254_p0 }
  0x82   : > { %p2260_p2 = pnand %p2258_p3, %p2255_p1 }
  0x84   : > { %2263 = shalt.err (!%p2260_p2)
}
  0x85   : > { %s2264_s24 = scalar_lea.vmem %s473_s28, 16  ;;  %s2271_s27 = scalar_lea.vmem %s473_s28, 32 }
  0x86   : > { %p2265_p5 = scmp.ne.s32.totalorder %s473_s28, %s2264_s24  ;;  %p2272_p10 = scmp.lt.s32.totalorder %s473_s28, %s473_s28 }
  0x87   : > { %p2273_p4 = scmp.lt.s32.totalorder %s2271_s27, %s2264_s24 }
  0x88   : > { %p2267_p7 = pnand %p2265_p5, %p2786_p8 }
  0x89   : > { %p2274_p11 = por %p2273_p4, %p2272_p10 }
  0x8a   : > { %p2268_p9 = pneg %p2267_p7 }
  0x8c   : > { %p2275_p12 = pnand %p2274_p11, %p2268_p9 }
  0x8e   : > { %2278 = shalt.err (!%p2275_p12)
}
  0x8f   : > { %1997 = dma.hbm_to_vmem [thread:$0]  (!%p2770_p6), %s3348_s9, 16, %s473_s28, [#allocation18]  }
  0x90   : > { %s2634_s14 = smov [#allocation20]   ;;  %s2635_s21 = smov [#allocation7]  }
  0x91   : > { %s496_s17 = sshll.u32 %s2634_s14, 4  ;;  %s391_s26 = sshll.u32 %s2635_s21, 4  ;;  %s497_s17 = int_to_ptr.vmem [resolvable:$true] %s496_s17  ;;  %s392_s26 = int_to_ptr.vmem [resolvable:$true] %s391_s26 }
  0x92   : > { %s2279_s22 = scalar_lea.hbm %s3350_s11, 16 }
  0x93   : > { %p2280_p13 = scmp.ne.s32.totalorder %s3350_s11, %s2279_s22  ;;  %p2286_p3 = scmp.lt.u32.totalorder %s2279_s22, %s3350_s11 }
  0x95   : > { %p2282_p0 = pnand %p2280_p13, %p2786_p8 }
  0x97   : > { %p2283_p1 = pneg %p2282_p0 }
  0x99   : > { %p2288_p2 = pnand %p2286_p3, %p2283_p1 }
  0x9b   : > { %2291 = shalt.err (!%p2288_p2)
}
  0x9c   : > { %s2292_s28 = scalar_lea.vmem %s497_s17, 16  ;;  %s2299_s0 = scalar_lea.vmem %s497_s17, 32 }
  0x9d   : > { %p2293_p5 = scmp.ne.s32.totalorder %s497_s17, %s2292_s28  ;;  %p2300_p10 = scmp.lt.s32.totalorder %s497_s17, %s497_s17 }
  0x9e   : > { %p2301_p4 = scmp.lt.s32.totalorder %s2299_s0, %s2292_s28 }
  0x9f   : > { %p2295_p7 = pnand %p2293_p5, %p2786_p8 }
  0xa0   : > { %p2302_p11 = por %p2301_p4, %p2300_p10 }
  0xa1   : > { %p2296_p9 = pneg %p2295_p7 }
  0xa3   : > { %p2303_p12 = pnand %p2302_p11, %p2296_p9 }
  0xa5   : > { %2306 = shalt.err (!%p2303_p12)
}
  0xa6   : > { %2003 = dma.hbm_to_vmem [thread:$0]  (!%p2770_p6), %s3350_s11, 16, %s497_s17, [#allocation21]  }
  0xa7   : > { %s3376_s2 = sld [smem:[#allocation40_spill]] }
  0xad   : > { %s2307_s22 = scalar_lea.hbm %s3376_s2, 16 }
  0xae   : > { %p2308_p13 = scmp.ne.s32.totalorder %s3376_s2, %s2307_s22  ;;  %p2314_p3 = scmp.lt.u32.totalorder %s2307_s22, %s3376_s2 }
  0xb0   : > { %p2310_p0 = pnand %p2308_p13, %p2786_p8 }
  0xb2   : > { %p2311_p1 = pneg %p2310_p0 }
  0xb4   : > { %p2316_p2 = pnand %p2314_p3, %p2311_p1 }
  0xb6   : > { %2319 = shalt.err (!%p2316_p2)
}
  0xb7   : > { %s2320_s28 = scalar_lea.vmem %s392_s26, 16  ;;  %s2327_s17 = scalar_lea.vmem %s392_s26, 32 }
  0xb8   : > { %p2321_p5 = scmp.ne.s32.totalorder %s392_s26, %s2320_s28  ;;  %p2328_p10 = scmp.lt.s32.totalorder %s392_s26, %s392_s26 }
  0xb9   : > { %p2329_p4 = scmp.lt.s32.totalorder %s2327_s17, %s2320_s28 }
  0xba   : > { %p2323_p7 = pnand %p2321_p5, %p2786_p8 }
  0xbb   : > { %p2330_p11 = por %p2329_p4, %p2328_p10 }
  0xbc   : > { %p2324_p9 = pneg %p2323_p7 }
  0xbe   : > { %p2331_p12 = pnand %p2330_p11, %p2324_p9 }
  0xc0   : > { %2334 = shalt.err (!%p2331_p12)
}
  0xc1   : > { %1976 = dma.hbm_to_vmem [thread:$0]  (!%p2770_p6), %s3376_s2, 16, %s392_s26, [#allocation6]  }
  0xc2   : > { %s2636_s21 = smov [#allocation10]   ;;  %s2335_s19 = scalar_lea.hbm %s3343_s4, 256 }
  0xc3   : > { %s412_s20 = sshll.u32 %s2636_s21, 4  ;;  %p2336_p13 = scmp.ne.s32.totalorder %s3343_s4, %s2335_s19  ;;  %s413_s20 = int_to_ptr.vmem [resolvable:$true] %s412_s20 }
  0xc4   : > { %p2342_p3 = scmp.lt.u32.totalorder %s2335_s19, %s3343_s4 }
  0xc5   : > { %p2338_p0 = pnand %p2336_p13, %p2786_p8 }
  0xc7   : > { %p2339_p1 = pneg %p2338_p0 }
  0xc9   : > { %p2344_p2 = pnand %p2342_p3, %p2339_p1 }
  0xcb   : > { %2347 = shalt.err (!%p2344_p2)
}
  0xcc   : > { %s2348_s26 = scalar_lea.vmem %s413_s20, 256  ;;  %p2356_p10 = scmp.lt.s32.totalorder %s413_s20, %s413_s20 }
  0xcd   : > { %p2349_p5 = scmp.ne.s32.totalorder %s413_s20, %s2348_s26  ;;  %p2357_p4 = scmp.lt.s32.totalorder %s2348_s26, %s2348_s26 }
  0xcf   : > { %p2351_p7 = pnand %p2349_p5, %p2786_p8  ;;  %p2358_p11 = por %p2357_p4, %p2356_p10 }
  0xd1   : > { %p2352_p9 = pneg %p2351_p7 }
  0xd3   : > { %p2359_p12 = pnand %p2358_p11, %p2352_p9 }
  0xd5   : > { %2362 = shalt.err (!%p2359_p12)
}
  0xd6   : > { %s2637_s17 = smov 64   ;;  %s2638_s0 = smov 4  }
  0xd7   : > { %1982 = dma.hbm_to_vmem [thread:$0]  (!%p2770_p6), %s3343_s4, 256, %s413_s20, [#allocation9], %s2637_s17, %s2637_s17, %s2638_s0  }
  0xd8   : > { %s2639_s18 = smov [#allocation13]   ;;  %s2640_s19 = smov [#allocation16]  }
  0xd9   : > { %s436_s22 = sshll.u32 %s2639_s18, 4  ;;  %s461_s24 = sshll.u32 %s2640_s19, 4  ;;  %s437_s22 = int_to_ptr.vmem [resolvable:$true] %s436_s22  ;;  %s2949_s24 = int_to_ptr.vmem [resolvable:$true] %s461_s24 }
  0xda   : > { %s2363_s28 = scalar_lea.hbm %s3345_s6, 256 }
  0xdb   : > { %p2364_p13 = scmp.ne.s32.totalorder %s3345_s6, %s2363_s28  ;;  %p2370_p3 = scmp.lt.u32.totalorder %s2363_s28, %s3345_s6 }
  0xdd   : > { %p2366_p0 = pnand %p2364_p13, %p2786_p8 }
  0xdf   : > { %p2367_p1 = pneg %p2366_p0 }
  0xe1   : > { %p2372_p2 = pnand %p2370_p3, %p2367_p1 }
  0xe3   : > { %2375 = shalt.err (!%p2372_p2)
}
  0xe4   : > { %s2376_s21 = scalar_lea.vmem %s437_s22, 256  ;;  %p2384_p10 = scmp.lt.s32.totalorder %s437_s22, %s437_s22 }
  0xe5   : > { %p2377_p5 = scmp.ne.s32.totalorder %s437_s22, %s2376_s21  ;;  %p2385_p4 = scmp.lt.s32.totalorder %s2376_s21, %s2376_s21 }
  0xe7   : > { %p2379_p7 = pnand %p2377_p5, %p2786_p8  ;;  %p2386_p11 = por %p2385_p4, %p2384_p10 }
  0xe9   : > { %p2380_p9 = pneg %p2379_p7 }
  0xeb   : > { %p2387_p12 = pnand %p2386_p11, %p2380_p9 }
  0xed   : > { %2390 = shalt.err (!%p2387_p12)
}
  0xee   : > { %1988 = dma.hbm_to_vmem [thread:$0]  (!%p2770_p6), %s3345_s6, 256, %s437_s22, [#allocation12], %s2637_s17, %s2637_s17, %s2638_s0  }
  0xef   : > { %s2391_s29 = scalar_lea.hbm %s3347_s8, 16 }
  0xf0   : > { %p2392_p13 = scmp.ne.s32.totalorder %s3347_s8, %s2391_s29  ;;  %p2398_p3 = scmp.lt.u32.totalorder %s2391_s29, %s3347_s8 }
  0xf2   : > { %p2394_p0 = pnand %p2392_p13, %p2786_p8 }
  0xf4   : > { %p2395_p1 = pneg %p2394_p0 }
  0xf6   : > { %p2400_p2 = pnand %p2398_p3, %p2395_p1 }
  0xf8   : > { %2403 = shalt.err (!%p2400_p2)
}
  0xf9   : > { %s2404_s22 = scalar_lea.vmem %s2949_s24, 16  ;;  %s2411_s21 = scalar_lea.vmem %s2949_s24, 32 }
  0xfa   : > { %p2405_p5 = scmp.ne.s32.totalorder %s2949_s24, %s2404_s22  ;;  %p2412_p10 = scmp.lt.s32.totalorder %s2949_s24, %s2949_s24 }
  0xfb   : > { %p2413_p4 = scmp.lt.s32.totalorder %s2411_s21, %s2404_s22 }
  0xfc   : > { %p2407_p7 = pnand %p2405_p5, %p2786_p8 }
  0xfd   : > { %p2414_p11 = por %p2413_p4, %p2412_p10 }
  0xfe   : > { %p2408_p9 = pneg %p2407_p7 }
 0x100   : > { %p2415_p12 = pnand %p2414_p11, %p2408_p9 }
 0x102   : > { %2418 = shalt.err (!%p2415_p12)
}
 0x103   : > { %1994 = dma.hbm_to_vmem [thread:$0]  (!%p2770_p6), %s3347_s8, 16, %s2949_s24, [#allocation15]  }
 0x104   : > { %s2641_s19 = smov [#allocation19]   ;;  %s2642_s29 = smov [#allocation22]  }
 0x105   : > { %s482_s27 = sshll.u32 %s2641_s19, 4  ;;  %s506_s28 = sshll.u32 %s2642_s29, 4  ;;  %s483_s27 = int_to_ptr.vmem [resolvable:$true] %s482_s27  ;;  %s2996_s28 = int_to_ptr.vmem [resolvable:$true] %s506_s28 }
 0x106   : > { %s2419_s20 = scalar_lea.hbm %s3349_s10, 256 }
 0x107   : > { %p2420_p13 = scmp.ne.s32.totalorder %s3349_s10, %s2419_s20  ;;  %p2426_p3 = scmp.lt.u32.totalorder %s2419_s20, %s3349_s10 }
 0x109   : > { %p2422_p0 = pnand %p2420_p13, %p2786_p8 }
 0x10b   : > { %p2423_p1 = pneg %p2422_p0 }
 0x10d   : > { %p2428_p2 = pnand %p2426_p3, %p2423_p1 }
 0x10f   : > { %2431 = shalt.err (!%p2428_p2)
}
 0x110   : > { %s2432_s18 = scalar_lea.vmem %s483_s27, 256  ;;  %p2440_p10 = scmp.lt.s32.totalorder %s483_s27, %s483_s27 }
 0x111   : > { %p2433_p5 = scmp.ne.s32.totalorder %s483_s27, %s2432_s18  ;;  %p2441_p4 = scmp.lt.s32.totalorder %s2432_s18, %s2432_s18 }
 0x113   : > { %p2435_p7 = pnand %p2433_p5, %p2786_p8  ;;  %p2442_p11 = por %p2441_p4, %p2440_p10 }
 0x115   : > { %p2436_p9 = pneg %p2435_p7 }
 0x117   : > { %p2443_p12 = pnand %p2442_p11, %p2436_p9 }
 0x119   : > { %2446 = shalt.err (!%p2443_p12)
}
 0x11a   : > { %2000 = dma.hbm_to_vmem [thread:$0]  (!%p2770_p6), %s3349_s10, 256, %s483_s27, [#allocation18], %s2637_s17, %s2637_s17, %s2638_s0  }
 0x11b   : > { %s2447_s20 = scalar_lea.hbm %s3351_s12, 1024 }
 0x11c   : > { %p2448_p13 = scmp.ne.s32.totalorder %s3351_s12, %s2447_s20  ;;  %p2454_p3 = scmp.lt.u32.totalorder %s2447_s20, %s3351_s12 }
 0x11e   : > { %p2450_p0 = pnand %p2448_p13, %p2786_p8 }
 0x120   : > { %p2451_p1 = pneg %p2450_p0 }
 0x122   : > { %p2456_p2 = pnand %p2454_p3, %p2451_p1 }
 0x124   : > { %2459 = shalt.err (!%p2456_p2)
}
 0x125   : > { %s2460_s27 = scalar_lea.vmem %s2996_s28, 1024  ;;  %p2468_p10 = scmp.lt.s32.totalorder %s2996_s28, %s2996_s28 }
 0x126   : > { %p2461_p5 = scmp.ne.s32.totalorder %s2996_s28, %s2460_s27  ;;  %p2469_p4 = scmp.lt.s32.totalorder %s2460_s27, %s2460_s27 }
 0x128   : > { %p2463_p7 = pnand %p2461_p5, %p2786_p8  ;;  %p2470_p11 = por %p2469_p4, %p2468_p10 }
 0x12a   : > { %p2464_p9 = pneg %p2463_p7 }
 0x12c   : > { %p2471_p12 = pnand %p2470_p11, %p2464_p9 }
 0x12e   : > { %2474 = shalt.err (!%p2471_p12)
}
 0x12f   : > { %2006 = dma.hbm_to_vmem [thread:$0]  (!%p2770_p6), %s3351_s12, 1024, %s2996_s28, [#allocation21], %s2637_s17, %s2637_s17, %s2638_s0  }
 0x130   : > { %s2643_s29 = smov [#allocation23]   ;;  %s2475_s22 = scalar_lea.hbm %s3352_s13, 16 }
 0x131   : > { %s520_s26 = sshll.u32 %s2643_s29, 4  ;;  %p2476_p13 = scmp.ne.s32.totalorder %s3352_s13, %s2475_s22  ;;  %s521_s26 = int_to_ptr.vmem [resolvable:$true] %s520_s26 }
 0x132   : > { %p2482_p3 = scmp.lt.u32.totalorder %s2475_s22, %s3352_s13 }
 0x133   : > { %p2478_p0 = pnand %p2476_p13, %p2786_p8 }
 0x135   : > { %p2479_p1 = pneg %p2478_p0 }
 0x137   : > { %p2484_p2 = pnand %p2482_p3, %p2479_p1 }
 0x139   : > { %2487 = shalt.err (!%p2484_p2)
}
 0x13a   : > { %s2488_s17 = scalar_lea.vmem %s521_s26, 16  ;;  %s2495_s0 = scalar_lea.vmem %s521_s26, 32 }
 0x13b   : > { %p2489_p5 = scmp.ne.s32.totalorder %s521_s26, %s2488_s17  ;;  %p2496_p10 = scmp.lt.s32.totalorder %s521_s26, %s521_s26 }
 0x13c   : > { %p2497_p4 = scmp.lt.s32.totalorder %s2495_s0, %s2488_s17 }
 0x13d   : > { %p2491_p7 = pnand %p2489_p5, %p2786_p8 }
 0x13e   : > { %p2498_p11 = por %p2497_p4, %p2496_p10 }
 0x13f   : > { %p2492_p9 = pneg %p2491_p7 }
 0x141   : > { %p2499_p12 = pnand %p2498_p11, %p2492_p9 }
 0x143   : > { %2502 = shalt.err (!%p2499_p12)
}
 0x144   : > { %s3377_s23 = sld [smem:[#allocation35_spill]]  ;;  %s3378_s19 = sld [smem:[#allocation36_spill]] }
 0x145   : > { %2009 = dma.hbm_to_vmem [thread:$0]  (!%p2770_p6), %s3352_s13, 16, %s521_s26, [#allocation24]  }
 0x146   : > { %s1717_s29 = sadd.s32 4294967294, %s2627_s16   ;;  %s3065_s25 = sadd.s32 1, %s2627_s16  }
 0x147   : > { %s44_s14 = sadd.s32 1, %s2623_s15  ;;  %s41_s20 = ssub.s32 %s2627_s16, %s3065_s25 }
 0x148   : > { %p51_p8 = scmp.ne.s32.totalorder %s2623_s15, %s2619_s30  ;;  %p42_p13 = scmp.eq.s32.totalorder %s41_s20, 0 }
 0x149   : > { %p52_p0 = scmp.eq.s32.totalorder %s2627_s16, 0  ;;  %p360_p9 = scmp.eq.s32.totalorder %s1717_s29, 1 }
 0x14a   : > { %p57_p1 = scmp.ne.s32.totalorder %s2619_s30, %s3377_s23  ;;  %p354_p3 = scmp.eq.s32.totalorder %s3378_s19, 1 }
 0x14b   : > { %s3077_s22 = scalar_select %p42_p13, %s2623_s15, %s44_s14  }
 0x14c   : > { %p53_p2 = por %p52_p0, %p51_p8  ;;  %p3379_p5 = scmp.eq.s32.totalorder %s3378_s19, 0 }
 0x14d   : > { %p3085_p6 = por %p354_p3, %p51_p8  ;;  %p2031_p10 = scmp.lt.s32.totalorder %s2627_s16, 2 }
 0x14e   : > { %p3081_p7 = por %p3379_p5, %p57_p1  ;;  %s531_s1 = sand.u32 1, %s2623_s15  }
 0x14f   : > { %s3381_s26 = scalar_select %p3085_p6, 1, 0 }
 0x150   : > { %p3091_p4 = por %p360_p9, %p57_p1  ;;  %s1733_s27 = sshll.u32 %s531_s1, 2 }
 0x151   : > { %s1734_s17 = sshll.u32 %s2627_s16, 6  ;;  %s3383_s18 = sld [smem:[#allocation38_spill]] }
 0x152   : > { %s3382_s24 = scalar_select %p3091_p4, 1, 0 }
 0x153   : > { %s535_s19 = scalar_lea.vmem [#allocation2], %s1733_s27  ;;  %p3101_p11 = pnand %p2031_p10, %p53_p2 }
 0x154   : > { %s542_s14 = sshll.u32 %s535_s19, 4  ;;  %s532_s20 = scalar_lea.sflag [#allocation3], %s531_s1  ;;  %s3105_s14 = int_to_ptr.vmem [resolvable:$true] %s542_s14 }
 0x155   : > { %p2505_p8 = pneg %p3101_p11 }
 0x157   : > { %s3099_s23 = scalar_lea.hbm %s3383_s18, %s1734_s17  ;;  %s2508_s0 = scalar_lea.hbm %s3383_s18, 128 }
 0x158   : > { %s2503_s2 = scalar_lea.hbm %s3099_s23, 64  ;;  %p2509_p1 = scmp.lt.u32.totalorder %s3099_s23, %s3383_s18 }
 0x159   : > { %p2504_p12 = scmp.ne.s32.totalorder %s3099_s23, %s2503_s2  ;;  %p2510_p3 = scmp.lt.u32.totalorder %s2508_s0, %s2503_s2 }
 0x15a   : > { %p2512_p5 = scmp.lt.u32.totalorder %s2503_s2, %s3099_s23 }
 0x15b   : > { %p2506_p13 = pnand %p2505_p8, %p2504_p12  ;;  %p2511_p2 = por %p2510_p3, %p2509_p1 }
 0x15d   : > { %p2507_p0 = pneg %p2506_p13  ;;  %p2513_p9 = por %p2512_p5, %p2511_p2 }
 0x15f   : > { %p2514_p10 = pnand %p2513_p9, %p2507_p0 }
 0x161   : > { %2517 = shalt.err (!%p2514_p10)
}
 0x162   : > { %s2518_s1 = scalar_lea.vmem %s3105_s14, 64  ;;  %s2644_s17 = smov [#allocation2]  }
 0x163   : > { %p2519_p12 = scmp.ne.s32.totalorder %s3105_s14, %s2518_s1  ;;  %s2523_s27 = sshll.u32 %s2644_s17, 4  ;;  %s2524_s27 = int_to_ptr.vmem [resolvable:$false] %s2523_s27 }
 0x164   : > { %s2525_s28 = scalar_lea.vmem %s2524_s27, 128  ;;  %p2526_p6 = scmp.lt.s32.totalorder %s3105_s14, %s2524_s27 }
 0x165   : > { %p2521_p13 = pnand %p2519_p12, %p2505_p8  ;;  %p2527_p1 = scmp.lt.s32.totalorder %s2525_s28, %s2518_s1 }
 0x167   : > { %p2522_p4 = pneg %p2521_p13  ;;  %p2528_p3 = por %p2527_p1, %p2526_p6 }
 0x169   : > { %p2529_p2 = pnand %p2528_p3, %p2522_p4 }
 0x16b   : > { %2532 = shalt.err (!%p2529_p2)
}
 0x16c   : > { %2013 = dma.hbm_to_vmem [thread:$0]  (!%p3101_p11), %s3099_s23, 64, %s3105_s14, %s532_s20  }
 0x16d   : > { %s3385_s2 = sld [smem:[#allocation37_spill]] }
 0x173   : > { %p3386_p0 = scmp.ne.s32.totalorder %s3385_s2, 0 }
 0x174   : > { %s3135_s0 = sand.u32 (!%p3386_p0), 1, %s2619_s30  }
 0x175   : > { %551 = sbr.rel (%p3386_p0) target bundleno = 3054 (0xbee), region = 76  ;;  %s1736_s19 = sshll.u32 (!%p3386_p0), %s3135_s0, 2 }
 0x176   : > { %s554_s1 = scalar_lea.sflag (!%p3386_p0), [#allocation3], %s3135_s0  ;;  %s557_s17 = scalar_lea.vmem (!%p3386_p0), [#allocation2], %s1736_s19 }
 0x17c   : > { %2578 = dma.done.wait (%p3081_p7), %s554_s1, 64  }
 0x17d   : > { %2580 = vsyncadd (%p3081_p7), %s554_s1, 4294967232  ;;  %s3387_s23 = sld [smem:[#allocation36_spill]] }
 0x183   : > { %p3388_p6 = scmp.eq.s32.totalorder %s3387_s23, 0 }
 0x185   : > { %2582 = dma.done.wait (%p3388_p6), [#allocation6], 80   ;;  %p3389_p4 = pmov %p3388_p6 }
 0x187   : > { %2584 = vsyncadd (%p3389_p4), [#allocation6], 4294967216  ;;  %p3390_p11 = pmov %p3389_p4 }
 0x188   : > { %p3391_p8 = pmov %p3389_p4 }
 0x189   : > { %2586 = dma.done.wait (%p3390_p11), [#allocation9], 272  }
 0x18a   : > { %2588 = vsyncadd (%p3391_p8), [#allocation9], 4294967024  ;;  %p3392_p5 = pmov %p3389_p4 }
 0x18b   : > { %p3393_p9 = pmov %p3389_p4 }
 0x18c   : > { %2590 = dma.done.wait (%p3392_p5), [#allocation12], 272  }
 0x18d   : > { %2592 = vsyncadd (%p3393_p9), [#allocation12], 4294967024  ;;  %p3394_p7 = pmov %p3389_p4 }
 0x18e   : > { %p3395_p10 = pmov %p3389_p4 }
 0x18f   : > { %2594 = dma.done.wait (%p3394_p7), [#allocation15], 32  }
 0x190   : > { %2596 = vsyncadd (%p3395_p10), [#allocation15], 4294967264  ;;  %p3396_p12 = pmov %p3389_p4 }
 0x191   : > { %p3397_p13 = pmov %p3389_p4 }
 0x192   : > { %2598 = dma.done.wait (%p3396_p12), [#allocation18], 272  }
 0x193   : > { %2600 = vsyncadd (%p3397_p13), [#allocation18], 4294967024  ;;  %p3398_p1 = pmov %p3389_p4 }
 0x195   : > { %2602 = dma.done.wait (%p3398_p1), [#allocation21], 1040   ;;  %p3399_p3 = pmov %p3398_p1 }
 0x196   : > { %p3400_p2 = pmov %p3398_p1 }
 0x197   : > { %2604 = vsyncadd (%p3399_p3), [#allocation21], 4294966256 }
 0x198   : > { %2606 = dma.done.wait (%p3400_p2), [#allocation24], 16   ;;  %p3401_p0 = pmov %p3398_p1 }
 0x199   : > { %vm660_vm0 = vcmask 257024   ;;  %v655_v0 = vld [vmem:[%s557_s17] sm:$0xf]  ;;  %v656_v1 = vld [vmem:[#allocation5] sm:$0xf]  ;;  %v2103_v9 = vld [vmem:[#allocation10] sm:$0xff]  }
 0x19a   : > { %2608 = vsyncadd (%p3401_p0), [#allocation24], 4294967280  ;;  %v3173_v2 = vadd.f32 %v656_v1, %v655_v0  ;;  %v2645_v10 = vmov 0.0   ;;  %vm2646_vm1 = vmmov 0   ;;  %v2104_v11 = vld [vmem:[#allocation10 + $0x8] sm:$0xff]   ;;  %vm713_vm2 = vcmask 261120  }
 0x19b   : > { %1822 = vmatprep.subr.bf16.mxu0 %v2645_v10  ;;  %1826 = vmatprep.mubr.msk.bf16.mxu0 %vm2646_vm1, %v2645_v10  ;;  %v1751_v16 = vld [vmem:[#allocation7] ss:$0 sm:$0xff]  ;;  %v1752_v18 = vld [vmem:[#allocation8] ss:$0 sm:$0xff]  ;;  %v1753_v22 = vld [vmem:[#allocation11] ss:$0 sm:$0xff] }
 0x19c   : > { %v661_v3 = vsel %vm660_vm0, %v3173_v2, 0.0  ;;  %1823 = vmatpush3.bf16.msra.mxu0 %v2103_v9  ;;  %1842 = vmatprep.subr.bf16.mxu1 %v2645_v10  ;;  %s2647_s21 = smov 104   ;;  %s2648_s14 = smov 120   ;;  %vm767_vm3 = vcmask 64512   ;;  %vm962_vm4 = vcmask 27648   ;;  %vm1017_vm5 = vcmask 1041408  }
 0x19d   : > { %662 = vadd.xlane.f32.xlu0 %v661_v3  ;;  %1824 = vmatprep.subr.bf16.mxu0 %v2645_v10  ;;  %s2649_s29 = smov 112   ;;  %s2650_s20 = smov 96   ;;  %vm1013_vm6 = vcmask 31744   ;;  %vm1218_vm7 = vcmask 130048   ;;  %vm1220_vm8 = vcmask 195584  }
 0x19e   : > { %1844 = vmatprep.mubr.msk.bf16.mxu1 %vm2646_vm1, %v2645_v10  ;;  %s2651_s27 = smov 64   ;;  %s2652_s28 = smov 8  }
 0x19f   : > { %s2653_s2 = smov 16   ;;  %s2654_s1 = smov 24  }
 0x1a0   : > { %1825 = vmatpush3.bf16.msra.mxu0 %v2104_v11  ;;  %s1785_s17 = sshll.u32 %s3387_s23, 6  ;;  %p3403_p4 = scmp.ne.s32.totalorder %s3381_s26, 0 }
 0x1a1   : > { %1830 = vmatprep.subr.bf16.mxu0 %v2645_v10 }
 0x22a   : > { %v663_v4 = vpop.xlane.xlu0 %662 }
 0x22b   : > { %v665_v5 = vmul.f32 0.03125, %v663_v4 }
 0x22d   : > { %v666_v6 = vsub.f32 %v3173_v2, %v665_v5 }
 0x22f   : > { %v667_v7 = vmul.f32 %v666_v6, %v666_v6 }
 0x231   : > { %v668_v8 = vsel %vm660_vm0, %v667_v7, 0.0 }
 0x232   : > { %669 = vadd.xlane.f32.xlu0 %v668_v8 }
 0x2bf   : > { %v670_v12 = vpop.xlane.xlu0 %669 }
 0x2c0   : > { %v671_v13 = vmul.f32 0.03125, %v670_v12 }
 0x2c2   : > { %v672_v14 = vadd.f32 1e-05, %v671_v13 }
 0x2c4   : > { %2117 = vrsqrt.f32 %v672_v14 }
 0x2ce   : > { %v2118_v15 = vpop.eup %2117 }
 0x2cf   : > { %v674_v17 = vmul.f32 %v2118_v15, %v666_v6 }
 0x2d1   : > { %v681_v19 = vmul.f32 %v1751_v16, %v674_v17 }
 0x2d3   : > { %v688_v20 = vadd.f32 %v1752_v18, %v681_v19 }
 0x2d5   : > { %v689_v21 = vpack.c.bf16 %v688_v20, %v688_v20 }
 0x2d7   : > { %1827 = vmatmul.mubr.msk.bf16.vlgmr.msra.gmra.mrb[0].mxu0 %vm713_vm2, %v689_v21 }
 0x2d8   : > { %1832 = vmatprep.mubr.msk.bf16.mxu0 %vm2646_vm1, %v2645_v10 }
 0x3aa   : > { %v751_v23 = vpop.f32.mrb[0].mxu0 }
 0x3ab   : > { %v752_v24 = vadd.f32 %v1753_v22, %v751_v23  ;;  %v1828_v25 = vpop.f32.mrb[1].mxu0 }
 0x3ac   : > { %v754_v26 = vpop.f32.mrb[2].mxu0 }
 0x3ad   : > { %v3190_v27 = vpack.c.bf16 %v752_v24, %v752_v24  ;;  %v1829_v28 = vpop.f32.mrb[3].mxu0 }
 0x3af   : > { %763 = vrot.lane.b32.xlu0 %v3190_v27, %s2647_s21  ;;  %759 = vrot.lane.b32.xlu1 %v3190_v27, %s2648_s14  ;;  %s653_s21 = scalar_lea.vmem [#allocation25], %s1736_s19  ;;  %s1510_s19 = scalar_lea.sflag [#allocation4], %s3135_s0 }
 0x3b0   : > { %s1523_s14 = sshll.u32 %s653_s21, 4  ;;  %s3296_s14 = int_to_ptr.vmem [resolvable:$true] %s1523_s14 }
 0x3b1   : > { %s2533_s23 = scalar_lea.vmem %s3296_s14, 64 }
 0x3b2   : > { %p2534_p6 = scmp.ne.s32.totalorder %s3296_s14, %s2533_s23 }
 0x3b3   : > { %761 = vrot.lane.b32.xlu1 %v3190_v27, %s2649_s29 }
 0x3b4   : > { %p2535_p11 = pnand %p2534_p6, %p3403_p4 }
 0x3b6   : > { %p2536_p8 = pneg %p2535_p11 }
 0x3b7   : > { %765 = vrot.lane.b32.xlu1 %v3190_v27, %s2650_s20 }
 0x421   : > { %v3196_v29 = vpop.permute.xlu1 %759  ;;  %v3202_v31 = vpop.permute.xlu0 %763 }
 0x422   : > { %814 = vrot.lane.b32.xlu1 %v3196_v29, %s2650_s20 }
 0x425   : > { %v3199_v30 = vpop.permute.xlu1 %761 }
 0x426   : > { %862 = vrot.lane.b32.xlu1 %v3199_v30, %s2650_s20 }
 0x429   : > { %v766_v32 = vpop.permute.xlu1 %765 }
 0x42a   : > { %v772_v33 = vsel %vm767_vm3, %v766_v32, 0  ;;  %910 = vrot.lane.b32.xlu1 %v3202_v31, %s2650_s20 }
 0x42b   : > { %1831 = vmatpush3.bf16.xpose.msra.mxu0 %v772_v33 }
 0x42c   : > { %1836 = vmatprep.subr.bf16.mxu0 %v2645_v10 }
 0x432   : > { %1833 = vmatmul.mubr.msk.bf16.vlgmr.msra.gmra.mrb[4].mxu0 %vm767_vm3, %v3190_v27 }
 0x433   : > { %1838 = vmatprep.mubr.msk.bf16.mxu0 %vm2646_vm1, %v2645_v10 }
 0x494   : > { %v815_v34 = vpop.permute.xlu1 %814 }
 0x495   : > { %v820_v35 = vsel %vm767_vm3, %v815_v34, 0 }
 0x496   : > { %1837 = vmatpush3.bf16.xpose.msra.mxu0 %v820_v35 }
 0x497   : > { %1848 = vmatprep.subr.bf16.mxu0 %v2645_v10 }
 0x498   : > { %v863_v36 = vpop.permute.xlu1 %862 }
 0x499   : > { %v868_v37 = vsel %vm767_vm3, %v863_v36, 0 }
 0x49a   : > { %1843 = vmatpush3.bf16.xpose.msra.mxu1 %v868_v37 }
 0x49b   : > { %1854 = vmatprep.subr.bf16.mxu1 %v2645_v10 }
 0x49c   : > { %v911_v38 = vpop.permute.xlu1 %910 }
 0x49d   : > { %v916_v39 = vsel %vm767_vm3, %v911_v38, 0  ;;  %1839 = vmatmul.mubr.msk.bf16.vlgmr.msra.gmra.mrb[8].mxu0 %vm767_vm3, %v3196_v29 }
 0x49e   : > { %1849 = vmatpush3.bf16.xpose.msra.mxu0 %v916_v39  ;;  %1850 = vmatprep.mubr.msk.bf16.mxu0 %vm2646_vm1, %v2645_v10 }
 0x49f   : > { %1860 = vmatprep.subr.bf16.mxu0 %v2645_v10 }
 0x4a1   : > { %1845 = vmatmul.mubr.msk.bf16.vlgmr.msra.gmra.mrb[0].mxu1 %vm767_vm3, %v3199_v30 }
 0x4a2   : > { %1856 = vmatprep.mubr.msk.bf16.mxu1 %vm2646_vm1, %v2645_v10 }
 0x4a5   : > { %1851 = vmatmul.mubr.msk.bf16.vlgmr.msra.gmra.mrb[12].mxu0 %vm767_vm3, %v3202_v31 }
 0x4a6   : > { %1862 = vmatprep.mubr.msk.bf16.mxu0 %vm2646_vm1, %v2645_v10 }
 0x505   : > { %v808_v40 = vpop.f32.mrb[4].mxu0 }
 0x506   : > { %v958_v41 = vmul.f32 0.35355338, %v808_v40  ;;  %v1834_v42 = vpop.f32.mrb[5].mxu0 }
 0x507   : > { %v811_v43 = vpop.f32.mrb[6].mxu0 }
 0x508   : > { %v1835_v44 = vpop.f32.mrb[7].mxu0  ;;  %v963_v45 = vsel %vm962_vm4, %v958_v41, -inf }
 0x509   : > { %964 = vmax.xlane.f32.xlu1 %v963_v45 }
 0x570   : > { %v856_v46 = vpop.f32.mrb[8].mxu0 }
 0x571   : > { %v959_v47 = vmul.f32 0.35355338, %v856_v46  ;;  %v1840_v48 = vpop.f32.mrb[9].mxu0 }
 0x572   : > { %v859_v49 = vpop.f32.mrb[10].mxu0 }
 0x573   : > { %v1841_v50 = vpop.f32.mrb[11].mxu0  ;;  %v966_v51 = vsel %vm962_vm4, %v959_v47, -inf }
 0x574   : > { %v904_v52 = vpop.f32.mrb[0].mxu1  ;;  %967 = vmax.xlane.f32.xlu0 %v966_v51  ;;  %v2105_v50 = vld [vmem:[#allocation13] sm:$0xff]   ;;  %v2106_v51 = vld [vmem:[#allocation13 + $0x8] sm:$0xff]  }
 0x575   : > { %v960_v53 = vmul.f32 0.35355338, %v904_v52  ;;  %v1846_v54 = vpop.f32.mrb[1].mxu1 }
 0x576   : > { %v907_v55 = vpop.f32.mrb[2].mxu1 }
 0x577   : > { %v1847_v56 = vpop.f32.mrb[3].mxu1  ;;  %v969_v57 = vsel %vm962_vm4, %v960_v53, -inf }
 0x578   : > { %970 = vmax.xlane.f32.xlu1 %v969_v57  ;;  %v952_v58 = vpop.f32.mrb[12].mxu0 }
 0x579   : > { %v961_v59 = vmul.f32 0.35355338, %v952_v58  ;;  %v1852_v60 = vpop.f32.mrb[13].mxu0 }
 0x57a   : > { %v955_v61 = vpop.f32.mrb[14].mxu0 }
 0x57b   : > { %v1853_v62 = vpop.f32.mrb[15].mxu0  ;;  %v972_v63 = vsel %vm962_vm4, %v961_v59, -inf }
 0x57c   : > { %973 = vmax.xlane.f32.xlu0 %v972_v63 }
 0x589   : > { %1011 = vrot.lane.b32.xlu1 %v3190_v27, %s2651_s27 }
 0x596   : > { %v965_v0 = vpop.xlane.xlu1 %964 }
 0x597   : > { %v975_v1 = vsub.f32 %v958_v41, %v965_v0 }
 0x599   : > { %v979_v3 = vmul.f32 1.442695, %v975_v1 }
 0x59b   : > { %2119 = vpow2.f32 %v979_v3 }
 0x5a5   : > { %v2120_v4 = vpop.eup %2119 }
 0x5a6   : > { %v987_v5 = vsel %vm962_vm4, %v2120_v4, 0.0 }
 0x5ad   : > { %988 = vadd.xlane.f32.xlu1 %v987_v5 }
 0x601   : > { %v968_v6 = vpop.xlane.xlu0 %967 }
 0x602   : > { %v976_v7 = vsub.f32 %v959_v47, %v968_v6 }
 0x604   : > { %v981_v8 = vmul.f32 1.442695, %v976_v7 }
 0x605   : > { %v971_v9 = vpop.xlane.xlu1 %970 }
 0x606   : > { %2121 = vpow2.f32 %v981_v8  ;;  %v977_v11 = vsub.f32 %v960_v53, %v971_v9  ;;  %v1765_v8 = vld [vmem:[#allocation14] ss:$0 sm:$0xff] }
 0x608   : > { %v983_v12 = vmul.f32 1.442695, %v977_v11 }
 0x609   : > { %v1012_v13 = vpop.permute.xlu1 %1011  ;;  %v974_v14 = vpop.xlane.xlu0 %973 }
 0x60a   : > { %2123 = vpow2.f32 %v983_v12  ;;  %v1019_v15 = vsel %vm1017_vm5, %v1012_v13, 0  ;;  %v978_v16 = vsub.f32 %v961_v59, %v974_v14 }
 0x60b   : > { %1855 = vmatpush3.bf16.msra.mxu1 %v1019_v15 }
 0x60c   : > { %v985_v17 = vmul.f32 1.442695, %v978_v16  ;;  %1866 = vmatprep.subr.bf16.mxu1 %v2645_v10 }
 0x60e   : > { %2125 = vpow2.f32 %v985_v17 }
 0x610   : > { %v2122_v18 = vpop.eup %2121 }
 0x611   : > { %v990_v19 = vsel %vm962_vm4, %v2122_v18, 0.0 }
 0x612   : > { %991 = vadd.xlane.f32.xlu0 %v990_v19 }
 0x614   : > { %v2124_v20 = vpop.eup %2123 }
 0x615   : > { %v993_v21 = vsel %vm962_vm4, %v2124_v20, 0.0 }
 0x616   : > { %994 = vadd.xlane.f32.xlu1 %v993_v21 }
 0x618   : > { %v2126_v22 = vpop.eup %2125 }
 0x619   : > { %v996_v23 = vsel %vm962_vm4, %v2126_v22, 0.0 }
 0x61a   : > { %997 = vadd.xlane.f32.xlu0 %v996_v23  ;;  %v2108_v23 = vld [vmem:[#allocation19 + $0x8] sm:$0xff]  }
 0x627   : > { %1109 = vrot.lane.b32.xlu1 %v3199_v30, %s2651_s27 }
 0x62b   : > { %1157 = vrot.lane.b32.xlu1 %v3202_v31, %s2651_s27 }
 0x630   : > { %1061 = vrot.lane.b32.xlu0 %v3196_v29, %s2651_s27  ;;  %s3402_s27 = sld [smem:[#allocation42_spill]] }
 0x63a   : > { %v989_v24 = vpop.xlane.xlu1 %988 }
 0x63b   : > { %2127 = vrcp.f32 %v989_v24 }
 0x645   : > { %v2128_v25 = vpop.eup %2127 }
 0x646   : > { %v1003_v26 = vmul.f32 %v2128_v25, %v2120_v4 }
 0x648   : > { %v1007_v27 = vpack.c.bf16 %v1003_v26, %v1003_v26 }
 0x64a   : > { %1857 = vmatmul.mubr.msk.bf16.vlgmr.msra.gmra.mrb[4].mxu1 %vm1013_vm6, %v1007_v27  ;;  %v1769_v27 = vld [vmem:[#allocation16] ss:$0 sm:$0xff] }
 0x64b   : > { %1868 = vmatprep.mubr.msk.bf16.mxu1 %vm2646_vm1, %v2645_v10 }
 0x69f   : > { %v992_v28 = vpop.xlane.xlu0 %991 }
 0x6a0   : > { %2129 = vrcp.f32 %v992_v28 }
 0x6a3   : > { %v995_v30 = vpop.xlane.xlu1 %994 }
 0x6a4   : > { %2131 = vrcp.f32 %v995_v30  ;;  %v1770_v30 = vld [vmem:[#allocation17] ss:$0 sm:$0xff] }
 0x6a7   : > { %v1110_v32 = vpop.permute.xlu1 %1109  ;;  %v998_v31 = vpop.xlane.xlu0 %997 }
 0x6a8   : > { %v1115_v33 = vsel %vm1017_vm5, %v1110_v32, 0  ;;  %2133 = vrcp.f32 %v998_v31 }
 0x6a9   : > { %1867 = vmatpush3.bf16.msra.mxu1 %v1115_v33 }
 0x6aa   : > { %v2130_v29 = vpop.eup %2129  ;;  %1878 = vmatprep.subr.bf16.mxu1 %v2645_v10 }
 0x6ab   : > { %v1004_v34 = vmul.f32 %v2130_v29, %v2122_v18  ;;  %v1062_v35 = vpop.permute.xlu0 %1061  ;;  %v1158_v37 = vpop.permute.xlu1 %1157  ;;  %v2109_v29 = vld [vmem:[#allocation22] sm:$0xff]  }
 0x6ac   : > { %v1067_v36 = vsel %vm1017_vm5, %v1062_v35, 0  ;;  %v1163_v41 = vsel %vm1017_vm5, %v1158_v37, 0  ;;  %v2111_v35 = vld [vmem:[#allocation22 + $0x10] sm:$0xff]   ;;  %v2113_v37 = vld [vmem:[#allocation22 + $0x20] sm:$0xff]  }
 0x6ad   : > { %1861 = vmatpush3.bf16.msra.mxu0 %v1067_v36  ;;  %v1008_v38 = vpack.c.bf16 %v1004_v34, %v1004_v34  ;;  %v2110_v34 = vld [vmem:[#allocation22 + $0x8] sm:$0xff]   ;;  %v2112_v36 = vld [vmem:[#allocation22 + $0x18] sm:$0xff]  }
 0x6ae   : > { %v2132_v39 = vpop.eup %2131  ;;  %1872 = vmatprep.subr.bf16.mxu0 %v2645_v10 }
 0x6af   : > { %v1005_v40 = vmul.f32 %v2132_v39, %v2124_v20  ;;  %v2115_v39 = vld [vmem:[#allocation22 + $0x30] sm:$0xff]  }
 0x6b0   : > { %1863 = vmatmul.mubr.msk.bf16.vlgmr.msra.gmra.mrb[16].mxu0 %vm1013_vm6, %v1008_v38  ;;  %v2114_v38 = vld [vmem:[#allocation22 + $0x28] sm:$0xff]  }
 0x6b1   : > { %1873 = vmatpush3.bf16.msra.mxu0 %v1163_v41  ;;  %v1009_v42 = vpack.c.bf16 %v1005_v40, %v1005_v40  ;;  %1874 = vmatprep.mubr.msk.bf16.mxu0 %vm2646_vm1, %v2645_v10  ;;  %v2116_v40 = vld [vmem:[#allocation22 + $0x38] sm:$0xff]  }
 0x6b2   : > { %v2134_v43 = vpop.eup %2133  ;;  %1886 = vmatprep.subr.bf16.mxu0 %v2645_v10  ;;  %v1771_v41 = vld [vmem:[#allocation20] ss:$0 sm:$0xff] }
 0x6b3   : > { %v1006_v44 = vmul.f32 %v2134_v43, %v2126_v22  ;;  %1869 = vmatmul.mubr.msk.bf16.vlgmr.msra.gmra.mrb[8].mxu1 %vm1013_vm6, %v1009_v42  ;;  %v2107_v22 = vld [vmem:[#allocation19] sm:$0xff]  }
 0x6b4   : > { %1882 = vmatprep.mubr.msk.bf16.mxu1 %vm2646_vm1, %v2645_v10  ;;  %1879 = vmatpush3.bf16.msra.mxu1 %v2105_v50 }
 0x6b5   : > { %v1010_v45 = vpack.c.bf16 %v1006_v44, %v1006_v44  ;;  %1880 = vmatprep.subr.bf16.mxu1 %v2645_v10 }
 0x6b8   : > { %1875 = vmatmul.mubr.msk.bf16.vlgmr.msra.gmra.mrb[20].mxu0 %vm1013_vm6, %v1010_v45  ;;  %1881 = vmatpush3.bf16.msra.mxu1 %v2106_v51 }
 0x6b9   : > { %1890 = vmatprep.mubr.msk.bf16.mxu0 %vm2646_vm1, %v2645_v10  ;;  %1894 = vmatprep.subr.bf16.mxu1 %v2645_v10 }
 0x6ba   : > { %1887 = vmatpush3.bf16.msra.mxu0 %v2107_v22 }
 0x6bb   : > { %1888 = vmatprep.subr.bf16.mxu0 %v2645_v10 }
 0x6be   : > { %1889 = vmatpush3.bf16.msra.mxu0 %v2108_v23 }
 0x71d   : > { %v1055_v46 = vpop.f32.mrb[4].mxu1 }
 0x71e   : > { %v1858_v47 = vpop.f32.mrb[5].mxu1 }
 0x71f   : > { %v1058_v48 = vpop.f32.mrb[6].mxu1 }
 0x720   : > { %v1859_v49 = vpop.f32.mrb[7].mxu1 }
 0x783   : > { %v1103_v52 = vpop.f32.mrb[16].mxu0 }
 0x784   : > { %1206 = vrot.lane.b32.xlu0 %v1103_v52, %s2652_s28  ;;  %v1864_v53 = vpop.f32.mrb[17].mxu0  ;;  %s3294_s28 = scalar_lea.hbm %s3402_s27, %s1785_s17 }
 0x785   : > { %v1106_v54 = vpop.f32.mrb[18].mxu0 }
 0x786   : > { %v1865_v55 = vpop.f32.mrb[19].mxu0  ;;  %v1151_v56 = vpop.f32.mrb[8].mxu1 }
 0x787   : > { %1210 = vrot.lane.b32.xlu1 %v1151_v56, %s2653_s2  ;;  %v1870_v57 = vpop.f32.mrb[9].mxu1  ;;  %v1775_v56 = vld [vmem:[#allocation23] ss:$0 sm:$0xff]  ;;  %s2655_s2 = smov [#allocation25]  }
 0x788   : > { %v1154_v58 = vpop.f32.mrb[10].mxu1 }
 0x789   : > { %v1871_v59 = vpop.f32.mrb[11].mxu1 }
 0x78b   : > { %v1199_v60 = vpop.f32.mrb[20].mxu0 }
 0x78c   : > { %1214 = vrot.lane.b32.xlu0 %v1199_v60, %s2654_s1  ;;  %v1876_v61 = vpop.f32.mrb[21].mxu0  ;;  %s2537_s1 = sshll.u32 %s2655_s2, 4  ;;  %s2538_s1 = int_to_ptr.vmem [resolvable:$false] %s2537_s1 }
 0x78d   : > { %v1202_v62 = vpop.f32.mrb[22].mxu0  ;;  %s2539_s3 = scalar_lea.vmem %s2538_s1, 128  ;;  %p2540_p5 = scmp.lt.s32.totalorder %s3296_s14, %s2538_s1 }
 0x78e   : > { %v1877_v63 = vpop.f32.mrb[23].mxu0  ;;  %p2541_p9 = scmp.lt.s32.totalorder %s2539_s3, %s2533_s23 }
 0x790   : > { %p2542_p7 = por %p2541_p9, %p2540_p5 }
 0x792   : > { %p2543_p10 = pnand %p2542_p7, %p2536_p8 }
 0x7f6   : > { %v1207_v0 = vpop.permute.xlu0 %1206 }
 0x7f7   : > { %v1217_v3 = vsel %vm767_vm3, %v1055_v46, %v1207_v0 }
 0x7f9   : > { %v1211_v1 = vpop.permute.xlu1 %1210 }
 0x7fa   : > { %v1219_v4 = vsel %vm1218_vm7, %v1217_v3, %v1211_v1 }
 0x7fe   : > { %v1215_v5 = vpop.permute.xlu0 %1214 }
 0x7ff   : > { %v1221_v6 = vsel %vm1220_vm8, %v1219_v4, %v1215_v5 }
 0x800   : > { %v1222_v7 = vpack.c.bf16 %v1221_v6, %v1221_v6 }
 0x802   : > { %1883 = vmatmul.mubr.msk.bf16.vlgmr.msra.gmra.mrb[12].mxu1 %vm713_vm2, %v1222_v7 }
 0x803   : > { %1910 = vmatprep.mubr.msk.bf16.mxu1 %vm2646_vm1, %v2645_v10  ;;  %1895 = vmatpush3.bf16.msra.mxu1 %v2109_v29 }
 0x804   : > { %1896 = vmatprep.subr.bf16.mxu1 %v2645_v10 }
 0x807   : > { %1897 = vmatpush3.bf16.msra.mxu1 %v2110_v34 }
 0x808   : > { %1898 = vmatprep.subr.bf16.mxu1 %v2645_v10 }
 0x80b   : > { %1899 = vmatpush3.bf16.msra.mxu1 %v2111_v35 }
 0x80c   : > { %1900 = vmatprep.subr.bf16.mxu1 %v2645_v10 }
 0x80f   : > { %1901 = vmatpush3.bf16.msra.mxu1 %v2112_v36 }
 0x810   : > { %1902 = vmatprep.subr.bf16.mxu1 %v2645_v10 }
 0x813   : > { %1903 = vmatpush3.bf16.msra.mxu1 %v2113_v37 }
 0x814   : > { %1904 = vmatprep.subr.bf16.mxu1 %v2645_v10 }
 0x817   : > { %1905 = vmatpush3.bf16.msra.mxu1 %v2114_v38 }
 0x818   : > { %1906 = vmatprep.subr.bf16.mxu1 %v2645_v10 }
 0x81b   : > { %1907 = vmatpush3.bf16.msra.mxu1 %v2115_v39 }
 0x81c   : > { %1908 = vmatprep.subr.bf16.mxu1 %v2645_v10 }
 0x81f   : > { %1909 = vmatpush3.bf16.msra.mxu1 %v2116_v40 }
 0x8d5   : > { %v1283_v9 = vpop.f32.mrb[12].mxu1 }
 0x8d6   : > { %v1284_v11 = vadd.f32 %v1765_v8, %v1283_v9  ;;  %v1884_v12 = vpop.f32.mrb[13].mxu1 }
 0x8d7   : > { %v1286_v13 = vpop.f32.mrb[14].mxu1 }
 0x8d8   : > { %v3272_v14 = vadd.f32 %v1284_v11, %v3173_v2  ;;  %v1885_v15 = vpop.f32.mrb[15].mxu1 }
 0x8da   : > { %v1292_v16 = vsel %vm660_vm0, %v3272_v14, 0.0 }
 0x8db   : > { %1293 = vadd.xlane.f32.xlu1 %v1292_v16 }
 0x968   : > { %v1294_v17 = vpop.xlane.xlu1 %1293 }
 0x969   : > { %v1295_v18 = vmul.f32 0.03125, %v1294_v17 }
 0x96b   : > { %v1296_v19 = vsub.f32 %v3272_v14, %v1295_v18 }
 0x96d   : > { %v1297_v20 = vmul.f32 %v1296_v19, %v1296_v19 }
 0x96f   : > { %v1298_v21 = vsel %vm660_vm0, %v1297_v20, 0.0 }
 0x970   : > { %1299 = vadd.xlane.f32.xlu0 %v1298_v21 }
 0x9fd   : > { %v1300_v2 = vpop.xlane.xlu0 %1299 }
 0x9fe   : > { %v1301_v24 = vmul.f32 0.03125, %v1300_v2 }
 0xa00   : > { %v1302_v25 = vadd.f32 1e-05, %v1301_v24 }
 0xa02   : > { %2135 = vrsqrt.f32 %v1302_v25 }
 0xa0c   : > { %v2136_v26 = vpop.eup %2135 }
 0xa0d   : > { %v1304_v28 = vmul.f32 %v2136_v26, %v1296_v19 }
 0xa0f   : > { %v1311_v32 = vmul.f32 %v1769_v27, %v1304_v28 }
 0xa11   : > { %v1318_v31 = vadd.f32 %v1770_v30, %v1311_v32 }
 0xa13   : > { %v1319_v33 = vpack.c.bf16 %v1318_v31, %v1318_v31 }
 0xa15   : > { %1891 = vmatmul.mubr.msk.bf16.vlgmr.msra.gmra.mrb[24].mxu0 %vm713_vm2, %v1319_v33 }
 0xae8   : > { %v1380_v42 = vpop.f32.mrb[24].mxu0 }
 0xae9   : > { %v1381_v43 = vadd.f32 %v1771_v41, %v1380_v42  ;;  %v1892_v44 = vpop.f32.mrb[25].mxu0 }
 0xaea   : > { %v1383_v45 = vpop.f32.mrb[26].mxu0 }
 0xaeb   : > { %v1386_v46 = vmul.f32 %v1381_v43, %v1381_v43  ;;  %v1893_v47 = vpop.f32.mrb[27].mxu0 }
 0xaed   : > { %v1387_v48 = vmul.f32 %v1386_v46, %v1381_v43 }
 0xaef   : > { %v1388_v49 = vmul.f32 0.044715, %v1387_v48 }
 0xaf1   : > { %v1389_v50 = vadd.f32 %v1388_v49, %v1381_v43 }
 0xaf3   : > { %v1390_v51 = vmul.f32 0.7978846, %v1389_v50 }
 0xaf5   : > { %2137 = vtanh.f32 %v1390_v51 }
 0xaff   : > { %v2138_v52 = vpop.eup %2137 }
 0xb00   : > { %v1392_v53 = vadd.f32 1.0, %v2138_v52 }
 0xb02   : > { %v1393_v54 = vmul.f32 0.5, %v1392_v53 }
 0xb04   : > { %v1394_v55 = vmul.f32 %v1393_v54, %v1381_v43 }
 0xb06   : > { %v1395_v10 = vpack.c.bf16 %v1394_v55, %v1394_v55 }
 0xb08   : > { %1911 = vmatmul.mubr.bf16.vlgmr.msra.gmra.mrb[16].mxu1 %v1395_v10 }
 0xbdb   : > { %v1501_v57 = vpop.f32.mrb[16].mxu1 }
 0xbdc   : > { %v1502_v58 = vadd.f32 %v1775_v56, %v1501_v57  ;;  %v1912_v59 = vpop.f32.mrb[17].mxu1 }
 0xbdd   : > { %v1504_v60 = vpop.f32.mrb[18].mxu1 }
 0xbde   : > { %v1507_v61 = vadd.f32 %v1502_v58, %v3272_v14  ;;  %v1913_v62 = vpop.f32.mrb[19].mxu1 }
 0xbe0   : > { %1508 = vst.msk [vmem:[%s653_s21] sm:$0xf] %vm660_vm0, %v1507_v61 }
 0xbe1   : > { %2546 = shalt.err (!%p2543_p10)
}
 0xbe2   : > { %s2547_s0 = scalar_lea.hbm %s3294_s28, 64  ;;  %s2551_s29 = scalar_lea.hbm %s3402_s27, 128 }
 0xbe3   : > { %p2548_p12 = scmp.ne.s32.totalorder %s3294_s28, %s2547_s0  ;;  %p2552_p3 = scmp.lt.u32.totalorder %s3294_s28, %s3402_s27 }
 0xbe4   : > { %p2553_p2 = scmp.lt.u32.totalorder %s2551_s29, %s2547_s0  ;;  %p2555_p6 = scmp.lt.u32.totalorder %s2547_s0, %s3294_s28 }
 0xbe5   : > { %p2549_p13 = pnand %p2548_p12, %p3403_p4 }
 0xbe6   : > { %p2554_p0 = por %p2553_p2, %p2552_p3 }
 0xbe7   : > { %p2550_p1 = pneg %p2549_p13 }
 0xbe8   : > { %p2556_p11 = por %p2555_p6, %p2554_p0 }
 0xbea   : > { %p2557_p8 = pnand %p2556_p11, %p2550_p1 }
 0xbec   : > { %2560 = shalt.err (!%p2557_p8)
}
 0xbed   : > { %1968 = dma.vmem_to_hbm [thread:$0]  (%p3403_p4), %s3296_s14, 64, %s3294_s28, %s1510_s19  }
 0xbee PF: > { %s3404_s3 = sld [smem:[#allocation35_spill]]  ;;  %p3405_p5 = scmp.ne.s32.totalorder %s3382_s24, 0 }
 0xbef   : > { %p3406_p9 = scmp.ge.s32.totalorder %s2627_s16, 2 }
 0xbf1   : > { %p2015_p7 = pnand %p3406_p9, %p3405_p5 }
 0xbf4   : > { %s1535_s23 = sand.u32 1, %s3404_s3  }
 0xbf5   : > { %s1536_s1 = scalar_lea.sflag [#allocation4], %s1535_s23 }
 0xbf6   : > { %2610 = dma.done.wait (!%p2015_p7), %s1536_s1, 64  }
 0xbf7   : > { %2612 = vsyncadd (!%p2015_p7), %s1536_s1, 4294967232  ;;  %p34_p10 = scmp.ge.s32.totalorder %s3065_s25, 4   ;;  %s3407_s29 = smov %s2619_s30 }
 0xbf8   : > { %s3408_s30 = smov %s2623_s15  ;;  %s3409_s15 = smov %s3077_s22 }
 0xbf9   : > { %s3410_s16 = smov %s3065_s25  ;;  %36 = sbr.rel (!%p34_p10) target bundleno = 18 (0x12), region = 173 }
 0xc00   :  { %1541 = vsyncpa [#allocation3], 1 }
 0xc01   :  { %1543 = vsyncpa [#allocation3 + $0x1], 1 }
 0xc02   :  { %1544 = vsyncpa [#allocation6], 1 }
 0xc03   :  { %1545 = vsyncpa [#allocation9], 1 }
 0xc04   :  { %1546 = vsyncpa [#allocation12], 1 }
 0xc05   :  { %1547 = vsyncpa [#allocation15], 1 }
 0xc06   :  { %1548 = vsyncpa [#allocation18], 1 }
 0xc07   :  { %1549 = vsyncpa [#allocation21], 1 }
 0xc08   :  { %1550 = vsyncpa [#allocation24], 1 }
 0xc09   :  { %1551 = vsyncpa [#allocation4], 1 }
 0xc0a   :  { %1553 = vsyncpa [#allocation4 + $0x1], 1 }

// kernel: transformer_vqvae_forward.15
= control target key start
LH: loop header
LB: loop body
LE: loop exit
PB: predicated region body
PF: predicated region fallthrough
CT: control target
= control target key end

     0   :  { %11 = vsyncpa [#allocation3], 0  ;;  %s637_s0 = inlined_call_operand.hbm [shape: f32[8,32], index: 0, kind: input, shape index: {}]   ;;  %s638_s1 = inlined_call_operand.hbm [shape: f32[1,32], index: 1, kind: input, shape index: {}]   ;;  %s639_s2 = inlined_call_operand.hbm [shape: f32[1,32], index: 2, kind: input, shape index: {}]   ;;  %s640_s3 = inlined_call_operand.hbm [shape: bf16[32,32], index: 3, kind: input, shape index: {}]   ;;  %s641_s4 = inlined_call_operand.hbm [shape: bf16[32,16], index: 4, kind: input, shape index: {}]   ;;  %s642_s5 = inlined_call_operand.hbm [shape: f32[1,16], index: 5, kind: input, shape index: {}]   ;;  %s643_s6 = inlined_call_operand.hbm [shape: f32[8,16], index: 6, kind: output, shape index: {}]  }
   0x1   :  { %12 = vsyncpa [#allocation6], 0 }
   0x2   :  { %13 = vsyncpa [#allocation9], 0 }
   0x3   :  { %14 = vsyncpa [#allocation12], 0 }
   0x4   :  { %15 = vsyncpa [#allocation4], 0  ;;  %s490_s21 = smov [#allocation5]   ;;  %s491_s23 = smov [#allocation8]  }
   0x5   :  { %s32_s22 = sshll.u32 %s490_s21, 4  ;;  %s51_s24 = sshll.u32 %s491_s23, 4  ;;  %s33_s22 = int_to_ptr.vmem [resolvable:$true] %s32_s22  ;;  %s536_s24 = int_to_ptr.vmem [resolvable:$true] %s51_s24 }
   0x6   :  { %s326_s27 = scalar_lea.hbm %s638_s1, 16 }
   0x7   :  { %p327_p0 = scmp.ne.s32.totalorder %s638_s1, %s326_s27  ;;  %p330_p1 = scmp.lt.u32.totalorder %s326_s27, %s638_s1 }
   0x9   :  { %p332_p2 = pnand %p330_p1, %p327_p0 }
   0xb   :  { %335 = shalt.err (!%p332_p2)
}
   0xc   :  { %s336_s8 = scalar_lea.vmem %s33_s22, 16  ;;  %s340_s9 = scalar_lea.vmem %s33_s22, 32 }
   0xd   :  { %p337_p3 = scmp.ne.s32.totalorder %s33_s22, %s336_s8  ;;  %p341_p4 = scmp.lt.s32.totalorder %s33_s22, %s33_s22 }
   0xe   :  { %p342_p5 = scmp.lt.s32.totalorder %s340_s9, %s336_s8 }
  0x10   :  { %p343_p6 = por %p342_p5, %p341_p4 }
  0x12   :  { %p344_p7 = pnand %p343_p6, %p337_p3 }
  0x14   :  { %347 = shalt.err (!%p344_p7)
}
  0x15   :  { %35 = dma.hbm_to_vmem [thread:$0]  %s638_s1, 16, %s33_s22, [#allocation6]  }
  0x16   :  { %s348_s14 = scalar_lea.hbm %s640_s3, 256 }
  0x17   :  { %p349_p8 = scmp.ne.s32.totalorder %s640_s3, %s348_s14  ;;  %p352_p9 = scmp.lt.u32.totalorder %s348_s14, %s640_s3 }
  0x19   :  { %p354_p10 = pnand %p352_p9, %p349_p8 }
  0x1b   :  { %357 = shalt.err (!%p354_p10)
}
  0x1c   :  { %s358_s19 = scalar_lea.vmem %s536_s24, 256  ;;  %p363_p12 = scmp.lt.s32.totalorder %s536_s24, %s536_s24 }
  0x1d   :  { %p359_p11 = scmp.ne.s32.totalorder %s536_s24, %s358_s19  ;;  %p364_p13 = scmp.lt.s32.totalorder %s358_s19, %s358_s19 }
  0x1f   :  { %p365_p0 = por %p364_p13, %p363_p12 }
  0x21   :  { %p366_p1 = pnand %p365_p0, %p359_p11 }
  0x23   :  { %369 = shalt.err (!%p366_p1)
}
  0x24   :  { %s492_s1 = smov 64   ;;  %s493_s20 = smov 4  }
  0x25   :  { %57 = dma.hbm_to_vmem [thread:$0]  %s640_s3, 256, %s536_s24, [#allocation9], %s492_s1, %s492_s1, %s493_s20  }
  0x26   :  { %s494_s23 = smov [#allocation2]   ;;  %s495_s26 = smov [#allocation7]  }
  0x27   :  { %s22_s25 = sshll.u32 %s494_s23, 4  ;;  %s42_s27 = sshll.u32 %s495_s26, 4  ;;  %s23_s25 = int_to_ptr.vmem [resolvable:$true] %s22_s25  ;;  %s43_s27 = int_to_ptr.vmem [resolvable:$true] %s42_s27 }
  0x28   :  { %s370_s30 = scalar_lea.hbm %s637_s0, 128 }
  0x29   :  { %p371_p2 = scmp.ne.s32.totalorder %s637_s0, %s370_s30  ;;  %p374_p3 = scmp.lt.u32.totalorder %s370_s30, %s637_s0 }
  0x2b   :  { %p376_p4 = pnand %p374_p3, %p371_p2 }
  0x2d   :  { %379 = shalt.err (!%p376_p4)
}
  0x2e   :  { %s380_s3 = scalar_lea.vmem %s23_s25, 128  ;;  %p385_p6 = scmp.lt.s32.totalorder %s23_s25, %s23_s25 }
  0x2f   :  { %p381_p5 = scmp.ne.s32.totalorder %s23_s25, %s380_s3  ;;  %p386_p7 = scmp.lt.s32.totalorder %s380_s3, %s380_s3 }
  0x31   :  { %p387_p8 = por %p386_p7, %p385_p6 }
  0x33   :  { %p388_p9 = pnand %p387_p8, %p381_p5 }
  0x35   :  { %391 = shalt.err (!%p388_p9)
}
  0x36   :  { %25 = dma.hbm_to_vmem [thread:$0]  %s637_s0, 128, %s23_s25, [#allocation3]  }
  0x37   :  { %s392_s14 = scalar_lea.hbm %s639_s2, 16 }
  0x38   :  { %p393_p10 = scmp.ne.s32.totalorder %s639_s2, %s392_s14  ;;  %p396_p11 = scmp.lt.u32.totalorder %s392_s14, %s639_s2 }
  0x3a   :  { %p398_p12 = pnand %p396_p11, %p393_p10 }
  0x3c   :  { %401 = shalt.err (!%p398_p12)
}
  0x3d   :  { %s402_s19 = scalar_lea.vmem %s43_s27, 16  ;;  %s406_s21 = scalar_lea.vmem %s43_s27, 32 }
  0x3e   :  { %p403_p13 = scmp.ne.s32.totalorder %s43_s27, %s402_s19  ;;  %p407_p0 = scmp.lt.s32.totalorder %s43_s27, %s43_s27 }
  0x3f   :  { %p408_p1 = scmp.lt.s32.totalorder %s406_s21, %s402_s19 }
  0x41   :  { %p409_p2 = por %p408_p1, %p407_p0 }
  0x43   :  { %p410_p3 = pnand %p409_p2, %p403_p13 }
  0x45   :  { %413 = shalt.err (!%p410_p3)
}
  0x46   :  { %45 = dma.hbm_to_vmem [thread:$0]  %s639_s2, 16, %s43_s27, [#allocation6]  }
  0x47   :  { %s496_s23 = smov [#allocation10]   ;;  %s497_s26 = smov [#allocation11]  }
  0x48   :  { %s63_s25 = sshll.u32 %s496_s23, 4  ;;  %s76_s28 = sshll.u32 %s497_s26, 4  ;;  %s64_s25 = int_to_ptr.vmem [resolvable:$true] %s63_s25  ;;  %s77_s28 = int_to_ptr.vmem [resolvable:$true] %s76_s28 }
  0x49   :  { %s414_s7 = scalar_lea.hbm %s641_s4, 256 }
  0x4a   :  { %p415_p4 = scmp.ne.s32.totalorder %s641_s4, %s414_s7  ;;  %p418_p5 = scmp.lt.u32.totalorder %s414_s7, %s641_s4 }
  0x4c   :  { %p420_p6 = pnand %p418_p5, %p415_p4 }
  0x4e   :  { %423 = shalt.err (!%p420_p6)
}
  0x4f   :  { %s424_s2 = scalar_lea.vmem %s64_s25, 256  ;;  %p429_p8 = scmp.lt.s32.totalorder %s64_s25, %s64_s25 }
  0x50   :  { %p425_p7 = scmp.ne.s32.totalorder %s64_s25, %s424_s2  ;;  %p430_p9 = scmp.lt.s32.totalorder %s424_s2, %s424_s2 }
  0x52   :  { %p431_p10 = por %p430_p9, %p429_p8 }
  0x54   :  { %p432_p11 = pnand %p431_p10, %p425_p7 }
  0x56   :  { %435 = shalt.err (!%p432_p11)
}
  0x57   :  { %69 = dma.hbm_to_vmem [thread:$0]  %s641_s4, 256, %s64_s25, [#allocation9], %s492_s1, %s492_s1, %s493_s20  }
  0x58   :  { %s436_s13 = scalar_lea.hbm %s642_s5, 16 }
  0x59   :  { %p437_p12 = scmp.ne.s32.totalorder %s642_s5, %s436_s13  ;;  %p440_p13 = scmp.lt.u32.totalorder %s436_s13, %s642_s5 }
  0x5b   :  { %p442_p0 = pnand %p440_p13, %p437_p12 }
  0x5d   :  { %445 = shalt.err (!%p442_p0)
}
  0x5e   :  { %s446_s18 = scalar_lea.vmem %s77_s28, 16  ;;  %s450_s19 = scalar_lea.vmem %s77_s28, 32 }
  0x5f   :  { %p447_p1 = scmp.ne.s32.totalorder %s77_s28, %s446_s18  ;;  %p451_p2 = scmp.lt.s32.totalorder %s77_s28, %s77_s28 }
  0x60   :  { %p452_p3 = scmp.lt.s32.totalorder %s450_s19, %s446_s18 }
  0x62   :  { %p453_p4 = por %p452_p3, %p451_p2 }
  0x64   :  { %p454_p5 = pnand %p453_p4, %p447_p1 }
  0x66   :  { %457 = shalt.err (!%p454_p5)
}
  0x67   :  { %79 = dma.hbm_to_vmem [thread:$0]  %s642_s5, 16, %s77_s28, [#allocation12]  }
  0x68   :  { %480 = dma.done.wait [#allocation3], 128  }
  0x69   :  { %481 = vsyncadd [#allocation3], 4294967168 }
  0x6a   :  { %482 = dma.done.wait [#allocation6], 32  }
  0x6b   :  { %483 = vsyncadd [#allocation6], 4294967264 }
  0x6c   :  { %484 = dma.done.wait [#allocation9], 512  }
  0x6d   :  { %485 = vsyncadd [#allocation9], 4294966784 }
  0x6e   :  { %486 = dma.done.wait [#allocation12], 16  }
  0x6f   :  { %487 = vsyncadd [#allocation12], 4294967280  ;;  %vm102_vm0 = vcmask 261120   ;;  %v99_v0 = vld [vmem:[#allocation2] sm:$0xff]  ;;  %v320_v7 = vld [vmem:[#allocation8] sm:$0xff]   ;;  %v498_v8 = vmov 0.0  }
  0x70   :  { %v103_v1 = vsel %vm102_vm0, %v99_v0, 0.0  ;;  %293 = vmatprep.subr.bf16.mxu0 %v498_v8  ;;  %301 = vmatprep.subr.bf16.mxu1 %v498_v8  ;;  %v321_v9 = vld [vmem:[#allocation8 + $0x8] sm:$0xff]   ;;  %vm499_vm1 = vmmov 0   ;;  %v322_v10 = vld [vmem:[#allocation10] sm:$0xff]   ;;  %v278_v15 = vld [vmem:[#allocation5] ss:$0 sm:$0xff] }
  0x71   :  { %104 = vadd.xlane.f32.xlu0 %v103_v1  ;;  %294 = vmatpush3.bf16.msra.mxu0 %v320_v7  ;;  %v279_v17 = vld [vmem:[#allocation7] ss:$0 sm:$0xff]  ;;  %v283_v27 = vld [vmem:[#allocation11] ss:$0 sm:$0xff]  ;;  %s500_s5 = smov [#allocation13]   ;;  %vm258_vm2 = vcmask 130048  }
  0x72   :  { %297 = vmatprep.mubr.msk.bf16.mxu0 %vm499_vm1, %v498_v8  ;;  %295 = vmatprep.subr.bf16.mxu0 %v498_v8  ;;  %v323_v21 = vld [vmem:[#allocation10 + $0x8] sm:$0xff]   ;;  %s266_s20 = sshll.u32 %s500_s5, 4  ;;  %s267_s20 = int_to_ptr.vmem [resolvable:$true] %s266_s20 }
  0x73   :  { %305 = vmatprep.mubr.msk.bf16.mxu1 %vm499_vm1, %v498_v8  ;;  %302 = vmatpush3.bf16.msra.mxu1 %v322_v10  ;;  %s458_s21 = scalar_lea.vmem %s267_s20, 128  ;;  %p463_p7 = scmp.lt.s32.totalorder %s267_s20, %s267_s20 }
  0x74   :  { %303 = vmatprep.subr.bf16.mxu1 %v498_v8  ;;  %p459_p6 = scmp.ne.s32.totalorder %s267_s20, %s458_s21  ;;  %p464_p8 = scmp.lt.s32.totalorder %s458_s21, %s458_s21 }
  0x75   :  { %296 = vmatpush3.bf16.msra.mxu0 %v321_v9 }
  0x76   :  { %p465_p9 = por %p464_p8, %p463_p7 }
  0x77   :  { %304 = vmatpush3.bf16.msra.mxu1 %v323_v21 }
  0x78   :  { %p466_p10 = pnand %p465_p9, %p459_p6 }
  0xfe   :  { %v105_v2 = vpop.xlane.xlu0 %104 }
  0xff   :  { %v107_v3 = vmul.f32 0.03125, %v105_v2 }
 0x101   :  { %v108_v4 = vsub.f32 %v99_v0, %v107_v3 }
 0x103   :  { %v109_v5 = vmul.f32 %v108_v4, %v108_v4 }
 0x105   :  { %v110_v6 = vsel %vm102_vm0, %v109_v5, 0.0 }
 0x106   :  { %111 = vadd.xlane.f32.xlu0 %v110_v6 }
 0x193   :  { %v112_v11 = vpop.xlane.xlu0 %111 }
 0x194   :  { %v113_v12 = vmul.f32 0.03125, %v112_v11 }
 0x196   :  { %v114_v13 = vadd.f32 1e-05, %v113_v12 }
 0x198   :  { %324 = vrsqrt.f32 %v114_v13 }
 0x1a2   :  { %v325_v14 = vpop.eup %324 }
 0x1a3   :  { %v116_v16 = vmul.f32 %v325_v14, %v108_v4 }
 0x1a5   :  { %v123_v18 = vmul.f32 %v278_v15, %v116_v16 }
 0x1a7   :  { %v130_v19 = vadd.f32 %v279_v17, %v123_v18 }
 0x1a9   :  { %v131_v20 = vpack.c.bf16 %v130_v19, %v130_v19 }
 0x1ab   :  { %298 = vmatmul.mubr.msk.bf16.vlgmr.msra.gmra.mrb[0].mxu0 %vm102_vm0, %v131_v20 }
 0x27e   :  { %v185_v22 = vpop.f32.mrb[0].mxu0 }
 0x27f   :  { %v191_v23 = vpack.c.bf16 %v185_v22, %v185_v22  ;;  %v299_v24 = vpop.f32.mrb[1].mxu0 }
 0x280   :  { %v188_v25 = vpop.f32.mrb[2].mxu0 }
 0x281   :  { %v300_v26 = vpop.f32.mrb[3].mxu0  ;;  %306 = vmatmul.mubr.msk.bf16.vlgmr.msra.gmra.mrb[0].mxu1 %vm102_vm0, %v191_v23 }
 0x354   :  { %v252_v28 = vpop.f32.mrb[0].mxu1 }
 0x355   :  { %v253_v29 = vadd.f32 %v283_v27, %v252_v28  ;;  %v307_v30 = vpop.f32.mrb[1].mxu1 }
 0x356   :  { %v255_v31 = vpop.f32.mrb[2].mxu1 }
 0x357   :  { %v308_v32 = vpop.f32.mrb[3].mxu1  ;;  %259 = vst.msk [vmem:[#allocation13] sm:$0xff] %vm258_vm2, %v253_v29 }
 0x358   :  { %469 = shalt.err (!%p466_p10)
}
 0x359   :  { %s470_s23 = scalar_lea.hbm %s643_s6, 128 }
 0x35a   :  { %p471_p11 = scmp.ne.s32.totalorder %s643_s6, %s470_s23  ;;  %p474_p12 = scmp.lt.u32.totalorder %s470_s23, %s643_s6 }
 0x35c   :  { %p476_p13 = pnand %p474_p12, %p471_p11 }
 0x35e   :  { %479 = shalt.err (!%p476_p13)
}
 0x35f   :  { %269 = dma.vmem_to_hbm [thread:$0]  %s267_s20, 128, %s643_s6, [#allocation4]  }
 0x360   :  { %488 = dma.done.wait [#allocation4], 128  }
 0x361   :  { %489 = vsyncadd [#allocation4], 4294967168 }
 0x362   :  { %273 = vsyncpa [#allocation3], 1 }
 0x363   :  { %274 = vsyncpa [#allocation6], 1 }
 0x364   :  { %275 = vsyncpa [#allocation9], 1 }
 0x365   :  { %276 = vsyncpa [#allocation12], 1 }
 0x366   :  { %277 = vsyncpa [#allocation4], 1 }

// kernel: transformer_vqvae_forward.17
= control target key start
LH: loop header
LB: loop body
LE: loop exit
PB: predicated region body
PF: predicated region fallthrough
CT: control target
= control target key end

     0   :  { %8 = vsyncpa [#allocation4], 0  ;;  %s339_s0 = inlined_call_operand.hbm [shape: f32[8,16], index: 0, kind: input, shape index: {}]   ;;  %s340_s1 = inlined_call_operand.hbm [shape: bf16[16,32], index: 1, kind: input, shape index: {}]   ;;  %s341_s2 = inlined_call_operand.hbm [shape: f32[1,32], index: 2, kind: input, shape index: {}]   ;;  %s342_s3 = inlined_call_operand.hbm [shape: f32[8,32], index: 3, kind: output, shape index: {}]  }
   0x1   :  { %9 = vsyncpa [#allocation7], 0 }
   0x2   :  { %10 = vsyncpa [#allocation5], 0  ;;  %s260_s12 = smov [#allocation6]   ;;  %s166_s16 = scalar_lea.hbm %s340_s1, 128 }
   0x3   :  { %s26_s13 = sshll.u32 %s260_s12, 4  ;;  %p167_p0 = scmp.ne.s32.totalorder %s340_s1, %s166_s16  ;;  %s27_s13 = int_to_ptr.vmem [resolvable:$true] %s26_s13 }
   0x4   :  { %p170_p1 = scmp.lt.u32.totalorder %s166_s16, %s340_s1 }
   0x6   :  { %p172_p2 = pnand %p170_p1, %p167_p0 }
   0x8   :  { %175 = shalt.err (!%p172_p2)
}
   0x9   :  { %s176_s21 = scalar_lea.vmem %s27_s13, 128  ;;  %p181_p4 = scmp.lt.s32.totalorder %s27_s13, %s27_s13 }
   0xa   :  { %p177_p3 = scmp.ne.s32.totalorder %s27_s13, %s176_s21  ;;  %p182_p5 = scmp.lt.s32.totalorder %s176_s21, %s176_s21 }
   0xc   :  { %p183_p6 = por %p182_p5, %p181_p4 }
   0xe   :  { %p184_p7 = pnand %p183_p6, %p177_p3 }
  0x10   :  { %187 = shalt.err (!%p184_p7)
}
  0x11   :  { %s261_s22 = smov 64   ;;  %s262_s23 = smov 4  }
  0x12   :  { %32 = dma.hbm_to_vmem [thread:$0]  %s340_s1, 128, %s27_s13, [#allocation7], %s261_s22, %s261_s22, %s262_s23  }
  0x13   :  { %s263_s26 = smov [#allocation3]   ;;  %s264_s28 = smov [#allocation8]  }
  0x14   :  { %s17_s27 = sshll.u32 %s263_s26, 4  ;;  %s39_s29 = sshll.u32 %s264_s28, 4  ;;  %s18_s27 = int_to_ptr.vmem [resolvable:$true] %s17_s27  ;;  %s40_s29 = int_to_ptr.vmem [resolvable:$true] %s39_s29 }
  0x15   :  { %s188_s5 = scalar_lea.hbm %s339_s0, 128 }
  0x16   :  { %p189_p8 = scmp.ne.s32.totalorder %s339_s0, %s188_s5  ;;  %p192_p9 = scmp.lt.u32.totalorder %s188_s5, %s339_s0 }
  0x18   :  { %p194_p10 = pnand %p192_p9, %p189_p8 }
  0x1a   :  { %197 = shalt.err (!%p194_p10)
}
  0x1b   :  { %s198_s1 = scalar_lea.vmem %s18_s27, 128  ;;  %p203_p12 = scmp.lt.s32.totalorder %s18_s27, %s18_s27 }
  0x1c   :  { %p199_p11 = scmp.ne.s32.totalorder %s18_s27, %s198_s1  ;;  %p204_p13 = scmp.lt.s32.totalorder %s198_s1, %s198_s1 }
  0x1e   :  { %p205_p0 = por %p204_p13, %p203_p12 }
  0x20   :  { %p206_p1 = pnand %p205_p0, %p199_p11 }
  0x22   :  { %209 = shalt.err (!%p206_p1)
}
  0x23   :  { %20 = dma.hbm_to_vmem [thread:$0]  %s339_s0, 128, %s18_s27, [#allocation4]  }
  0x24   :  { %s210_s14 = scalar_lea.hbm %s341_s2, 16 }
  0x25   :  { %p211_p2 = scmp.ne.s32.totalorder %s341_s2, %s210_s14  ;;  %p214_p3 = scmp.lt.u32.totalorder %s210_s14, %s341_s2 }
  0x27   :  { %p216_p4 = pnand %p214_p3, %p211_p2 }
  0x29   :  { %219 = shalt.err (!%p216_p4)
}
  0x2a   :  { %s220_s19 = scalar_lea.vmem %s40_s29, 16  ;;  %s224_s20 = scalar_lea.vmem %s40_s29, 32 }
  0x2b   :  { %p221_p5 = scmp.ne.s32.totalorder %s40_s29, %s220_s19  ;;  %p225_p6 = scmp.lt.s32.totalorder %s40_s29, %s40_s29 }
  0x2c   :  { %p226_p7 = scmp.lt.s32.totalorder %s224_s20, %s220_s19 }
  0x2e   :  { %p227_p8 = por %p226_p7, %p225_p6 }
  0x30   :  { %p228_p9 = pnand %p227_p8, %p221_p5 }
  0x32   :  { %231 = shalt.err (!%p228_p9)
}
  0x33   :  { %42 = dma.hbm_to_vmem [thread:$0]  %s341_s2, 16, %s40_s29, [#allocation7]  }
  0x34   :  { %254 = dma.done.wait [#allocation4], 128  }
  0x35   :  { %255 = vsyncadd [#allocation4], 4294967168 }
  0x36   :  { %256 = dma.done.wait [#allocation7], 144  }
  0x37   :  { %257 = vsyncadd [#allocation7], 4294967152  ;;  %vm57_vm0 = vcmask 261120   ;;  %v265_v0 = vmov 0.0   ;;  %vm266_vm1 = vmmov 0   ;;  %v165_v1 = vld [vmem:[#allocation6] sm:$0xff]  }
  0x38   :  { %58 = vst.msk [vmem:[#allocation2] sm:$0xff] %vm57_vm0, %v265_v0  ;;  %151 = vmatprep.subr.bf16.mxu0 %v265_v0  ;;  %153 = vmatprep.mubr.msk.bf16.mxu0 %vm266_vm1, %v265_v0  ;;  %v60_v2 = vld [vmem:[#allocation3] sm:$0xff]  ;;  %vm70_vm2 = vcmask 130048   ;;  %v148_v10 = vld [vmem:[#allocation8] ss:$0 sm:$0xff]  ;;  %s267_s2 = smov [#allocation9]  }
  0x39   :  { %152 = vmatpush3.bf16.msra.mxu0 %v165_v1  ;;  %v61_v3 = vpack.c.bf16 %v60_v2, %v60_v2  ;;  %s136_s22 = sshll.u32 %s267_s2, 4  ;;  %s137_s22 = int_to_ptr.vmem [resolvable:$true] %s136_s22 }
  0x3a   :  { %s232_s23 = scalar_lea.vmem %s137_s22, 128  ;;  %p237_p11 = scmp.lt.s32.totalorder %s137_s22, %s137_s22 }
  0x3b   :  { %p233_p10 = scmp.ne.s32.totalorder %s137_s22, %s232_s23  ;;  %p238_p12 = scmp.lt.s32.totalorder %s232_s23, %s232_s23 }
  0x3c   :  { %154 = vmatmul.mubr.msk.bf16.vlgmr.msra.gmra.mrb[0].mxu0 %vm70_vm2, %v61_v3 }
  0x3d   :  { %p239_p13 = por %p238_p12, %p237_p11 }
  0x3f   :  { %v59_v4 = vld [vmem:[#allocation2] sm:$0xff]  ;;  %p240_p0 = pnand %p239_p13, %p233_p10 }
 0x10f   :  { %v108_v5 = vpop.f32.mrb[0].mxu0 }
 0x110   :  { %v114_v6 = vadd.f32 %v108_v5, %v59_v4  ;;  %v155_v7 = vpop.f32.mrb[1].mxu0 }
 0x111   :  { %v111_v8 = vpop.f32.mrb[2].mxu0 }
 0x112   :  { %116 = vst.msk [vmem:[#allocation2] sm:$0xff] %vm57_vm0, %v114_v6  ;;  %v156_v9 = vpop.f32.mrb[3].mxu0 }
 0x119   :  { %v120_v11 = vld [vmem:[#allocation2] sm:$0xff] }
 0x11a   :  { %v128_v12 = vadd.f32 %v148_v10, %v120_v11 }
 0x11c   :  { %129 = vst.msk [vmem:[#allocation9] sm:$0xff] %vm57_vm0, %v128_v12 }
 0x11d   :  { %243 = shalt.err (!%p240_p0)
}
 0x11e   :  { %s244_s26 = scalar_lea.hbm %s342_s3, 128 }
 0x11f   :  { %p245_p1 = scmp.ne.s32.totalorder %s342_s3, %s244_s26  ;;  %p248_p2 = scmp.lt.u32.totalorder %s244_s26, %s342_s3 }
 0x121   :  { %p250_p3 = pnand %p248_p2, %p245_p1 }
 0x123   :  { %253 = shalt.err (!%p250_p3)
}
 0x124   :  { %139 = dma.vmem_to_hbm [thread:$0]  %s137_s22, 128, %s342_s3, [#allocation5]  }
 0x125   :  { %258 = dma.done.wait [#allocation5], 128  }
 0x126   :  { %259 = vsyncadd [#allocation5], 4294967168 }
 0x127   :  { %143 = vsyncpa [#allocation4], 1 }
 0x128   :  { %144 = vsyncpa [#allocation7], 1 }
 0x129   :  { %145 = vsyncpa [#allocation5], 1 }

// kernel: transformer_vqvae_forward.20
= control target key start
LH: loop header
LB: loop body
LE: loop exit
PB: predicated region body
PF: predicated region fallthrough
CT: control target
= control target key end

     0   :  { %8 = vsyncpa [#allocation3], 0  ;;  %s978_s0 = inlined_call_operand.hbm [shape: f32[2,6,32], index: 0, kind: input, shape index: {}]   ;;  %s979_s1 = inlined_call_operand.hbm [shape: bf16[96,64], index: 1, kind: input, shape index: {}]   ;;  %s980_s2 = inlined_call_operand.hbm [shape: f32[1,64], index: 2, kind: input, shape index: {}]   ;;  %s981_s3 = inlined_call_operand.hbm [shape: f32[2,4,64], index: 3, kind: output, shape index: {}]  }
   0x1   :  { %10 = vsyncpa [#allocation3 + $0x1], 0 }
   0x2   :  { %11 = vsyncpa [#allocation6], 0 }
   0x3   :  { %12 = vsyncpa [#allocation4], 0 }
   0x4   :  { %14 = vsyncpa [#allocation4 + $0x1], 0  ;;  %s747_s12 = smov 0   ;;  %s749_s13 = smov 0  }
   0x5   :  { %s751_s14 = smov 0   ;;  %s753_s15 = smov 0  }
   0x6 LB: > { %s768_s16 = sadd.s32 4294967295, %s715_s15   ;;  %s433_s17 = sadd.s32 4294967294, %s715_s15   ;;  %s715_s15 = sphi %s753_s15, %s1001_s15   ;;  %s711_s14 = sphi %s751_s14, %s1000_s14   ;;  %s707_s13 = sphi %s749_s13, %s999_s13   ;;  %s703_s12 = sphi %s747_s12, %s998_s12  }
   0x7   : > { %p40_p0 = scmp.ne.s32.totalorder %s707_s13, %s703_s12  ;;  %p982_p1 = scmp.eq.s32.totalorder %s768_s16, 0 }
   0x8   : > { %p112_p3 = scmp.eq.s32.totalorder %s433_s17, 1  ;;  %p434_p5 = scmp.ge.s32.totalorder %s715_s15, 1 }
   0x9   : > { %p777_p4 = por %p982_p1, %p40_p0  ;;  %p119_p7 = scmp.lt.s32.totalorder %s715_s15, 3 }
   0xa   : > { %p782_p6 = por %p112_p3, %p40_p0  ;;  %s717_s21 = smov [#allocation5]  }
   0xb   : > { %s985_s18 = scalar_select %p777_p4, 1, 0 }
   0xc   : > { %s986_s19 = scalar_select %p782_p6, 1, 0 }
   0xd   : > { %p787_p8 = pnand %p434_p5, %p119_p7  ;;  %s131_s22 = sshll.u32 %s717_s21, 4  ;;  %s791_s22 = int_to_ptr.vmem [resolvable:$true] %s131_s22 }
   0xe   : > { %s718_s24 = smov [#allocation7]   ;;  %s559_s28 = scalar_lea.hbm %s979_s1, 768 }
   0xf   : > { %p492_p9 = pneg %p787_p8  ;;  %s145_s25 = sshll.u32 %s718_s24, 4  ;;  %s802_s25 = int_to_ptr.vmem [resolvable:$true] %s145_s25 }
  0x10   : > { %p560_p12 = scmp.ne.s32.totalorder %s979_s1, %s559_s28  ;;  %p566_p5 = scmp.lt.u32.totalorder %s559_s28, %s979_s1 }
  0x11   : > { %p798_p11 = pnand %p492_p9, %p982_p1 }
  0x13   : > { %p561_p13 = pneg %p798_p11 }
  0x15   : > { %p562_p0 = pnand %p561_p13, %p560_p12 }
  0x17   : > { %p563_p3 = pneg %p562_p0 }
  0x19   : > { %p568_p7 = pnand %p566_p5, %p563_p3 }
  0x1b   : > { %571 = shalt.err (!%p568_p7)
}
  0x1c   : > { %s572_s6 = scalar_lea.vmem %s791_s22, 768  ;;  %p580_p2 = scmp.lt.s32.totalorder %s791_s22, %s791_s22 }
  0x1d   : > { %p573_p9 = scmp.ne.s32.totalorder %s791_s22, %s572_s6  ;;  %p581_p12 = scmp.lt.s32.totalorder %s572_s6, %s572_s6 }
  0x1f   : > { %p575_p10 = pnand %p573_p9, %p561_p13  ;;  %p582_p0 = por %p581_p12, %p580_p2 }
  0x21   : > { %p576_p1 = pneg %p575_p10 }
  0x23   : > { %p583_p6 = pnand %p582_p0, %p576_p1 }
  0x25   : > { %586 = shalt.err (!%p583_p6)
}
  0x26   : > { %s719_s7 = smov 64   ;;  %s720_s8 = smov 4  }
  0x27   : > { %495 = dma.hbm_to_vmem [thread:$0]  (!%p798_p11), %s979_s1, 768, %s791_s22, [#allocation6], %s719_s7, %s719_s7, %s720_s8  }
  0x28   : > { %s587_s21 = scalar_lea.hbm %s980_s2, 16 }
  0x29   : > { %p588_p2 = scmp.ne.s32.totalorder %s980_s2, %s587_s21  ;;  %p594_p10 = scmp.lt.u32.totalorder %s587_s21, %s980_s2 }
  0x2b   : > { %p590_p1 = pnand %p588_p2, %p561_p13 }
  0x2d   : > { %p591_p6 = pneg %p590_p1 }
  0x2f   : > { %p596_p3 = pnand %p594_p10, %p591_p6 }
  0x31   : > { %599 = shalt.err (!%p596_p3)
}
  0x32   : > { %s600_s22 = scalar_lea.vmem %s802_s25, 16  ;;  %s607_s29 = scalar_lea.vmem %s802_s25, 32 }
  0x33   : > { %p601_p5 = scmp.ne.s32.totalorder %s802_s25, %s600_s22  ;;  %p608_p12 = scmp.lt.s32.totalorder %s802_s25, %s802_s25 }
  0x34   : > { %p609_p0 = scmp.lt.s32.totalorder %s607_s29, %s600_s22 }
  0x35   : > { %p603_p7 = pnand %p601_p5, %p561_p13 }
  0x36   : > { %p610_p2 = por %p609_p0, %p608_p12 }
  0x37   : > { %p604_p9 = pneg %p603_p7 }
  0x39   : > { %p611_p1 = pnand %p610_p2, %p604_p9 }
  0x3b   : > { %614 = shalt.err (!%p611_p1)
}
  0x3c   : > { %498 = dma.hbm_to_vmem [thread:$0]  (!%p798_p11), %s980_s2, 16, %s802_s25, [#allocation6]  }
  0x3d   : > { %s858_s5 = sadd.s32 1, %s715_s15   ;;  %s27_s23 = sadd.s32 1, %s711_s14 }
  0x3e   : > { %s24_s6 = ssub.s32 %s715_s15, %s858_s5  ;;  %p34_p13 = scmp.ne.s32.totalorder %s711_s14, %s707_s13 }
  0x3f   : > { %p25_p6 = scmp.eq.s32.totalorder %s24_s6, 0  ;;  %p35_p10 = scmp.eq.s32.totalorder %s715_s15, 0 }
  0x40   : > { %p989_p3 = scmp.eq.s32.totalorder %s768_s16, 1  ;;  %p509_p7 = scmp.lt.s32.totalorder %s715_s15, 2 }
  0x41   : > { %s874_s8 = scalar_select %p25_p6, %s711_s14, %s27_s23  }
  0x42   : > { %p868_p5 = por %p989_p3, %p34_p13  ;;  %p36_p9 = por %p35_p10, %p34_p13 }
  0x43   : > { %s156_s9 = sand.u32 1, %s711_s14   ;;  %s439_s25 = sshll.u32 %s715_s15, 7 }
  0x44   : > { %s990_s7 = scalar_select %p868_p5, 1, 0 }
  0x45   : > { %s438_s10 = sshll.u32 %s156_s9, 3  ;;  %s881_s21 = scalar_lea.hbm %s978_s0, %s439_s25 }
  0x46   : > { %s160_s24 = scalar_lea.vmem [#allocation2], %s438_s10  ;;  %p885_p11 = pnand %p509_p7, %p36_p9 }
  0x47   : > { %s167_s26 = sshll.u32 %s160_s24, 4  ;;  %s157_s28 = scalar_lea.sflag [#allocation3], %s156_s9  ;;  %s883_s26 = int_to_ptr.vmem [resolvable:$true] %s167_s26 }
  0x48   : > { %s615_s22 = scalar_lea.hbm %s881_s21, 128  ;;  %p617_p0 = pneg %p885_p11 }
  0x49   : > { %p616_p12 = scmp.ne.s32.totalorder %s881_s21, %s615_s22  ;;  %s620_s4 = scalar_lea.hbm %s978_s0, 256 }
  0x4a   : > { %p621_p13 = scmp.lt.u32.totalorder %s881_s21, %s978_s0  ;;  %p622_p6 = scmp.lt.u32.totalorder %s620_s4, %s615_s22 }
  0x4b   : > { %p618_p2 = pnand %p617_p0, %p616_p12  ;;  %p624_p3 = scmp.lt.u32.totalorder %s615_s22, %s881_s21 }
  0x4c   : > { %p623_p10 = por %p622_p6, %p621_p13 }
  0x4d   : > { %p619_p1 = pneg %p618_p2 }
  0x4e   : > { %p625_p7 = por %p624_p3, %p623_p10 }
  0x50   : > { %p626_p9 = pnand %p625_p7, %p619_p1 }
  0x52   : > { %629 = shalt.err (!%p626_p9)
}
  0x53   : > { %s630_s9 = scalar_lea.vmem %s883_s26, 128  ;;  %s721_s10 = smov [#allocation2]  }
  0x54   : > { %p631_p12 = scmp.ne.s32.totalorder %s883_s26, %s630_s9  ;;  %s635_s25 = sshll.u32 %s721_s10, 4  ;;  %s636_s25 = int_to_ptr.vmem [resolvable:$false] %s635_s25 }
  0x55   : > { %s637_s11 = scalar_lea.vmem %s636_s25, 256  ;;  %p638_p4 = scmp.lt.s32.totalorder %s883_s26, %s636_s25 }
  0x56   : > { %p633_p2 = pnand %p631_p12, %p617_p0  ;;  %p639_p13 = scmp.lt.s32.totalorder %s637_s11, %s630_s9 }
  0x58   : > { %p634_p5 = pneg %p633_p2  ;;  %p640_p6 = por %p639_p13, %p638_p4 }
  0x5a   : > { %p641_p10 = pnand %p640_p6, %p634_p5 }
  0x5c   : > { %644 = shalt.err (!%p641_p10)
}
  0x5d   : > { %502 = dma.hbm_to_vmem [thread:$0]  (!%p885_p11), %s881_s21, 128, %s883_s26, %s157_s28  }
  0x5e   : > { %176 = sbr.rel (%p787_p8) target bundleno = 458 (0x1ca), region = 32  ;;  %s917_s17 = sand.u32 (!%p787_p8), 1, %s707_s13  }
  0x5f   : > { %s441_s24 = sshll.u32 (!%p787_p8), %s917_s17, 3  ;;  %s179_s22 = scalar_lea.sflag (!%p787_p8), [#allocation3], %s917_s17 }
  0x60   : > { %s182_s29 = scalar_lea.vmem (!%p787_p8), [#allocation2], %s441_s24  ;;  %p992_p4 = scmp.ne.s32.totalorder (!%p787_p8), %s985_s18, 0 }
  0x65   : > { %690 = dma.done.wait (%p992_p4), %s179_s22, 128  }
  0x66   : > { %692 = vsyncadd (%p992_p4), %s179_s22, 4294967168  ;;  %p993_p5 = scmp.eq.s32.totalorder %s768_s16, 0 }
  0x68   : > { %694 = dma.done.wait (%p993_p5), [#allocation6], 784   ;;  %p994_p11 = pmov %p993_p5 }
  0x69   : > { %v722_v0 = vmov 0.0   ;;  %vm723_vm0 = vmmov 0   ;;  %v214_v1 = vld [vmem:[%s182_s29] sm:$0x3f]  ;;  %v553_v3 = vld [vmem:[#allocation5] sm:$0xff]   ;;  %s724_s20 = smov 32  }
  0x6a   : > { %696 = vsyncadd (%p994_p11), [#allocation6], 4294966512  ;;  %464 = vmatprep.subr.bf16.mxu0 %v722_v0  ;;  %476 = vmatprep.mubr.msk.bf16.mxu0 %vm723_vm0, %v722_v0  ;;  %v216_v2 = vrot.slane %v214_v1, 1  ;;  %v220_v4 = vrot.slane %v214_v1, 2  ;;  %v554_v5 = vld [vmem:[#allocation5 + $0x8] sm:$0xff]   ;;  %s725_s18 = smov 64  }
  0x6b   : > { %465 = vmatpush3.bf16.msra.mxu0 %v553_v3  ;;  %v555_v6 = vld [vmem:[#allocation5 + $0x10] sm:$0xff]   ;;  %v556_v7 = vld [vmem:[#allocation5 + $0x18] sm:$0xff]   ;;  %v557_v8 = vld [vmem:[#allocation5 + $0x20] sm:$0xff]   ;;  %vm224_vm1 = vcmask 261120   ;;  %vm226_vm2 = vcmask 523264   ;;  %vm284_vm3 = vcmask 785408  }
  0x6c   : > { %217 = vrot.lane.b32.xlu0 %v216_v2, %s724_s20  ;;  %466 = vmatprep.subr.bf16.mxu0 %v722_v0  ;;  %v558_v9 = vld [vmem:[#allocation5 + $0x28] sm:$0xff]   ;;  %s444_s21 = sshll.u32 %s917_s17, 2  ;;  %v445_v15 = vld [vmem:[#allocation7] ss:$0 sm:$0xff]  ;;  %s454_s26 = sshll.u32 %s768_s16, 6  ;;  %vm328_vm4 = vcmask 519168  }
  0x6d   : > { %s212_s27 = scalar_lea.vmem [#allocation8], %s444_s21  ;;  %s934_s23 = scalar_lea.hbm %s981_s3, %s454_s26 }
  0x6e   : > { %s344_s28 = sshll.u32 %s212_s27, 4  ;;  %s331_s16 = scalar_lea.sflag [#allocation4], %s917_s17  ;;  %s936_s28 = int_to_ptr.vmem [resolvable:$true] %s344_s28 }
  0x6f   : > { %467 = vmatpush3.bf16.msra.mxu0 %v554_v5  ;;  %s645_s6 = scalar_lea.vmem %s936_s28, 64  ;;  %p995_p0 = scmp.ne.s32.totalorder %s990_s7, 0 }
  0x70   : > { %221 = vrot.lane.b32.xlu0 %v220_v4, %s725_s18  ;;  %468 = vmatprep.subr.bf16.mxu0 %v722_v0  ;;  %p646_p8 = scmp.ne.s32.totalorder %s936_s28, %s645_s6  ;;  %s726_s9 = smov [#allocation8]  }
  0x71   : > { %s649_s10 = sshll.u32 %s726_s9, 4  ;;  %s650_s10 = int_to_ptr.vmem [resolvable:$false] %s649_s10 }
  0x72   : > { %p647_p1 = pnand %p646_p8, %p995_p0  ;;  %s651_s25 = scalar_lea.vmem %s650_s10, 128 }
  0x73   : > { %469 = vmatpush3.bf16.msra.mxu0 %v555_v6  ;;  %p652_p7 = scmp.lt.s32.totalorder %s936_s28, %s650_s10  ;;  %p653_p9 = scmp.lt.s32.totalorder %s651_s25, %s645_s6 }
  0x74   : > { %470 = vmatprep.subr.bf16.mxu0 %v722_v0  ;;  %p648_p3 = pneg %p647_p1 }
  0x75   : > { %p654_p12 = por %p653_p9, %p652_p7 }
  0x77   : > { %471 = vmatpush3.bf16.msra.mxu0 %v556_v7  ;;  %p655_p2 = pnand %p654_p12, %p648_p3 }
  0x78   : > { %472 = vmatprep.subr.bf16.mxu0 %v722_v0 }
  0x7b   : > { %473 = vmatpush3.bf16.msra.mxu0 %v557_v8 }
  0x7c   : > { %474 = vmatprep.subr.bf16.mxu0 %v722_v0 }
  0x7f   : > { %475 = vmatpush3.bf16.msra.mxu0 %v558_v9 }
  0xde   : > { %v218_v10 = vpop.permute.xlu0 %217 }
  0xdf   : > { %v225_v11 = vsel %vm224_vm1, %v214_v1, %v218_v10 }
  0xe2   : > { %v222_v12 = vpop.permute.xlu0 %221 }
  0xe3   : > { %v227_v13 = vsel %vm226_vm2, %v225_v11, %v222_v12 }
  0xe4   : > { %v228_v14 = vpack.c.bf16 %v227_v13, %v227_v13 }
  0xe6   : > { %477 = vmatmul.mubr.msk.bf16.vlgmr.msra.gmra.mrb[0].mxu0 %vm284_vm3, %v228_v14 }
 0x1b9   : > { %v322_v16 = vpop.f32.mrb[0].mxu0 }
 0x1ba   : > { %v323_v17 = vadd.f32 %v445_v15, %v322_v16  ;;  %v478_v18 = vpop.f32.mrb[1].mxu0 }
 0x1bb   : > { %v325_v19 = vpop.f32.mrb[2].mxu0 }
 0x1bc   : > { %v479_v20 = vpop.f32.mrb[3].mxu0  ;;  %329 = vst.msk [vmem:[%s212_s27] sm:$0xf] %vm328_vm4, %v323_v17 }
 0x1bd   : > { %658 = shalt.err (!%p655_p2)
}
 0x1be   : > { %s659_s11 = scalar_lea.hbm %s934_s23, 64  ;;  %s663_s22 = scalar_lea.hbm %s981_s3, 128 }
 0x1bf   : > { %p660_p13 = scmp.ne.s32.totalorder %s934_s23, %s659_s11  ;;  %p664_p4 = scmp.lt.u32.totalorder %s934_s23, %s981_s3 }
 0x1c0   : > { %p665_p5 = scmp.lt.u32.totalorder %s663_s22, %s659_s11  ;;  %p667_p8 = scmp.lt.u32.totalorder %s659_s11, %s934_s23 }
 0x1c1   : > { %p661_p6 = pnand %p660_p13, %p995_p0 }
 0x1c2   : > { %p666_p11 = por %p665_p5, %p664_p4 }
 0x1c3   : > { %p662_p10 = pneg %p661_p6 }
 0x1c4   : > { %p668_p1 = por %p667_p8, %p666_p11 }
 0x1c6   : > { %p669_p3 = pnand %p668_p1, %p662_p10 }
 0x1c8   : > { %672 = shalt.err (!%p669_p3)
}
 0x1c9   : > { %490 = dma.vmem_to_hbm [thread:$0]  (%p995_p0), %s936_s28, 64, %s934_s23, %s331_s16  }
 0x1ca PF: > { %s356_s18 = sand.u32 1, %s703_s12   ;;  %p996_p7 = scmp.ne.s32.totalorder %s986_s19, 0 }
 0x1cb   : > { %p997_p9 = scmp.ge.s32.totalorder %s715_s15, 2  ;;  %s357_s21 = scalar_lea.sflag [#allocation4], %s356_s18 }
 0x1cd   : > { %p504_p12 = pnand %p997_p9, %p996_p7 }
 0x1cf   : > { %698 = dma.done.wait (!%p504_p12), %s357_s21, 64  }
 0x1d0   : > { %700 = vsyncadd (!%p504_p12), %s357_s21, 4294967232  ;;  %p17_p2 = scmp.ge.s32.totalorder %s858_s5, 4   ;;  %s998_s12 = smov %s707_s13 }
 0x1d1   : > { %s999_s13 = smov %s711_s14  ;;  %s1000_s14 = smov %s874_s8 }
 0x1d2   : > { %s1001_s15 = smov %s858_s5  ;;  %19 = sbr.rel (!%p17_p2) target bundleno = 6 (0x6), region = 85 }
 0x1d9   :  { %362 = vsyncpa [#allocation3], 1 }
 0x1da   :  { %364 = vsyncpa [#allocation3 + $0x1], 1 }
 0x1db   :  { %365 = vsyncpa [#allocation6], 1 }
 0x1dc   :  { %366 = vsyncpa [#allocation4], 1 }
 0x1dd   :  { %368 = vsyncpa [#allocation4 + $0x1], 1 }

// kernel: transformer_vqvae_forward.16
= control target key start
LH: loop header
LB: loop body
LE: loop exit
PB: predicated region body
PF: predicated region fallthrough
CT: control target
= control target key end

     0   :  { %9 = vsyncpa [#allocation3], 0  ;;  %s3692_s0 = inlined_call_operand.hbm [shape: f32[8,16], index: 0, kind: input, shape index: {}]   ;;  %s3693_s1 = inlined_call_operand.hbm [shape: f32[4,16,4], index: 1, kind: input, shape index: {}]   ;;  %s3694_s2 = inlined_call_operand.hbm [shape: f32[8,16], index: 2, kind: output, shape index: {0}]   ;;  %s3695_s3 = inlined_call_operand.hbm [shape: s32[8,4], index: 3, kind: output, shape index: {1}]  }
   0x1   :  { %10 = vsyncpa [#allocation6], 0 }
   0x2   :  { %11 = vsyncpa [#allocation4], 0 }
   0x3   :  { %12 = vsyncpa [#allocation9], 0  ;;  %s2493_s12 = smov [#allocation2]   ;;  %s2494_s14 = smov [#allocation5]  }
   0x4   :  { %s19_s13 = sshll.u32 %s2493_s12, 4  ;;  %s28_s15 = sshll.u32 %s2494_s14, 4  ;;  %s20_s13 = int_to_ptr.vmem [resolvable:$true] %s19_s13  ;;  %s2529_s15 = int_to_ptr.vmem [resolvable:$true] %s28_s15 }
   0x5   :  { %s2397_s18 = scalar_lea.hbm %s3692_s0, 128 }
   0x6   :  { %p2398_p0 = scmp.ne.s32.totalorder %s3692_s0, %s2397_s18  ;;  %p2401_p1 = scmp.lt.u32.totalorder %s2397_s18, %s3692_s0 }
   0x8   :  { %p2403_p2 = pnand %p2401_p1, %p2398_p0 }
   0xa   :  { %2406 = shalt.err (!%p2403_p2)
}
   0xb   :  { %s2407_s23 = scalar_lea.vmem %s20_s13, 128  ;;  %p2412_p4 = scmp.lt.s32.totalorder %s20_s13, %s20_s13 }
   0xc   :  { %p2408_p3 = scmp.ne.s32.totalorder %s20_s13, %s2407_s23  ;;  %p2413_p5 = scmp.lt.s32.totalorder %s2407_s23, %s2407_s23 }
   0xe   :  { %p2414_p6 = por %p2413_p5, %p2412_p4 }
  0x10   :  { %p2415_p7 = pnand %p2414_p6, %p2408_p3 }
  0x12   :  { %2418 = shalt.err (!%p2415_p7)
}
  0x13   :  { %22 = dma.hbm_to_vmem [thread:$0]  %s3692_s0, 128, %s20_s13, [#allocation3]  }
  0x14   :  { %s2419_s28 = scalar_lea.hbm %s3693_s1, 1024 }
  0x15   :  { %p2420_p8 = scmp.ne.s32.totalorder %s3693_s1, %s2419_s28  ;;  %p2423_p9 = scmp.lt.u32.totalorder %s2419_s28, %s3693_s1 }
  0x17   :  { %p2425_p10 = pnand %p2423_p9, %p2420_p8 }
  0x19   :  { %2428 = shalt.err (!%p2425_p10)
}
  0x1a   :  { %s2429_s6 = scalar_lea.vmem %s2529_s15, 1024  ;;  %p2434_p12 = scmp.lt.s32.totalorder %s2529_s15, %s2529_s15 }
  0x1b   :  { %p2430_p11 = scmp.ne.s32.totalorder %s2529_s15, %s2429_s6  ;;  %p2435_p13 = scmp.lt.s32.totalorder %s2429_s6, %s2429_s6 }
  0x1d   :  { %p2436_p0 = por %p2435_p13, %p2434_p12 }
  0x1f   :  { %p2437_p1 = pnand %p2436_p0, %p2430_p11 }
  0x21   :  { %2440 = shalt.err (!%p2437_p1)
}
  0x22   :  { %s2495_s0 = smov 128   ;;  %s2496_s7 = smov 8  }
  0x23   :  { %34 = dma.hbm_to_vmem [thread:$0]  %s3693_s1, 1024, %s2529_s15, [#allocation6], %s2495_s0, %s2495_s0, %s2496_s7  }
  0x24   :  { %2485 = dma.done.wait [#allocation3], 128  }
  0x25   :  { %2486 = vsyncadd [#allocation3], 4294967168 }
  0x26   :  { %2487 = dma.done.wait [#allocation6], 1024  }
  0x27   :  { %2488 = vsyncadd [#allocation6], 4294966272  ;;  %v625_v0 = vld [vmem:[#allocation5 + $0x10] sm:$0xff]  ;;  %v2561_v1 = vld [vmem:[#allocation5 + $0x20] sm:$0xff]  ;;  %s2497_s10 = smov 4   ;;  %s2498_s1 = smov 12   ;;  %v49_v10 = vlaneseq }
  0x28   :  { %3733 = vst [vmem:[#allocation14_spill] sm:$0xff] %v2561_v1  ;;  %629 = vrot.lane.b32.xlu0 %v625_v0, %s2497_s10  ;;  %1174 = vrot.lane.b32.xlu1 %v2561_v1, %s2496_s7  ;;  %v2566_v2 = vld [vmem:[#allocation5 + $0x28] sm:$0xff]  ;;  %v2568_v3 = vld [vmem:[#allocation5 + $0x30] sm:$0xff]  ;;  %v2570_v4 = vld [vmem:[#allocation5 + $0x38] sm:$0xff]  ;;  %v2499_v8 = vmov 1966171168  }
  0x29   :  { %3734 = vst [vmem:[#allocation15_spill] sm:$0xff] %v2566_v2  ;;  %3735 = vst [vmem:[#allocation16_spill] sm:$0xff] %v2568_v3  ;;  %v626_v5 = vld [vmem:[#allocation5 + $0x18] sm:$0xff]  ;;  %v47_v9 = vunpack.c.l.s4 %v2499_v8  ;;  %v2584_v12 = vshrl.u32 %v49_v10, 7  ;;  %s2500_s11 = smov 124   ;;  %s2501_s12 = smov 120  }
  0x2a   :  { %3736 = vst [vmem:[#allocation17_spill] sm:$0xff] %v2570_v4  ;;  %v41_v14 = vld [vmem:[#allocation2] sm:$0xff]  ;;  %s2502_s13 = smov 116   ;;  %vm166_vm0 = vcmask 31744   ;;  %vm242_vm1 = vcmask 130112   ;;  %vm307_vm2 = vcmask 1041409  }
  0x2b   :  { %v48_v11 = vunpack.c.0.s8 %v47_v9  ;;  %v2588_v16 = vsub.s32 0, %v2584_v12  ;;  %v45_v26 = vcombine.high %v41_v14, %v41_v14  ;;  %vm309_vm3 = vcmask 1042434   ;;  %s2507_s14 = smov [#allocation8]  }
  0x2c   :  { %631 = vrot.lane.b32.xlu0 %v626_v5, %s2497_s10  ;;  %1176 = vrot.lane.b32.xlu1 %v2566_v2, %s2496_s7  ;;  %vm311_vm4 = vcmask 1043459   ;;  %vm313_vm5 = vcmask 1044484   ;;  %vm315_vm6 = vcmask 1045509   ;;  %vm317_vm7 = vcmask 1046534   ;;  %s2300_s15 = sshll.u32 %s2507_s14, 4  ;;  %s2301_s15 = int_to_ptr.vmem [resolvable:$true] %s2300_s15 }
  0x2d   :  { %v51_v13 = vsub.s32 %v48_v11, %v2584_v12  ;;  %3737 = vst [vmem:[#allocation18_spill] sm:$0xff] %v2588_v16  ;;  %vm319_vm8 = vcmask 1047559   ;;  %vm322_vm9 = vcmask 130048   ;;  %s2441_s16 = scalar_lea.vmem %s2301_s15, 128  ;;  %p2446_p3 = scmp.lt.s32.totalorder %s2301_s15, %s2301_s15 }
  0x2e   :  { %p2442_p2 = scmp.ne.s32.totalorder %s2301_s15, %s2441_s16  ;;  %p2447_p4 = scmp.lt.s32.totalorder %s2441_s16, %s2441_s16 }
  0x2f   :  { %v52_v15 = vrot.slane %v41_v14, %v51_v13  ;;  %v59_v33 = vrot.slane %v45_v26, %v51_v13 }
  0x30   :  { %1719 = vrot.lane.b32.xlu0 %v2568_v3, %s2498_s1  ;;  %1721 = vrot.lane.b32.xlu1 %v2570_v4, %s2498_s1  ;;  %p2448_p5 = por %p2447_p4, %p2446_p3 }
  0x31   :  { %v60_v17 = vcombine.high %v52_v15, %v52_v15  ;;  %v68_v18 = vrot.slane %v52_v15, %v51_v13  ;;  %v75_v38 = vrot.slane %v59_v33, %v51_v13  ;;  %v61_v50 = vcombine.high %v59_v33, %v59_v33 }
  0x32   :  { %p2449_p6 = pnand %p2448_p5, %p2442_p2 }
  0x33   :  { %v2591_v19 = vrot.slane %v68_v18, %v2588_v16  ;;  %v82_v20 = vrot.slane %v60_v17, %v51_v13  ;;  %v90_v22 = vcombine.high %v68_v18, %v68_v18  ;;  %v2620_v39 = vrot.slane %v75_v38, %v2588_v16 }
  0x34   :  { %v89_v57 = vrot.slane %v61_v50, %v51_v13 }
  0x35   :  { %v2594_v21 = vrot.slane %v82_v20, %v2588_v16  ;;  %v92_v25 = vcombine.high %v82_v20, %v82_v20  ;;  %v2603_v29 = vrot.slane %v90_v22, %v2588_v16  ;;  %v91_v22 = vcombine.high %v75_v38, %v75_v38 }
  0x36   :  { %v2649_v60 = vrot.slane %v89_v57, %v2588_v16 }
  0x37   :  { %v2611_v32 = vrot.slane %v92_v25, %v2588_v16 }
  0x9a   :  { %v2596_v23 = vpop.permute.xlu0 %629  ;;  %v2626_v44 = vpop.permute.xlu1 %1174 }
  0x9b   :  { %v635_v24 = vsub.f32 %v2591_v19, %v2596_v23  ;;  %v637_v28 = vsub.f32 %v2594_v21, %v2596_v23  ;;  %v639_v37 = vsub.f32 %v2603_v29, %v2596_v23  ;;  %v641_v43 = vsub.f32 %v2611_v32, %v2596_v23 }
  0x9c   :  { %v643_v48 = vsub.f32 %v2620_v39, %v2596_v23  ;;  %v1180_v49 = vsub.f32 %v2591_v19, %v2626_v44  ;;  %v1182_v59 = vsub.f32 %v2594_v21, %v2626_v44  ;;  %v645_v0 = vsub.f32 %v2649_v60, %v2596_v23 }
  0x9d   :  { %v651_v27 = vmul.f32 %v635_v24, %v635_v24  ;;  %v653_v35 = vmul.f32 %v637_v28, %v637_v28  ;;  %v655_v41 = vmul.f32 %v639_v37, %v639_v37  ;;  %v657_v46 = vmul.f32 %v641_v43, %v641_v43 }
  0x9e   :  { %v2605_v30 = vpop.permute.xlu0 %631  ;;  %v2638_v51 = vpop.permute.xlu1 %1176  ;;  %v659_v53 = vmul.f32 %v643_v48, %v643_v48  ;;  %v1196_v55 = vmul.f32 %v1180_v49, %v1180_v49  ;;  %v1198_v62 = vmul.f32 %v1182_v59, %v1182_v59  ;;  %v661_v9 = vmul.f32 %v645_v0, %v645_v0 }
  0x9f   :  { %683 = vrot.lane.b32.xlu0 %v651_v27, %s2500_s11  ;;  %v636_v31 = vsub.f32 %v2591_v19, %v2605_v30  ;;  %v638_v36 = vsub.f32 %v2594_v21, %v2605_v30  ;;  %v640_v42 = vsub.f32 %v2603_v29, %v2605_v30  ;;  %v642_v47 = vsub.f32 %v2611_v32, %v2605_v30 }
  0xa0   :  { %v644_v54 = vsub.f32 %v2620_v39, %v2605_v30  ;;  %v1181_v56 = vsub.f32 %v2591_v19, %v2638_v51  ;;  %v1183_v63 = vsub.f32 %v2594_v21, %v2638_v51  ;;  %v646_v11 = vsub.f32 %v2649_v60, %v2605_v30 }
  0xa1   :  { %v652_v34 = vmul.f32 %v636_v31, %v636_v31  ;;  %v654_v40 = vmul.f32 %v638_v36, %v638_v36  ;;  %v656_v45 = vmul.f32 %v640_v42, %v640_v42  ;;  %v658_v52 = vmul.f32 %v642_v47, %v642_v47 }
  0xa2   :  { %v660_v58 = vmul.f32 %v644_v54, %v644_v54  ;;  %v1197_v61 = vmul.f32 %v1181_v56, %v1181_v56  ;;  %v2659_v5 = vpop.permute.xlu0 %1719  ;;  %v1199_v8 = vmul.f32 %v1183_v63, %v1183_v63  ;;  %v1184_v13 = vsub.f32 %v2603_v29, %v2626_v44  ;;  %v2669_v15 = vpop.permute.xlu1 %1721 }
  0xa3   :  { %685 = vrot.lane.b32.xlu1 %v652_v34, %s2500_s11  ;;  %687 = vrot.lane.b32.xlu0 %v653_v35, %s2500_s11  ;;  %v1725_v14 = vsub.f32 %v2591_v19, %v2659_v5  ;;  %v662_v17 = vmul.f32 %v646_v11, %v646_v11  ;;  %v1185_v20 = vsub.f32 %v2603_v29, %v2638_v51 }
  0xa4   :  { %v1200_v18 = vmul.f32 %v1184_v13, %v1184_v13  ;;  %v1726_v25 = vsub.f32 %v2591_v19, %v2669_v15  ;;  %v1727_v27 = vsub.f32 %v2594_v21, %v2659_v5  ;;  %v2680_v28 = vrot.slane %v91_v22, %v2588_v16 }
  0xa5   :  { %v1741_v24 = vmul.f32 %v1725_v14, %v1725_v14  ;;  %v1201_v26 = vmul.f32 %v1185_v20, %v1185_v20  ;;  %v1728_v34 = vsub.f32 %v2594_v21, %v2669_v15  ;;  %v93_v36 = vcombine.high %v89_v57, %v89_v57 }
  0xa6   :  { %v1742_v31 = vmul.f32 %v1726_v25, %v1726_v25  ;;  %v1743_v33 = vmul.f32 %v1727_v27, %v1727_v27  ;;  %v647_v35 = vsub.f32 %v2680_v28, %v2596_v23  ;;  %v1729_v47 = vsub.f32 %v2603_v29, %v2659_v5 }
  0xa7   :  { %689 = vrot.lane.b32.xlu1 %v654_v40, %s2500_s11  ;;  %691 = vrot.lane.b32.xlu0 %v655_v41, %s2500_s11  ;;  %v1744_v37 = vmul.f32 %v1728_v34, %v1728_v34  ;;  %v648_v40 = vsub.f32 %v2680_v28, %v2605_v30  ;;  %v1186_v41 = vsub.f32 %v2611_v32, %v2626_v44 }
  0xa8   :  { %v663_v38 = vmul.f32 %v647_v35, %v647_v35  ;;  %v2697_v42 = vrot.slane %v93_v36, %v2588_v16  ;;  %v1745_v49 = vmul.f32 %v1729_v47, %v1729_v47  ;;  %v1730_v50 = vsub.f32 %v2603_v29, %v2669_v15  ;;  %v2770_v47 = vld [vmem:[#allocation5] sm:$0xff] }
  0xa9   :  { %v664_v43 = vmul.f32 %v648_v40, %v648_v40  ;;  %v1188_v56 = vsub.f32 %v2620_v39, %v2626_v44  ;;  %v1731_v59 = vsub.f32 %v2611_v32, %v2659_v5  ;;  %v1190_v63 = vsub.f32 %v2649_v60, %v2626_v44 }
  0xaa   :  { %v1733_v11 = vsub.f32 %v2620_v39, %v2659_v5  ;;  %v1735_v25 = vsub.f32 %v2649_v60, %v2659_v5  ;;  %v1195_v36 = vsub.f32 %v2697_v42, %v2638_v51 }
  0xab   :  { %693 = vrot.lane.b32.xlu1 %v656_v45, %s2500_s11  ;;  %695 = vrot.lane.b32.xlu0 %v657_v46, %s2500_s11  ;;  %v1202_v45 = vmul.f32 %v1186_v41, %v1186_v41  ;;  %v1187_v46 = vsub.f32 %v2611_v32, %v2638_v51  ;;  %v1739_v41 = vsub.f32 %v2697_v42, %v2659_v5 }
  0xac   :  { %v1749_v14 = vmul.f32 %v1733_v11, %v1733_v11  ;;  %v1751_v27 = vmul.f32 %v1735_v25, %v1735_v25  ;;  %v142_v25 = vsub.f32 %v2620_v39, %v2770_v47 }
  0xad   :  { %v1203_v48 = vmul.f32 %v1187_v46, %v1187_v46 }
  0xaf   :  { %697 = vrot.lane.b32.xlu1 %v658_v52, %s2500_s11  ;;  %699 = vrot.lane.b32.xlu0 %v659_v53, %s2500_s11  ;;  %v649_v52 = vsub.f32 %v2697_v42, %v2596_v23  ;;  %v1746_v53 = vmul.f32 %v1730_v50, %v1730_v50  ;;  %v1189_v23 = vsub.f32 %v2620_v39, %v2638_v51 }
  0xb0   :  { %v136_v50 = vsub.f32 %v2594_v21, %v2770_v47 }
  0xb1   :  { %v665_v54 = vmul.f32 %v649_v52, %v649_v52  ;;  %v43_v52 = vld [vmem:[#allocation5 + $0x8] sm:$0xff] }
  0xb3   :  { %701 = vrot.lane.b32.xlu1 %v660_v58, %s2500_s11  ;;  %1228 = vrot.lane.b32.xlu0 %v1196_v55, %s2501_s12  ;;  %v650_v55 = vsub.f32 %v2697_v42, %v2605_v30  ;;  %v1204_v58 = vmul.f32 %v1188_v56, %v1188_v56  ;;  %v1205_v30 = vmul.f32 %v1189_v23, %v1189_v23 }
  0xb4   :  { %v137_v56 = vsub.f32 %v2594_v21, %v43_v52 }
  0xb5   :  { %v666_v57 = vmul.f32 %v650_v55, %v650_v55  ;;  %v152_v55 = vmul.f32 %v136_v50, %v136_v50 }
  0xb7   :  { %1230 = vrot.lane.b32.xlu1 %v1197_v61, %s2501_s12  ;;  %1232 = vrot.lane.b32.xlu0 %v1198_v62, %s2501_s12  ;;  %v1747_v61 = vmul.f32 %v1731_v59, %v1731_v59  ;;  %v1732_v62 = vsub.f32 %v2611_v32, %v2669_v15  ;;  %v173_v59 = vsel %vm166_vm0, %v152_v55, 0.0 }
  0xb9   :  { %v1748_v0 = vmul.f32 %v1732_v62, %v1732_v62 }
  0xbb   :  { %1234 = vrot.lane.b32.xlu1 %v1199_v8, %s2501_s12  ;;  %703 = vrot.lane.b32.xlu0 %v661_v9, %s2500_s11  ;;  %v1206_v8 = vmul.f32 %v1190_v63, %v1190_v63  ;;  %v1191_v9 = vsub.f32 %v2649_v60, %v2638_v51  ;;  %v138_v63 = vsub.f32 %v2603_v29, %v2770_v47 }
  0xbd   :  { %v1207_v13 = vmul.f32 %v1191_v9, %v1191_v9  ;;  %v141_v9 = vsub.f32 %v2611_v32, %v43_v52 }
  0xbf   :  { %705 = vrot.lane.b32.xlu1 %v662_v17, %s2500_s11  ;;  %1236 = vrot.lane.b32.xlu0 %v1200_v18, %s2501_s12  ;;  %v1734_v17 = vsub.f32 %v2620_v39, %v2669_v15  ;;  %v1192_v18 = vsub.f32 %v2680_v28, %v2626_v44 }
  0xc1   :  { %v1750_v20 = vmul.f32 %v1734_v17, %v1734_v17  ;;  %v1208_v22 = vmul.f32 %v1192_v18, %v1192_v18  ;;  %v157_v18 = vmul.f32 %v141_v9, %v141_v9 }
  0xc3   :  { %1238 = vrot.lane.b32.xlu1 %v1201_v26, %s2501_s12  ;;  %1773 = vrot.lane.b32.xlu0 %v1741_v24, %s2502_s13  ;;  %v1193_v24 = vsub.f32 %v2680_v28, %v2638_v51 }
  0xc5   :  { %v1209_v26 = vmul.f32 %v1193_v24, %v1193_v24 }
  0xc7   :  { %1775 = vrot.lane.b32.xlu1 %v1742_v31, %s2502_s13  ;;  %1777 = vrot.lane.b32.xlu0 %v1743_v33, %s2502_s13  ;;  %v1736_v31 = vsub.f32 %v2649_v60, %v2669_v15  ;;  %v1194_v33 = vsub.f32 %v2697_v42, %v2626_v44  ;;  %v1738_v44 = vsub.f32 %v2680_v28, %v2669_v15 }
  0xc9   :  { %v1752_v34 = vmul.f32 %v1736_v31, %v1736_v31  ;;  %v1210_v35 = vmul.f32 %v1194_v33, %v1194_v33  ;;  %v1754_v51 = vmul.f32 %v1738_v44, %v1738_v44  ;;  %v145_v33 = vsub.f32 %v2649_v60, %v43_v52 }
  0xca   :  { %v147_v44 = vsub.f32 %v2680_v28, %v43_v52 }
  0xcb   :  { %1779 = vrot.lane.b32.xlu1 %v1744_v37, %s2502_s13  ;;  %707 = vrot.lane.b32.xlu0 %v663_v38, %s2500_s11  ;;  %v1737_v37 = vsub.f32 %v2680_v28, %v2659_v5  ;;  %v1211_v38 = vmul.f32 %v1195_v36, %v1195_v36  ;;  %v134_v5 = vsub.f32 %v2591_v19, %v2770_v47 }
  0xcc   :  { %v144_v36 = vsub.f32 %v2649_v60, %v2770_v47  ;;  %v163_v60 = vmul.f32 %v147_v44, %v147_v44 }
  0xcd   :  { %v1753_v40 = vmul.f32 %v1737_v37, %v1737_v37 }
  0xcf   :  { %709 = vrot.lane.b32.xlu1 %v664_v43, %s2500_s11  ;;  %1240 = vrot.lane.b32.xlu0 %v1202_v45, %s2501_s12  ;;  %v1755_v43 = vmul.f32 %v1739_v41, %v1739_v41  ;;  %v1740_v45 = vsub.f32 %v2697_v42, %v2669_v15 }
  0xd1   :  { %v1756_v46 = vmul.f32 %v1740_v45, %v1740_v45 }
  0xd3   :  { %1242 = vrot.lane.b32.xlu1 %v1203_v48, %s2501_s12  ;;  %1781 = vrot.lane.b32.xlu0 %v1745_v49, %s2502_s13  ;;  %v150_v49 = vmul.f32 %v134_v5, %v134_v5 }
  0xd7   :  { %1783 = vrot.lane.b32.xlu1 %v1746_v53, %s2502_s13  ;;  %711 = vrot.lane.b32.xlu0 %v665_v54, %s2500_s11  ;;  %v167_v54 = vsel %vm166_vm0, %v150_v49, 0.0 }
  0xdb   :  { %713 = vrot.lane.b32.xlu1 %v666_v57, %s2500_s11  ;;  %1244 = vrot.lane.b32.xlu0 %v1204_v58, %s2501_s12  ;;  %v135_v57 = vsub.f32 %v2591_v19, %v43_v52 }
  0xdd   :  { %v151_v62 = vmul.f32 %v135_v57, %v135_v57 }
  0xdf   :  { %1246 = vrot.lane.b32.xlu1 %v1205_v30, %s2501_s12  ;;  %1785 = vrot.lane.b32.xlu0 %v1747_v61, %s2502_s13  ;;  %v153_v30 = vmul.f32 %v137_v56, %v137_v56  ;;  %v139_v61 = vsub.f32 %v2603_v29, %v43_v52  ;;  %v170_v11 = vsel %vm166_vm0, %v151_v62, 0.0  ;;  %v206_v56 = vsel %vm166_vm0, %v163_v60, 0.0 }
  0xe1   :  { %v176_v19 = vsel %vm166_vm0, %v153_v30, 0.0 }
  0xe3   :  { %1787 = vrot.lane.b32.xlu1 %v1748_v0, %s2502_s13  ;;  %1248 = vrot.lane.b32.xlu0 %v1206_v8, %s2501_s12  ;;  %v155_v8 = vmul.f32 %v139_v61, %v139_v61 }
  0xe5   :  { %v182_v29 = vsel %vm166_vm0, %v155_v8, 0.0 }
  0xe7   :  { %1250 = vrot.lane.b32.xlu1 %v1207_v13, %s2501_s12  ;;  %1789 = vrot.lane.b32.xlu0 %v1749_v14, %s2502_s13  ;;  %v154_v13 = vmul.f32 %v138_v63, %v138_v63  ;;  %v140_v14 = vsub.f32 %v2611_v32, %v2770_v47  ;;  %v188_v32 = vsel %vm166_vm0, %v157_v18, 0.0 }
  0xe9   :  { %v156_v24 = vmul.f32 %v140_v14, %v140_v14 }
  0xeb   :  { %1791 = vrot.lane.b32.xlu1 %v1750_v20, %s2502_s13  ;;  %1252 = vrot.lane.b32.xlu0 %v1208_v22, %s2501_s12  ;;  %v143_v20 = vsub.f32 %v2620_v39, %v43_v52  ;;  %v179_v22 = vsel %vm166_vm0, %v154_v13, 0.0 }
  0xed   :  { %v159_v31 = vmul.f32 %v143_v20, %v143_v20 }
  0xef   :  { %1254 = vrot.lane.b32.xlu1 %v1209_v26, %s2501_s12  ;;  %1793 = vrot.lane.b32.xlu0 %v1751_v27, %s2502_s13 }
  0xf3   :  { %1795 = vrot.lane.b32.xlu1 %v1752_v34, %s2502_s13  ;;  %1256 = vrot.lane.b32.xlu0 %v1210_v35, %s2501_s12  ;;  %v185_v34 = vsel %vm166_vm0, %v156_v24, 0.0  ;;  %v158_v35 = vmul.f32 %v142_v25, %v142_v25 }
  0xf5   :  { %v191_v41 = vsel %vm166_vm0, %v158_v35, 0.0 }
  0xf7   :  { %1258 = vrot.lane.b32.xlu1 %v1211_v38, %s2501_s12  ;;  %1797 = vrot.lane.b32.xlu0 %v1753_v40, %s2502_s13  ;;  %v194_v38 = vsel %vm166_vm0, %v159_v31, 0.0  ;;  %v161_v40 = vmul.f32 %v145_v33, %v145_v33 }
  0xf9   :  { %v200_v45 = vsel %vm166_vm0, %v161_v40, 0.0 }
  0xfb   :  { %1799 = vrot.lane.b32.xlu1 %v1754_v51, %s2502_s13  ;;  %1801 = vrot.lane.b32.xlu0 %v1755_v43, %s2502_s13  ;;  %v160_v51 = vmul.f32 %v144_v36, %v144_v36  ;;  %v146_v43 = vsub.f32 %v2680_v28, %v2770_v47 }
  0xfd   :  { %v197_v49 = vsel %vm166_vm0, %v160_v51, 0.0  ;;  %v162_v50 = vmul.f32 %v146_v43, %v146_v43 }
  0xff   :  { %1803 = vrot.lane.b32.xlu1 %v1756_v46, %s2502_s13  ;;  %v149_v46 = vsub.f32 %v2697_v42, %v43_v52  ;;  %v203_v57 = vsel %vm166_vm0, %v162_v50, 0.0 }
 0x101   :  { %v165_v28 = vmul.f32 %v149_v46, %v149_v46 }
 0x103   :  { %v212_v52 = vsel %vm166_vm0, %v165_v28, 0.0 }
 0x111   :  { %v2774_v48 = vpop.permute.xlu0 %683 }
 0x115   :  { %v2778_v15 = vpop.permute.xlu1 %685  ;;  %v2780_v53 = vpop.permute.xlu0 %687 }
 0x116   :  { %v734_v63 = vsel %vm166_vm0, %v2778_v15, 0.0 }
 0x119   :  { %v2785_v58 = vpop.permute.xlu1 %689  ;;  %v2787_v23 = vpop.permute.xlu0 %691 }
 0x11a   :  { %168 = vadd.xlane.f32.xlu0 %v167_v54  ;;  %v148_v54 = vsub.f32 %v2697_v42, %v2770_v47  ;;  %v740_v8 = vsel %vm166_vm0, %v2785_v58, 0.0  ;;  %v743_v15 = vsel %vm166_vm0, %v2787_v23, 0.0 }
 0x11d   :  { %v2793_v0 = vpop.permute.xlu1 %693  ;;  %v2795_v21 = vpop.permute.xlu0 %695 }
 0x11e   :  { %174 = vadd.xlane.f32.xlu0 %v173_v59  ;;  %v164_v59 = vmul.f32 %v148_v54, %v148_v54  ;;  %v746_v14 = vsel %vm166_vm0, %v2793_v0, 0.0  ;;  %v749_v18 = vsel %vm166_vm0, %v2795_v21, 0.0 }
 0x120   :  { %v209_v62 = vsel %vm166_vm0, %v164_v59, 0.0 }
 0x121   :  { %v2802_v17 = vpop.permute.xlu1 %697  ;;  %v2809_v26 = vpop.permute.xlu0 %699 }
 0x122   :  { %177 = vadd.xlane.f32.xlu0 %v176_v19  ;;  %v731_v19 = vsel %vm166_vm0, %v2774_v48, 0.0  ;;  %v752_v58 = vsel %vm166_vm0, %v2802_v17, 0.0  ;;  %v755_v0 = vsel %vm166_vm0, %v2809_v26, 0.0 }
 0x123   :  { %171 = vadd.xlane.f32.xlu1 %v170_v11  ;;  %v737_v11 = vsel %vm166_vm0, %v2780_v53, 0.0 }
 0x125   :  { %v2811_v27 = vpop.permute.xlu1 %701  ;;  %v1229_v39 = vpop.permute.xlu0 %1228 }
 0x126   :  { %183 = vadd.xlane.f32.xlu0 %v182_v29  ;;  %v758_v53 = vsel %vm166_vm0, %v2811_v27, 0.0  ;;  %v1276_v17 = vsel %vm166_vm0, %v1229_v39, 0.0 }
 0x127   :  { %180 = vadd.xlane.f32.xlu1 %v179_v22 }
 0x129   :  { %v1231_v37 = vpop.permute.xlu1 %1230  ;;  %v1233_v55 = vpop.permute.xlu0 %1232 }
 0x12a   :  { %189 = vadd.xlane.f32.xlu0 %v188_v32  ;;  %v1279_v22 = vsel %vm166_vm0, %v1231_v37, 0.0  ;;  %v1282_v27 = vsel %vm166_vm0, %v1233_v55, 0.0 }
 0x12b   :  { %186 = vadd.xlane.f32.xlu1 %v185_v34 }
 0x12d   :  { %v1235_v5 = vpop.permute.xlu1 %1234  ;;  %v704_v61 = vpop.permute.xlu0 %703 }
 0x12e   :  { %195 = vadd.xlane.f32.xlu0 %v194_v38  ;;  %v1285_v21 = vsel %vm166_vm0, %v1235_v5, 0.0  ;;  %v761_v26 = vsel %vm166_vm0, %v704_v61, 0.0 }
 0x12f   :  { %192 = vadd.xlane.f32.xlu1 %v191_v41 }
 0x131   :  { %v706_v30 = vpop.permute.xlu1 %705  ;;  %v1237_v47 = vpop.permute.xlu0 %1236 }
 0x132   :  { %201 = vadd.xlane.f32.xlu0 %v200_v45  ;;  %v764_v32 = vsel %vm166_vm0, %v706_v30, 0.0  ;;  %v1288_v35 = vsel %vm166_vm0, %v1237_v47, 0.0 }
 0x133   :  { %198 = vadd.xlane.f32.xlu1 %v197_v49 }
 0x135   :  { %v1239_v42 = vpop.permute.xlu1 %1238  ;;  %v1774_v13 = vpop.permute.xlu0 %1773 }
 0x136   :  { %207 = vadd.xlane.f32.xlu0 %v206_v56  ;;  %v1291_v34 = vsel %vm166_vm0, %v1239_v42, 0.0  ;;  %v1821_v38 = vsel %vm166_vm0, %v1774_v13, 0.0 }
 0x137   :  { %204 = vadd.xlane.f32.xlu1 %v203_v57 }
 0x139   :  { %v1776_v9 = vpop.permute.xlu1 %1775  ;;  %v1778_v29 = vpop.permute.xlu0 %1777 }
 0x13a   :  { %213 = vadd.xlane.f32.xlu0 %v212_v52  ;;  %v1824_v39 = vsel %vm166_vm0, %v1776_v9, 0.0  ;;  %v1827_v41 = vsel %vm166_vm0, %v1778_v29, 0.0 }
 0x13b   :  { %210 = vadd.xlane.f32.xlu1 %v209_v62 }
 0x13d   :  { %v1780_v48 = vpop.permute.xlu1 %1779  ;;  %v708_v23 = vpop.permute.xlu0 %707 }
 0x13e   :  { %735 = vadd.xlane.f32.xlu0 %v734_v63  ;;  %v1830_v40 = vsel %vm166_vm0, %v1780_v48, 0.0  ;;  %v767_v45 = vsel %vm166_vm0, %v708_v23, 0.0 }
 0x13f   :  { %732 = vadd.xlane.f32.xlu1 %v731_v19 }
 0x141   :  { %v710_v20 = vpop.permute.xlu1 %709  ;;  %v1241_v25 = vpop.permute.xlu0 %1240 }
 0x142   :  { %741 = vadd.xlane.f32.xlu0 %v740_v8  ;;  %v770_v43 = vsel %vm166_vm0, %v710_v20, 0.0  ;;  %v1294_v49 = vsel %vm166_vm0, %v1241_v25, 0.0 }
 0x143   :  { %738 = vadd.xlane.f32.xlu1 %v737_v11 }
 0x145   :  { %v1243_v24 = vpop.permute.xlu1 %1242  ;;  %v1782_v33 = vpop.permute.xlu0 %1781 }
 0x146   :  { %747 = vadd.xlane.f32.xlu0 %v746_v14  ;;  %v1297_v5 = vsel %vm166_vm0, %v1243_v24, 0.0  ;;  %v1833_v55 = vsel %vm166_vm0, %v1782_v33, 0.0  ;;  %v2895_v33 = vand.u32 127, %v49_v10 }
 0x147   :  { %744 = vadd.xlane.f32.xlu1 %v743_v15 }
 0x148   :  { %3738 = vst [vmem:[#allocation19_spill] sm:$0xff] %v2895_v33 }
 0x149   :  { %v1784_v31 = vpop.permute.xlu1 %1783  ;;  %v712_v37 = vpop.permute.xlu0 %711 }
 0x14a   :  { %753 = vadd.xlane.f32.xlu0 %v752_v58  ;;  %v1836_v50 = vsel %vm166_vm0, %v1784_v31, 0.0  ;;  %v773_v57 = vsel %vm166_vm0, %v712_v37, 0.0 }
 0x14b   :  { %750 = vadd.xlane.f32.xlu1 %v749_v18 }
 0x14d   :  { %v714_v36 = vpop.permute.xlu1 %713  ;;  %v1245_v51 = vpop.permute.xlu0 %1244 }
 0x14e   :  { %759 = vadd.xlane.f32.xlu0 %v758_v53  ;;  %v776_v28 = vsel %vm166_vm0, %v714_v36, 0.0  ;;  %v1300_v52 = vsel %vm166_vm0, %v1245_v51, 0.0  ;;  %v2920_v51 = vsub.s32 %v2895_v33, %v2584_v12 }
 0x14f   :  { %756 = vadd.xlane.f32.xlu1 %v755_v0 }
 0x151   :  { %v1247_v44 = vpop.permute.xlu1 %1246  ;;  %v1786_v46 = vpop.permute.xlu0 %1785 }
 0x152   :  { %1280 = vadd.xlane.f32.xlu0 %v1279_v22  ;;  %v1303_v61 = vsel %vm166_vm0, %v1247_v44, 0.0  ;;  %v1839_v47 = vsel %vm166_vm0, %v1786_v46, 0.0 }
 0x153   :  { %1277 = vadd.xlane.f32.xlu1 %v1276_v17 }
 0x155   :  { %v1788_v60 = vpop.permute.xlu1 %1787  ;;  %v1249_v56 = vpop.permute.xlu0 %1248 }
 0x156   :  { %1286 = vadd.xlane.f32.xlu0 %v1285_v21  ;;  %v1842_v62 = vsel %vm166_vm0, %v1788_v60, 0.0  ;;  %v1306_v8 = vsel %vm166_vm0, %v1249_v56, 0.0 }
 0x157   :  { %1283 = vadd.xlane.f32.xlu1 %v1282_v27 }
 0x159   :  { %v1251_v54 = vpop.permute.xlu1 %1250  ;;  %v1790_v30 = vpop.permute.xlu0 %1789 }
 0x15a   :  { %765 = vadd.xlane.f32.xlu0 %v764_v32  ;;  %v1309_v19 = vsel %vm166_vm0, %v1251_v54, 0.0  ;;  %v1845_v14 = vsel %vm166_vm0, %v1790_v30, 0.0 }
 0x15b   :  { %762 = vadd.xlane.f32.xlu1 %v761_v26 }
 0x15d   :  { %v1792_v59 = vpop.permute.xlu1 %1791  ;;  %v1253_v63 = vpop.permute.xlu0 %1252 }
 0x15e   :  { %1292 = vadd.xlane.f32.xlu0 %v1291_v34  ;;  %v1848_v13 = vsel %vm166_vm0, %v1792_v59, 0.0  ;;  %v1312_v29 = vsel %vm166_vm0, %v1253_v63, 0.0 }
 0x15f   :  { %1289 = vadd.xlane.f32.xlu1 %v1288_v35 }
 0x161   :  { %v1255_v42 = vpop.permute.xlu1 %1254  ;;  %v1794_v11 = vpop.permute.xlu0 %1793 }
 0x162   :  { %1825 = vadd.xlane.f32.xlu0 %v1824_v39  ;;  %v1315_v15 = vsel %vm166_vm0, %v1255_v42, 0.0  ;;  %v1851_v53 = vsel %vm166_vm0, %v1794_v11, 0.0  ;;  %v237_v39 = vadd.s32 4294967288, %v2895_v33 }
 0x163   :  { %1822 = vadd.xlane.f32.xlu1 %v1821_v38 }
 0x164   :  { %v2912_v44 = vsub.s32 %v237_v39, %v2584_v12 }
 0x165   :  { %v1796_v9 = vpop.permute.xlu1 %1795  ;;  %v1257_v58 = vpop.permute.xlu0 %1256 }
 0x166   :  { %1831 = vadd.xlane.f32.xlu0 %v1830_v40  ;;  %v1854_v18 = vsel %vm166_vm0, %v1796_v9, 0.0  ;;  %v1318_v22 = vsel %vm166_vm0, %v1257_v58, 0.0 }
 0x167   :  { %1828 = vadd.xlane.f32.xlu1 %v1827_v41 }
 0x169   :  { %v1259_v48 = vpop.permute.xlu1 %1258  ;;  %v1798_v0 = vpop.permute.xlu0 %1797 }
 0x16a   :  { %771 = vadd.xlane.f32.xlu0 %v770_v43  ;;  %v1321_v23 = vsel %vm166_vm0, %v1259_v48, 0.0  ;;  %v1857_v25 = vsel %vm166_vm0, %v1798_v0, 0.0 }
 0x16b   :  { %768 = vadd.xlane.f32.xlu1 %v767_v45 }
 0x16d   :  { %v1800_v20 = vpop.permute.xlu1 %1799  ;;  %v1802_v21 = vpop.permute.xlu0 %1801 }
 0x16e   :  { %1298 = vadd.xlane.f32.xlu0 %v1297_v5  ;;  %v1860_v17 = vsel %vm166_vm0, %v1800_v20, 0.0  ;;  %v1863_v32 = vsel %vm166_vm0, %v1802_v21, 0.0 }
 0x16f   :  { %1295 = vadd.xlane.f32.xlu1 %v1294_v49 }
 0x171   :  { %v1804_v24 = vpop.permute.xlu1 %1803 }
 0x172   :  { %1837 = vadd.xlane.f32.xlu0 %v1836_v50  ;;  %v1866_v27 = vsel %vm166_vm0, %v1804_v24, 0.0 }
 0x173   :  { %1834 = vadd.xlane.f32.xlu1 %v1833_v55 }
 0x176   :  { %777 = vadd.xlane.f32.xlu0 %v776_v28 }
 0x177   :  { %774 = vadd.xlane.f32.xlu1 %v773_v57 }
 0x17a   :  { %1304 = vadd.xlane.f32.xlu0 %v1303_v61 }
 0x17b   :  { %1301 = vadd.xlane.f32.xlu1 %v1300_v52 }
 0x17e   :  { %1843 = vadd.xlane.f32.xlu0 %v1842_v62 }
 0x17f   :  { %1840 = vadd.xlane.f32.xlu1 %v1839_v47 }
 0x182   :  { %1310 = vadd.xlane.f32.xlu0 %v1309_v19 }
 0x183   :  { %1307 = vadd.xlane.f32.xlu1 %v1306_v8 }
 0x186   :  { %1849 = vadd.xlane.f32.xlu0 %v1848_v13 }
 0x187   :  { %1846 = vadd.xlane.f32.xlu1 %v1845_v14 }
 0x18a   :  { %1316 = vadd.xlane.f32.xlu0 %v1315_v15 }
 0x18b   :  { %1313 = vadd.xlane.f32.xlu1 %v1312_v29 }
 0x18e   :  { %1855 = vadd.xlane.f32.xlu0 %v1854_v18 }
 0x18f   :  { %1852 = vadd.xlane.f32.xlu1 %v1851_v53 }
 0x192   :  { %1322 = vadd.xlane.f32.xlu0 %v1321_v23 }
 0x193   :  { %1319 = vadd.xlane.f32.xlu1 %v1318_v22 }
 0x196   :  { %1861 = vadd.xlane.f32.xlu0 %v1860_v17 }
 0x197   :  { %1858 = vadd.xlane.f32.xlu1 %v1857_v25 }
 0x19a   :  { %1867 = vadd.xlane.f32.xlu0 %v1866_v27 }
 0x19b   :  { %1864 = vadd.xlane.f32.xlu1 %v1863_v32 }
 0x1a7   :  { %v2890_v31 = vpop.xlane.xlu0 %168 }
 0x1a8   :  { %v236_v50 = vrot.slane %v2890_v31, %v2920_v51 }
 0x1ab   :  { %v2892_v26 = vpop.xlane.xlu0 %174 }
 0x1ac   :  { %v247_v54 = vrot.slane %v2892_v26, %v2920_v51 }
 0x1af   :  { %v2897_v34 = vpop.xlane.xlu0 %177 }
 0x1b0   :  { %v2899_v35 = vpop.xlane.xlu1 %171  ;;  %388 = vbcast.lane.b32.xlu0 %v2895_v33, 264  ;;  %v251_v43 = vrot.slane %v2897_v34, %v2912_v44 }
 0x1b1   :  { %v241_v45 = vrot.slane %v2899_v35, %v2912_v44 }
 0x1b2   :  { %v252_v59 = vsel %vm242_vm1, %v251_v43, %v247_v54 }
 0x1b3   :  { %v2902_v36 = vpop.xlane.xlu0 %183  ;;  %v243_v30 = vsel %vm242_vm1, %v241_v45, %v236_v50 }
 0x1b4   :  { %v2904_v37 = vpop.xlane.xlu1 %180  ;;  %v260_v46 = vrot.slane %v2902_v36, %v2912_v44  ;;  %v308_v9 = vsel %vm307_vm2, %v252_v59, %v243_v30 }
 0x1b5   :  { %v256_v5 = vrot.slane %v2904_v37, %v2920_v51 }
 0x1b7   :  { %v2907_v38 = vpop.xlane.xlu0 %189  ;;  %v261_v42 = vsel %vm242_vm1, %v260_v46, %v256_v5  ;;  %v2503_v46 = vmov 0  }
 0x1b8   :  { %v2909_v40 = vpop.xlane.xlu1 %186  ;;  %v269_v55 = vrot.slane %v2907_v38, %v2912_v44  ;;  %v310_v13 = vsel %vm309_vm3, %v261_v42, %v308_v9  ;;  %2391 = vset.pattern.permute.xlu0 %v2503_v46  ;;  %2390 = vset.pattern.permute.xlu1 %v2503_v46 }
 0x1b9   :  { %v265_v56 = vrot.slane %v2909_v40, %v2920_v51 }
 0x1bb   :  { %v2914_v10 = vpop.xlane.xlu0 %195  ;;  %v270_v19 = vsel %vm242_vm1, %v269_v55, %v265_v56 }
 0x1bc   :  { %v2916_v41 = vpop.xlane.xlu1 %192  ;;  %v278_v28 = vrot.slane %v2914_v10, %v2912_v44  ;;  %v312_v48 = vsel %vm311_vm4, %v270_v19, %v310_v13 }
 0x1bd   :  { %v274_v57 = vrot.slane %v2916_v41, %v2920_v51 }
 0x1bf   :  { %v2926_v60 = vpop.xlane.xlu0 %201  ;;  %v279_v11 = vsel %vm242_vm1, %v278_v28, %v274_v57 }
 0x1c0   :  { %v2932_v49 = vpop.xlane.xlu1 %198  ;;  %v287_v61 = vrot.slane %v2926_v60, %v2912_v44  ;;  %v314_v20 = vsel %vm313_vm5, %v279_v11, %v312_v48 }
 0x1c1   :  { %v283_v52 = vrot.slane %v2932_v49, %v2920_v51 }
 0x1c3   :  { %v2952_v62 = vpop.xlane.xlu0 %207  ;;  %v288_v14 = vsel %vm242_vm1, %v287_v61, %v283_v52 }
 0x1c4   :  { %v296_v47 = vrot.slane %v2952_v62, %v2912_v44  ;;  %v2957_v63 = vpop.xlane.xlu1 %204  ;;  %v316_v0 = vsel %vm315_vm6, %v288_v14, %v314_v20 }
 0x1c5   :  { %v292_v8 = vrot.slane %v2957_v63, %v2920_v51 }
 0x1c7   :  { %v2966_v15 = vpop.xlane.xlu0 %213  ;;  %v297_v18 = vsel %vm242_vm1, %v296_v47, %v292_v8 }
 0x1c8   :  { %v305_v29 = vrot.slane %v2966_v15, %v2912_v44  ;;  %v2971_v58 = vpop.xlane.xlu1 %210  ;;  %v318_v22 = vsel %vm317_vm7, %v297_v18, %v316_v0 }
 0x1c9   :  { %v301_v53 = vrot.slane %v2971_v58, %v2920_v51 }
 0x1cb   :  { %v306_v23 = vsel %vm242_vm1, %v305_v29, %v301_v53  ;;  %v2984_v21 = vpop.xlane.xlu0 %735 }
 0x1cc   :  { %v320_v17 = vsel %vm319_vm8, %v306_v23, %v318_v22  ;;  %v2981_v24 = vpop.xlane.xlu1 %732 }
 0x1cd   :  { %v323_v25 = vsel %vm322_vm9, %v320_v17, inf }
 0x1ce   :  { %324 = vmin.xlane.f32.xlu1 %v323_v25 }
 0x1cf   :  { %v2988_v32 = vpop.xlane.xlu0 %741 }
 0x1d0   :  { %v2986_v27 = vpop.xlane.xlu1 %738 }
 0x1d3   :  { %v2992_v43 = vpop.xlane.xlu0 %747 }
 0x1d4   :  { %v2990_v39 = vpop.xlane.xlu1 %744 }
 0x1d7   :  { %v2997_v5 = vpop.xlane.xlu0 %753 }
 0x1d8   :  { %v2994_v45 = vpop.xlane.xlu1 %750 }
 0x1db   :  { %v3001_v54 = vpop.xlane.xlu0 %759 }
 0x1dc   :  { %v2999_v50 = vpop.xlane.xlu1 %756 }
 0x1df   :  { %384 = vbcast.lane.b32.xlu1 %v2895_v33, 256  ;;  %v3005_v56 = vpop.xlane.xlu0 %1280 }
 0x1e0   :  { %v3003_v55 = vpop.xlane.xlu1 %1277 }
 0x1e1   :  { %3739 = vst [vmem:[#allocation20_spill] sm:$0xff] %v3003_v55  ;;  %v3089_v55 = vsub.s32 3, %v2584_v12 }
 0x1e3   :  { %v3009_v57 = vpop.xlane.xlu0 %1286 }
 0x1e4   :  { %v3007_v28 = vpop.xlane.xlu1 %1283 }
 0x1e5   :  { %3740 = vst [vmem:[#allocation21_spill] sm:$0xff] %v3007_v28 }
 0x1e7   :  { %v3013_v30 = vpop.xlane.xlu0 %765 }
 0x1e8   :  { %v3011_v59 = vpop.xlane.xlu1 %762 }
 0x1eb   :  { %v3017_v52 = vpop.xlane.xlu0 %1292 }
 0x1ec   :  { %v3015_v61 = vpop.xlane.xlu1 %1289  ;;  %3742 = vst [vmem:[#allocation23_spill] sm:$0xff] %v3017_v52 }
 0x1ed   :  { %3741 = vst [vmem:[#allocation22_spill] sm:$0xff] %v3015_v61 }
 0x1ef   :  { %v3021_v47 = vpop.xlane.xlu0 %1825 }
 0x1f0   :  { %v3019_v42 = vpop.xlane.xlu1 %1822 }
 0x1f3   :  { %v3025_v8 = vpop.xlane.xlu0 %1831 }
 0x1f4   :  { %v3023_v19 = vpop.xlane.xlu1 %1828 }
 0x1f7   :  { %v3029_v11 = vpop.xlane.xlu0 %771 }
 0x1f8   :  { %v3027_v9 = vpop.xlane.xlu1 %768 }
 0x1fb   :  { %v3033_v14 = vpop.xlane.xlu0 %1298 }
 0x1fc   :  { %v3031_v13 = vpop.xlane.xlu1 %1295  ;;  %3744 = vst [vmem:[#allocation25_spill] sm:$0xff] %v3033_v14 }
 0x1fd   :  { %3743 = vst [vmem:[#allocation24_spill] sm:$0xff] %v3031_v13 }
 0x1ff   :  { %v3037_v29 = vpop.xlane.xlu0 %1837 }
 0x200   :  { %v3035_v48 = vpop.xlane.xlu1 %1834 }
 0x203   :  { %v3041_v53 = vpop.xlane.xlu0 %777 }
 0x204   :  { %v3039_v18 = vpop.xlane.xlu1 %774 }
 0x205   :  { %3745 = vst [vmem:[#allocation26_spill] sm:$0xff] %v3039_v18 }
 0x207   :  { %v3045_v0 = vpop.xlane.xlu0 %1304 }
 0x208   :  { %v3043_v20 = vpop.xlane.xlu1 %1301  ;;  %3747 = vst [vmem:[#allocation28_spill] sm:$0xff] %v3045_v0  ;;  %v3078_v0 = vsub.s32 1, %v2584_v12 }
 0x209   :  { %3746 = vst [vmem:[#allocation27_spill] sm:$0xff] %v3043_v20 }
 0x20a   :  { %3763 = vst [vmem:[#allocation44_spill] sm:$0xff] %v3078_v0 }
 0x20b   :  { %v3049_v22 = vpop.xlane.xlu0 %1843 }
 0x20c   :  { %v3047_v23 = vpop.xlane.xlu1 %1840  ;;  %3749 = vst [vmem:[#allocation30_spill] sm:$0xff] %v3049_v22 }
 0x20d   :  { %3748 = vst [vmem:[#allocation29_spill] sm:$0xff] %v3047_v23 }
 0x20f   :  { %v3053_v25 = vpop.xlane.xlu0 %1310 }
 0x210   :  { %v3051_v17 = vpop.xlane.xlu1 %1307  ;;  %3751 = vst [vmem:[#allocation32_spill] sm:$0xff] %v3053_v25 }
 0x211   :  { %3750 = vst [vmem:[#allocation31_spill] sm:$0xff] %v3051_v17 }
 0x213   :  { %v3057_v7 = vpop.xlane.xlu0 %1849 }
 0x214   :  { %v3055_v46 = vpop.xlane.xlu1 %1846  ;;  %3753 = vst [vmem:[#allocation34_spill] sm:$0xff] %v3057_v7 }
 0x215   :  { %3752 = vst [vmem:[#allocation33_spill] sm:$0xff] %v3055_v46 }
 0x217   :  { %v3061_v3 = vpop.xlane.xlu0 %1316 }
 0x218   :  { %v3059_v6 = vpop.xlane.xlu1 %1313  ;;  %3755 = vst [vmem:[#allocation36_spill] sm:$0xff] %v3061_v3 }
 0x219   :  { %3754 = vst [vmem:[#allocation35_spill] sm:$0xff] %v3059_v6  ;;  %v3081_v6 = vsub.s32 2, %v2584_v12 }
 0x21b   :  { %v3065_v1 = vpop.xlane.xlu0 %1855  ;;  %3764 = vst [vmem:[#allocation45_spill] sm:$0xff] %v3081_v6 }
 0x21c   :  { %v3063_v4 = vpop.xlane.xlu1 %1852  ;;  %3757 = vst [vmem:[#allocation38_spill] sm:$0xff] %v3065_v1 }
 0x21d   :  { %3756 = vst [vmem:[#allocation37_spill] sm:$0xff] %v3063_v4 }
 0x21f   :  { %v3069_v33 = vpop.xlane.xlu0 %1322 }
 0x220   :  { %v3067_v2 = vpop.xlane.xlu1 %1319  ;;  %3759 = vst [vmem:[#allocation40_spill] sm:$0xff] %v3069_v33 }
 0x221   :  { %3758 = vst [vmem:[#allocation39_spill] sm:$0xff] %v3067_v2 }
 0x223   :  { %v3073_v17 = vpop.xlane.xlu0 %1861 }
 0x224   :  { %v3071_v20 = vpop.xlane.xlu1 %1858  ;;  %3761 = vst [vmem:[#allocation42_spill] sm:$0xff] %v3073_v17 }
 0x225   :  { %3760 = vst [vmem:[#allocation41_spill] sm:$0xff] %v3071_v20 }
 0x227   :  { %v3085_v2 = vpop.xlane.xlu0 %1867 }
 0x228   :  { %v3075_v25 = vpop.xlane.xlu1 %1864  ;;  %3765 = vst [vmem:[#allocation46_spill] sm:$0xff] %v3085_v2 }
 0x229   :  { %3762 = vst [vmem:[#allocation43_spill] sm:$0xff] %v3075_v25 }
 0x25b   :  { %v325_v3 = vpop.xlane.xlu1 %324 }
 0x25c   :  { %v334_v13 = vrot.slane %v325_v3, %v3078_v0  ;;  %v330_v14 = vrot.slane %v325_v3, %v2588_v16  ;;  %v338_v33 = vrot.slane %v325_v3, %v3081_v6  ;;  %v3097_v0 = vpop.permute.xlu0 %388  ;;  %v342_v6 = vrot.slane %v325_v3, %v3089_v55 }
 0x25e   :  { %vm369_vm10 = vcmp.le.f32.partialorder %v2892_v26, %v334_v13  ;;  %vm367_vm11 = vcmp.le.f32.partialorder %v2890_v31, %v330_v14  ;;  %vm372_vm12 = vcmp.le.f32.partialorder %v2902_v36, %v338_v33  ;;  %vm368_vm13 = vcmp.le.f32.partialorder %v2899_v35, %v330_v14 }
 0x25f   :  { %v3093_v61 = vpop.permute.xlu1 %384  ;;  %v3103_v26 = vsub.s32 4, %v2584_v12  ;;  %v395_v31 = vsel %vm372_vm12, %v3097_v0, 16  ;;  %v391_v16 = vsel %vm368_vm13, %v3097_v0, 16  ;;  %vm374_vm14 = vcmp.le.f32.partialorder %v2907_v38, %v342_v6 }
 0x260   :  { %v392_v52 = vsel %vm369_vm10, %v3093_v61, 16  ;;  %v390_v28 = vsel %vm367_vm11, %v3093_v61, 16  ;;  %vm370_vm15 = vcmp.le.f32.partialorder %v2897_v34, %v334_v13  ;;  %v3111_v36 = vsub.s32 5, %v2584_v12 }
 0x261   :  { %413 = vperm.xlu0 %2391, %v392_v52   ;;  %407 = vperm.xlu1 %2390, %v390_v28   ;;  %v346_v28 = vrot.slane %v325_v3, %v3103_v26  ;;  %v397_v35 = vsel %vm374_vm14, %v3097_v0, 16  ;;  %v393_v52 = vsel %vm370_vm15, %v3097_v0, 16  ;;  %vm371_vm11 = vcmp.le.f32.partialorder %v2904_v37, %v338_v33 }
 0x262   :  { %v3119_v38 = vsub.s32 6, %v2584_v12  ;;  %v394_v13 = vsel %vm371_vm11, %v3093_v61, 16  ;;  %vm373_vm13 = vcmp.le.f32.partialorder %v2909_v40, %v342_v6 }
 0x263   :  { %vm376_vm10 = vcmp.le.f32.partialorder %v2914_v10, %v346_v28  ;;  %v3127_v10 = vsub.s32 7, %v2584_v12  ;;  %v396_v37 = vsel %vm373_vm13, %v3093_v61, 16  ;;  %vm375_vm15 = vcmp.le.f32.partialorder %v2916_v41, %v346_v28 }
 0x264   :  { %v399_v34 = vsel %vm376_vm10, %v3097_v0, 16  ;;  %v354_v14 = vrot.slane %v325_v3, %v3119_v38  ;;  %v398_v6 = vsel %vm375_vm15, %v3093_v61, 16  ;;  %v802_v28 = vrot.slane %v2984_v21, %v2912_v44 }
 0x265   :  { %422 = vperm.xlu0 %2391, %v395_v31   ;;  %410 = vperm.xlu1 %2390, %v391_v16   ;;  %v350_v16 = vrot.slane %v325_v3, %v3111_v36  ;;  %v358_v31 = vrot.slane %v325_v3, %v3127_v10 }
 0x266   :  { %vm380_vm14 = vcmp.le.f32.partialorder %v2952_v62, %v354_v14  ;;  %v811_v62 = vrot.slane %v2988_v32, %v2912_v44 }
 0x267   :  { %vm378_vm12 = vcmp.le.f32.partialorder %v2926_v60, %v350_v16  ;;  %v403_v60 = vsel %vm380_vm14, %v3097_v0, 16  ;;  %vm382_vm10 = vcmp.le.f32.partialorder %v2966_v15, %v358_v31  ;;  %vm377_vm11 = vcmp.le.f32.partialorder %v2932_v49, %v350_v16 }
 0x268   :  { %v401_v33 = vsel %vm378_vm12, %v3097_v0, 16  ;;  %v405_v12 = vsel %vm382_vm10, %v3097_v0, 16  ;;  %v400_v40 = vsel %vm377_vm11, %v3093_v61, 16  ;;  %vm379_vm12 = vcmp.le.f32.partialorder %v2957_v63, %v354_v14 }
 0x269   :  { %428 = vperm.xlu0 %2391, %v397_v35   ;;  %416 = vperm.xlu1 %2390, %v393_v52   ;;  %v402_v3 = vsel %vm379_vm12, %v3093_v61, 16  ;;  %vm381_vm13 = vcmp.le.f32.partialorder %v2971_v58, %v358_v31  ;;  %v807_v49 = vrot.slane %v2986_v27, %v2920_v51  ;;  %v820_v15 = vrot.slane %v2992_v43, %v2912_v44 }
 0x26a   :  { %v404_v41 = vsel %vm381_vm13, %v3093_v61, 16  ;;  %v816_v63 = vrot.slane %v2990_v39, %v2920_v51  ;;  %v798_v58 = vrot.slane %v2981_v24, %v2920_v51  ;;  %v829_v35 = vrot.slane %v2997_v5, %v2912_v44 }
 0x26b   :  { %v825_v52 = vrot.slane %v2994_v45, %v2920_v51  ;;  %v812_v16 = vsel %vm242_vm1, %v811_v62, %v807_v49  ;;  %v834_v14 = vrot.slane %v2999_v50, %v2920_v51  ;;  %v1888_v62 = vrot.slane %v3019_v42, %v2920_v51 }
 0x26c   :  { %v1901_v49 = vrot.slane %v3025_v8, %v2912_v44 }
 0x26d   :  { %434 = vperm.xlu0 %2391, %v399_v34   ;;  %419 = vperm.xlu1 %2390, %v394_v13   ;;  %v821_v34 = vsel %vm242_vm1, %v820_v15, %v816_v63  ;;  %v838_v13 = vrot.slane %v3001_v54, %v2912_v44  ;;  %v1897_v15 = vrot.slane %v3023_v19, %v2920_v51 }
 0x26e   :  { %v856_v63 = vrot.slane %v3029_v11, %v2912_v44 }
 0x271   :  { %440 = vperm.xlu0 %2391, %v401_v33   ;;  %425 = vperm.xlu1 %2390, %v396_v37   ;;  %v803_v33 = vsel %vm242_vm1, %v802_v28, %v798_v58  ;;  %v830_v37 = vsel %vm242_vm1, %v829_v35, %v825_v52  ;;  %v852_v28 = vrot.slane %v3027_v9, %v2920_v51 }
 0x272   :  { %v867_v31 = vsel %vm307_vm2, %v812_v16, %v803_v33  ;;  %v1910_v58 = vrot.slane %v3037_v29, %v2912_v44  ;;  %v1906_v35 = vrot.slane %v3035_v48, %v2920_v51  ;;  %v865_v52 = vrot.slane %v3041_v53, %v2912_v44 }
 0x273   :  { %v861_v16 = vrot.slane %v3039_v18, %v2920_v51  ;;  %v1928_v33 = vrot.slane %v3057_v7, %v2912_v44  ;;  %v1902_v18 = vsel %vm242_vm1, %v1901_v49, %v1897_v15  ;;  %v1347_v15 = vrot.slane %v3005_v56, %v2912_v44  ;;  %v3776_v7 = vld [vmem:[#allocation36_spill] sm:$0xff] }
 0x275   :  { %446 = vperm.xlu0 %2391, %v403_v60   ;;  %431 = vperm.xlu1 %2390, %v398_v6   ;;  %v868_v60 = vsel %vm309_vm3, %v821_v34, %v867_v31  ;;  %v1919_v34 = vrot.slane %v3049_v22, %v2912_v44  ;;  %v1937_v22 = vrot.slane %v3065_v1, %v2912_v44 }
 0x276   :  { %v869_v6 = vsel %vm311_vm4, %v830_v37, %v868_v60  ;;  %v1924_v37 = vrot.slane %v3055_v46, %v2920_v51  ;;  %v1942_v46 = vrot.slane %v3071_v20, %v2920_v51  ;;  %v866_v49 = vsel %vm242_vm1, %v865_v52, %v861_v16  ;;  %v3766_v52 = vld [vmem:[#allocation21_spill] sm:$0xff] }
 0x277   :  { %v1352_v16 = vrot.slane %v3766_v52, %v2920_v51 }
 0x279   :  { %452 = vperm.xlu0 %2391, %v405_v12   ;;  %437 = vperm.xlu1 %2390, %v400_v40   ;;  %v839_v12 = vsel %vm242_vm1, %v838_v13, %v834_v14  ;;  %v847_v40 = vrot.slane %v3013_v30, %v2912_v44  ;;  %v1915_v13 = vrot.slane %v3047_v23, %v2920_v51 }
 0x27a   :  { %v870_v31 = vsel %vm313_vm5, %v839_v12, %v869_v6  ;;  %v1933_v23 = vrot.slane %v3063_v4, %v2920_v51  ;;  %v857_v6 = vsel %vm242_vm1, %v856_v63, %v852_v28  ;;  %v1356_v63 = vrot.slane %v3009_v57, %v2912_v44  ;;  %v3775_v4 = vld [vmem:[#allocation31_spill] sm:$0xff] }
 0x27b   :  { %v1920_v12 = vsel %vm242_vm1, %v1919_v34, %v1915_v13  ;;  %v1388_v1 = vrot.slane %v3775_v4, %v2920_v51  ;;  %v3779_v4 = vld [vmem:[#allocation39_spill] sm:$0xff] }
 0x27c   :  { %v1938_v34 = vsel %vm242_vm1, %v1937_v22, %v1933_v23 }
 0x27d   :  { %443 = vperm.xlu1 %2390, %v402_v3   ;;  %v843_v3 = vrot.slane %v3011_v59, %v2920_v51 }
 0x27f   :  { %v848_v14 = vsel %vm242_vm1, %v847_v40, %v843_v3  ;;  %v1911_v40 = vsel %vm242_vm1, %v1910_v58, %v1906_v35  ;;  %v1946_v3 = vrot.slane %v3073_v17, %v2912_v44  ;;  %v1929_v35 = vsel %vm242_vm1, %v1928_v33, %v1924_v37 }
 0x280   :  { %v871_v20 = vsel %vm315_vm6, %v848_v14, %v870_v31  ;;  %v3767_v14 = vld [vmem:[#allocation23_spill] sm:$0xff]  ;;  %v3768_v31 = vld [vmem:[#allocation22_spill] sm:$0xff] }
 0x281   :  { %449 = vperm.xlu1 %2390, %v404_v41   ;;  %v1892_v41 = vrot.slane %v3021_v47, %v2912_v44  ;;  %v872_v13 = vsel %vm317_vm7, %v857_v6, %v871_v20  ;;  %v1365_v37 = vrot.slane %v3767_v14, %v2912_v44  ;;  %v3769_v20 = vld [vmem:[#allocation20_spill] sm:$0xff]  ;;  %v3770_v6 = vld [vmem:[#allocation25_spill] sm:$0xff] }
 0x282   :  { %v873_v33 = vsel %vm319_vm8, %v866_v49, %v872_v13  ;;  %v1343_v22 = vrot.slane %v3769_v20, %v2920_v51  ;;  %v3773_v13 = vld [vmem:[#allocation27_spill] sm:$0xff] }
 0x283   :  { %v1893_v60 = vsel %vm242_vm1, %v1892_v41, %v1888_v62  ;;  %v1955_v41 = vrot.slane %v3085_v2, %v2912_v44  ;;  %v1951_v62 = vrot.slane %v3075_v25, %v2920_v51  ;;  %v1379_v2 = vrot.slane %v3773_v13, %v2920_v51 }
 0x284   :  { %v1957_v58 = vsel %vm307_vm2, %v1902_v18, %v1893_v60  ;;  %v1947_v18 = vsel %vm242_vm1, %v1946_v3, %v1942_v46  ;;  %v1361_v60 = vrot.slane %v3768_v31, %v2920_v51  ;;  %v3771_v46 = vld [vmem:[#allocation24_spill] sm:$0xff]  ;;  %v1401_v13 = vrot.slane %v3776_v7, %v2912_v44 }
 0x285   :  { %v1958_v28 = vsel %vm309_vm3, %v1911_v40, %v1957_v58  ;;  %v1956_v23 = vsel %vm242_vm1, %v1955_v41, %v1951_v62  ;;  %v1370_v3 = vrot.slane %v3771_v46, %v2920_v51  ;;  %v3772_v58 = vld [vmem:[#allocation28_spill] sm:$0xff]  ;;  %v1357_v62 = vsel %vm242_vm1, %v1356_v63, %v1352_v16 }
 0x286   :  { %v1959_v25 = vsel %vm311_vm4, %v1920_v12, %v1958_v28  ;;  %v1374_v12 = vrot.slane %v3770_v6, %v2912_v44  ;;  %v1383_v28 = vrot.slane %v3772_v58, %v2912_v44  ;;  %v3778_v16 = vld [vmem:[#allocation40_spill] sm:$0xff] }
 0x287   :  { %v1960_v40 = vsel %vm313_vm5, %v1929_v35, %v1959_v25  ;;  %v875_v25 = vsel %vm322_vm9, %v873_v33, inf  ;;  %v3774_v35 = vld [vmem:[#allocation32_spill] sm:$0xff]  ;;  %v3777_v33 = vld [vmem:[#allocation35_spill] sm:$0xff] }
 0x288   :  { %v1961_v49 = vsel %vm315_vm6, %v1938_v34, %v1960_v40  ;;  %v1392_v17 = vrot.slane %v3774_v35, %v2912_v44  ;;  %v1366_v40 = vsel %vm242_vm1, %v1365_v37, %v1361_v60  ;;  %v1397_v58 = vrot.slane %v3777_v33, %v2920_v51 }
 0x289   :  { %v1962_v41 = vsel %vm317_vm7, %v1947_v18, %v1961_v49  ;;  %v1348_v18 = vsel %vm242_vm1, %v1347_v15, %v1343_v22  ;;  %v1375_v63 = vsel %vm242_vm1, %v1374_v12, %v1370_v3  ;;  %v1410_v49 = vrot.slane %v3778_v16, %v2912_v44 }
 0x28a   :  { %v1963_v34 = vsel %vm319_vm8, %v1956_v23, %v1962_v41  ;;  %v1412_v23 = vsel %vm307_vm2, %v1357_v62, %v1348_v18  ;;  %v1384_v37 = vsel %vm242_vm1, %v1383_v28, %v1379_v2  ;;  %v1393_v33 = vsel %vm242_vm1, %v1392_v17, %v1388_v1 }
 0x28b   :  { %v1965_v60 = vsel %vm322_vm9, %v1963_v34, inf  ;;  %v1413_v41 = vsel %vm309_vm3, %v1366_v40, %v1412_v23  ;;  %v1402_v22 = vsel %vm242_vm1, %v1401_v13, %v1397_v58 }
 0x28c   :  { %v1414_v15 = vsel %vm311_vm4, %v1375_v63, %v1413_v41 }
 0x28d   :  { %v1415_v3 = vsel %vm313_vm5, %v1384_v37, %v1414_v15 }
 0x298   :  { %876 = vmin.xlane.f32.xlu0 %v875_v25  ;;  %v1406_v25 = vrot.slane %v3779_v4, %v2920_v51  ;;  %v1416_v4 = vsel %vm315_vm6, %v1393_v33, %v1415_v3 }
 0x299   :  { %v1417_v62 = vsel %vm317_vm7, %v1402_v22, %v1416_v4 }
 0x29a   :  { %v1411_v12 = vsel %vm242_vm1, %v1410_v49, %v1406_v25 }
 0x29b   :  { %v1418_v2 = vsel %vm319_vm8, %v1411_v12, %v1417_v62 }
 0x29c   :  { %1966 = vmin.xlane.f32.xlu0 %v1965_v60  ;;  %v1420_v28 = vsel %vm322_vm9, %v1418_v2, inf }
 0x2a5   :  { %1421 = vmin.xlane.f32.xlu1 %v1420_v28 }
 0x2e0   :  { %v414_v34 = vpop.permute.xlu0 %413  ;;  %v408_v1 = vpop.permute.xlu1 %407 }
 0x2e1   :  { %v457_v18 = vrot.slane %v408_v1, %v2920_v51  ;;  %v466_v33 = vrot.slane %v414_v34, %v2920_v51 }
 0x2e4   :  { %v423_v17 = vpop.permute.xlu0 %422  ;;  %v411_v40 = vpop.permute.xlu1 %410 }
 0x2e5   :  { %v461_v58 = vrot.slane %v411_v40, %v2912_v44  ;;  %v479_v41 = vrot.slane %v423_v17, %v2912_v44 }
 0x2e7   :  { %v462_v13 = vsel %vm242_vm1, %v461_v58, %v457_v18 }
 0x2e8   :  { %v429_v63 = vpop.permute.xlu0 %428  ;;  %v417_v49 = vpop.permute.xlu1 %416 }
 0x2e9   :  { %v470_v4 = vrot.slane %v417_v49, %v2912_v44  ;;  %v488_v62 = vrot.slane %v429_v63, %v2912_v44 }
 0x2eb   :  { %v471_v25 = vsel %vm242_vm1, %v470_v4, %v466_v33 }
 0x2ec   :  { %v526_v23 = vsel %vm307_vm2, %v471_v25, %v462_v13  ;;  %v435_v37 = vpop.permute.xlu0 %434  ;;  %v420_v60 = vpop.permute.xlu1 %419 }
 0x2ed   :  { %v475_v15 = vrot.slane %v420_v60, %v2920_v51  ;;  %v497_v18 = vrot.slane %v435_v37, %v2912_v44 }
 0x2ef   :  { %v480_v22 = vsel %vm242_vm1, %v479_v41, %v475_v15 }
 0x2f0   :  { %v527_v12 = vsel %vm309_vm3, %v480_v22, %v526_v23  ;;  %v426_v3 = vpop.permute.xlu1 %425  ;;  %v441_v28 = vpop.permute.xlu0 %440 }
 0x2f1   :  { %v484_v2 = vrot.slane %v426_v3, %v2920_v51  ;;  %v506_v63 = vrot.slane %v441_v28, %v2912_v44 }
 0x2f3   :  { %v489_v34 = vsel %vm242_vm1, %v488_v62, %v484_v2 }
 0x2f4   :  { %v528_v1 = vsel %vm311_vm4, %v489_v34, %v527_v12  ;;  %v432_v40 = vpop.permute.xlu1 %431  ;;  %v447_v13 = vpop.permute.xlu0 %446 }
 0x2f5   :  { %v493_v17 = vrot.slane %v432_v40, %v2920_v51  ;;  %v515_v41 = vrot.slane %v447_v13, %v2912_v44  ;;  %v3780_v40 = vld [vmem:[#allocation18_spill] sm:$0xff] }
 0x2f7   :  { %v498_v58 = vsel %vm242_vm1, %v497_v18, %v493_v17  ;;  %v3781_v17 = vld [vmem:[#allocation44_spill] sm:$0xff] }
 0x2f8   :  { %v529_v49 = vsel %vm313_vm5, %v498_v58, %v528_v1  ;;  %v438_v33 = vpop.permute.xlu1 %437  ;;  %v453_v15 = vpop.permute.xlu0 %452 }
 0x2f9   :  { %v502_v4 = vrot.slane %v438_v33, %v2920_v51  ;;  %v524_v62 = vrot.slane %v453_v15, %v2912_v44  ;;  %v3782_v33 = vld [vmem:[#allocation45_spill] sm:$0xff] }
 0x2fb   :  { %v507_v25 = vsel %vm242_vm1, %v506_v63, %v502_v4 }
 0x2fc   :  { %v530_v23 = vsel %vm315_vm6, %v507_v25, %v529_v49  ;;  %v444_v60 = vpop.permute.xlu1 %443 }
 0x2fd   :  { %v511_v37 = vrot.slane %v444_v60, %v2920_v51 }
 0x2ff   :  { %v516_v22 = vsel %vm242_vm1, %v515_v41, %v511_v37 }
 0x300   :  { %v531_v12 = vsel %vm317_vm7, %v516_v22, %v530_v23  ;;  %v450_v3 = vpop.permute.xlu1 %449 }
 0x301   :  { %v520_v2 = vrot.slane %v450_v3, %v2920_v51 }
 0x303   :  { %v525_v28 = vsel %vm242_vm1, %v524_v62, %v520_v2 }
 0x304   :  { %v3319_v34 = vsel %vm319_vm8, %v525_v28, %v531_v12 }
 0x325   :  { %v3321_v1 = vpop.xlane.xlu0 %876 }
 0x326   :  { %v882_v18 = vrot.slane %v3321_v1, %v3780_v40  ;;  %v886_v58 = vrot.slane %v3321_v1, %v3781_v17  ;;  %v890_v63 = vrot.slane %v3321_v1, %v3782_v33  ;;  %v902_v37 = vrot.slane %v3321_v1, %v3111_v36 }
 0x327   :  { %v906_v62 = vrot.slane %v3321_v1, %v3119_v38 }
 0x328   :  { %vm920_vm14 = vcmp.le.f32.partialorder %v2984_v21, %v882_v18  ;;  %vm919_vm15 = vcmp.le.f32.partialorder %v2981_v24, %v882_v18  ;;  %vm922_vm10 = vcmp.le.f32.partialorder %v2988_v32, %v886_v58  ;;  %vm921_vm11 = vcmp.le.f32.partialorder %v2986_v27, %v886_v58  ;;  %v3783_v18 = vld [vmem:[#allocation26_spill] sm:$0xff]  ;;  %v3785_v58 = vld [vmem:[#allocation27_spill] sm:$0xff] }
 0x329   :  { %v936_v13 = vsel %vm920_vm14, %v3097_v0, 16  ;;  %v935_v49 = vsel %vm919_vm15, %v3093_v61, 16  ;;  %v938_v4 = vsel %vm922_vm10, %v3097_v0, 16  ;;  %v937_v25 = vsel %vm921_vm11, %v3093_v61, 16  ;;  %v3373_v22 = vpop.xlane.xlu0 %1966 }
 0x32a   :  { %955 = vperm.xlu0 %2391, %v936_v13   ;;  %952 = vperm.xlu1 %2390, %v935_v49   ;;  %vm924_vm12 = vcmp.le.f32.partialorder %v2992_v43, %v890_v63  ;;  %vm923_vm13 = vcmp.le.f32.partialorder %v2990_v39, %v890_v63  ;;  %v894_v24 = vrot.slane %v3321_v1, %v3089_v55  ;;  %v3787_v63 = vld [vmem:[#allocation29_spill] sm:$0xff] }
 0x32b   :  { %v940_v21 = vsel %vm924_vm12, %v3097_v0, 16  ;;  %v939_v27 = vsel %vm923_vm13, %v3093_v61, 16  ;;  %v898_v32 = vrot.slane %v3321_v1, %v3103_v26  ;;  %v1976_v3 = vrot.slane %v3373_v22, %v3781_v17 }
 0x32c   :  { %vm926_vm14 = vcmp.le.f32.partialorder %v2997_v5, %v894_v24  ;;  %vm925_vm15 = vcmp.le.f32.partialorder %v2994_v45, %v894_v24  ;;  %v1980_v28 = vrot.slane %v3373_v22, %v3782_v33  ;;  %v1984_v13 = vrot.slane %v3373_v22, %v3089_v55 }
 0x32d   :  { %v942_v39 = vsel %vm926_vm14, %v3097_v0, 16  ;;  %v941_v43 = vsel %vm925_vm15, %v3093_v61, 16  ;;  %vm928_vm10 = vcmp.le.f32.partialorder %v3001_v54, %v898_v32  ;;  %vm927_vm11 = vcmp.le.f32.partialorder %v2999_v50, %v898_v32 }
 0x32e   :  { %961 = vperm.xlu0 %2391, %v938_v4   ;;  %958 = vperm.xlu1 %2390, %v937_v25   ;;  %v944_v45 = vsel %vm928_vm10, %v3097_v0, 16  ;;  %v943_v60 = vsel %vm927_vm11, %v3093_v61, 16  ;;  %vm930_vm10 = vcmp.le.f32.partialorder %v3013_v30, %v902_v37  ;;  %vm929_vm11 = vcmp.le.f32.partialorder %v3011_v59, %v902_v37  ;;  %v3793_v37 = vld [vmem:[#allocation37_spill] sm:$0xff] }
 0x32f   :  { %v1972_v30 = vrot.slane %v3373_v22, %v3780_v40 }
 0x332   :  { %967 = vperm.xlu0 %2391, %v940_v21   ;;  %964 = vperm.xlu1 %2390, %v939_v27   ;;  %v3347_v23 = vpop.xlane.xlu1 %1421  ;;  %v1988_v21 = vrot.slane %v3373_v22, %v3103_v26 }
 0x333   :  { %v1427_v5 = vrot.slane %v3347_v23, %v3780_v40  ;;  %v1431_v41 = vrot.slane %v3347_v23, %v3781_v17  ;;  %v1435_v15 = vrot.slane %v3347_v23, %v3782_v33  ;;  %v1439_v2 = vrot.slane %v3347_v23, %v3089_v55  ;;  %v3786_v33 = vld [vmem:[#allocation30_spill] sm:$0xff]  ;;  %v3788_v55 = vld [vmem:[#allocation31_spill] sm:$0xff] }
 0x334   :  { %v910_v40 = vrot.slane %v3321_v1, %v3127_v10  ;;  %v1443_v17 = vrot.slane %v3347_v23, %v3103_v26  ;;  %v3784_v1 = vld [vmem:[#allocation28_spill] sm:$0xff]  ;;  %v1447_v4 = vrot.slane %v3347_v23, %v3111_v36  ;;  %v3791_v26 = vld [vmem:[#allocation35_spill] sm:$0xff] }
 0x335   :  { %vm1465_vm12 = vcmp.le.f32.partialorder %v3005_v56, %v1427_v5  ;;  %vm1464_vm13 = vcmp.le.f32.partialorder %v3769_v20, %v1427_v5  ;;  %vm1467_vm14 = vcmp.le.f32.partialorder %v3009_v57, %v1431_v41  ;;  %vm1466_vm15 = vcmp.le.f32.partialorder %v3766_v52, %v1431_v41 }
 0x336   :  { %973 = vperm.xlu0 %2391, %v942_v39   ;;  %970 = vperm.xlu1 %2390, %v941_v43   ;;  %v1481_v54 = vsel %vm1465_vm12, %v3097_v0, 16  ;;  %v1480_v50 = vsel %vm1464_vm13, %v3093_v61, 16  ;;  %v1483_v56 = vsel %vm1467_vm14, %v3097_v0, 16  ;;  %v1482_v20 = vsel %vm1466_vm15, %v3093_v61, 16  ;;  %v3789_v39 = vld [vmem:[#allocation34_spill] sm:$0xff]  ;;  %v3790_v43 = vld [vmem:[#allocation33_spill] sm:$0xff] }
 0x337   :  { %v946_v57 = vsel %vm930_vm10, %v3097_v0, 16  ;;  %v945_v52 = vsel %vm929_vm11, %v3093_v61, 16  ;;  %vm1469_vm12 = vcmp.le.f32.partialorder %v3767_v14, %v1435_v15  ;;  %vm1468_vm13 = vcmp.le.f32.partialorder %v3768_v31, %v1435_v15 }
 0x338   :  { %v1485_v59 = vsel %vm1469_vm12, %v3097_v0, 16  ;;  %v1484_v12 = vsel %vm1468_vm13, %v3093_v61, 16  ;;  %vm2010_vm14 = vcmp.le.f32.partialorder %v3021_v47, %v1972_v30  ;;  %vm2009_vm15 = vcmp.le.f32.partialorder %v3019_v42, %v1972_v30  ;;  %v3796_v30 = vld [vmem:[#allocation41_spill] sm:$0xff] }
 0x339   :  { %v2026_v14 = vsel %vm2010_vm14, %v3097_v0, 16  ;;  %v2025_v31 = vsel %vm2009_vm15, %v3093_v61, 16  ;;  %vm2012_vm10 = vcmp.le.f32.partialorder %v3025_v8, %v1976_v3  ;;  %vm2011_vm11 = vcmp.le.f32.partialorder %v3023_v19, %v1976_v3  ;;  %v3798_v3 = vld [vmem:[#allocation43_spill] sm:$0xff] }
 0x33a   :  { %979 = vperm.xlu0 %2391, %v944_v45   ;;  %976 = vperm.xlu1 %2390, %v943_v60   ;;  %v2028_v47 = vsel %vm2012_vm10, %v3097_v0, 16  ;;  %v2027_v42 = vsel %vm2011_vm11, %v3093_v61, 16  ;;  %vm932_vm12 = vcmp.le.f32.partialorder %v3029_v11, %v906_v62  ;;  %vm931_vm13 = vcmp.le.f32.partialorder %v3027_v9, %v906_v62 }
 0x33b   :  { %v948_v8 = vsel %vm932_vm12, %v3097_v0, 16  ;;  %v947_v19 = vsel %vm931_vm13, %v3093_v61, 16  ;;  %vm1471_vm14 = vcmp.le.f32.partialorder %v3770_v6, %v1439_v2  ;;  %vm1470_vm15 = vcmp.le.f32.partialorder %v3771_v46, %v1439_v2 }
 0x33c   :  { %v1487_v11 = vsel %vm1471_vm14, %v3097_v0, 16  ;;  %v1486_v9 = vsel %vm1470_vm15, %v3093_v61, 16  ;;  %vm2014_vm10 = vcmp.le.f32.partialorder %v3037_v29, %v1980_v28  ;;  %vm2013_vm11 = vcmp.le.f32.partialorder %v3035_v48, %v1980_v28 }
 0x33d   :  { %v2030_v6 = vsel %vm2014_vm10, %v3097_v0, 16  ;;  %v2029_v46 = vsel %vm2013_vm11, %v3093_v61, 16  ;;  %vm934_vm12 = vcmp.le.f32.partialorder %v3041_v53, %v910_v40  ;;  %vm933_vm13 = vcmp.le.f32.partialorder %v3783_v18, %v910_v40 }
 0x33e   :  { %1500 = vperm.xlu0 %2391, %v1481_v54   ;;  %1497 = vperm.xlu1 %2390, %v1480_v50   ;;  %v950_v29 = vsel %vm934_vm12, %v3097_v0, 16  ;;  %v949_v48 = vsel %vm933_vm13, %v3093_v61, 16  ;;  %vm1473_vm14 = vcmp.le.f32.partialorder %v3784_v1, %v1443_v17  ;;  %vm1472_vm15 = vcmp.le.f32.partialorder %v3785_v58, %v1443_v17  ;;  %v3792_v50 = vld [vmem:[#allocation38_spill] sm:$0xff] }
 0x33f   :  { %v1489_v53 = vsel %vm1473_vm14, %v3097_v0, 16  ;;  %v1488_v49 = vsel %vm1472_vm15, %v3093_v61, 16  ;;  %vm2016_vm10 = vcmp.le.f32.partialorder %v3786_v33, %v1984_v13  ;;  %vm2015_vm11 = vcmp.le.f32.partialorder %v3787_v63, %v1984_v13 }
 0x340   :  { %v2032_v25 = vsel %vm2016_vm10, %v3097_v0, 16  ;;  %v2031_v24 = vsel %vm2015_vm11, %v3093_v61, 16  ;;  %vm1475_vm12 = vcmp.le.f32.partialorder %v3774_v35, %v1447_v4  ;;  %vm1474_vm13 = vcmp.le.f32.partialorder %v3788_v55, %v1447_v4 }
 0x341   :  { %v1491_v27 = vsel %vm1475_vm12, %v3097_v0, 16  ;;  %v1490_v32 = vsel %vm1474_vm13, %v3093_v61, 16  ;;  %vm2018_vm14 = vcmp.le.f32.partialorder %v3789_v39, %v1988_v21  ;;  %vm2017_vm15 = vcmp.le.f32.partialorder %v3790_v43, %v1988_v21 }
 0x342   :  { %1506 = vperm.xlu0 %2391, %v1483_v56   ;;  %1503 = vperm.xlu1 %2390, %v1482_v20   ;;  %v1451_v5 = vrot.slane %v3347_v23, %v3119_v38  ;;  %v2034_v35 = vsel %vm2018_vm14, %v3097_v0, 16  ;;  %v2033_v45 = vsel %vm2017_vm15, %v3093_v61, 16  ;;  %v1992_v60 = vrot.slane %v3373_v22, %v3111_v36  ;;  %v3794_v36 = vld [vmem:[#allocation39_spill] sm:$0xff] }
 0x343   :  { %v1455_v56 = vrot.slane %v3347_v23, %v3127_v10  ;;  %v1996_v15 = vrot.slane %v3373_v22, %v3119_v38  ;;  %v3795_v23 = vld [vmem:[#allocation42_spill] sm:$0xff]  ;;  %v3473_v62 = vsel %vm322_vm9, %v3319_v34, 2147483647 }
 0x344   :  { %vm1477_vm10 = vcmp.le.f32.partialorder %v3776_v7, %v1451_v5  ;;  %vm1476_vm11 = vcmp.le.f32.partialorder %v3791_v26, %v1451_v5  ;;  %vm2020_vm12 = vcmp.le.f32.partialorder %v3792_v50, %v1992_v60  ;;  %vm2019_vm13 = vcmp.le.f32.partialorder %v3793_v37, %v1992_v60  ;;  %v3797_v38 = vld [vmem:[#allocation46_spill] sm:$0xff] }
 0x345   :  { %v1493_v41 = vsel %vm1477_vm10, %v3097_v0, 16  ;;  %v1492_v54 = vsel %vm1476_vm11, %v3093_v61, 16  ;;  %v2036_v7 = vsel %vm2020_vm12, %v3097_v0, 16  ;;  %v2035_v20 = vsel %vm2019_vm13, %v3093_v61, 16 }
 0x346   :  { %985 = vperm.xlu0 %2391, %v946_v57   ;;  %982 = vperm.xlu1 %2390, %v945_v52   ;;  %vm1479_vm14 = vcmp.le.f32.partialorder %v3778_v16, %v1455_v56  ;;  %vm1478_vm15 = vcmp.le.f32.partialorder %v3794_v36, %v1455_v56  ;;  %vm2022_vm10 = vcmp.le.f32.partialorder %v3795_v23, %v1996_v15 }
 0x347   :  { %v1495_v57 = vsel %vm1479_vm14, %v3097_v0, 16  ;;  %v1494_v52 = vsel %vm1478_vm15, %v3093_v61, 16  ;;  %vm2021_vm11 = vcmp.le.f32.partialorder %v3796_v30, %v1996_v15  ;;  %v2038_v16 = vsel %vm2022_vm10, %v3097_v0, 16 }
 0x348   :  { %vm2279_vm14 = vcmask 15360   ;;  %vm2281_vm10 = vcmask 23552  }
 0x34a   :  { %1512 = vperm.xlu0 %2391, %v1485_v59   ;;  %1509 = vperm.xlu1 %2390, %v1484_v12   ;;  %v2000_v59 = vrot.slane %v3373_v22, %v3127_v10  ;;  %v2037_v12 = vsel %vm2021_vm11, %v3093_v61, 16  ;;  %v535_v10 = vshra.s32 %v3473_v62, 16 }
 0x34c   :  { %vm2024_vm12 = vcmp.le.f32.partialorder %v3797_v38, %v2000_v59  ;;  %vm2023_vm13 = vcmp.le.f32.partialorder %v3798_v3, %v2000_v59  ;;  %v3476_v22 = vcvt.s32.f32 %v535_v10 }
 0x34e   :  { %2045 = vperm.xlu0 %2391, %v2026_v14   ;;  %2042 = vperm.xlu1 %2390, %v2025_v31   ;;  %v2040_v14 = vsel %vm2024_vm12, %v3097_v0, 16  ;;  %v2039_v31 = vsel %vm2023_vm13, %v3093_v61, 16 }
 0x352   :  { %2051 = vperm.xlu0 %2391, %v2028_v47   ;;  %2048 = vperm.xlu1 %2390, %v2027_v42  }
 0x356   :  { %991 = vperm.xlu0 %2391, %v948_v8   ;;  %988 = vperm.xlu1 %2390, %v947_v19  }
 0x35a   :  { %1518 = vperm.xlu0 %2391, %v1487_v11   ;;  %1515 = vperm.xlu1 %2390, %v1486_v9  }
 0x35e   :  { %2057 = vperm.xlu0 %2391, %v2030_v6   ;;  %2054 = vperm.xlu1 %2390, %v2029_v46  }
 0x362   :  { %997 = vperm.xlu0 %2391, %v950_v29   ;;  %994 = vperm.xlu1 %2390, %v949_v48  }
 0x366   :  { %1524 = vperm.xlu0 %2391, %v1489_v53   ;;  %1521 = vperm.xlu1 %2390, %v1488_v49  }
 0x36a   :  { %2063 = vperm.xlu0 %2391, %v2032_v25   ;;  %2060 = vperm.xlu1 %2390, %v2031_v24  }
 0x36e   :  { %1530 = vperm.xlu0 %2391, %v1491_v27   ;;  %1527 = vperm.xlu1 %2390, %v1490_v32  }
 0x372   :  { %2069 = vperm.xlu0 %2391, %v2034_v35   ;;  %2066 = vperm.xlu1 %2390, %v2033_v45  }
 0x376   :  { %1536 = vperm.xlu0 %2391, %v1493_v41   ;;  %1533 = vperm.xlu1 %2390, %v1492_v54  }
 0x37a   :  { %2075 = vperm.xlu0 %2391, %v2036_v7   ;;  %2072 = vperm.xlu1 %2390, %v2035_v20  }
 0x37e   :  { %1542 = vperm.xlu0 %2391, %v1495_v57   ;;  %1539 = vperm.xlu1 %2390, %v1494_v52  }
 0x382   :  { %2081 = vperm.xlu0 %2391, %v2038_v16   ;;  %2078 = vperm.xlu1 %2390, %v2037_v12  }
 0x386   :  { %2087 = vperm.xlu0 %2391, %v2040_v14   ;;  %2084 = vperm.xlu1 %2390, %v2039_v31  }
 0x3a9   :  { %v956_v47 = vpop.permute.xlu0 %955  ;;  %v953_v42 = vpop.permute.xlu1 %952 }
 0x3aa   :  { %538 = vmin.xlane.f32.xlu1 %v3476_v22  ;;  %v1006_v27 = vrot.slane %v956_v47, %v2912_v44  ;;  %v1002_v32 = vrot.slane %v953_v42, %v2920_v51 }
 0x3ac   :  { %v1007_v7 = vsel %vm242_vm1, %v1006_v27, %v1002_v32 }
 0x3ad   :  { %v962_v2 = vpop.permute.xlu0 %961  ;;  %v959_v8 = vpop.permute.xlu1 %958 }
 0x3ae   :  { %v1015_v63 = vrot.slane %v962_v2, %v2912_v44  ;;  %v1011_v4 = vrot.slane %v959_v8, %v2920_v51 }
 0x3b0   :  { %v1016_v45 = vsel %vm242_vm1, %v1015_v63, %v1011_v4 }
 0x3b1   :  { %v968_v19 = vpop.permute.xlu0 %967  ;;  %v965_v0 = vpop.permute.xlu1 %964  ;;  %v1071_v36 = vsel %vm307_vm2, %v1016_v45, %v1007_v7 }
 0x3b2   :  { %v1024_v25 = vrot.slane %v968_v19, %v2912_v44  ;;  %v1020_v24 = vrot.slane %v965_v0, %v2920_v51 }
 0x3b4   :  { %v1025_v41 = vsel %vm242_vm1, %v1024_v25, %v1020_v24 }
 0x3b5   :  { %v974_v28 = vpop.permute.xlu0 %973  ;;  %v971_v61 = vpop.permute.xlu1 %970  ;;  %v1072_v57 = vsel %vm309_vm3, %v1025_v41, %v1071_v36 }
 0x3b6   :  { %v1033_v39 = vrot.slane %v974_v28, %v2912_v44  ;;  %v1029_v43 = vrot.slane %v971_v61, %v2920_v51 }
 0x3b8   :  { %v1034_v20 = vsel %vm242_vm1, %v1033_v39, %v1029_v43 }
 0x3b9   :  { %v980_v11 = vpop.permute.xlu0 %979  ;;  %v977_v9 = vpop.permute.xlu1 %976  ;;  %v1073_v23 = vsel %vm311_vm4, %v1034_v20, %v1072_v57 }
 0x3ba   :  { %v1042_v5 = vrot.slane %v980_v11, %v2912_v44  ;;  %v1038_v35 = vrot.slane %v977_v9, %v2920_v51 }
 0x3bc   :  { %v1043_v15 = vsel %vm242_vm1, %v1042_v5, %v1038_v35 }
 0x3bd   :  { %v3479_v40 = vpop.permute.xlu0 %1500  ;;  %v3481_v34 = vpop.permute.xlu1 %1497  ;;  %v1074_v12 = vsel %vm313_vm5, %v1043_v15, %v1073_v23 }
 0x3be   :  { %v1551_v25 = vrot.slane %v3479_v40, %v2912_v44  ;;  %v1547_v24 = vrot.slane %v3481_v34, %v2920_v51 }
 0x3c0   :  { %v1552_v5 = vsel %vm242_vm1, %v1551_v25, %v1547_v24 }
 0x3c1   :  { %v3483_v6 = vpop.permute.xlu0 %1506  ;;  %v3485_v46 = vpop.permute.xlu1 %1503 }
 0x3c5   :  { %v986_v18 = vpop.permute.xlu0 %985  ;;  %v983_v17 = vpop.permute.xlu1 %982 }
 0x3c6   :  { %v1051_v26 = vrot.slane %v986_v18, %v2912_v44  ;;  %v1047_v60 = vrot.slane %v983_v17, %v2920_v51 }
 0x3c8   :  { %v1052_v52 = vsel %vm242_vm1, %v1051_v26, %v1047_v60 }
 0x3c9   :  { %v3487_v29 = vpop.permute.xlu0 %1512  ;;  %v3489_v48 = vpop.permute.xlu1 %1509  ;;  %v1075_v14 = vsel %vm315_vm6, %v1052_v52, %v1074_v12 }
 0x3ca   :  { %v1569_v63 = vrot.slane %v3487_v29, %v2912_v44  ;;  %v1565_v4 = vrot.slane %v3489_v48, %v2920_v51 }
 0x3cc   :  { %v1570_v43 = vsel %vm242_vm1, %v1569_v63, %v1565_v4 }
 0x3cd   :  { %v3491_v1 = vpop.permute.xlu0 %2045  ;;  %v3493_v58 = vpop.permute.xlu1 %2042 }
 0x3ce   :  { %v2096_v20 = vrot.slane %v3491_v1, %v2912_v44  ;;  %v2092_v36 = vrot.slane %v3493_v58, %v2920_v51 }
 0x3d1   :  { %v3495_v13 = vpop.permute.xlu0 %2051  ;;  %v3497_v53 = vpop.permute.xlu1 %2048 }
 0x3d2   :  { %v2101_v7 = vrot.slane %v3497_v53, %v2920_v51 }
 0x3d5   :  { %v992_v49 = vpop.permute.xlu0 %991  ;;  %v989_v33 = vpop.permute.xlu1 %988 }
 0x3d6   :  { %v1060_v54 = vrot.slane %v992_v49, %v2912_v44  ;;  %v1056_v50 = vrot.slane %v989_v33, %v2920_v51  ;;  %v1560_v49 = vrot.slane %v3483_v6, %v2912_v44  ;;  %v1556_v33 = vrot.slane %v3485_v46, %v2920_v51 }
 0x3d8   :  { %v1061_v30 = vsel %vm242_vm1, %v1060_v54, %v1056_v50  ;;  %v1561_v48 = vsel %vm242_vm1, %v1560_v49, %v1556_v33  ;;  %v2105_v50 = vrot.slane %v3495_v13, %v2912_v44 }
 0x3d9   :  { %v3503_v55 = vpop.permute.xlu0 %1518  ;;  %v3505_v21 = vpop.permute.xlu1 %1515  ;;  %v1076_v31 = vsel %vm317_vm7, %v1061_v30, %v1075_v14  ;;  %v1616_v60 = vsel %vm307_vm2, %v1561_v48, %v1552_v5 }
 0x3da   :  { %v1578_v27 = vrot.slane %v3503_v55, %v2912_v44  ;;  %v1574_v6 = vrot.slane %v3505_v21, %v2920_v51  ;;  %v1617_v54 = vsel %vm309_vm3, %v1570_v43, %v1616_v60  ;;  %v2393_v60 = vld [vmem:[#allocation5] sm:$0xff] }
 0x3dc   :  { %v1579_v55 = vsel %vm242_vm1, %v1578_v27, %v1574_v6 }
 0x3dd   :  { %v3519_v37 = vpop.permute.xlu0 %2057  ;;  %v3521_v56 = vpop.permute.xlu1 %2054  ;;  %v1618_v15 = vsel %vm311_vm4, %v1579_v55, %v1617_v54 }
 0x3de   :  { %v2114_v52 = vrot.slane %v3519_v37, %v2912_v44  ;;  %v2110_v23 = vrot.slane %v3521_v56, %v2920_v51  ;;  %v2106_v37 = vsel %vm242_vm1, %v2105_v50, %v2101_v7  ;;  %v2504_v50 = vmov 0.0|0.0  }
 0x3df   :  { %2362 = vmatprep.subr.bf16.mxu0 %v2504_v50  ;;  %v2506_v7 = vmov 0.0   ;;  %2365 = vmatprep.subr.bf16.mxu1 %v2504_v50 }
 0x3e1   :  { %v998_v59 = vpop.permute.xlu0 %997  ;;  %v995_v16 = vpop.permute.xlu1 %994 }
 0x3e2   :  { %v1069_v38 = vrot.slane %v998_v59, %v2912_v44  ;;  %v1065_v3 = vrot.slane %v995_v16, %v2920_v51 }
 0x3e4   :  { %v1070_v10 = vsel %vm242_vm1, %v1069_v38, %v1065_v3 }
 0x3e5   :  { %v1525_v47 = vpop.permute.xlu0 %1524  ;;  %v1522_v42 = vpop.permute.xlu1 %1521  ;;  %v1077_v2 = vsel %vm319_vm8, %v1070_v10, %v1076_v31 }
 0x3e6   :  { %v3539_v8 = vsel %vm322_vm9, %v1077_v2, 2147483647  ;;  %v1587_v39 = vrot.slane %v1525_v47, %v2912_v44  ;;  %v1583_v29 = vrot.slane %v1522_v42, %v2920_v51  ;;  %v2097_v42 = vsel %vm242_vm1, %v2096_v20, %v2092_v36 }
 0x3e7   :  { %v1080_v19 = vshra.s32 %v3539_v8, 16  ;;  %v2115_v2 = vsel %vm242_vm1, %v2114_v52, %v2110_v23  ;;  %v2161_v49 = vsel %vm307_vm2, %v2106_v37, %v2097_v42 }
 0x3e8   :  { %v1588_v41 = vsel %vm242_vm1, %v1587_v39, %v1583_v29  ;;  %v2162_v4 = vsel %vm309_vm3, %v2115_v2, %v2161_v49 }
 0x3e9   :  { %v3542_v0 = vpop.permute.xlu0 %2063  ;;  %v3544_v28 = vpop.permute.xlu1 %2060  ;;  %v3546_v61 = vcvt.s32.f32 %v1080_v19  ;;  %v1619_v13 = vsel %vm313_vm5, %v1588_v41, %v1618_v15  ;;  %v2394_v41 = vld [vmem:[#allocation5 + $0x8] sm:$0xff]  ;;  %v2395_v15 = vld [vmem:[#allocation5 + $0x10] sm:$0xff] }
 0x3ea   :  { %v2123_v1 = vrot.slane %v3542_v0, %v2912_v44  ;;  %v2119_v58 = vrot.slane %v3544_v28, %v2920_v51  ;;  %v2363_v54 = vpack.c.bf16 %v2394_v41, %v2393_v60 }
 0x3eb   :  { %1083 = vmin.xlane.f32.xlu0 %v3546_v61 }
 0x3ec   :  { %2364 = vmatpush3.bf16.msra.mxu0 %v2363_v54 }
 0x3ed   :  { %v1531_v11 = vpop.permute.xlu0 %1530  ;;  %v1528_v9 = vpop.permute.xlu1 %1527  ;;  %2368 = vmatprep.subr.bf16.mxu0 %v2504_v50 }
 0x3ee   :  { %v1596_v40 = vrot.slane %v1531_v11, %v2912_v44  ;;  %v1592_v34 = vrot.slane %v1528_v9, %v2920_v51  ;;  %v2124_v11 = vsel %vm242_vm1, %v2123_v1, %v2119_v58 }
 0x3ef   :  { %v2163_v24 = vsel %vm311_vm4, %v2124_v11, %v2162_v4  ;;  %v3803_v11 = vld [vmem:[#allocation17_spill] sm:$0xff] }
 0x3f0   :  { %v1597_v57 = vsel %vm242_vm1, %v1596_v40, %v1592_v34 }
 0x3f1   :  { %v3549_v18 = vpop.permute.xlu0 %2069  ;;  %v2067_v17 = vpop.permute.xlu1 %2066  ;;  %v1620_v56 = vsel %vm315_vm6, %v1597_v57, %v1619_v13  ;;  %v2396_v57 = vld [vmem:[#allocation5 + $0x18] sm:$0xff] }
 0x3f2   :  { %v2132_v38 = vrot.slane %v3549_v18, %v2912_v44  ;;  %v2128_v3 = vrot.slane %v2067_v17, %v2920_v51  ;;  %v2366_v52 = vpack.c.bf16 %v2396_v57, %v2395_v15 }
 0x3f4   :  { %v2133_v33 = vsel %vm242_vm1, %v2132_v38, %v2128_v3  ;;  %2367 = vmatpush3.bf16.msra.mxu1 %v2366_v52  ;;  %v3799_v38 = vld [vmem:[#allocation19_spill] sm:$0xff] }
 0x3f5   :  { %v1537_v32 = vpop.permute.xlu0 %1536  ;;  %v1534_v46 = vpop.permute.xlu1 %1533  ;;  %v2164_v39 = vsel %vm313_vm5, %v2133_v33, %v2163_v24  ;;  %2371 = vmatprep.subr.bf16.mxu1 %v2504_v50 }
 0x3f6   :  { %v1605_v21 = vrot.slane %v1537_v32, %v2912_v44  ;;  %v1601_v35 = vrot.slane %v1534_v46, %v2920_v51 }
 0x3f8   :  { %v1606_v53 = vsel %vm242_vm1, %v1605_v21, %v1601_v35 }
 0x3f9   :  { %v2076_v45 = vpop.permute.xlu0 %2075  ;;  %v2073_v26 = vpop.permute.xlu1 %2072  ;;  %v1621_v14 = vsel %vm317_vm7, %v1606_v53, %v1620_v56 }
 0x3fa   :  { %v2141_v31 = vrot.slane %v2076_v45, %v2912_v44  ;;  %v2137_v10 = vrot.slane %v2073_v26, %v2920_v51  ;;  %v534_v45 = vand.u32 65535, %v3473_v62  ;;  %v1079_v62 = vand.u32 65535, %v3539_v8 }
 0x3fc   :  { %v2142_v25 = vsel %vm242_vm1, %v2141_v31, %v2137_v10  ;;  %v1081_v20 = vcvt.s32.f32 %v1079_v62  ;;  %v3801_v31 = vld [vmem:[#allocation14_spill] sm:$0xff] }
 0x3fd   :  { %v1543_v30 = vpop.permute.xlu0 %1542  ;;  %v1540_v59 = vpop.permute.xlu1 %1539  ;;  %v2165_v43 = vsel %vm315_vm6, %v2142_v25, %v2164_v39 }
 0x3fe   :  { %v1614_v16 = vrot.slane %v1543_v30, %v2912_v44  ;;  %v1610_v12 = vrot.slane %v1540_v59, %v2920_v51 }
 0x400   :  { %v1615_v47 = vsel %vm242_vm1, %v1614_v16, %v1610_v12 }
 0x401   :  { %v2082_v19 = vpop.permute.xlu0 %2081  ;;  %v2079_v0 = vpop.permute.xlu1 %2078  ;;  %v1622_v28 = vsel %vm319_vm8, %v1615_v47, %v1621_v14  ;;  %v3800_v14 = vld [vmem:[#allocation15_spill] sm:$0xff] }
 0x402   :  { %v2150_v9 = vrot.slane %v2082_v19, %v2912_v44  ;;  %v2146_v18 = vrot.slane %v2079_v0, %v2920_v51  ;;  %v1623_v17 = vsel %vm322_vm9, %v1622_v28, 2147483647  ;;  %v3802_v10 = vpack.c.bf16 %v3800_v14, %v3801_v31 }
 0x403   :  { %v1625_v63 = vshra.s32 %v1623_v17, 16  ;;  %v1624_v23 = vand.u32 65535, %v1623_v17 }
 0x404   :  { %v2151_v27 = vsel %vm242_vm1, %v2150_v9, %v2146_v18  ;;  %v3804_v9 = vld [vmem:[#allocation16_spill] sm:$0xff] }
 0x405   :  { %v2088_v6 = vpop.permute.xlu0 %2087  ;;  %v2085_v32 = vpop.permute.xlu1 %2084  ;;  %v1627_v46 = vcvt.s32.f32 %v1625_v63  ;;  %v2166_v40 = vsel %vm317_vm7, %v2151_v27, %v2165_v43  ;;  %v1626_v53 = vcvt.s32.f32 %v1624_v23  ;;  %v3805_v18 = vpack.c.bf16 %v3803_v11, %v3804_v9 }
 0x406   :  { %v2159_v29 = vrot.slane %v2088_v6, %v2912_v44  ;;  %v2155_v48 = vrot.slane %v2085_v32, %v2920_v51  ;;  %v536_v44 = vcvt.s32.f32 %v534_v45 }
 0x407   :  { %1628 = vmin.xlane.f32.xlu0 %v1627_v46 }
 0x408   :  { %v2160_v34 = vsel %vm242_vm1, %v2159_v29, %v2155_v48  ;;  %vm2505_vm1 = vmmov 0  }
 0x409   :  { %v2167_v5 = vsel %vm319_vm8, %v2160_v34, %v2166_v40  ;;  %2338 = vmatprep.mubr.msk.f32.mxu0 %vm2505_vm1, %v2506_v7  ;;  %2345 = vmatprep.mubr.msk.f32.mxu1 %vm2505_vm1, %v2506_v7  ;;  %vm2277_vm8 = vcmask 7168  }
 0x40a   :  { %v2168_v55 = vsel %vm322_vm9, %v2167_v5, 2147483647 }
 0x40b   :  { %v2170_v21 = vshra.s32 %v2168_v55, 16  ;;  %v2169_v59 = vand.u32 65535, %v2168_v55 }
 0x40d   :  { %v2172_v35 = vcvt.s32.f32 %v2170_v21  ;;  %v2171_v8 = vcvt.s32.f32 %v2169_v59 }
 0x40f   :  { %2173 = vmin.xlane.f32.xlu1 %v2172_v35 }
 0x437   :  { %v539_v26 = vpop.xlane.xlu1 %538 }
 0x438   :  { %vm540_vm2 = vcmp.eq.f32.partialorder %v3476_v22, %v539_v26 }
 0x439   :  { %v541_v51 = vsel %vm540_vm2, %v536_v44, inf }
 0x43a   :  { %542 = vmin.xlane.f32.xlu0 %v541_v51 }
 0x478   :  { %v1084_v22 = vpop.xlane.xlu0 %1083 }
 0x479   :  { %vm1085_vm3 = vcmp.eq.f32.partialorder %v3546_v61, %v1084_v22  ;;  %v545_v61 = vcvt.f32.s32 %v539_v26  ;;  %v1090_v47 = vcvt.f32.s32 %v1084_v22 }
 0x47a   :  { %v1086_v36 = vsel %vm1085_vm3, %v1081_v20, inf }
 0x47b   :  { %1087 = vmin.xlane.f32.xlu1 %v1086_v36  ;;  %v546_v12 = vshll.u32 %v545_v61, 16  ;;  %v1091_v2 = vshll.u32 %v1090_v47, 16 }
 0x494   :  { %v1629_v13 = vpop.xlane.xlu0 %1628 }
 0x495   :  { %vm1630_vm4 = vcmp.eq.f32.partialorder %v1627_v46, %v1629_v13  ;;  %v1635_v17 = vcvt.f32.s32 %v1629_v13 }
 0x496   :  { %v1631_v30 = vsel %vm1630_vm4, %v1626_v53, inf }
 0x497   :  { %1632 = vmin.xlane.f32.xlu0 %v1631_v30  ;;  %v1636_v33 = vshll.u32 %v1635_v17, 16 }
 0x49c   :  { %v2174_v1 = vpop.xlane.xlu1 %2173 }
 0x49d   :  { %vm2175_vm5 = vcmp.eq.f32.partialorder %v2172_v35, %v2174_v1  ;;  %v2180_v24 = vcvt.f32.s32 %v2174_v1 }
 0x49e   :  { %v2176_v58 = vsel %vm2175_vm5, %v2171_v8, inf }
 0x49f   :  { %2177 = vmin.xlane.f32.xlu1 %v2176_v58  ;;  %v2181_v46 = vshll.u32 %v2180_v24, 16 }
 0x4c7   :  { %v543_v16 = vpop.xlane.xlu0 %542 }
 0x4c8   :  { %v544_v37 = vcvt.f32.s32 %v543_v16 }
 0x4ca   :  { %v547_v56 = vadd.s32 %v546_v12, %v544_v37 }
 0x4cc   :  { %vm548_vm6 = vcmp.eq.s32.totalorder %v3799_v38, %v547_v56 }
 0x4cd   :  { %v2314_v3 = vsel %vm548_vm6, 1.0, %v2506_v7 }
 0x4ce   :  { %2339 = vmatmul.mubr.msk.f32.vlgmr.msra.gmra.mrb[0].mxu0 %vm322_vm9, %v2314_v3 }
 0x4cf   :  { %2370 = vmatpush3.bf16.msra.mxu0 %v3802_v10  ;;  %2352 = vmatprep.mubr.msk.f32.mxu0 %vm2505_vm1, %v2506_v7 }
 0x508   :  { %v1088_v42 = vpop.xlane.xlu1 %1087 }
 0x509   :  { %v1089_v19 = vcvt.f32.s32 %v1088_v42 }
 0x50b   :  { %v1092_v0 = vadd.s32 %v1091_v2, %v1089_v19 }
 0x50d   :  { %vm1093_vm7 = vcmp.eq.s32.totalorder %v3799_v38, %v1092_v0  ;;  %v2278_v25 = vsel %vm2277_vm8, %v547_v56, %v1092_v0 }
 0x50e   :  { %v2316_v28 = vsel %vm1093_vm7, 1.0, %v2506_v7 }
 0x50f   :  { %2346 = vmatmul.mubr.msk.f32.vlgmr.msra.gmra.mrb[0].mxu1 %vm322_vm9, %v2316_v28 }
 0x510   :  { %2373 = vmatpush3.bf16.msra.mxu1 %v3805_v18  ;;  %2359 = vmatprep.mubr.msk.f32.mxu1 %vm2505_vm1, %v2506_v7 }
 0x524   :  { %v1633_v49 = vpop.xlane.xlu0 %1632 }
 0x525   :  { %v1634_v63 = vcvt.f32.s32 %v1633_v49 }
 0x527   :  { %v1637_v4 = vadd.s32 %v1636_v33, %v1634_v63 }
 0x529   :  { %vm1638_vm15 = vcmp.eq.s32.totalorder %v3799_v38, %v1637_v4  ;;  %v2280_v27 = vsel %vm2279_vm14, %v2278_v25, %v1637_v4 }
 0x52a   :  { %v2318_v6 = vsel %vm1638_vm15, 1.0, %v2506_v7 }
 0x52b   :  { %2353 = vmatmul.mubr.msk.f32.vlgmr.msra.gmra.mrb[2].mxu0 %vm322_vm9, %v2318_v6 }
 0x52c   :  { %v2178_v32 = vpop.xlane.xlu1 %2177 }
 0x52d   :  { %v2179_v39 = vcvt.f32.s32 %v2178_v32 }
 0x52f   :  { %v2182_v29 = vadd.s32 %v2181_v46, %v2179_v39 }
 0x531   :  { %vm2183_vm11 = vcmp.eq.s32.totalorder %v3799_v38, %v2182_v29  ;;  %v2282_v48 = vsel %vm2281_vm10, %v2280_v27, %v2182_v29 }
 0x532   :  { %v2320_v43 = vsel %vm2183_vm11, 1.0, %v2506_v7  ;;  %2283 = vst.msk [vmem:[#allocation8] sm:$0xff] %vm166_vm0, %v2282_v48 }
 0x533   :  { %2360 = vmatmul.mubr.msk.f32.vlgmr.msra.gmra.mrb[2].mxu1 %vm322_vm9, %v2320_v43 }
 0x5a1   :  { %v620_v40 = vpop.f32.mrb[0].mxu0 }
 0x5a2   :  { %v2340_v34 = vpop.f32.mrb[1].mxu0 }
 0x5e2   :  { %v1165_v5 = vpop.f32.mrb[0].mxu1 }
 0x5e3   :  { %2260 = vrot.lane.b32.xlu0 %v1165_v5, %s2497_s10  ;;  %v2347_v55 = vpop.f32.mrb[1].mxu1 }
 0x5fe   :  { %v1710_v21 = vpop.f32.mrb[2].mxu0 }
 0x5ff   :  { %v2354_v35 = vpop.f32.mrb[3].mxu0  ;;  %2264 = vrot.lane.b32.xlu1 %v1710_v21, %s2496_s7 }
 0x600   :  { %2452 = shalt.err (!%p2449_p6)
}
 0x601   :  { %s2453_s19 = scalar_lea.hbm %s3695_s3, 128 }
 0x602   :  { %p2454_p7 = scmp.ne.s32.totalorder %s3695_s3, %s2453_s19  ;;  %p2457_p8 = scmp.lt.u32.totalorder %s2453_s19, %s3695_s3 }
 0x604   :  { %p2459_p9 = pnand %p2457_p8, %p2454_p7 }
 0x606   :  { %2462 = shalt.err (!%p2459_p9)
}
 0x607   :  { %2303 = dma.vmem_to_hbm [thread:$0]  %s2301_s15, 128, %s3695_s3, [#allocation9]   ;;  %v2255_v45 = vpop.f32.mrb[2].mxu1  ;;  %vm2272_vm12 = vcmask 64512   ;;  %vm2274_vm13 = vcmask 97280  }
 0x608   :  { %2268 = vrot.lane.b32.xlu1 %v2255_v45, %s2498_s1  ;;  %v2361_v26 = vpop.f32.mrb[3].mxu1  ;;  %s2508_s26 = smov [#allocation7]  }
 0x609   :  { %s2290_s27 = sshll.u32 %s2508_s26, 4  ;;  %s2291_s27 = int_to_ptr.vmem [resolvable:$true] %s2290_s27 }
 0x60a   :  { %s2463_s28 = scalar_lea.vmem %s2291_s27, 128  ;;  %p2468_p11 = scmp.lt.s32.totalorder %s2291_s27, %s2291_s27 }
 0x60b   :  { %p2464_p10 = scmp.ne.s32.totalorder %s2291_s27, %s2463_s28  ;;  %p2469_p12 = scmp.lt.s32.totalorder %s2463_s28, %s2463_s28 }
 0x60d   :  { %p2470_p13 = por %p2469_p12, %p2468_p11 }
 0x60f   :  { %p2471_p0 = pnand %p2470_p13, %p2464_p10 }
 0x655   :  { %v2261_v44 = vpop.permute.xlu0 %2260 }
 0x656   :  { %v2271_v60 = vsel %vm166_vm0, %v620_v40, %v2261_v44 }
 0x671   :  { %v2265_v51 = vpop.permute.xlu1 %2264 }
 0x672   :  { %v2273_v41 = vsel %vm2272_vm12, %v2271_v60, %v2265_v51 }
 0x67a   :  { %v2269_v54 = vpop.permute.xlu1 %2268 }
 0x67b   :  { %v2275_v50 = vsel %vm2274_vm13, %v2273_v41, %v2269_v54 }
 0x67c   :  { %2276 = vst.msk [vmem:[#allocation7] sm:$0xff] %vm322_vm9, %v2275_v50 }
 0x67d   :  { %2474 = shalt.err (!%p2471_p0)
}
 0x67e   :  { %s2475_s30 = scalar_lea.hbm %s3694_s2, 128 }
 0x67f   :  { %p2476_p1 = scmp.ne.s32.totalorder %s3694_s2, %s2475_s30  ;;  %p2479_p2 = scmp.lt.u32.totalorder %s2475_s30, %s3694_s2 }
 0x681   :  { %p2481_p3 = pnand %p2479_p2, %p2476_p1 }
 0x683   :  { %2484 = shalt.err (!%p2481_p3)
}
 0x684   :  { %2293 = dma.vmem_to_hbm [thread:$0]  %s2291_s27, 128, %s3694_s2, [#allocation4]  }
 0x685   :  { %2489 = dma.done.wait [#allocation4], 128  }
 0x686   :  { %2490 = vsyncadd [#allocation4], 4294967168 }
 0x687   :  { %2491 = dma.done.wait [#allocation9], 128  }
 0x688   :  { %2492 = vsyncadd [#allocation9], 4294967168 }
 0x689   :  { %2310 = vsyncpa [#allocation3], 1 }
 0x68a   :  { %2311 = vsyncpa [#allocation6], 1 }
 0x68b   :  { %2312 = vsyncpa [#allocation4], 1 }
 0x68c   :  { %2313 = vsyncpa [#allocation9], 1 }

// kernel: transformer_vqvae_forward.21
= control target key start
LH: loop header
LB: loop body
LE: loop exit
PB: predicated region body
PF: predicated region fallthrough
CT: control target
= control target key end

     0   :  { %11 = vsyncpa [#allocation3], 0  ;;  %s674_s0 = inlined_call_operand.hbm [shape: f32[16,32], index: 0, kind: input, shape index: {}]   ;;  %s675_s1 = inlined_call_operand.hbm [shape: f32[1,32], index: 1, kind: input, shape index: {}]   ;;  %s676_s2 = inlined_call_operand.hbm [shape: f32[1,32], index: 2, kind: input, shape index: {}]   ;;  %s677_s3 = inlined_call_operand.hbm [shape: bf16[32,32], index: 3, kind: input, shape index: {}]   ;;  %s678_s4 = inlined_call_operand.hbm [shape: bf16[32,16], index: 4, kind: input, shape index: {}]   ;;  %s679_s5 = inlined_call_operand.hbm [shape: f32[1,16], index: 5, kind: input, shape index: {}]   ;;  %s680_s6 = inlined_call_operand.hbm [shape: f32[16,16], index: 6, kind: output, shape index: {}]  }
   0x1   :  { %12 = vsyncpa [#allocation6], 0 }
   0x2   :  { %13 = vsyncpa [#allocation9], 0 }
   0x3   :  { %14 = vsyncpa [#allocation12], 0 }
   0x4   :  { %15 = vsyncpa [#allocation4], 0  ;;  %s517_s21 = smov [#allocation5]   ;;  %s518_s23 = smov [#allocation8]  }
   0x5   :  { %s34_s22 = sshll.u32 %s517_s21, 4  ;;  %s53_s24 = sshll.u32 %s518_s23, 4  ;;  %s35_s22 = int_to_ptr.vmem [resolvable:$true] %s34_s22  ;;  %s565_s24 = int_to_ptr.vmem [resolvable:$true] %s53_s24 }
   0x6   :  { %s353_s27 = scalar_lea.hbm %s675_s1, 16 }
   0x7   :  { %p354_p0 = scmp.ne.s32.totalorder %s675_s1, %s353_s27  ;;  %p357_p1 = scmp.lt.u32.totalorder %s353_s27, %s675_s1 }
   0x9   :  { %p359_p2 = pnand %p357_p1, %p354_p0 }
   0xb   :  { %362 = shalt.err (!%p359_p2)
}
   0xc   :  { %s363_s8 = scalar_lea.vmem %s35_s22, 16  ;;  %s367_s9 = scalar_lea.vmem %s35_s22, 32 }
   0xd   :  { %p364_p3 = scmp.ne.s32.totalorder %s35_s22, %s363_s8  ;;  %p368_p4 = scmp.lt.s32.totalorder %s35_s22, %s35_s22 }
   0xe   :  { %p369_p5 = scmp.lt.s32.totalorder %s367_s9, %s363_s8 }
  0x10   :  { %p370_p6 = por %p369_p5, %p368_p4 }
  0x12   :  { %p371_p7 = pnand %p370_p6, %p364_p3 }
  0x14   :  { %374 = shalt.err (!%p371_p7)
}
  0x15   :  { %37 = dma.hbm_to_vmem [thread:$0]  %s675_s1, 16, %s35_s22, [#allocation6]  }
  0x16   :  { %s375_s14 = scalar_lea.hbm %s677_s3, 256 }
  0x17   :  { %p376_p8 = scmp.ne.s32.totalorder %s677_s3, %s375_s14  ;;  %p379_p9 = scmp.lt.u32.totalorder %s375_s14, %s677_s3 }
  0x19   :  { %p381_p10 = pnand %p379_p9, %p376_p8 }
  0x1b   :  { %384 = shalt.err (!%p381_p10)
}
  0x1c   :  { %s385_s19 = scalar_lea.vmem %s565_s24, 256  ;;  %p390_p12 = scmp.lt.s32.totalorder %s565_s24, %s565_s24 }
  0x1d   :  { %p386_p11 = scmp.ne.s32.totalorder %s565_s24, %s385_s19  ;;  %p391_p13 = scmp.lt.s32.totalorder %s385_s19, %s385_s19 }
  0x1f   :  { %p392_p0 = por %p391_p13, %p390_p12 }
  0x21   :  { %p393_p1 = pnand %p392_p0, %p386_p11 }
  0x23   :  { %396 = shalt.err (!%p393_p1)
}
  0x24   :  { %s519_s1 = smov 64   ;;  %s520_s20 = smov 4  }
  0x25   :  { %59 = dma.hbm_to_vmem [thread:$0]  %s677_s3, 256, %s565_s24, [#allocation9], %s519_s1, %s519_s1, %s520_s20  }
  0x26   :  { %s521_s23 = smov [#allocation2]   ;;  %s397_s28 = scalar_lea.hbm %s674_s0, 256 }
  0x27   :  { %s21_s25 = sshll.u32 %s521_s23, 4  ;;  %p398_p2 = scmp.ne.s32.totalorder %s674_s0, %s397_s28  ;;  %s22_s25 = int_to_ptr.vmem [resolvable:$true] %s21_s25 }
  0x28   :  { %p401_p3 = scmp.lt.u32.totalorder %s397_s28, %s674_s0 }
  0x2a   :  { %p403_p4 = pnand %p401_p3, %p398_p2 }
  0x2c   :  { %406 = shalt.err (!%p403_p4)
}
  0x2d   :  { %s407_s9 = scalar_lea.vmem %s22_s25, 256  ;;  %p412_p6 = scmp.lt.s32.totalorder %s22_s25, %s22_s25 }
  0x2e   :  { %p408_p5 = scmp.ne.s32.totalorder %s22_s25, %s407_s9  ;;  %p413_p7 = scmp.lt.s32.totalorder %s407_s9, %s407_s9 }
  0x30   :  { %p414_p8 = por %p413_p7, %p412_p6 }
  0x32   :  { %p415_p9 = pnand %p414_p8, %p408_p5 }
  0x34   :  { %418 = shalt.err (!%p415_p9)
}
  0x35   :  { %s522_s3 = smov 128   ;;  %s523_s24 = smov 8  }
  0x36   :  { %27 = dma.hbm_to_vmem [thread:$0]  %s674_s0, 256, %s22_s25, [#allocation3], %s522_s3, %s522_s3, %s523_s24  }
  0x37   :  { %s524_s12 = smov [#allocation7]   ;;  %s525_s14 = smov [#allocation10]  }
  0x38   :  { %s44_s13 = sshll.u32 %s524_s12, 4  ;;  %s65_s15 = sshll.u32 %s525_s14, 4  ;;  %s45_s13 = int_to_ptr.vmem [resolvable:$true] %s44_s13  ;;  %s66_s15 = int_to_ptr.vmem [resolvable:$true] %s65_s15 }
  0x39   :  { %s419_s18 = scalar_lea.hbm %s676_s2, 16 }
  0x3a   :  { %p420_p10 = scmp.ne.s32.totalorder %s676_s2, %s419_s18  ;;  %p423_p11 = scmp.lt.u32.totalorder %s419_s18, %s676_s2 }
  0x3c   :  { %p425_p12 = pnand %p423_p11, %p420_p10 }
  0x3e   :  { %428 = shalt.err (!%p425_p12)
}
  0x3f   :  { %s429_s0 = scalar_lea.vmem %s45_s13, 16  ;;  %s433_s25 = scalar_lea.vmem %s45_s13, 32 }
  0x40   :  { %p430_p13 = scmp.ne.s32.totalorder %s45_s13, %s429_s0  ;;  %p434_p0 = scmp.lt.s32.totalorder %s45_s13, %s45_s13 }
  0x41   :  { %p435_p1 = scmp.lt.s32.totalorder %s433_s25, %s429_s0 }
  0x43   :  { %p436_p2 = por %p435_p1, %p434_p0 }
  0x45   :  { %p437_p3 = pnand %p436_p2, %p430_p13 }
  0x47   :  { %440 = shalt.err (!%p437_p3)
}
  0x48   :  { %47 = dma.hbm_to_vmem [thread:$0]  %s676_s2, 16, %s45_s13, [#allocation6]  }
  0x49   :  { %s441_s30 = scalar_lea.hbm %s678_s4, 256 }
  0x4a   :  { %p442_p4 = scmp.ne.s32.totalorder %s678_s4, %s441_s30  ;;  %p445_p5 = scmp.lt.u32.totalorder %s441_s30, %s678_s4 }
  0x4c   :  { %p447_p6 = pnand %p445_p5, %p442_p4 }
  0x4e   :  { %450 = shalt.err (!%p447_p6)
}
  0x4f   :  { %s451_s11 = scalar_lea.vmem %s66_s15, 256  ;;  %p456_p8 = scmp.lt.s32.totalorder %s66_s15, %s66_s15 }
  0x50   :  { %p452_p7 = scmp.ne.s32.totalorder %s66_s15, %s451_s11  ;;  %p457_p9 = scmp.lt.s32.totalorder %s451_s11, %s451_s11 }
  0x52   :  { %p458_p10 = por %p457_p9, %p456_p8 }
  0x54   :  { %p459_p11 = pnand %p458_p10, %p452_p7 }
  0x56   :  { %462 = shalt.err (!%p459_p11)
}
  0x57   :  { %71 = dma.hbm_to_vmem [thread:$0]  %s678_s4, 256, %s66_s15, [#allocation9], %s519_s1, %s519_s1, %s520_s20  }
  0x58   :  { %s526_s13 = smov [#allocation11]   ;;  %s463_s18 = scalar_lea.hbm %s679_s5, 16 }
  0x59   :  { %s78_s14 = sshll.u32 %s526_s13, 4  ;;  %p464_p12 = scmp.ne.s32.totalorder %s679_s5, %s463_s18  ;;  %s79_s14 = int_to_ptr.vmem [resolvable:$true] %s78_s14 }
  0x5a   :  { %p467_p13 = scmp.lt.u32.totalorder %s463_s18, %s679_s5 }
  0x5c   :  { %p469_p0 = pnand %p467_p13, %p464_p12 }
  0x5e   :  { %472 = shalt.err (!%p469_p0)
}
  0x5f   :  { %s473_s0 = scalar_lea.vmem %s79_s14, 16  ;;  %s477_s4 = scalar_lea.vmem %s79_s14, 32 }
  0x60   :  { %p474_p1 = scmp.ne.s32.totalorder %s79_s14, %s473_s0  ;;  %p478_p2 = scmp.lt.s32.totalorder %s79_s14, %s79_s14 }
  0x61   :  { %p479_p3 = scmp.lt.s32.totalorder %s477_s4, %s473_s0 }
  0x63   :  { %p480_p4 = por %p479_p3, %p478_p2 }
  0x65   :  { %p481_p5 = pnand %p480_p4, %p474_p1 }
  0x67   :  { %484 = shalt.err (!%p481_p5)
}
  0x68   :  { %81 = dma.hbm_to_vmem [thread:$0]  %s679_s5, 16, %s79_s14, [#allocation12]  }
  0x69   :  { %507 = dma.done.wait [#allocation3], 256  }
  0x6a   :  { %508 = vsyncadd [#allocation3], 4294967040 }
  0x6b   :  { %509 = dma.done.wait [#allocation6], 32  }
  0x6c   :  { %510 = vsyncadd [#allocation6], 4294967264 }
  0x6d   :  { %511 = dma.done.wait [#allocation9], 512  }
  0x6e   :  { %512 = vsyncadd [#allocation9], 4294966784 }
  0x6f   :  { %513 = dma.done.wait [#allocation12], 16  }
  0x70   :  { %514 = vsyncadd [#allocation12], 4294967280  ;;  %vm105_vm0 = vcmask 261120   ;;  %v101_v0 = vld [vmem:[#allocation2] sm:$0xff]  ;;  %v102_v1 = vld [vmem:[#allocation2 + $0x8] sm:$0xff]  ;;  %v527_v15 = vmov 0.0  }
  0x71   :  { %v106_v2 = vsel %vm105_vm0, %v101_v0, 0.0  ;;  %v109_v3 = vsel %vm105_vm0, %v102_v1, 0.0  ;;  %v345_v14 = vld [vmem:[#allocation8] sm:$0xff]   ;;  %316 = vmatprep.subr.bf16.mxu0 %v527_v15  ;;  %324 = vmatprep.subr.bf16.mxu1 %v527_v15  ;;  %v346_v16 = vld [vmem:[#allocation8 + $0x8] sm:$0xff]   ;;  %vm528_vm1 = vmmov 0   ;;  %v347_v17 = vld [vmem:[#allocation10] sm:$0xff]  }
  0x72   :  { %107 = vadd.xlane.f32.xlu0 %v106_v2  ;;  %317 = vmatpush3.bf16.msra.mxu0 %v345_v14  ;;  %v301_v26 = vld [vmem:[#allocation5] ss:$0 sm:$0xff]  ;;  %v302_v30 = vld [vmem:[#allocation7] ss:$0 sm:$0xff]  ;;  %v306_v41 = vld [vmem:[#allocation11] ss:$0 sm:$0xff] }
  0x73   :  { %320 = vmatprep.mubr.msk.bf16.mxu0 %vm528_vm1, %v527_v15  ;;  %318 = vmatprep.subr.bf16.mxu0 %v527_v15  ;;  %v348_v35 = vld [vmem:[#allocation10 + $0x8] sm:$0xff]   ;;  %vm278_vm2 = vcmask 130048   ;;  %s529_s5 = smov [#allocation13]  }
  0x74   :  { %328 = vmatprep.mubr.msk.bf16.mxu1 %vm528_vm1, %v527_v15  ;;  %325 = vmatpush3.bf16.msra.mxu1 %v347_v17  ;;  %s286_s15 = sshll.u32 %s529_s5, 4  ;;  %s287_s15 = int_to_ptr.vmem [resolvable:$true] %s286_s15 }
  0x75   :  { %326 = vmatprep.subr.bf16.mxu1 %v527_v15  ;;  %s485_s25 = scalar_lea.vmem %s287_s15, 256  ;;  %p490_p7 = scmp.lt.s32.totalorder %s287_s15, %s287_s15 }
  0x76   :  { %110 = vadd.xlane.f32.xlu0 %v109_v3  ;;  %319 = vmatpush3.bf16.msra.mxu0 %v346_v16  ;;  %p486_p6 = scmp.ne.s32.totalorder %s287_s15, %s485_s25  ;;  %p491_p8 = scmp.lt.s32.totalorder %s485_s25, %s485_s25 }
  0x78   :  { %327 = vmatpush3.bf16.msra.mxu1 %v348_v35  ;;  %p492_p9 = por %p491_p8, %p490_p7 }
  0x7a   :  { %p493_p10 = pnand %p492_p9, %p486_p6 }
  0xff   :  { %v108_v4 = vpop.xlane.xlu0 %107 }
 0x100   :  { %v113_v5 = vmul.f32 0.03125, %v108_v4 }
 0x102   :  { %v115_v6 = vsub.f32 %v101_v0, %v113_v5 }
 0x103   :  { %v111_v7 = vpop.xlane.xlu0 %110 }
 0x104   :  { %v114_v8 = vmul.f32 0.03125, %v111_v7  ;;  %v117_v9 = vmul.f32 %v115_v6, %v115_v6 }
 0x106   :  { %v116_v10 = vsub.f32 %v102_v1, %v114_v8  ;;  %v119_v11 = vsel %vm105_vm0, %v117_v9, 0.0 }
 0x107   :  { %120 = vadd.xlane.f32.xlu1 %v119_v11 }
 0x108   :  { %v118_v12 = vmul.f32 %v116_v10, %v116_v10 }
 0x10a   :  { %v122_v13 = vsel %vm105_vm0, %v118_v12, 0.0 }
 0x10b   :  { %123 = vadd.xlane.f32.xlu1 %v122_v13 }
 0x194   :  { %v121_v18 = vpop.xlane.xlu1 %120 }
 0x195   :  { %v125_v19 = vmul.f32 0.03125, %v121_v18 }
 0x197   :  { %v127_v20 = vadd.f32 1e-05, %v125_v19 }
 0x198   :  { %v124_v21 = vpop.xlane.xlu1 %123 }
 0x199   :  { %349 = vrsqrt.f32 %v127_v20  ;;  %v126_v22 = vmul.f32 0.03125, %v124_v21 }
 0x19b   :  { %v128_v23 = vadd.f32 1e-05, %v126_v22 }
 0x19d   :  { %351 = vrsqrt.f32 %v128_v23 }
 0x1a3   :  { %v350_v24 = vpop.eup %349 }
 0x1a4   :  { %v131_v25 = vmul.f32 %v350_v24, %v115_v6 }
 0x1a6   :  { %v139_v29 = vmul.f32 %v301_v26, %v131_v25 }
 0x1a7   :  { %v352_v27 = vpop.eup %351 }
 0x1a8   :  { %v132_v28 = vmul.f32 %v352_v27, %v116_v10  ;;  %v147_v32 = vadd.f32 %v302_v30, %v139_v29 }
 0x1aa   :  { %v140_v31 = vmul.f32 %v301_v26, %v132_v28 }
 0x1ac   :  { %v148_v33 = vadd.f32 %v302_v30, %v140_v31 }
 0x1ae   :  { %v149_v34 = vpack.c.bf16 %v148_v33, %v147_v32 }
 0x1b0   :  { %321 = vmatmul.mubr.msk.bf16.vlgmr.msra.gmra.mrb[0].mxu0 %vm105_vm0, %v149_v34 }
 0x283   :  { %v203_v36 = vpop.f32.mrb[0].mxu0 }
 0x284   :  { %v322_v37 = vpop.f32.mrb[1].mxu0 }
 0x285   :  { %v206_v38 = vpop.f32.mrb[2].mxu0 }
 0x286   :  { %v210_v39 = vpack.c.bf16 %v206_v38, %v203_v36  ;;  %v323_v40 = vpop.f32.mrb[3].mxu0 }
 0x288   :  { %329 = vmatmul.mubr.msk.bf16.vlgmr.msra.gmra.mrb[0].mxu1 %vm105_vm0, %v210_v39 }
 0x35b   :  { %v271_v42 = vpop.f32.mrb[0].mxu1 }
 0x35c   :  { %v272_v43 = vadd.f32 %v306_v41, %v271_v42  ;;  %v330_v44 = vpop.f32.mrb[1].mxu1 }
 0x35d   :  { %v274_v45 = vpop.f32.mrb[2].mxu1 }
 0x35e   :  { %v275_v46 = vadd.f32 %v306_v41, %v274_v45  ;;  %v331_v47 = vpop.f32.mrb[3].mxu1  ;;  %279 = vst.msk [vmem:[#allocation13] sm:$0xff] %vm278_vm2, %v272_v43 }
 0x360   :  { %280 = vst.msk [vmem:[#allocation13 + $0x8] sm:$0xff] %vm278_vm2, %v275_v46 }
 0x361   :  { %496 = shalt.err (!%p493_p10)
}
 0x362   :  { %s497_s28 = scalar_lea.hbm %s680_s6, 256 }
 0x363   :  { %p498_p11 = scmp.ne.s32.totalorder %s680_s6, %s497_s28  ;;  %p501_p12 = scmp.lt.u32.totalorder %s497_s28, %s680_s6 }
 0x365   :  { %p503_p13 = pnand %p501_p12, %p498_p11 }
 0x367   :  { %506 = shalt.err (!%p503_p13)
}
 0x368   :  { %292 = dma.vmem_to_hbm [thread:$0]  %s287_s15, 256, %s680_s6, [#allocation4], %s522_s3, %s522_s3, %s523_s24  }
 0x369   :  { %515 = dma.done.wait [#allocation4], 256  }
 0x36a   :  { %516 = vsyncadd [#allocation4], 4294967040 }
 0x36b   :  { %296 = vsyncpa [#allocation3], 1 }
 0x36c   :  { %297 = vsyncpa [#allocation6], 1 }
 0x36d   :  { %298 = vsyncpa [#allocation9], 1 }
 0x36e   :  { %299 = vsyncpa [#allocation12], 1 }
 0x36f   :  { %300 = vsyncpa [#allocation4], 1 }

</bundles_post_ra>
